<compile_context>
chip_gen: v6e
topology: v6e:2x2x1
jax: 0.10.0
libtpu: 0.0.40
codegen_flags: <defaults>
</compile_context>

<pallas_src>
import functools

import jax
import jax.numpy as jnp
import numpy as np
from jax import lax
from jax.experimental import pallas as pl
from jax.experimental.pallas import tpu as pltpu

_MIB = 1024 * 1024


def _round_up(x, m):
    return (x + m - 1) // m * m


def _tpu_vmem_and_cores():
    """Best-effort hardware query with conservative fallbacks."""
    vmem = 64 * _MIB            # smallest physical VMEM across v5e/v6e/v7x
    two_tc = False
    try:
        vmem = int(pltpu.get_tpu_info().vmem_capacity_bytes)
    except Exception:
        pass
    try:
        two_tc = "v7" in jax.devices()[0].device_kind.lower()
    except Exception:
        pass
    return vmem, two_tc


def _vmem_footprint(tile, d_pad, k_pad):
    """Rough VMEM bytes for one grid step at a given tile size."""
    stream = 2 * tile * 4 * d_pad          # x in (f32, double-buffered)
    stream += 2 * tile * 4 * d_pad         # quantized out
    stream += 2 * tile * 4 * k_pad         # probs out
    stream += 2 * 8 * 4 * k_pad            # counts/SSE out
    const = k_pad * d_pad * (4 + 2)        # f32 + bf16 codebook (single-buffered)
    const += 2 * 4 * k_pad                 # ||w||^2
    temps = tile * 4 * (5 * k_pad + 4 * d_pad)   # neg/e/probs/onehot/quant/diff
    return stream + const + temps


def _choose_tile(n, d_pad, k_pad, budget):
    n_cap = max(8, _round_up(n, 8))
    for cand in (1024, 512, 256, 128, 64, 32, 16, 8):
        t = min(cand, n_cap)
        if _vmem_footprint(t, d_pad, k_pad) <= budget:
            return t
    return min(8, n_cap)


def _codebook_kernel(x_ref, wq_ref, w_ref, w2_ref,
                     quant_ref, probs_ref, cnt_ref,
                     *, k_valid, n_valid):
    i = pl.program_id(0)

    x = x_ref[...]                      # [TN, Dp] f32
    wq = wq_ref[...]                    # [Kp, Dp] bf16 (cross-term copy)
    w = w_ref[...]                      # [Kp, Dp] f32  (exact gather copy)
    w2 = w2_ref[...]                    # [1, Kp]  f32  (precomputed ||w||^2)
    tn = x.shape[0]
    kp = wq.shape[0]

    # Distance cross-term on the MXU as a single bf16 pass with f32 accumulate.
    # The per-row ||x||^2 term is dropped: it is constant per row and cancels
    # exactly in both softmax(-dist) and argmin(dist).
    xw = lax.dot_general(x.astype(wq.dtype), wq, (((1,), (1,)), ((), ())),
                         preferred_element_type=jnp.float32)          # [TN, Kp]
    neg = 2.0 * xw - w2                                               # -(dist - ||x||^2)

    col = lax.broadcasted_iota(jnp.int32, (tn, kp), 1)
    if k_valid < kp:
        # Padded codebook rows must never win the argmin nor leak into softmax.
        neg = jnp.where(col < k_valid, neg, -1e30)

    # softmax(-dist) along K; the row max is reused below for the argmin.
    m = jnp.max(neg, axis=-1, keepdims=True)                          # [TN, 1]
    e = jnp.exp(neg - m)
    inv = pl.reciprocal(jnp.sum(e, axis=-1, keepdims=True), approx=False)
    probs_ref[...] = (e * inv).astype(probs_ref.dtype)

    # argmin(dist) == first column where neg hits its row max (matches
    # torch.argmin's first-minimal-index tie-break).
    idx = jnp.min(jnp.where(neg == m, col, kp), axis=-1, keepdims=True)
    onehot = (col == idx).astype(jnp.float32)                         # [TN, Kp]

    # Codebook lookup as an f32 MXU matmul.  HIGHEST precision keeps the rows
    # bit-exact (one-hot and the bf16 3-way split of f32 are exact).  The
    # straight-through output inputs + (quantized - inputs).detach() equals
    # `quantized` in the forward pass.
    quant = lax.dot_general(onehot, w, (((1,), (0,)), ((), ())),
                            preferred_element_type=jnp.float32,
                            precision=lax.Precision.HIGHEST)          # [TN, Dp]
    quant_ref[...] = quant.astype(quant_ref.dtype)

    diff = quant - x            # padded D columns are zero in both operands

    ones8 = jnp.ones((8, tn), jnp.float32)
    sub = lax.broadcasted_iota(jnp.int32, (8, kp), 0)
    lane = lax.broadcasted_iota(jnp.int32, (8, kp), 1)

    def _partials(d, oh):
        sse = jnp.sum(d * d)                                          # scalar
        # One-hot column counts via MXU (ones @ onehot) instead of a sublane
        # reduce; all 8 rows are identical copies of the counts, so stash the
        # per-tile SSE into row 1 / lane 0 (no separate SSE output needed).
        cnt = lax.dot_general(ones8, oh, (((1,), (0,)), ((), ())),
                              preferred_element_type=jnp.float32)     # [8, Kp]
        cnt_ref[...] = jnp.where((sub == 1) & (lane == 0), sse, cnt)

    if n_valid is None:
        _partials(diff, onehot)
    else:
        # Only trailing tiles contain zero-padded rows; keep the mask work off
        # the hot path for all other grid steps.
        needs_mask = (i + 1) * tn > n_valid

        @pl.when(jnp.logical_not(needs_mask))
        def _():
            _partials(diff, onehot)

        @pl.when(needs_mask)
        def _():
            row = lax.broadcasted_iota(jnp.int32, (tn, 1), 0)
            valid = (i * tn + row < n_valid).astype(jnp.float32)      # [TN, 1]
            _partials(diff * valid, onehot * valid)


@functools.partial(
    jax.jit,
    static_argnames=("commitment_cost", "tile", "vmem_limit", "even_grid",
                     "cross_dtype", "probs_dtype", "single_buffer"))
def _codebook_forward_impl(x, w, *, commitment_cost, tile, vmem_limit, even_grid,
                           cross_dtype, probs_dtype, single_buffer):
    N, D = x.shape
    K = w.shape[0]

    D_pad = _round_up(D, 128)
    K_pad = _round_up(K, 128)
    N_pad = _round_up(N, tile)
    grid_n = N_pad // tile
    if even_grid and grid_n > 1 and grid_n % 2 == 1:
        # 2-TensorCore chips: even step count avoids a one-step core imbalance.
        grid_n += 1
        N_pad = grid_n * tile

    xp = jnp.pad(x.astype(jnp.float32), ((0, N_pad - N), (0, D_pad - D)))
    wp = jnp.pad(w.astype(jnp.float32), ((0, K_pad - K), (0, D_pad - D)))
    wq = wp.astype(cross_dtype)                      # bf16 copy for the cross term
    w2 = jnp.sum(wp * wp, axis=1)[None, :]           # [1, K_pad]

    kernel = functools.partial(_codebook_kernel,
                               k_valid=K,
                               n_valid=(N if N_pad != N else None))

    # Grid-invariant blocks don't need double-buffering.
    const_kwargs = {"pipeline_mode": pl.Buffered(1)} if single_buffer else {}

    quant_p, probs_p, cnt_p = pl.pallas_call(
        kernel,
        grid=(grid_n,),
        in_specs=[
            pl.BlockSpec((tile, D_pad), lambda i: (i, 0)),                   # x tile
            pl.BlockSpec((K_pad, D_pad), lambda i: (0, 0), **const_kwargs),  # bf16 codebook
            pl.BlockSpec((K_pad, D_pad), lambda i: (0, 0), **const_kwargs),  # f32 codebook
            pl.BlockSpec((1, K_pad), lambda i: (0, 0), **const_kwargs),      # ||w||^2
        ],
        out_specs=(
            pl.BlockSpec((tile, D_pad), lambda i: (i, 0)),    # quantized tile
            pl.BlockSpec((tile, K_pad), lambda i: (i, 0)),    # probs tile
            pl.BlockSpec((8, K_pad), lambda i: (i, 0)),       # per-tile counts (+SSE)
        ),
        out_shape=(
            jax.ShapeDtypeStruct((N_pad, D_pad), jnp.float32),
            jax.ShapeDtypeStruct((N_pad, K_pad), probs_dtype),
            jax.ShapeDtypeStruct((grid_n * 8, K_pad), jnp.float32),
        ),
        compiler_params=pltpu.CompilerParams(
            dimension_semantics=("parallel",),
            vmem_limit_bytes=vmem_limit),
    )(xp, wq, wp, w2)

    quant = quant_p[:N, :D]
    probs = probs_p[:N, :K]

    # Tiny cross-tile finalization (O(grid_n * K)); kept out of the grid so the
    # N axis stays "parallel".
    counts = jnp.sum(cnt_p[0::8, :K], axis=0)
    sse = jnp.sum(cnt_p[1::8, 0])

    mse = sse / jnp.float32(N * D)
    loss = (1.0 + commitment_cost) * mse              # q_latent + commitment * e_latent
    avg = counts / jnp.float32(N)
    perplexity = jnp.exp(-jnp.sum(avg * jnp.log(avg + 1e-10)))
    return quant, probs, loss, perplexity


def codebook_forward(x, w, commitment_cost=0.25,
                     cross_dtype=jnp.bfloat16, probs_dtype=jnp.float32):
    x = jnp.asarray(x, jnp.float32)
    w = jnp.asarray(w, jnp.float32)
    N, D = x.shape
    K = w.shape[0]
    D_pad = _round_up(D, 128)
    K_pad = _round_up(K, 128)

    vmem_cap, two_tc = _tpu_vmem_and_cores()
    budget = max(24 * _MIB, vmem_cap - 16 * _MIB)     # ~48 MiB on v7x, ~112 MiB on v5e/v6e
    tile = _choose_tile(N, D_pad, K_pad, budget)
    vmem_limit = int(min(vmem_cap - 4 * _MIB,
                         max(3 * _vmem_footprint(tile, D_pad, K_pad) // 2, 32 * _MIB)))
    vmem_limit = max(vmem_limit, 16 * _MIB)

    kwargs = dict(commitment_cost=float(commitment_cost), tile=int(tile),
                  vmem_limit=vmem_limit, even_grid=bool(two_tc),
                  cross_dtype=cross_dtype, probs_dtype=probs_dtype)
    try:
        return _codebook_forward_impl(x, w, single_buffer=True, **kwargs)
    except Exception:
        # pl.Buffered(1) (single-buffered invariant codebook) may be unsupported
        # on older jax versions; fall back to default double-buffering.
        return _codebook_forward_impl(x, w, single_buffer=False, **kwargs)


def codebook_reference(x, w, commitment_cost=0.25, cross_dtype=jnp.float32):
    """Pure-JAX reference of the PyTorch forward.  `cross_dtype=bf16` mirrors the
    kernel's bf16 distance cross-term so the kernel mechanics can be checked
    at tight tolerances."""
    x = jnp.asarray(x, jnp.float32)
    w = jnp.asarray(w, jnp.float32)
    xw = jnp.einsum("nd,kd->nk", x.astype(cross_dtype), w.astype(cross_dtype),
                    preferred_element_type=jnp.float32)
    dist = (jnp.sum(x ** 2, axis=1, keepdims=True)
            + jnp.sum(w ** 2, axis=1) - 2.0 * xw)
    probs = jax.nn.softmax(-dist, axis=-1)
    idx = jnp.argmin(dist, axis=1)
    quant = w[idx]                                    # exact gather
    onehot = jax.nn.one_hot(idx, w.shape[0], dtype=jnp.float32)
    mse = jnp.mean((quant - x) ** 2)
    loss = mse + commitment_cost * mse
    avg = jnp.mean(onehot, axis=0)
    perp = jnp.exp(-jnp.sum(avg * jnp.log(avg + 1e-10)))
    return quant, probs, loss, perp


if __name__ == "__main__":
    num_embeddings = 8     # K
    embedding_dim = 32     # D
    n_vectors = 200        # N (flattened batch); not a tile multiple -> exercises row masking

    key = jax.random.PRNGKey(0)
    kx, kw = jax.random.split(key)
    x = jax.random.normal(kx, (n_vectors, embedding_dim), dtype=jnp.float32)
    # nn.Embedding default init ~ N(0, 1)
    w = jax.random.normal(kw, (num_embeddings, embedding_dim), dtype=jnp.float32)

    quant, probs, loss, perp = codebook_forward(x, w, commitment_cost=0.25)
    jax.block_until_ready((quant, probs, loss, perp))

    # (1) Matched reference (same bf16 cross-term): tight tolerances verify the
    #     kernel mechanics (tiling, masking, argmin, gather, reductions).
    mq, mp, ml, mpx = codebook_reference(x, w, 0.25, cross_dtype=jnp.bfloat16)
    np.testing.assert_allclose(np.asarray(quant), np.asarray(mq), rtol=1e-5, atol=1e-5)
    np.testing.assert_allclose(np.asarray(probs), np.asarray(mp), rtol=1e-3, atol=1e-6)
    np.testing.assert_allclose(float(loss), float(ml), rtol=1e-5, atol=1e-6)
    np.testing.assert_allclose(float(perp), float(mpx), rtol=1e-5, atol=1e-6)

    # (2) Full-f32 reference (the literal PyTorch formula).  The bf16 distance
    #     logits can only flip the argmin where two codes are nearly
    #     equidistant, so compare quantized rows where there is a clear winner
    #     and use bf16-logit-level tolerances for the softmax / aggregates.
    rq, rp, rl, rpx = codebook_reference(x, w, 0.25, cross_dtype=jnp.float32)
    dist = (jnp.sum(x ** 2, axis=1, keepdims=True)
            + jnp.sum(w ** 2, axis=1) - 2.0 * x @ w.T)
    top2 = np.sort(np.asarray(dist), axis=1)[:, :2]
    clear = (top2[:, 1] - top2[:, 0]) > 0.5
    np.testing.assert_allclose(np.asarray(quant)[clear], np.asarray(rq)[clear],
                               rtol=1e-5, atol=1e-5)
    np.testing.assert_allclose(np.asarray(probs), np.asarray(rp), rtol=0.25, atol=5e-3)
    np.testing.assert_allclose(float(loss), float(rl), rtol=1e-3, atol=1e-5)
    np.testing.assert_allclose(float(perp), float(rpx), rtol=2e-2, atol=1e-3)

    print("KERNEL_OK")
</pallas_src>

<mosaic_0001>
module attributes {stable_mosaic.version = 11 : i64} {
  func.func @_codebook_kernel(%arg0: i32, %arg1: memref<200x128xf32, #tpu.memory_space<vmem>>, %arg2: memref<128x128xbf16, #tpu.memory_space<vmem>>, %arg3: memref<128x128xf32, #tpu.memory_space<vmem>>, %arg4: memref<1x128xf32, #tpu.memory_space<vmem>>, %arg5: memref<200x128xf32, #tpu.memory_space<vmem>>, %arg6: memref<200x128xf32, #tpu.memory_space<vmem>>, %arg7: memref<8x128xf32, #tpu.memory_space<vmem>>) attributes {dimension_semantics = [#tpu.dimension_semantics<parallel>], iteration_bounds = array<i64: 1>, scalar_prefetch = 0 : i64, scratch_operands = 0 : i64, tpu.core_type = #tpu.core_type<tc>, window_params = [{transform_indices = @transform_0, window_bounds = array<i64: 200, 128>}, {pipeline_mode = #tpu.pipeline_mode<synchronous>, transform_indices = @transform_1, window_bounds = array<i64: 128, 128>}, {pipeline_mode = #tpu.pipeline_mode<synchronous>, transform_indices = @transform_2, window_bounds = array<i64: 128, 128>}, {pipeline_mode = #tpu.pipeline_mode<synchronous>, transform_indices = @transform_3, window_bounds = array<i64: 1, 128>}, {transform_indices = @transform_4, window_bounds = array<i64: 200, 128>}, {transform_indices = @transform_5, window_bounds = array<i64: 200, 128>}, {transform_indices = @transform_6, window_bounds = array<i64: 8, 128>}]} {
    %c0 = arith.constant 0 : index
    %c0_0 = arith.constant 0 : index
    %0 = vector.load %arg1[%c0, %c0_0] : memref<200x128xf32, #tpu.memory_space<vmem>>, vector<200x128xf32>
    %c0_1 = arith.constant 0 : index
    %c0_2 = arith.constant 0 : index
    %1 = vector.load %arg2[%c0_1, %c0_2] : memref<128x128xbf16, #tpu.memory_space<vmem>>, vector<128x128xbf16>
    %c0_3 = arith.constant 0 : index
    %c0_4 = arith.constant 0 : index
    %2 = vector.load %arg3[%c0_3, %c0_4] : memref<128x128xf32, #tpu.memory_space<vmem>>, vector<128x128xf32>
    %c0_5 = arith.constant 0 : index
    %c0_6 = arith.constant 0 : index
    %3 = vector.load %arg4[%c0_5, %c0_6] : memref<1x128xf32, #tpu.memory_space<vmem>>, vector<1x128xf32>
    %4 = arith.truncf %0 : vector<200x128xf32> to vector<200x128xbf16>
    %cst = arith.constant dense<0.000000e+00> : vector<200x128xf32>
    %5 = tpu.matmul %4, %1, %cst {dimension_numbers = #tpu.dot_dimension_numbers<[1], [1], [0], [0], [0, 0, 1, 0], [], []>} : vector<200x128xbf16>, vector<128x128xbf16>, vector<200x128xf32> -> vector<200x128xf32>
    %cst_7 = arith.constant 2.000000e+00 : f32
    %6 = vector.broadcast %cst_7 : f32 to vector<200x128xf32>
    %7 = arith.mulf %6, %5 : vector<200x128xf32>
    %8 = vector.broadcast %3 : vector<1x128xf32> to vector<200x128xf32>
    %9 = arith.subf %7, %8 : vector<200x128xf32>
    %10 = tpu.iota {dimensions = array<i32: 1>} : vector<200x128xi32>
    %c8_i32 = arith.constant 8 : i32
    %11 = vector.broadcast %c8_i32 : i32 to vector<200x128xi32>
    %12 = arith.cmpi slt, %10, %11 : vector<200x128xi32>
    %cst_8 = arith.constant -1.000000e+30 : f32
    %13 = vector.broadcast %cst_8 : f32 to vector<200x128xf32>
    %14 = arith.select %12, %9, %13 : vector<200x128xi1>, vector<200x128xf32>
    %cst_9 = arith.constant dense<0xFF800000> : vector<200xf32>
    %15 = vector.multi_reduction <maximumf>, %14, %cst_9 [1] : vector<200x128xf32> to vector<200xf32>
    %16 = vector.shape_cast %15 : vector<200xf32> to vector<200x1xf32>
    %17 = vector.broadcast %16 : vector<200x1xf32> to vector<200x128xf32>
    %18 = arith.subf %14, %17 : vector<200x128xf32>
    %19 = math.exp %18 : vector<200x128xf32>
    %cst_10 = arith.constant dense<0.000000e+00> : vector<200xf32>
    %20 = vector.multi_reduction <add>, %19, %cst_10 [1] : vector<200x128xf32> to vector<200xf32>
    %21 = vector.shape_cast %20 : vector<200xf32> to vector<200x1xf32>
    %22 = tpu.reciprocal %21 : vector<200x1xf32> -> vector<200x1xf32>
    %23 = vector.broadcast %22 : vector<200x1xf32> to vector<200x128xf32>
    %24 = arith.mulf %19, %23 : vector<200x128xf32>
    %c0_11 = arith.constant 0 : index
    %c0_12 = arith.constant 0 : index
    %25 = vector.load %arg6[%c0_11, %c0_12] : memref<200x128xf32, #tpu.memory_space<vmem>>, vector<200x128xf32>
    tpu.vector_store %arg6[%c0_11, %c0_12], %24 {strides = array<i32>} : memref<200x128xf32, #tpu.memory_space<vmem>>, vector<200x128xf32>,
    %26 = vector.broadcast %16 : vector<200x1xf32> to vector<200x128xf32>
    %27 = arith.cmpf oeq, %14, %26 : vector<200x128xf32>
    %c128_i32 = arith.constant 128 : i32
    %28 = vector.broadcast %c128_i32 : i32 to vector<200x128xi32>
    %29 = arith.select %27, %10, %28 : vector<200x128xi1>, vector<200x128xi32>
    %cst_13 = arith.constant dense<2147483647> : vector<200xi32>
    %30 = vector.multi_reduction <minsi>, %29, %cst_13 [1] : vector<200x128xi32> to vector<200xi32>
    %31 = vector.shape_cast %30 : vector<200xi32> to vector<200x1xi32>
    %32 = vector.broadcast %31 : vector<200x1xi32> to vector<200x128xi32>
    %33 = arith.cmpi eq, %10, %32 : vector<200x128xi32>
    %34 = arith.extui %33 : vector<200x128xi1> to vector<200x128xi32>
    %35 = arith.sitofp %34 : vector<200x128xi32> to vector<200x128xf32>
    %cst_14 = arith.constant dense<0.000000e+00> : vector<200x128xf32>
    %36 = tpu.matmul %35, %2, %cst_14 {dimension_numbers = #tpu.dot_dimension_numbers<[1], [0], [0], [1], [0, 0, 1, 1], [], []>, precision = #tpu.contract_precision<fp32>} : vector<200x128xf32>, vector<128x128xf32>, vector<200x128xf32> -> vector<200x128xf32>
    %c0_15 = arith.constant 0 : index
    %c0_16 = arith.constant 0 : index
    %37 = vector.load %arg5[%c0_15, %c0_16] : memref<200x128xf32, #tpu.memory_space<vmem>>, vector<200x128xf32>
    tpu.vector_store %arg5[%c0_15, %c0_16], %36 {strides = array<i32>} : memref<200x128xf32, #tpu.memory_space<vmem>>, vector<200x128xf32>,
    %38 = arith.subf %36, %0 : vector<200x128xf32>
    %cst_17 = arith.constant 1.000000e+00 : f32
    %39 = vector.broadcast %cst_17 : f32 to vector<8x200xf32>
    %40 = tpu.iota {dimensions = array<i32: 0>} : vector<8x128xi32>
    %41 = tpu.iota {dimensions = array<i32: 1>} : vector<8x128xi32>
    %42 = arith.mulf %38, %38 : vector<200x128xf32>
    %43 = vector.shape_cast %42 : vector<200x128xf32> to vector<1x200x128xf32>
    %cst_18 = arith.constant dense<0.000000e+00> : vector<1xf32>
    %44 = vector.multi_reduction <add>, %43, %cst_18 [1, 2] : vector<1x200x128xf32> to vector<1xf32>
    %45 = vector.shape_cast %44 : vector<1xf32> to vector<1x1x1xf32>
    %46 = vector.extract %45[0, 0, 0] : f32 from vector<1x1x1xf32>
    %cst_19 = arith.constant dense<0.000000e+00> : vector<8x128xf32>
    %47 = tpu.matmul %39, %35, %cst_19 {dimension_numbers = #tpu.dot_dimension_numbers<[1], [0], [0], [1], [0, 0, 1, 1], [], []>} : vector<8x200xf32>, vector<200x128xf32>, vector<8x128xf32> -> vector<8x128xf32>
    %c1_i32 = arith.constant 1 : i32
    %48 = vector.broadcast %c1_i32 : i32 to vector<8x128xi32>
    %49 = arith.cmpi eq, %40, %48 : vector<8x128xi32>
    %c0_i32 = arith.constant 0 : i32
    %50 = vector.broadcast %c0_i32 : i32 to vector<8x128xi32>
    %51 = arith.cmpi eq, %41, %50 : vector<8x128xi32>
    %52 = arith.andi %49, %51 : vector<8x128xi1>
    %53 = vector.broadcast %46 : f32 to vector<8x128xf32>
    %54 = arith.select %52, %53, %47 : vector<8x128xi1>, vector<8x128xf32>
    %c0_20 = arith.constant 0 : index
    %c0_21 = arith.constant 0 : index
    %55 = vector.load %arg7[%c0_20, %c0_21] : memref<8x128xf32, #tpu.memory_space<vmem>>, vector<8x128xf32>
    tpu.vector_store %arg7[%c0_20, %c0_21], %54 {strides = array<i32>} : memref<8x128xf32, #tpu.memory_space<vmem>>, vector<8x128xf32>,
    return
  }
  func.func @transform_0(%arg0: i32) -> (i32, i32) {
    %c0_i32 = arith.constant 0 : i32
    %c0_i32_0 = arith.constant 0 : i32
    return %arg0, %c0_i32 : i32, i32
  }
  func.func @transform_1(%arg0: i32) -> (i32, i32) {
    %c0_i32 = arith.constant 0 : i32
    %c0_i32_0 = arith.constant 0 : i32
    %c0_i32_1 = arith.constant 0 : i32
    return %c0_i32, %c0_i32_0 : i32, i32
  }
  func.func @transform_2(%arg0: i32) -> (i32, i32) {
    %c0_i32 = arith.constant 0 : i32
    %c0_i32_0 = arith.constant 0 : i32
    %c0_i32_1 = arith.constant 0 : i32
    return %c0_i32, %c0_i32_0 : i32, i32
  }
  func.func @transform_3(%arg0: i32) -> (i32, i32) {
    %c0_i32 = arith.constant 0 : i32
    %c0_i32_0 = arith.constant 0 : i32
    %c0_i32_1 = arith.constant 0 : i32
    return %c0_i32, %c0_i32_0 : i32, i32
  }
  func.func @transform_4(%arg0: i32) -> (i32, i32) {
    %c0_i32 = arith.constant 0 : i32
    %c0_i32_0 = arith.constant 0 : i32
    return %arg0, %c0_i32 : i32, i32
  }
  func.func @transform_5(%arg0: i32) -> (i32, i32) {
    %c0_i32 = arith.constant 0 : i32
    %c0_i32_0 = arith.constant 0 : i32
    return %arg0, %c0_i32 : i32, i32
  }
  func.func @transform_6(%arg0: i32) -> (i32, i32) {
    %c0_i32 = arith.constant 0 : i32
    %c0_i32_0 = arith.constant 0 : i32
    return %arg0, %c0_i32 : i32, i32
  }
}

module attributes {stable_mosaic.version = 11 : i64} {
  func.func @_codebook_kernel(%arg0: i32, %arg1: memref<200x128xf32, #tpu.memory_space<vmem>>, %arg2: memref<128x128xbf16, #tpu.memory_space<vmem>>, %arg3: memref<128x128xf32, #tpu.memory_space<vmem>>, %arg4: memref<1x128xf32, #tpu.memory_space<vmem>>, %arg5: memref<200x128xf32, #tpu.memory_space<vmem>>, %arg6: memref<200x128xf32, #tpu.memory_space<vmem>>, %arg7: memref<8x128xf32, #tpu.memory_space<vmem>>) attributes {dimension_semantics = [#tpu.dimension_semantics<parallel>], iteration_bounds = array<i64: 1>, scalar_prefetch = 0 : i64, scratch_operands = 0 : i64, tpu.core_type = #tpu.core_type<tc>, window_params = [{transform_indices = @transform_0, window_bounds = array<i64: 200, 128>}, {pipeline_mode = #tpu.pipeline_mode<synchronous>, transform_indices = @transform_1, window_bounds = array<i64: 128, 128>}, {pipeline_mode = #tpu.pipeline_mode<synchronous>, transform_indices = @transform_2, window_bounds = array<i64: 128, 128>}, {pipeline_mode = #tpu.pipeline_mode<synchronous>, transform_indices = @transform_3, window_bounds = array<i64: 1, 128>}, {transform_indices = @transform_4, window_bounds = array<i64: 200, 128>}, {transform_indices = @transform_5, window_bounds = array<i64: 200, 128>}, {transform_indices = @transform_6, window_bounds = array<i64: 8, 128>}]} {
    %c0 = arith.constant 0 : index
    %c0_0 = arith.constant 0 : index
    %0 = vector.load %arg1[%c0, %c0_0] : memref<200x128xf32, #tpu.memory_space<vmem>>, vector<200x128xf32>
    %c0_1 = arith.constant 0 : index
    %c0_2 = arith.constant 0 : index
    %1 = vector.load %arg2[%c0_1, %c0_2] : memref<128x128xbf16, #tpu.memory_space<vmem>>, vector<128x128xbf16>
    %c0_3 = arith.constant 0 : index
    %c0_4 = arith.constant 0 : index
    %2 = vector.load %arg3[%c0_3, %c0_4] : memref<128x128xf32, #tpu.memory_space<vmem>>, vector<128x128xf32>
    %c0_5 = arith.constant 0 : index
    %c0_6 = arith.constant 0 : index
    %3 = vector.load %arg4[%c0_5, %c0_6] : memref<1x128xf32, #tpu.memory_space<vmem>>, vector<1x128xf32>
    %4 = arith.truncf %0 : vector<200x128xf32> to vector<200x128xbf16>
    %cst = arith.constant dense<0.000000e+00> : vector<200x128xf32>
    %5 = tpu.matmul %4, %1, %cst {dimension_numbers = #tpu.dot_dimension_numbers<[1], [1], [0], [0], [0, 0, 1, 0], [], []>} : vector<200x128xbf16>, vector<128x128xbf16>, vector<200x128xf32> -> vector<200x128xf32>
    %cst_7 = arith.constant 2.000000e+00 : f32
    %6 = vector.broadcast %cst_7 : f32 to vector<200x128xf32>
    %7 = arith.mulf %6, %5 : vector<200x128xf32>
    %8 = vector.broadcast %3 : vector<1x128xf32> to vector<200x128xf32>
    %9 = arith.subf %7, %8 : vector<200x128xf32>
    %10 = tpu.iota {dimensions = array<i32: 1>} : vector<200x128xi32>
    %c8_i32 = arith.constant 8 : i32
    %11 = vector.broadcast %c8_i32 : i32 to vector<200x128xi32>
    %12 = arith.cmpi slt, %10, %11 : vector<200x128xi32>
    %cst_8 = arith.constant -1.000000e+30 : f32
    %13 = vector.broadcast %cst_8 : f32 to vector<200x128xf32>
    %14 = arith.select %12, %9, %13 : vector<200x128xi1>, vector<200x128xf32>
    %cst_9 = arith.constant dense<0xFF800000> : vector<200xf32>
    %15 = vector.multi_reduction <maximumf>, %14, %cst_9 [1] : vector<200x128xf32> to vector<200xf32>
    %16 = vector.shape_cast %15 : vector<200xf32> to vector<200x1xf32>
    %17 = vector.broadcast %16 : vector<200x1xf32> to vector<200x128xf32>
    %18 = arith.subf %14, %17 : vector<200x128xf32>
    %19 = math.exp %18 : vector<200x128xf32>
    %cst_10 = arith.constant dense<0.000000e+00> : vector<200xf32>
    %20 = vector.multi_reduction <add>, %19, %cst_10 [1] : vector<200x128xf32> to vector<200xf32>
    %21 = vector.shape_cast %20 : vector<200xf32> to vector<200x1xf32>
    %22 = tpu.reciprocal %21 : vector<200x1xf32> -> vector<200x1xf32>
    %23 = vector.broadcast %22 : vector<200x1xf32> to vector<200x128xf32>
    %24 = arith.mulf %19, %23 : vector<200x128xf32>
    %c0_11 = arith.constant 0 : index
    %c0_12 = arith.constant 0 : index
    %25 = vector.load %arg6[%c0_11, %c0_12] : memref<200x128xf32, #tpu.memory_space<vmem>>, vector<200x128xf32>
    tpu.vector_store %arg6[%c0_11, %c0_12], %24 {strides = array<i32>} : memref<200x128xf32, #tpu.memory_space<vmem>>, vector<200x128xf32>,
    %26 = vector.broadcast %16 : vector<200x1xf32> to vector<200x128xf32>
    %27 = arith.cmpf oeq, %14, %26 : vector<200x128xf32>
    %c128_i32 = arith.constant 128 : i32
    %28 = vector.broadcast %c128_i32 : i32 to vector<200x128xi32>
    %29 = arith.select %27, %10, %28 : vector<200x128xi1>, vector<200x128xi32>
    %cst_13 = arith.constant dense<2147483647> : vector<200xi32>
    %30 = vector.multi_reduction <minsi>, %29, %cst_13 [1] : vector<200x128xi32> to vector<200xi32>
    %31 = vector.shape_cast %30 : vector<200xi32> to vector<200x1xi32>
    %32 = vector.broadcast %31 : vector<200x1xi32> to vector<200x128xi32>
    %33 = arith.cmpi eq, %10, %32 : vector<200x128xi32>
    %34 = arith.extui %33 : vector<200x128xi1> to vector<200x128xi32>
    %35 = arith.sitofp %34 : vector<200x128xi32> to vector<200x128xf32>
    %cst_14 = arith.constant dense<0.000000e+00> : vector<200x128xf32>
    %36 = tpu.matmul %35, %2, %cst_14 {dimension_numbers = #tpu.dot_dimension_numbers<[1], [0], [0], [1], [0, 0, 1, 1], [], []>, precision = #tpu.contract_precision<fp32>} : vector<200x128xf32>, vector<128x128xf32>, vector<200x128xf32> -> vector<200x128xf32>
    %c0_15 = arith.constant 0 : index
    %c0_16 = arith.constant 0 : index
    %37 = vector.load %arg5[%c0_15, %c0_16] : memref<200x128xf32, #tpu.memory_space<vmem>>, vector<200x128xf32>
    tpu.vector_store %arg5[%c0_15, %c0_16], %36 {strides = array<i32>} : memref<200x128xf32, #tpu.memory_space<vmem>>, vector<200x128xf32>,
    %38 = arith.subf %36, %0 : vector<200x128xf32>
    %cst_17 = arith.constant 1.000000e+00 : f32
    %39 = vector.broadcast %cst_17 : f32 to vector<8x200xf32>
    %40 = tpu.iota {dimensions = array<i32: 0>} : vector<8x128xi32>
    %41 = tpu.iota {dimensions = array<i32: 1>} : vector<8x128xi32>
    %42 = arith.mulf %38, %38 : vector<200x128xf32>
    %43 = vector.shape_cast %42 : vector<200x128xf32> to vector<1x200x128xf32>
    %cst_18 = arith.constant dense<0.000000e+00> : vector<1xf32>
    %44 = vector.multi_reduction <add>, %43, %cst_18 [1, 2] : vector<1x200x128xf32> to vector<1xf32>
    %45 = vector.shape_cast %44 : vector<1xf32> to vector<1x1x1xf32>
    %46 = vector.extract %45[0, 0, 0] : f32 from vector<1x1x1xf32>
    %cst_19 = arith.constant dense<0.000000e+00> : vector<8x128xf32>
    %47 = tpu.matmul %39, %35, %cst_19 {dimension_numbers = #tpu.dot_dimension_numbers<[1], [0], [0], [1], [0, 0, 1, 1], [], []>} : vector<8x200xf32>, vector<200x128xf32>, vector<8x128xf32> -> vector<8x128xf32>
    %c1_i32 = arith.constant 1 : i32
    %48 = vector.broadcast %c1_i32 : i32 to vector<8x128xi32>
    %49 = arith.cmpi eq, %40, %48 : vector<8x128xi32>
    %c0_i32 = arith.constant 0 : i32
    %50 = vector.broadcast %c0_i32 : i32 to vector<8x128xi32>
    %51 = arith.cmpi eq, %41, %50 : vector<8x128xi32>
    %52 = arith.andi %49, %51 : vector<8x128xi1>
    %53 = vector.broadcast %46 : f32 to vector<8x128xf32>
    %54 = arith.select %52, %53, %47 : vector<8x128xi1>, vector<8x128xf32>
    %c0_20 = arith.constant 0 : index
    %c0_21 = arith.constant 0 : index
    %55 = vector.load %arg7[%c0_20, %c0_21] : memref<8x128xf32, #tpu.memory_space<vmem>>, vector<8x128xf32>
    tpu.vector_store %arg7[%c0_20, %c0_21], %54 {strides = array<i32>} : memref<8x128xf32, #tpu.memory_space<vmem>>, vector<8x128xf32>,
    return
  }
  func.func @transform_0(%arg0: i32) -> (i32, i32) {
    %c0_i32 = arith.constant 0 : i32
    %c0_i32_0 = arith.constant 0 : i32
    return %arg0, %c0_i32 : i32, i32
  }
  func.func @transform_1(%arg0: i32) -> (i32, i32) {
    %c0_i32 = arith.constant 0 : i32
    %c0_i32_0 = arith.constant 0 : i32
    %c0_i32_1 = arith.constant 0 : i32
    return %c0_i32, %c0_i32_0 : i32, i32
  }
  func.func @transform_2(%arg0: i32) -> (i32, i32) {
    %c0_i32 = arith.constant 0 : i32
    %c0_i32_0 = arith.constant 0 : i32
    %c0_i32_1 = arith.constant 0 : i32
    return %c0_i32, %c0_i32_0 : i32, i32
  }
  func.func @transform_3(%arg0: i32) -> (i32, i32) {
    %c0_i32 = arith.constant 0 : i32
    %c0_i32_0 = arith.constant 0 : i32
    %c0_i32_1 = arith.constant 0 : i32
    return %c0_i32, %c0_i32_0 : i32, i32
  }
  func.func @transform_4(%arg0: i32) -> (i32, i32) {
    %c0_i32 = arith.constant 0 : i32
    %c0_i32_0 = arith.constant 0 : i32
    return %arg0, %c0_i32 : i32, i32
  }
  func.func @transform_5(%arg0: i32) -> (i32, i32) {
    %c0_i32 = arith.constant 0 : i32
    %c0_i32_0 = arith.constant 0 : i32
    return %arg0, %c0_i32 : i32, i32
  }
  func.func @transform_6(%arg0: i32) -> (i32, i32) {
    %c0_i32 = arith.constant 0 : i32
    %c0_i32_0 = arith.constant 0 : i32
    return %arg0, %c0_i32 : i32, i32
  }
}

</mosaic_0001>

<bundles_post_ra>
// kernel: _codebook_forward_impl.1
= control target key start
LH: loop header
LB: loop body
LE: loop exit
PB: predicated region body
PF: predicated region fallthrough
CT: control target
= control target key end

     0   :  { %v7151_v0 = vmov 0.0   ;;  %vm4211_vm0 = vmmov 0   ;;  %v7150_v47 = vlaneseq  ;;  %s7143_s1 = inlined_call_operand.vmem [shape: bf16[128,128], index: 1, kind: input, shape index: {}]   ;;  %s7144_s0 = inlined_call_operand.vmem [shape: f32[200,128], index: 0, kind: input, shape index: {}]   ;;  %s7145_s3 = inlined_call_operand.vmem [shape: f32[1,128], index: 3, kind: input, shape index: {}]   ;;  %s7146_s2 = inlined_call_operand.vmem [shape: f32[128,128], index: 2, kind: input, shape index: {}]   ;;  %s7147_s5 = inlined_call_operand.vmem [shape: f32[200,128], index: 5, kind: output, shape index: {1}]   ;;  %s7148_s4 = inlined_call_operand.vmem [shape: f32[200,128], index: 4, kind: output, shape index: {0}]   ;;  %s7149_s6 = inlined_call_operand.vmem [shape: f32[8,128], index: 6, kind: output, shape index: {2}]  }
   0x1   :  { %3362 = vmatprep.subr.bf16.mxu0 %v7151_v0  ;;  %v4077_v1 = vld [vmem:[%s7143_s1 + $0x38] sm:$0xff]   ;;  %3378 = vmatprep.mubr.msk.bf16.mxu0 %vm4211_vm0, %v7151_v0  ;;  %v4078_v2 = vld [vmem:[%s7143_s1 + $0x30] sm:$0xff]   ;;  %v4079_v3 = vld [vmem:[%s7143_s1 + $0x28] sm:$0xff]  }
   0x2   :  { %3430 = vmatprep.subr.mxu1 %v7151_v0  ;;  %3462 = vmatprep.mubr.msk.f32.mxu1 %vm4211_vm0, %v7151_v0  ;;  %v4080_v4 = vld [vmem:[%s7143_s1 + $0x20] sm:$0xff]   ;;  %v4081_v5 = vld [vmem:[%s7143_s1 + $0x18] sm:$0xff]   ;;  %v4082_v6 = vld [vmem:[%s7143_s1 + $0x10] sm:$0xff]   ;;  %v4388_v48 = vand.u32 127, %v7150_v47 }
   0x3   :  { %3363 = vmatpush3.bf16.xpose.msra.mxu0 %v4077_v1  ;;  %v4083_v7 = vld [vmem:[%s7143_s1 + $0x8] sm:$0xff]   ;;  %v4084_v8 = vld [vmem:[%s7143_s1] sm:$0xff]   ;;  %v23_v12 = vld [vmem:[%s7144_s0 + $0x10] sm:$0xff] }
   0x4   :  { %3364 = vmatprep.subr.bf16.mxu0 %v7151_v0  ;;  %v21_v9 = vld [vmem:[%s7144_s0] sm:$0xff]  ;;  %v22_v10 = vld [vmem:[%s7144_s0 + $0x8] sm:$0xff]  ;;  %v24_v13 = vld [vmem:[%s7144_s0 + $0x18] sm:$0xff]  ;;  %7346 = vst [vmem:[#allocation2_spill] sm:$0xff] %v4388_v48  ;;  %vm334_vm1 = vcmp.lt.s32.totalorder %v4388_v48, 8 }
   0x5   :  { %v79_v11 = vpack.c.bf16 %v22_v10, %v21_v9  ;;  %v80_v14 = vpack.c.bf16 %v24_v13, %v23_v12  ;;  %v25_v15 = vld [vmem:[%s7144_s0 + $0x20] sm:$0xff]  ;;  %v26_v16 = vld [vmem:[%s7144_s0 + $0x28] sm:$0xff]  ;;  %v27_v18 = vld [vmem:[%s7144_s0 + $0x30] sm:$0xff] }
   0x6   :  { %v81_v17 = vpack.c.bf16 %v26_v16, %v25_v15  ;;  %v28_v19 = vld [vmem:[%s7144_s0 + $0x38] sm:$0xff]  ;;  %v29_v21 = vld [vmem:[%s7144_s0 + $0x40] sm:$0xff]  ;;  %v30_v22 = vld [vmem:[%s7144_s0 + $0x48] sm:$0xff] }
   0x7   :  { %v82_v20 = vpack.c.bf16 %v28_v19, %v27_v18  ;;  %v83_v23 = vpack.c.bf16 %v30_v22, %v29_v21  ;;  %v31_v24 = vld [vmem:[%s7144_s0 + $0x50] sm:$0xff]  ;;  %v32_v25 = vld [vmem:[%s7144_s0 + $0x58] sm:$0xff]  ;;  %v33_v27 = vld [vmem:[%s7144_s0 + $0x60] sm:$0xff] }
   0x8   :  { %v84_v26 = vpack.c.bf16 %v32_v25, %v31_v24  ;;  %v34_v28 = vld [vmem:[%s7144_s0 + $0x68] sm:$0xff]  ;;  %v35_v30 = vld [vmem:[%s7144_s0 + $0x70] sm:$0xff]  ;;  %v36_v31 = vld [vmem:[%s7144_s0 + $0x78] sm:$0xff] }
   0x9   :  { %v85_v29 = vpack.c.bf16 %v34_v28, %v33_v27  ;;  %v86_v32 = vpack.c.bf16 %v36_v31, %v35_v30  ;;  %v37_v33 = vld [vmem:[%s7144_s0 + $0x80] sm:$0xff]  ;;  %v38_v34 = vld [vmem:[%s7144_s0 + $0x88] sm:$0xff]  ;;  %v39_v36 = vld [vmem:[%s7144_s0 + $0x90] sm:$0xff] }
   0xa   :  { %v87_v35 = vpack.c.bf16 %v38_v34, %v37_v33  ;;  %v40_v37 = vld [vmem:[%s7144_s0 + $0x98] sm:$0xff]  ;;  %v41_v39 = vld [vmem:[%s7144_s0 + $0xa0] sm:$0xff]  ;;  %v42_v40 = vld [vmem:[%s7144_s0 + $0xa8] sm:$0xff] }
   0xb   :  { %3365 = vmatpush3.bf16.xpose.msra.mxu0 %v4078_v2  ;;  %v88_v38 = vpack.c.bf16 %v40_v37, %v39_v36  ;;  %v89_v41 = vpack.c.bf16 %v42_v40, %v41_v39  ;;  %v43_v42 = vld [vmem:[%s7144_s0 + $0xb0] sm:$0xff]  ;;  %v44_v43 = vld [vmem:[%s7144_s0 + $0xb8] sm:$0xff]  ;;  %v45_v45 = vld [vmem:[%s7144_s0 + $0xc0] sm:$0xff] }
   0xc   :  { %3366 = vmatprep.subr.bf16.mxu0 %v7151_v0  ;;  %v90_v44 = vpack.c.bf16 %v44_v43, %v43_v42  ;;  %v91_v46 = vpack.c.bf16 %v45_v45, %v45_v45  ;;  %v4393_v49 = vld [vmem:[%s7145_s3] ss:$0 sm:$0xff] }
  0x13   :  { %3367 = vmatpush3.bf16.xpose.msra.mxu0 %v4079_v3 }
  0x14   :  { %3368 = vmatprep.subr.bf16.mxu0 %v7151_v0 }
  0x1b   :  { %3369 = vmatpush3.bf16.xpose.msra.mxu0 %v4080_v4 }
  0x1c   :  { %3370 = vmatprep.subr.bf16.mxu0 %v7151_v0 }
  0x23   :  { %3371 = vmatpush3.bf16.xpose.msra.mxu0 %v4081_v5 }
  0x24   :  { %3372 = vmatprep.subr.bf16.mxu0 %v7151_v0 }
  0x2b   :  { %3373 = vmatpush3.bf16.xpose.msra.mxu0 %v4082_v6 }
  0x2c   :  { %3374 = vmatprep.subr.bf16.mxu0 %v7151_v0 }
  0x33   :  { %3375 = vmatpush3.bf16.xpose.msra.mxu0 %v4083_v7 }
  0x34   :  { %3376 = vmatprep.subr.bf16.mxu0 %v7151_v0 }
  0x3b   :  { %3377 = vmatpush3.bf16.xpose.msra.mxu0 %v4084_v8 }
  0x3c   :  { %3644 = vmatprep.subr.mxu0 %v7151_v0 }
  0x42   :  { %3379 = vmatmul.mubr.bf16.vlgmr.msra.gmra.mxu0 %v79_v11 }
  0x43   :  { %3382 = vmatprep.mubr.msk.bf16.mxu0 %vm4211_vm0, %v7151_v0 }
  0x4a   :  { %3383 = vmatmul.mubr.bf16.gmra.mxu0 %v80_v14 }
  0x4b   :  { %3386 = vmatprep.mubr.msk.bf16.mxu0 %vm4211_vm0, %v7151_v0 }
  0x52   :  { %3387 = vmatmul.mubr.bf16.gmra.mxu0 %v81_v17 }
  0x53   :  { %3390 = vmatprep.mubr.msk.bf16.mxu0 %vm4211_vm0, %v7151_v0 }
  0x5a   :  { %3391 = vmatmul.mubr.bf16.gmra.mxu0 %v82_v20 }
  0x5b   :  { %3394 = vmatprep.mubr.msk.bf16.mxu0 %vm4211_vm0, %v7151_v0 }
  0x62   :  { %3395 = vmatmul.mubr.bf16.gmra.mxu0 %v83_v23 }
  0x63   :  { %3398 = vmatprep.mubr.msk.bf16.mxu0 %vm4211_vm0, %v7151_v0 }
  0x6a   :  { %3399 = vmatmul.mubr.bf16.gmra.mxu0 %v84_v26 }
  0x6b   :  { %3402 = vmatprep.mubr.msk.bf16.mxu0 %vm4211_vm0, %v7151_v0 }
  0x72   :  { %3403 = vmatmul.mubr.bf16.gmra.mxu0 %v85_v29 }
  0x73   :  { %3406 = vmatprep.mubr.msk.bf16.mxu0 %vm4211_vm0, %v7151_v0 }
  0x7a   :  { %3407 = vmatmul.mubr.bf16.gmra.mxu0 %v86_v32 }
  0x7b   :  { %3410 = vmatprep.mubr.msk.bf16.mxu0 %vm4211_vm0, %v7151_v0 }
  0x82   :  { %3411 = vmatmul.mubr.bf16.gmra.mxu0 %v87_v35 }
  0x83   :  { %3414 = vmatprep.mubr.msk.bf16.mxu0 %vm4211_vm0, %v7151_v0 }
  0x8a   :  { %3415 = vmatmul.mubr.bf16.gmra.mxu0 %v88_v38 }
  0x8b   :  { %3418 = vmatprep.mubr.msk.bf16.mxu0 %vm4211_vm0, %v7151_v0 }
  0x92   :  { %3419 = vmatmul.mubr.bf16.gmra.mxu0 %v89_v41 }
  0x93   :  { %3422 = vmatprep.mubr.msk.bf16.mxu0 %vm4211_vm0, %v7151_v0 }
  0x9a   :  { %3423 = vmatmul.mubr.bf16.gmra.mxu0 %v90_v44 }
  0x9b   :  { %3426 = vmatprep.mubr.msk.bf16.mxu0 %vm4211_vm0, %v7151_v0 }
  0xa2   :  { %3427 = vmatmul.mubr.bf16.gmra.mxu0 %v91_v46 }
  0xa3   :  { %3676 = vmatprep.mubr.msk.f32.mxu0 %vm4211_vm0, %v7151_v0 }
 0x102   :  { %v174_v50 = vpop.f32.mrf.mxu0 }
 0x103   :  { %v276_v51 = vmul.f32 2.0, %v174_v50 }
 0x104   :  { %v3380_v52 = vpop.f32.mrf.mxu0 }
 0x105   :  { %v307_v53 = vsub.f32 %v276_v51, %v4393_v49 }
 0x106   :  { %v177_v54 = vpop.f32.mrf.mxu0 }
 0x107   :  { %v277_v55 = vmul.f32 2.0, %v177_v54  ;;  %v4399_v56 = vsel %vm334_vm1, %v307_v53, -1e+30 }
 0x108   :  { %360 = vmax.xlane.f32.xlu0 %v4399_v56  ;;  %v3381_v57 = vpop.f32.mrf.mxu0 }
 0x109   :  { %v308_v58 = vsub.f32 %v277_v55, %v4393_v49 }
 0x10a   :  { %v182_v59 = vpop.f32.mrf.mxu0 }
 0x10b   :  { %v278_v60 = vmul.f32 2.0, %v182_v59  ;;  %v4405_v61 = vsel %vm334_vm1, %v308_v58, -1e+30 }
 0x10c   :  { %7347 = vst [vmem:[#allocation3_spill] sm:$0xff] %v4405_v61  ;;  %362 = vmax.xlane.f32.xlu0 %v4405_v61  ;;  %v3384_v62 = vpop.f32.mrf.mxu0 }
 0x10d   :  { %v309_v63 = vsub.f32 %v278_v60, %v4393_v49 }
 0x10e   :  { %v185_v1 = vpop.f32.mrf.mxu0 }
 0x10f   :  { %v279_v2 = vmul.f32 2.0, %v185_v1  ;;  %v4411_v3 = vsel %vm334_vm1, %v309_v63, -1e+30 }
 0x110   :  { %364 = vmax.xlane.f32.xlu1 %v4411_v3  ;;  %v3385_v4 = vpop.f32.mrf.mxu0 }
 0x111   :  { %v310_v5 = vsub.f32 %v279_v2, %v4393_v49 }
 0x112   :  { %v190_v6 = vpop.f32.mrf.mxu0 }
 0x113   :  { %v280_v7 = vmul.f32 2.0, %v190_v6  ;;  %v4417_v8 = vsel %vm334_vm1, %v310_v5, -1e+30 }
 0x114   :  { %7348 = vst [vmem:[#allocation4_spill] sm:$0xff] %v4417_v8  ;;  %366 = vmax.xlane.f32.xlu1 %v4417_v8  ;;  %v3388_v9 = vpop.f32.mrf.mxu0 }
 0x115   :  { %v311_v10 = vsub.f32 %v280_v7, %v4393_v49 }
 0x116   :  { %v193_v11 = vpop.f32.mrf.mxu0 }
 0x117   :  { %v281_v12 = vmul.f32 2.0, %v193_v11  ;;  %v4423_v13 = vsel %vm334_vm1, %v311_v10, -1e+30 }
 0x118   :  { %368 = vmax.xlane.f32.xlu0 %v4423_v13  ;;  %v3389_v14 = vpop.f32.mrf.mxu0 }
 0x119   :  { %v312_v15 = vsub.f32 %v281_v12, %v4393_v49 }
 0x11a   :  { %v198_v16 = vpop.f32.mrf.mxu0 }
 0x11b   :  { %v282_v17 = vmul.f32 2.0, %v198_v16  ;;  %v4429_v18 = vsel %vm334_vm1, %v312_v15, -1e+30 }
 0x11c   :  { %7349 = vst [vmem:[#allocation5_spill] sm:$0xff] %v4429_v18  ;;  %370 = vmax.xlane.f32.xlu1 %v4429_v18  ;;  %v3392_v19 = vpop.f32.mrf.mxu0 }
 0x11d   :  { %v313_v20 = vsub.f32 %v282_v17, %v4393_v49 }
 0x11e   :  { %v201_v21 = vpop.f32.mrf.mxu0 }
 0x11f   :  { %v283_v22 = vmul.f32 2.0, %v201_v21  ;;  %v4435_v23 = vsel %vm334_vm1, %v313_v20, -1e+30 }
 0x120   :  { %7350 = vst [vmem:[#allocation6_spill] sm:$0xff] %v4435_v23  ;;  %372 = vmax.xlane.f32.xlu0 %v4435_v23  ;;  %v3393_v24 = vpop.f32.mrf.mxu0 }
 0x121   :  { %v314_v25 = vsub.f32 %v283_v22, %v4393_v49 }
 0x122   :  { %v206_v26 = vpop.f32.mrf.mxu0 }
 0x123   :  { %v284_v27 = vmul.f32 2.0, %v206_v26  ;;  %v4441_v28 = vsel %vm334_vm1, %v314_v25, -1e+30 }
 0x124   :  { %7351 = vst [vmem:[#allocation7_spill] sm:$0xff] %v4441_v28  ;;  %374 = vmax.xlane.f32.xlu1 %v4441_v28  ;;  %v3396_v29 = vpop.f32.mrf.mxu0 }
 0x125   :  { %v315_v30 = vsub.f32 %v284_v27, %v4393_v49 }
 0x126   :  { %v209_v31 = vpop.f32.mrf.mxu0 }
 0x127   :  { %v285_v32 = vmul.f32 2.0, %v209_v31  ;;  %v4447_v33 = vsel %vm334_vm1, %v315_v30, -1e+30 }
 0x128   :  { %7352 = vst [vmem:[#allocation8_spill] sm:$0xff] %v4447_v33  ;;  %376 = vmax.xlane.f32.xlu0 %v4447_v33  ;;  %v3397_v34 = vpop.f32.mrf.mxu0 }
 0x129   :  { %v316_v35 = vsub.f32 %v285_v32, %v4393_v49 }
 0x12a   :  { %v214_v36 = vpop.f32.mrf.mxu0 }
 0x12b   :  { %v286_v37 = vmul.f32 2.0, %v214_v36  ;;  %v4453_v38 = vsel %vm334_vm1, %v316_v35, -1e+30 }
 0x12c   :  { %7353 = vst [vmem:[#allocation9_spill] sm:$0xff] %v4453_v38  ;;  %378 = vmax.xlane.f32.xlu1 %v4453_v38  ;;  %v3400_v39 = vpop.f32.mrf.mxu0 }
 0x12d   :  { %v317_v40 = vsub.f32 %v286_v37, %v4393_v49 }
 0x12e   :  { %v217_v41 = vpop.f32.mrf.mxu0 }
 0x12f   :  { %v287_v42 = vmul.f32 2.0, %v217_v41  ;;  %v4459_v43 = vsel %vm334_vm1, %v317_v40, -1e+30 }
 0x130   :  { %7354 = vst [vmem:[#allocation10_spill] sm:$0xff] %v4459_v43  ;;  %380 = vmax.xlane.f32.xlu0 %v4459_v43  ;;  %v3401_v44 = vpop.f32.mrf.mxu0 }
 0x131   :  { %v318_v45 = vsub.f32 %v287_v42, %v4393_v49 }
 0x132   :  { %v222_v46 = vpop.f32.mrf.mxu0 }
 0x133   :  { %v288_v50 = vmul.f32 2.0, %v222_v46  ;;  %v4465_v51 = vsel %vm334_vm1, %v318_v45, -1e+30 }
 0x134   :  { %7355 = vst [vmem:[#allocation11_spill] sm:$0xff] %v4465_v51  ;;  %382 = vmax.xlane.f32.xlu1 %v4465_v51  ;;  %v3404_v52 = vpop.f32.mrf.mxu0 }
 0x135   :  { %v319_v53 = vsub.f32 %v288_v50, %v4393_v49 }
 0x136   :  { %v225_v54 = vpop.f32.mrf.mxu0 }
 0x137   :  { %v289_v55 = vmul.f32 2.0, %v225_v54  ;;  %v4471_v57 = vsel %vm334_vm1, %v319_v53, -1e+30 }
 0x138   :  { %7356 = vst [vmem:[#allocation12_spill] sm:$0xff] %v4471_v57  ;;  %384 = vmax.xlane.f32.xlu0 %v4471_v57  ;;  %v3405_v58 = vpop.f32.mrf.mxu0 }
 0x139   :  { %v320_v59 = vsub.f32 %v289_v55, %v4393_v49 }
 0x13a   :  { %v230_v60 = vpop.f32.mrf.mxu0 }
 0x13b   :  { %v290_v62 = vmul.f32 2.0, %v230_v60  ;;  %v4477_v63 = vsel %vm334_vm1, %v320_v59, -1e+30 }
 0x13c   :  { %7357 = vst [vmem:[#allocation13_spill] sm:$0xff] %v4477_v63  ;;  %386 = vmax.xlane.f32.xlu1 %v4477_v63  ;;  %v3408_v1 = vpop.f32.mrf.mxu0 }
 0x13d   :  { %v321_v2 = vsub.f32 %v290_v62, %v4393_v49 }
 0x13e   :  { %v233_v4 = vpop.f32.mrf.mxu0 }
 0x13f   :  { %v291_v5 = vmul.f32 2.0, %v233_v4  ;;  %v4483_v6 = vsel %vm334_vm1, %v321_v2, -1e+30 }
 0x140   :  { %7358 = vst [vmem:[#allocation14_spill] sm:$0xff] %v4483_v6  ;;  %388 = vmax.xlane.f32.xlu0 %v4483_v6  ;;  %v3409_v7 = vpop.f32.mrf.mxu0 }
 0x141   :  { %v322_v9 = vsub.f32 %v291_v5, %v4393_v49 }
 0x142   :  { %v238_v10 = vpop.f32.mrf.mxu0 }
 0x143   :  { %v292_v11 = vmul.f32 2.0, %v238_v10  ;;  %v4489_v12 = vsel %vm334_vm1, %v322_v9, -1e+30 }
 0x144   :  { %7359 = vst [vmem:[#allocation15_spill] sm:$0xff] %v4489_v12  ;;  %390 = vmax.xlane.f32.xlu1 %v4489_v12  ;;  %v3412_v14 = vpop.f32.mrf.mxu0 }
 0x145   :  { %v323_v15 = vsub.f32 %v292_v11, %v4393_v49 }
 0x146   :  { %v241_v16 = vpop.f32.mrf.mxu0 }
 0x147   :  { %v293_v17 = vmul.f32 2.0, %v241_v16  ;;  %v4495_v19 = vsel %vm334_vm1, %v323_v15, -1e+30 }
 0x148   :  { %7360 = vst [vmem:[#allocation16_spill] sm:$0xff] %v4495_v19  ;;  %392 = vmax.xlane.f32.xlu0 %v4495_v19  ;;  %v3413_v20 = vpop.f32.mrf.mxu0 }
 0x149   :  { %v324_v21 = vsub.f32 %v293_v17, %v4393_v49 }
 0x14a   :  { %v246_v22 = vpop.f32.mrf.mxu0 }
 0x14b   :  { %v294_v24 = vmul.f32 2.0, %v246_v22  ;;  %v4501_v25 = vsel %vm334_vm1, %v324_v21, -1e+30 }
 0x14c   :  { %7361 = vst [vmem:[#allocation17_spill] sm:$0xff] %v4501_v25  ;;  %394 = vmax.xlane.f32.xlu1 %v4501_v25  ;;  %v3416_v26 = vpop.f32.mrf.mxu0 }
 0x14d   :  { %v325_v27 = vsub.f32 %v294_v24, %v4393_v49 }
 0x14e   :  { %v249_v29 = vpop.f32.mrf.mxu0 }
 0x14f   :  { %v295_v30 = vmul.f32 2.0, %v249_v29  ;;  %v4507_v31 = vsel %vm334_vm1, %v325_v27, -1e+30 }
 0x150   :  { %7362 = vst [vmem:[#allocation18_spill] sm:$0xff] %v4507_v31  ;;  %396 = vmax.xlane.f32.xlu0 %v4507_v31  ;;  %v3417_v32 = vpop.f32.mrf.mxu0 }
 0x151   :  { %v326_v34 = vsub.f32 %v295_v30, %v4393_v49 }
 0x152   :  { %v254_v35 = vpop.f32.mrf.mxu0 }
 0x153   :  { %v296_v36 = vmul.f32 2.0, %v254_v35  ;;  %v4513_v37 = vsel %vm334_vm1, %v326_v34, -1e+30 }
 0x154   :  { %7363 = vst [vmem:[#allocation19_spill] sm:$0xff] %v4513_v37  ;;  %398 = vmax.xlane.f32.xlu1 %v4513_v37  ;;  %v3420_v39 = vpop.f32.mrf.mxu0 }
 0x155   :  { %v327_v40 = vsub.f32 %v296_v36, %v4393_v49 }
 0x156   :  { %v257_v41 = vpop.f32.mrf.mxu0 }
 0x157   :  { %v297_v42 = vmul.f32 2.0, %v257_v41  ;;  %v4519_v44 = vsel %vm334_vm1, %v327_v40, -1e+30 }
 0x158   :  { %7364 = vst [vmem:[#allocation20_spill] sm:$0xff] %v4519_v44  ;;  %400 = vmax.xlane.f32.xlu1 %v4519_v44  ;;  %v3421_v45 = vpop.f32.mrf.mxu0 }
 0x159   :  { %v328_v46 = vsub.f32 %v297_v42, %v4393_v49 }
 0x15a   :  { %v262_v50 = vpop.f32.mrf.mxu0 }
 0x15b   :  { %v298_v52 = vmul.f32 2.0, %v262_v50  ;;  %v4525_v53 = vsel %vm334_vm1, %v328_v46, -1e+30 }
 0x15c   :  { %7365 = vst [vmem:[#allocation21_spill] sm:$0xff] %v4525_v53  ;;  %402 = vmax.xlane.f32.xlu1 %v4525_v53  ;;  %v3424_v54 = vpop.f32.mrf.mxu0 }
 0x15d   :  { %v329_v55 = vsub.f32 %v298_v52, %v4393_v49 }
 0x15e   :  { %v265_v58 = vpop.f32.mrf.mxu0 }
 0x15f   :  { %v299_v59 = vmul.f32 2.0, %v265_v58  ;;  %v4531_v60 = vsel %vm334_vm1, %v329_v55, -1e+30 }
 0x160   :  { %7366 = vst [vmem:[#allocation22_spill] sm:$0xff] %v4531_v60  ;;  %404 = vmax.xlane.f32.xlu1 %v4531_v60  ;;  %v3425_v62 = vpop.f32.mrf.mxu0 }
 0x161   :  { %v330_v1 = vsub.f32 %v299_v59, %v4393_v49 }
 0x162   :  { %v270_v2 = vpop.f32.mrf.mxu0 }
 0x163   :  { %v300_v4 = vmul.f32 2.0, %v270_v2  ;;  %v4537_v5 = vsel %vm334_vm1, %v330_v1, -1e+30 }
 0x164   :  { %7367 = vst [vmem:[#allocation23_spill] sm:$0xff] %v4537_v5  ;;  %406 = vmax.xlane.f32.xlu1 %v4537_v5  ;;  %v3428_v7 = vpop.f32.mrf.mxu0 }
 0x165   :  { %v331_v9 = vsub.f32 %v300_v4, %v4393_v49 }
 0x166   :  { %v273_v10 = vpop.f32.mrf.mxu0 }
 0x167   :  { %v4543_v11 = vsel %vm334_vm1, %v331_v9, -1e+30 }
 0x168   :  { %7368 = vst [vmem:[#allocation24_spill] sm:$0xff] %v4543_v11  ;;  %408 = vmax.xlane.f32.xlu1 %v4543_v11  ;;  %v3429_v14 = vpop.f32.mrf.mxu0 }
 0x191   :  { %v4546_v15 = vpop.xlane.xlu0 %360 }
 0x192   :  { %vm610_vm2 = vcmp.eq.f32.partialorder %v4399_v56, %v4546_v15 }
 0x193   :  { %v4551_v16 = vsel %vm610_vm2, %v4388_v48, 128 }
 0x194   :  { %v661_v17 = vshra.s32 %v4551_v16, 16 }
 0x195   :  { %v4554_v20 = vpop.xlane.xlu0 %362 }
 0x196   :  { %7369 = vst [vmem:[#allocation25_spill] sm:$0xff] %v4554_v20  ;;  %vm611_vm3 = vcmp.eq.f32.partialorder %v4405_v61, %v4554_v20  ;;  %v4558_v49 = vcvt.s32.f32 %v661_v17 }
 0x197   :  { %v4561_v21 = vsel %vm611_vm3, %v4388_v48, 128 }
 0x198   :  { %664 = vmin.xlane.f32.xlu0 %v4558_v49  ;;  %v675_v22 = vshra.s32 %v4561_v21, 16 }
 0x199   :  { %v4565_v24 = vpop.xlane.xlu1 %364 }
 0x19a   :  { %vm612_vm4 = vcmp.eq.f32.partialorder %v4411_v3, %v4565_v24  ;;  %v4569_v26 = vcvt.s32.f32 %v675_v22 }
 0x19b   :  { %v4572_v27 = vsel %vm612_vm4, %v4388_v48, 128 }
 0x19c   :  { %678 = vmin.xlane.f32.xlu0 %v4569_v26  ;;  %v689_v29 = vshra.s32 %v4572_v27, 16 }
 0x19d   :  { %v4576_v30 = vpop.xlane.xlu1 %366 }
 0x19e   :  { %7370 = vst [vmem:[#allocation26_spill] sm:$0xff] %v4576_v30  ;;  %vm613_vm5 = vcmp.eq.f32.partialorder %v4417_v8, %v4576_v30  ;;  %v4580_v32 = vcvt.s32.f32 %v689_v29 }
 0x19f   :  { %v4583_v34 = vsel %vm613_vm5, %v4388_v48, 128 }
 0x1a0   :  { %692 = vmin.xlane.f32.xlu0 %v4580_v32  ;;  %v703_v35 = vshra.s32 %v4583_v34, 16 }
 0x1a1   :  { %v4587_v36 = vpop.xlane.xlu0 %368 }
 0x1a2   :  { %vm614_vm6 = vcmp.eq.f32.partialorder %v4423_v13, %v4587_v36  ;;  %v4591_v39 = vcvt.s32.f32 %v703_v35 }
 0x1a3   :  { %v4594_v40 = vsel %vm614_vm6, %v4388_v48, 128 }
 0x1a4   :  { %706 = vmin.xlane.f32.xlu0 %v4591_v39  ;;  %v717_v41 = vshra.s32 %v4594_v40, 16 }
 0x1a5   :  { %v4598_v42 = vpop.xlane.xlu1 %370 }
 0x1a6   :  { %7371 = vst [vmem:[#allocation27_spill] sm:$0xff] %v4598_v42  ;;  %vm615_vm7 = vcmp.eq.f32.partialorder %v4429_v18, %v4598_v42  ;;  %v4602_v45 = vcvt.s32.f32 %v717_v41 }
 0x1a7   :  { %v4605_v46 = vsel %vm615_vm7, %v4388_v48, 128 }
 0x1a8   :  { %720 = vmin.xlane.f32.xlu0 %v4602_v45  ;;  %v731_v50 = vshra.s32 %v4605_v46, 16 }
 0x1a9   :  { %v4609_v52 = vpop.xlane.xlu0 %372 }
 0x1aa   :  { %7372 = vst [vmem:[#allocation28_spill] sm:$0xff] %v4609_v52  ;;  %vm616_vm8 = vcmp.eq.f32.partialorder %v4435_v23, %v4609_v52  ;;  %v4613_v54 = vcvt.s32.f32 %v731_v50  ;;  %v674_v52 = vand.u32 65535, %v4561_v21 }
 0x1ab   :  { %v4616_v55 = vsel %vm616_vm8, %v4388_v48, 128 }
 0x1ac   :  { %734 = vmin.xlane.f32.xlu0 %v4613_v54  ;;  %v745_v58 = vshra.s32 %v4616_v55, 16 }
 0x1ad   :  { %v4620_v59 = vpop.xlane.xlu1 %374 }
 0x1ae   :  { %7373 = vst [vmem:[#allocation29_spill] sm:$0xff] %v4620_v59  ;;  %vm617_vm9 = vcmp.eq.f32.partialorder %v4441_v28, %v4620_v59  ;;  %v4624_v62 = vcvt.s32.f32 %v745_v58 }
 0x1af   :  { %v4627_v1 = vsel %vm617_vm9, %v4388_v48, 128 }
 0x1b0   :  { %748 = vmin.xlane.f32.xlu1 %v4624_v62  ;;  %v759_v2 = vshra.s32 %v4627_v1, 16 }
 0x1b1   :  { %v4631_v4 = vpop.xlane.xlu0 %376 }
 0x1b2   :  { %7374 = vst [vmem:[#allocation30_spill] sm:$0xff] %v4631_v4  ;;  %vm618_vm10 = vcmp.eq.f32.partialorder %v4447_v33, %v4631_v4  ;;  %v4635_v7 = vcvt.s32.f32 %v759_v2 }
 0x1b3   :  { %v4638_v9 = vsel %vm618_vm10, %v4388_v48, 128 }
 0x1b4   :  { %762 = vmin.xlane.f32.xlu0 %v4635_v7  ;;  %v773_v10 = vshra.s32 %v4638_v9, 16 }
 0x1b5   :  { %v4642_v14 = vpop.xlane.xlu1 %378 }
 0x1b6   :  { %7375 = vst [vmem:[#allocation31_spill] sm:$0xff] %v4642_v14  ;;  %vm619_vm11 = vcmp.eq.f32.partialorder %v4453_v38, %v4642_v14  ;;  %v4646_v17 = vcvt.s32.f32 %v773_v10 }
 0x1b7   :  { %v4649_v22 = vsel %vm619_vm11, %v4388_v48, 128 }
 0x1b8   :  { %776 = vmin.xlane.f32.xlu1 %v4646_v17  ;;  %v787_v29 = vshra.s32 %v4649_v22, 16 }
 0x1b9   :  { %v4653_v35 = vpop.xlane.xlu0 %380 }
 0x1ba   :  { %7376 = vst [vmem:[#allocation32_spill] sm:$0xff] %v4653_v35  ;;  %vm620_vm12 = vcmp.eq.f32.partialorder %v4459_v43, %v4653_v35  ;;  %v4657_v41 = vcvt.s32.f32 %v787_v29 }
 0x1bb   :  { %v4660_v50 = vsel %vm620_vm12, %v4388_v48, 128 }
 0x1bc   :  { %790 = vmin.xlane.f32.xlu0 %v4657_v41  ;;  %v801_v58 = vshra.s32 %v4660_v50, 16 }
 0x1bd   :  { %v4664_v2 = vpop.xlane.xlu1 %382 }
 0x1be   :  { %7377 = vst [vmem:[#allocation33_spill] sm:$0xff] %v4664_v2  ;;  %vm621_vm13 = vcmp.eq.f32.partialorder %v4465_v51, %v4664_v2  ;;  %v4668_v10 = vcvt.s32.f32 %v801_v58 }
 0x1bf   :  { %v4671_v47 = vsel %vm621_vm13, %v4388_v48, 128 }
 0x1c0   :  { %804 = vmin.xlane.f32.xlu1 %v4668_v10  ;;  %v815_v29 = vshra.s32 %v4671_v47, 16 }
 0x1c1   :  { %v4675_v0 = vpop.xlane.xlu0 %384 }
 0x1c2   :  { %7378 = vst [vmem:[#allocation34_spill] sm:$0xff] %v4675_v0  ;;  %vm622_vm14 = vcmp.eq.f32.partialorder %v4471_v57, %v4675_v0  ;;  %v4679_v38 = vcvt.s32.f32 %v815_v29 }
 0x1c3   :  { %v4682_v14 = vsel %vm622_vm14, %v4388_v48, 128 }
 0x1c4   :  { %818 = vmin.xlane.f32.xlu0 %v4679_v38  ;;  %v829_v58 = vshra.s32 %v4682_v14, 16 }
 0x1c5   :  { %v4686_v51 = vpop.xlane.xlu1 %386 }
 0x1c6   :  { %7379 = vst [vmem:[#allocation35_spill] sm:$0xff] %v4686_v51  ;;  %vm623_vm15 = vcmp.eq.f32.partialorder %v4477_v63, %v4686_v51  ;;  %v4690_v2 = vcvt.s32.f32 %v829_v58 }
 0x1c7   :  { %v4693_v28 = vsel %vm623_vm15, %v4388_v48, 128 }
 0x1c8   :  { %832 = vmin.xlane.f32.xlu1 %v4690_v2  ;;  %v843_v29 = vshra.s32 %v4693_v28, 16 }
 0x1c9   :  { %v4697_v59 = vpop.xlane.xlu0 %388 }
 0x1ca   :  { %7380 = vst [vmem:[#allocation36_spill] sm:$0xff] %v4697_v59  ;;  %vm624_vm1 = vcmp.eq.f32.partialorder %v4483_v6, %v4697_v59  ;;  %v4701_v18 = vcvt.s32.f32 %v843_v29 }
 0x1cb   :  { %v4704_v42 = vsel %vm624_vm1, %v4388_v48, 128 }
 0x1cc   :  { %846 = vmin.xlane.f32.xlu0 %v4701_v18  ;;  %v857_v58 = vshra.s32 %v4704_v42, 16 }
 0x1cd   :  { %v4708_v63 = vpop.xlane.xlu1 %390 }
 0x1ce   :  { %7381 = vst [vmem:[#allocation37_spill] sm:$0xff] %v4708_v63  ;;  %vm625_vm2 = vcmp.eq.f32.partialorder %v4489_v12, %v4708_v63  ;;  %v4712_v51 = vcvt.s32.f32 %v857_v58 }
 0x1cf   :  { %v4715_v8 = vsel %vm625_vm2, %v4388_v48, 128 }
 0x1d0   :  { %860 = vmin.xlane.f32.xlu1 %v4712_v51  ;;  %v871_v29 = vshra.s32 %v4715_v8, 16 }
 0x1d1   :  { %v4719_v30 = vpop.xlane.xlu0 %392 }
 0x1d2   :  { %7382 = vst [vmem:[#allocation38_spill] sm:$0xff] %v4719_v30  ;;  %vm626_vm3 = vcmp.eq.f32.partialorder %v4495_v19, %v4719_v30  ;;  %v4723_v61 = vcvt.s32.f32 %v871_v29 }
 0x1d3   :  { %v4726_v20 = vsel %vm626_vm3, %v4388_v48, 128 }
 0x1d4   :  { %874 = vmin.xlane.f32.xlu0 %v4723_v61  ;;  %v885_v58 = vshra.s32 %v4726_v20, 16 }
 0x1d5   :  { %v4730_v12 = vpop.xlane.xlu1 %394 }
 0x1d6   :  { %7383 = vst [vmem:[#allocation39_spill] sm:$0xff] %v4730_v12  ;;  %vm627_vm4 = vcmp.eq.f32.partialorder %v4501_v25, %v4730_v12  ;;  %v4734_v63 = vcvt.s32.f32 %v885_v58 }
 0x1d7   :  { %v4737_v6 = vsel %vm627_vm4, %v4388_v48, 128 }
 0x1d8   :  { %888 = vmin.xlane.f32.xlu1 %v4734_v63  ;;  %v899_v29 = vshra.s32 %v4737_v6, 16 }
 0x1d9   :  { %v4741_v19 = vpop.xlane.xlu0 %396 }
 0x1da   :  { %7384 = vst [vmem:[#allocation40_spill] sm:$0xff] %v4741_v19  ;;  %vm628_vm5 = vcmp.eq.f32.partialorder %v4507_v31, %v4741_v19  ;;  %v4745_v30 = vcvt.s32.f32 %v899_v29 }
 0x1db   :  { %v4748_v59 = vsel %vm628_vm5, %v4388_v48, 128 }
 0x1dc   :  { %902 = vmin.xlane.f32.xlu0 %v4745_v30  ;;  %v913_v58 = vshra.s32 %v4748_v59, 16 }
 0x1dd   :  { %v4752_v25 = vpop.xlane.xlu1 %398 }
 0x1de   :  { %7385 = vst [vmem:[#allocation41_spill] sm:$0xff] %v4752_v25  ;;  %vm629_vm6 = vcmp.eq.f32.partialorder %v4513_v37, %v4752_v25  ;;  %v4756_v12 = vcvt.s32.f32 %v913_v58 }
 0x1df   :  { %v4759_v57 = vsel %vm629_vm6, %v4388_v48, 128 }
 0x1e0   :  { %916 = vmin.xlane.f32.xlu0 %v4756_v12  ;;  %v927_v29 = vshra.s32 %v4759_v57, 16 }
 0x1e1   :  { %v4763_v31 = vpop.xlane.xlu1 %400 }
 0x1e2   :  { %7386 = vst [vmem:[#allocation42_spill] sm:$0xff] %v4763_v31  ;;  %vm630_vm7 = vcmp.eq.f32.partialorder %v4519_v44, %v4763_v31  ;;  %v4767_v19 = vcvt.s32.f32 %v927_v29 }
 0x1e3   :  { %v4770_v0 = vsel %vm630_vm7, %v4388_v48, 128 }
 0x1e4   :  { %930 = vmin.xlane.f32.xlu0 %v4767_v19  ;;  %v941_v58 = vshra.s32 %v4770_v0, 16 }
 0x1e5   :  { %v4774_v37 = vpop.xlane.xlu1 %402 }
 0x1e6   :  { %7387 = vst [vmem:[#allocation43_spill] sm:$0xff] %v4774_v37  ;;  %vm631_vm8 = vcmp.eq.f32.partialorder %v4525_v53, %v4774_v37  ;;  %v4778_v25 = vcvt.s32.f32 %v941_v58 }
 0x1e7   :  { %v4781_v43 = vsel %vm631_vm8, %v4388_v48, 128 }
 0x1e8   :  { %944 = vmin.xlane.f32.xlu0 %v4778_v25  ;;  %v955_v29 = vshra.s32 %v4781_v43, 16 }
 0x1e9   :  { %v4785_v44 = vpop.xlane.xlu1 %404 }
 0x1ea   :  { %7388 = vst [vmem:[#allocation44_spill] sm:$0xff] %v4785_v44  ;;  %vm632_vm9 = vcmp.eq.f32.partialorder %v4531_v60, %v4785_v44  ;;  %v4789_v31 = vcvt.s32.f32 %v955_v29 }
 0x1eb   :  { %v4792_v35 = vsel %vm632_vm9, %v4388_v48, 128 }
 0x1ec   :  { %958 = vmin.xlane.f32.xlu0 %v4789_v31  ;;  %v969_v58 = vshra.s32 %v4792_v35, 16 }
 0x1ed   :  { %v4796_v53 = vpop.xlane.xlu1 %406 }
 0x1ee   :  { %7389 = vst [vmem:[#allocation45_spill] sm:$0xff] %v4796_v53  ;;  %vm633_vm10 = vcmp.eq.f32.partialorder %v4537_v5, %v4796_v53  ;;  %v4800_v37 = vcvt.s32.f32 %v969_v58  ;;  %v77_v53 = vld [vmem:[%s7146_s2 + $0x78] sm:$0xff] }
 0x1ef   :  { %v4803_v33 = vsel %vm633_vm10, %v4388_v48, 128  ;;  %v4824_v23 = vand.u32 4294901760, %v77_v53 }
 0x1f0   :  { %972 = vmin.xlane.f32.xlu0 %v4800_v37  ;;  %v983_v29 = vshra.s32 %v4803_v33, 16 }
 0x1f1   :  { %v4807_v60 = vpop.xlane.xlu1 %408  ;;  %7394 = vst [vmem:[#allocation50_spill] sm:$0xff] %v4824_v23  ;;  %3431 = vmatpush3.msra.mxu1 %v4824_v23 }
 0x1f2   :  { %7390 = vst [vmem:[#allocation46_spill] sm:$0xff] %v4807_v60  ;;  %vm634_vm11 = vcmp.eq.f32.partialorder %v4543_v11, %v4807_v60  ;;  %v4811_v44 = vcvt.s32.f32 %v983_v29  ;;  %v76_v29 = vld [vmem:[%s7146_s2 + $0x70] sm:$0xff]  ;;  %v7397_v60 = vmov 0.0  }
 0x1f3   :  { %v4814_v4 = vsel %vm634_vm11, %v4388_v48, 128  ;;  %v4830_v48 = vsub.f32 %v77_v53, %v4824_v23  ;;  %v4832_v11 = vand.u32 4294901760, %v76_v29  ;;  %3432 = vmatprep.subr.mxu1 %v7397_v60  ;;  %v74_v53 = vld [vmem:[%s7146_s2 + $0x60] sm:$0xff] }
 0x1f4   :  { %7391 = vst [vmem:[#allocation47_spill] sm:$0xff] %v4811_v44  ;;  %7392 = vst [vmem:[#allocation48_spill] sm:$0xff] %v4814_v4  ;;  %986 = vmin.xlane.f32.xlu0 %v4811_v44  ;;  %v997_v58 = vshra.s32 %v4814_v4, 16  ;;  %v70_v4 = vld [vmem:[%s7146_s2 + $0x40] sm:$0xff] }
 0x1f5   :  { %7395 = vst [vmem:[#allocation51_spill] sm:$0xff] %v4830_v48  ;;  %7396 = vst [vmem:[#allocation52_spill] sm:$0xff] %v4832_v11  ;;  %3645 = vmatpush3.msra.mxu0 %v4830_v48  ;;  %3433 = vmatpush3.msra.mxu1 %v4832_v11  ;;  %v4855_v48 = vand.u32 4294901760, %v74_v53 }
 0x1f6   :  { %v4818_v5 = vcvt.s32.f32 %v997_v58  ;;  %v75_v58 = vld [vmem:[%s7146_s2 + $0x68] sm:$0xff]  ;;  %3646 = vmatprep.subr.mxu0 %v7397_v60  ;;  %3434 = vmatprep.subr.mxu1 %v7397_v60 }
 0x1f7   :  { %v4843_v44 = vand.u32 4294901760, %v75_v58  ;;  %7401 = vst [vmem:[#allocation56_spill] sm:$0xff] %v4855_v48 }
 0x1f8   :  { %7393 = vst [vmem:[#allocation49_spill] sm:$0xff] %v4818_v5  ;;  %1000 = vmin.xlane.f32.xlu0 %v4818_v5  ;;  %v4841_v5 = vsub.f32 %v76_v29, %v4832_v11  ;;  %v73_v29 = vld [vmem:[%s7146_s2 + $0x58] sm:$0xff]  ;;  %v4865_v11 = vsub.f32 %v74_v53, %v4855_v48 }
 0x1f9   :  { %7399 = vst [vmem:[#allocation54_spill] sm:$0xff] %v4843_v44  ;;  %v4853_v23 = vsub.f32 %v75_v58, %v4843_v44  ;;  %3435 = vmatpush3.msra.mxu1 %v4843_v44  ;;  %v660_v58 = vand.u32 65535, %v4551_v16  ;;  %v72_v44 = vld [vmem:[%s7146_s2 + $0x50] sm:$0xff]  ;;  %v71_v16 = vld [vmem:[%s7146_s2 + $0x48] sm:$0xff] }
 0x1fa   :  { %7398 = vst [vmem:[#allocation53_spill] sm:$0xff] %v4841_v5  ;;  %3647 = vmatpush3.msra.mxu0 %v4841_v5  ;;  %3436 = vmatprep.subr.mxu1 %v7397_v60  ;;  %7402 = vst [vmem:[#allocation57_spill] sm:$0xff] %v4865_v11  ;;  %v4867_v5 = vand.u32 4294901760, %v73_v29  ;;  %v4880_v53 = vand.u32 4294901760, %v72_v44 }
 0x1fb   :  { %7400 = vst [vmem:[#allocation55_spill] sm:$0xff] %v4853_v23  ;;  %3648 = vmatprep.subr.mxu0 %v7397_v60  ;;  %3437 = vmatpush3.msra.mxu1 %v4855_v48 }
 0x1fc   :  { %3649 = vmatpush3.msra.mxu0 %v4853_v23  ;;  %7403 = vst [vmem:[#allocation58_spill] sm:$0xff] %v4867_v5  ;;  %3438 = vmatprep.subr.mxu1 %v7397_v60  ;;  %v4878_v23 = vsub.f32 %v73_v29, %v4867_v5  ;;  %7405 = vst [vmem:[#allocation60_spill] sm:$0xff] %v4880_v53  ;;  %v4890_v48 = vsub.f32 %v72_v44, %v4880_v53 }
 0x1fd   :  { %3650 = vmatprep.subr.mxu0 %v7397_v60  ;;  %3439 = vmatpush3.msra.mxu1 %v4867_v5  ;;  %v662_v5 = vcvt.s32.f32 %v660_v58  ;;  %v69_v58 = vld [vmem:[%s7146_s2 + $0x38] sm:$0xff] }
 0x1fe   :  { %3651 = vmatpush3.msra.mxu0 %v4865_v11  ;;  %7404 = vst [vmem:[#allocation59_spill] sm:$0xff] %v4878_v23  ;;  %3440 = vmatprep.subr.mxu1 %v7397_v60  ;;  %7406 = vst [vmem:[#allocation61_spill] sm:$0xff] %v4890_v48  ;;  %v4892_v11 = vand.u32 4294901760, %v71_v16 }
 0x1ff   :  { %3652 = vmatprep.subr.mxu0 %v7397_v60  ;;  %3441 = vmatpush3.msra.mxu1 %v4880_v53  ;;  %v4909_v53 = vand.u32 4294901760, %v70_v4 }
 0x200   :  { %3653 = vmatpush3.msra.mxu0 %v4878_v23  ;;  %7407 = vst [vmem:[#allocation62_spill] sm:$0xff] %v4892_v11  ;;  %3442 = vmatprep.subr.mxu1 %v7397_v60  ;;  %v4907_v44 = vsub.f32 %v71_v16, %v4892_v11  ;;  %v4921_v16 = vand.u32 4294901760, %v69_v58  ;;  %v68_v23 = vld [vmem:[%s7146_s2 + $0x30] sm:$0xff] }
 0x201   :  { %3654 = vmatprep.subr.mxu0 %v7397_v60  ;;  %7408 = vst [vmem:[#allocation63_spill] sm:$0xff] %v4909_v53  ;;  %3443 = vmatpush3.msra.mxu1 %v4892_v11  ;;  %v676_v11 = vcvt.s32.f32 %v674_v52  ;;  %v67_v52 = vld [vmem:[%s7146_s2 + $0x28] sm:$0xff] }
 0x202   :  { %3655 = vmatpush3.msra.mxu0 %v4890_v48  ;;  %3444 = vmatprep.subr.mxu1 %v7397_v60  ;;  %7410 = vst [vmem:[#allocation65_spill] sm:$0xff] %v4921_v16 }
 0x203   :  { %3656 = vmatprep.subr.mxu0 %v7397_v60  ;;  %3445 = vmatpush3.msra.mxu1 %v4909_v53 }
 0x204   :  { %3657 = vmatpush3.msra.mxu0 %v4907_v44  ;;  %3446 = vmatprep.subr.mxu1 %v7397_v60 }
 0x205   :  { %3658 = vmatprep.subr.mxu0 %v7397_v60  ;;  %3447 = vmatpush3.msra.mxu1 %v4921_v16 }
 0x206   :  { %3448 = vmatprep.subr.mxu1 %v7397_v60 }
 0x221   :  { %v4895_v29 = vpop.xlane.xlu0 %664 }
 0x222   :  { %vm666_vm12 = vcmp.eq.f32.partialorder %v4558_v49, %v4895_v29  ;;  %v4919_v49 = vsub.f32 %v70_v4, %v4909_v53  ;;  %v4935_v4 = vsub.f32 %v69_v58, %v4921_v16  ;;  %v4949_v58 = vand.u32 4294901760, %v67_v52 }
 0x223   :  { %v667_v21 = vsel %vm666_vm12, %v662_v5, inf  ;;  %v688_v5 = vand.u32 65535, %v4572_v27 }
 0x224   :  { %668 = vmin.xlane.f32.xlu1 %v667_v21  ;;  %7409 = vst [vmem:[#allocation64_spill] sm:$0xff] %v4919_v49  ;;  %3659 = vmatpush3.msra.mxu0 %v4919_v49  ;;  %v4937_v21 = vand.u32 4294901760, %v68_v23  ;;  %7413 = vst [vmem:[#allocation68_spill] sm:$0xff] %v4949_v58 }
 0x225   :  { %v4923_v48 = vpop.xlane.xlu0 %678  ;;  %3660 = vmatprep.subr.mxu0 %v7397_v60  ;;  %v690_v49 = vcvt.s32.f32 %v688_v5  ;;  %v65_v5 = vld [vmem:[%s7146_s2 + $0x18] sm:$0xff] }
 0x226   :  { %vm680_vm13 = vcmp.eq.f32.partialorder %v4569_v26, %v4923_v48  ;;  %7411 = vst [vmem:[#allocation66_spill] sm:$0xff] %v4937_v21  ;;  %3661 = vmatpush3.msra.mxu0 %v4935_v4  ;;  %v4947_v26 = vsub.f32 %v68_v23, %v4937_v21  ;;  %v4963_v23 = vsub.f32 %v67_v52, %v4949_v58  ;;  %v4977_v52 = vand.u32 4294901760, %v65_v5 }
 0x227   :  { %v681_v27 = vsel %vm680_vm13, %v676_v11, inf  ;;  %v702_v11 = vand.u32 65535, %v4583_v34  ;;  %3662 = vmatprep.subr.mxu0 %v7397_v60  ;;  %3449 = vmatpush3.msra.mxu1 %v4937_v21 }
 0x228   :  { %682 = vmin.xlane.f32.xlu1 %v681_v27  ;;  %7412 = vst [vmem:[#allocation67_spill] sm:$0xff] %v4947_v26  ;;  %v66_v27 = vld [vmem:[%s7146_s2 + $0x20] sm:$0xff]  ;;  %3663 = vmatpush3.msra.mxu0 %v4947_v26  ;;  %7414 = vst [vmem:[#allocation69_spill] sm:$0xff] %v4963_v23 }
 0x229   :  { %v4951_v53 = vpop.xlane.xlu0 %692  ;;  %v4965_v16 = vand.u32 4294901760, %v66_v27  ;;  %3664 = vmatprep.subr.mxu0 %v7397_v60  ;;  %3450 = vmatprep.subr.mxu1 %v7397_v60  ;;  %7417 = vst [vmem:[#allocation72_spill] sm:$0xff] %v4977_v52  ;;  %v704_v21 = vcvt.s32.f32 %v702_v11 }
 0x22a   :  { %vm694_vm14 = vcmp.eq.f32.partialorder %v4580_v32, %v4951_v53  ;;  %3665 = vmatpush3.msra.mxu0 %v4963_v23  ;;  %3451 = vmatpush3.msra.mxu1 %v4949_v58  ;;  %v63_v58 = vld [vmem:[%s7146_s2 + $0x8] sm:$0xff] }
 0x22b   :  { %7415 = vst [vmem:[#allocation70_spill] sm:$0xff] %v4965_v16  ;;  %v695_v34 = vsel %vm694_vm14, %v690_v49, inf  ;;  %v4975_v32 = vsub.f32 %v66_v27, %v4965_v16  ;;  %v716_v49 = vand.u32 65535, %v4594_v40  ;;  %3666 = vmatprep.subr.mxu0 %v7397_v60  ;;  %v4991_v27 = vsub.f32 %v65_v5, %v4977_v52  ;;  %3452 = vmatprep.subr.mxu1 %v7397_v60 }
 0x22c   :  { %696 = vmin.xlane.f32.xlu1 %v695_v34  ;;  %v64_v34 = vld [vmem:[%s7146_s2 + $0x10] sm:$0xff]  ;;  %3453 = vmatpush3.msra.mxu1 %v4965_v16  ;;  %v5005_v5 = vand.u32 4294901760, %v63_v58 }
 0x22d   :  { %7416 = vst [vmem:[#allocation71_spill] sm:$0xff] %v4975_v32  ;;  %v4979_v26 = vpop.xlane.xlu0 %706  ;;  %3667 = vmatpush3.msra.mxu0 %v4975_v32  ;;  %v4994_v11 = vand.u32 4294901760, %v64_v34  ;;  %v718_v23 = vcvt.s32.f32 %v716_v49  ;;  %3454 = vmatprep.subr.mxu1 %v7397_v60 }
 0x22e   :  { %vm708_vm15 = vcmp.eq.f32.partialorder %v4591_v39, %v4979_v26  ;;  %3668 = vmatprep.subr.mxu0 %v7397_v60  ;;  %7420 = vst [vmem:[#allocation75_spill] sm:$0xff] %v5005_v5  ;;  %3455 = vmatpush3.msra.mxu1 %v4977_v52  ;;  %v7460_v52 = vld [vmem:[#allocation57_spill] sm:$0xff] }
 0x22f   :  { %7418 = vst [vmem:[#allocation73_spill] sm:$0xff] %v4994_v11  ;;  %v709_v40 = vsel %vm708_vm15, %v704_v21, inf  ;;  %3669 = vmatpush3.msra.mxu0 %v4991_v27  ;;  %v5003_v39 = vsub.f32 %v64_v34, %v4994_v11  ;;  %v730_v21 = vand.u32 65535, %v4605_v46  ;;  %v5019_v34 = vsub.f32 %v63_v58, %v5005_v5  ;;  %3456 = vmatprep.subr.mxu1 %v7397_v60 }
 0x230   :  { %710 = vmin.xlane.f32.xlu1 %v709_v40  ;;  %3670 = vmatprep.subr.mxu0 %v7397_v60  ;;  %v62_v40 = vld [vmem:[%s7146_s2] sm:$0xff]  ;;  %v744_v58 = vand.u32 65535, %v4616_v55 }
 0x231   :  { %7419 = vst [vmem:[#allocation74_spill] sm:$0xff] %v5003_v39  ;;  %v5007_v32 = vpop.xlane.xlu0 %720  ;;  %3671 = vmatpush3.msra.mxu0 %v5003_v39  ;;  %v5022_v49 = vand.u32 4294901760, %v62_v40  ;;  %v732_v39 = vcvt.s32.f32 %v730_v21  ;;  %3457 = vmatpush3.msra.mxu1 %v4994_v11 }
 0x232   :  { %vm722_vm1 = vcmp.eq.f32.partialorder %v4602_v45, %v5007_v32  ;;  %3672 = vmatprep.subr.mxu0 %v7397_v60  ;;  %3458 = vmatprep.subr.mxu1 %v7397_v60  ;;  %v746_v21 = vcvt.s32.f32 %v744_v58 }
 0x233   :  { %7421 = vst [vmem:[#allocation76_spill] sm:$0xff] %v5022_v49  ;;  %v723_v46 = vsel %vm722_vm1, %v718_v23, inf  ;;  %3673 = vmatpush3.msra.mxu0 %v5019_v34  ;;  %v5028_v16 = vsub.f32 %v62_v40, %v5022_v49  ;;  %3459 = vmatpush3.msra.mxu1 %v5005_v5  ;;  %v758_v40 = vand.u32 65535, %v4627_v1  ;;  %v786_v5 = vand.u32 65535, %v4649_v22 }
 0x234   :  { %724 = vmin.xlane.f32.xlu1 %v723_v46  ;;  %3674 = vmatprep.subr.mxu0 %v7397_v60  ;;  %v814_v22 = vand.u32 65535, %v4671_v47  ;;  %v842_v47 = vand.u32 65535, %v4693_v28  ;;  %v870_v28 = vand.u32 65535, %v4715_v8  ;;  %v898_v8 = vand.u32 65535, %v4737_v6 }
 0x235   :  { %v5030_v45 = vpop.xlane.xlu0 %734  ;;  %3675 = vmatpush3.msra.mxu0 %v5028_v16  ;;  %3460 = vmatprep.subr.mxu1 %v7397_v60  ;;  %v760_v46 = vcvt.s32.f32 %v758_v40  ;;  %v788_v40 = vcvt.s32.f32 %v786_v5  ;;  %v926_v6 = vand.u32 65535, %v4759_v57  ;;  %v954_v57 = vand.u32 65535, %v4781_v43 }
 0x236   :  { %vm736_vm2 = vcmp.eq.f32.partialorder %v4613_v54, %v5030_v45  ;;  %3858 = vmatprep.subr.mxu0 %v7397_v60  ;;  %3461 = vmatpush3.msra.mxu1 %v5022_v49  ;;  %v816_v5 = vcvt.s32.f32 %v814_v22  ;;  %v872_v22 = vcvt.s32.f32 %v870_v28 }
 0x237   :  { %v737_v23 = vsel %vm736_vm2, %v732_v39, inf  ;;  %3537 = vmatprep.subr.mxu1 %v7397_v60 }
 0x238   :  { %738 = vmin.xlane.f32.xlu1 %v737_v23  ;;  %v772_v23 = vand.u32 65535, %v4638_v9  ;;  %v800_v9 = vand.u32 65535, %v4660_v50  ;;  %v828_v50 = vand.u32 65535, %v4682_v14  ;;  %v856_v14 = vand.u32 65535, %v4704_v42 }
 0x239   :  { %v5042_v55 = vpop.xlane.xlu1 %748  ;;  %v884_v42 = vand.u32 65535, %v4726_v20  ;;  %v912_v20 = vand.u32 65535, %v4748_v59  ;;  %v940_v59 = vand.u32 65535, %v4770_v0  ;;  %v956_v0 = vcvt.s32.f32 %v954_v57  ;;  %v7430_v57 = vld [vmem:[#allocation10_spill] sm:$0xff] }
 0x23a   :  { %vm750_vm3 = vcmp.eq.f32.partialorder %v4624_v62, %v5042_v55  ;;  %v774_v49 = vcvt.s32.f32 %v772_v23 }
 0x23b   :  { %v751_v54 = vsel %vm750_vm3, %v746_v21, inf }
 0x23c   :  { %752 = vmin.xlane.f32.xlu1 %v751_v54 }
 0x23d   :  { %v5049_v39 = vpop.xlane.xlu0 %762 }
 0x23e   :  { %vm764_vm4 = vcmp.eq.f32.partialorder %v4635_v7, %v5049_v39 }
 0x23f   :  { %v765_v58 = vsel %vm764_vm4, %v760_v46, inf  ;;  %v802_v46 = vcvt.s32.f32 %v800_v9 }
 0x240   :  { %766 = vmin.xlane.f32.xlu1 %v765_v58  ;;  %v830_v58 = vcvt.s32.f32 %v828_v50 }
 0x241   :  { %v5054_v1 = vpop.xlane.xlu1 %776 }
 0x242   :  { %vm778_vm5 = vcmp.eq.f32.partialorder %v4646_v17, %v5054_v1 }
 0x243   :  { %v779_v62 = vsel %vm778_vm5, %v774_v49, inf }
 0x244   :  { %780 = vmin.xlane.f32.xlu0 %v779_v62 }
 0x245   :  { %v5059_v21 = vpop.xlane.xlu0 %790 }
 0x246   :  { %vm792_vm6 = vcmp.eq.f32.partialorder %v4657_v41, %v5059_v21 }
 0x247   :  { %v793_v7 = vsel %vm792_vm6, %v788_v40, inf  ;;  %v844_v40 = vcvt.s32.f32 %v842_v47  ;;  %v914_v47 = vcvt.s32.f32 %v912_v20  ;;  %v7425_v20 = vld [vmem:[#allocation47_spill] sm:$0xff] }
 0x248   :  { %794 = vmin.xlane.f32.xlu1 %v793_v7  ;;  %v858_v7 = vcvt.s32.f32 %v856_v14 }
 0x249   :  { %v5064_v54 = vpop.xlane.xlu1 %804 }
 0x24a   :  { %vm806_vm7 = vcmp.eq.f32.partialorder %v4668_v10, %v5064_v54 }
 0x24b   :  { %v807_v17 = vsel %vm806_vm7, %v802_v46, inf }
 0x24c   :  { %808 = vmin.xlane.f32.xlu0 %v807_v17 }
 0x24d   :  { %v5069_v49 = vpop.xlane.xlu0 %818 }
 0x24e   :  { %vm820_vm8 = vcmp.eq.f32.partialorder %v4679_v38, %v5069_v49 }
 0x24f   :  { %v821_v41 = vsel %vm820_vm8, %v816_v5, inf  ;;  %v886_v5 = vcvt.s32.f32 %v884_v42 }
 0x250   :  { %822 = vmin.xlane.f32.xlu1 %v821_v41  ;;  %v900_v41 = vcvt.s32.f32 %v898_v8 }
 0x251   :  { %v5074_v23 = vpop.xlane.xlu1 %832 }
 0x252   :  { %vm834_vm9 = vcmp.eq.f32.partialorder %v4690_v2, %v5074_v23 }
 0x253   :  { %v835_v10 = vsel %vm834_vm9, %v830_v58, inf }
 0x254   :  { %836 = vmin.xlane.f32.xlu0 %v835_v10 }
 0x255   :  { %v5079_v62 = vpop.xlane.xlu0 %846 }
 0x256   :  { %vm848_vm10 = vcmp.eq.f32.partialorder %v4701_v18, %v5079_v62 }
 0x257   :  { %v849_v38 = vsel %vm848_vm10, %v844_v40, inf  ;;  %v928_v40 = vcvt.s32.f32 %v926_v6  ;;  %v7427_v6 = vld [vmem:[#allocation8_spill] sm:$0xff] }
 0x258   :  { %850 = vmin.xlane.f32.xlu1 %v849_v38  ;;  %v942_v38 = vcvt.s32.f32 %v940_v59 }
 0x259   :  { %v5084_v9 = vpop.xlane.xlu1 %860 }
 0x25a   :  { %vm862_vm11 = vcmp.eq.f32.partialorder %v4712_v51, %v5084_v9 }
 0x25b   :  { %v863_v2 = vsel %vm862_vm11, %v858_v7, inf }
 0x25c   :  { %864 = vmin.xlane.f32.xlu0 %v863_v2 }
 0x25d   :  { %v5089_v46 = vpop.xlane.xlu0 %874 }
 0x25e   :  { %vm876_vm12 = vcmp.eq.f32.partialorder %v4723_v61, %v5089_v46 }
 0x25f   :  { %v877_v18 = vsel %vm876_vm12, %v872_v22, inf  ;;  %v412_v22 = vsub.f32 %v4411_v3, %v4565_v24  ;;  %v7422_v24 = vld [vmem:[#allocation48_spill] sm:$0xff] }
 0x260   :  { %878 = vmin.xlane.f32.xlu1 %v877_v18  ;;  %v414_v18 = vsub.f32 %v4423_v13, %v4587_v36 }
 0x261   :  { %v5094_v17 = vpop.xlane.xlu1 %888  ;;  %v439_v42 = vmul.f32 1.442695, %v412_v22 }
 0x262   :  { %vm890_vm13 = vcmp.eq.f32.partialorder %v4734_v63, %v5094_v17  ;;  %v443_v8 = vmul.f32 1.442695, %v414_v18 }
 0x263   :  { %v891_v51 = vsel %vm890_vm13, %v886_v5, inf  ;;  %v996_v5 = vand.u32 65535, %v7422_v24  ;;  %v7435_v24 = vld [vmem:[#allocation38_spill] sm:$0xff] }
 0x264   :  { %892 = vmin.xlane.f32.xlu0 %v891_v51  ;;  %v7423_v51 = vld [vmem:[#allocation28_spill] sm:$0xff] }
 0x265   :  { %v5099_v50 = vpop.xlane.xlu0 %902 }
 0x266   :  { %vm904_vm14 = vcmp.eq.f32.partialorder %v4745_v30, %v5099_v50 }
 0x267   :  { %v905_v61 = vsel %vm904_vm14, %v900_v41, inf  ;;  %v7424_v41 = vld [vmem:[#allocation6_spill] sm:$0xff] }
 0x268   :  { %906 = vmin.xlane.f32.xlu1 %v905_v61 }
 0x269   :  { %v5104_v58 = vpop.xlane.xlu0 %916 }
 0x26a   :  { %vm918_vm15 = vcmp.eq.f32.partialorder %v4756_v12, %v5104_v58  ;;  %v410_v12 = vsub.f32 %v4399_v56, %v4546_v15 }
 0x26b   :  { %v919_v63 = vsel %vm918_vm15, %v914_v47, inf  ;;  %v7426_v47 = vld [vmem:[#allocation30_spill] sm:$0xff] }
 0x26c   :  { %920 = vmin.xlane.f32.xlu0 %v919_v63  ;;  %v435_v2 = vmul.f32 1.442695, %v410_v12  ;;  %v418_v63 = vsub.f32 %v7427_v6, %v7426_v47  ;;  %v7439_v47 = vld [vmem:[#allocation42_spill] sm:$0xff]  ;;  %v7440_v6 = vld [vmem:[#allocation20_spill] sm:$0xff] }
 0x26d   :  { %v5109_v10 = vpop.xlane.xlu0 %930 }
 0x26e   :  { %vm932_vm1 = vcmp.eq.f32.partialorder %v4767_v19, %v5109_v10  ;;  %v968_v19 = vand.u32 65535, %v4792_v35  ;;  %4085 = vpow2.f32 %v435_v2  ;;  %v7432_v2 = vld [vmem:[#allocation12_spill] sm:$0xff] }
 0x26f   :  { %v933_v30 = vsel %vm932_vm1, %v928_v40, inf  ;;  %4087 = vpow2.f32 %v439_v42  ;;  %v7428_v40 = vld [vmem:[#allocation49_spill] sm:$0xff]  ;;  %v7434_v42 = vld [vmem:[#allocation14_spill] sm:$0xff] }
 0x270   :  { %934 = vmin.xlane.f32.xlu1 %v933_v30  ;;  %v970_v15 = vcvt.s32.f32 %v968_v19  ;;  %4089 = vpow2.f32 %v443_v8  ;;  %v451_v30 = vmul.f32 1.442695, %v418_v63  ;;  %v7431_v19 = vld [vmem:[#allocation34_spill] sm:$0xff]  ;;  %v430_v63 = vsub.f32 %v7440_v6, %v7439_v47 }
 0x271   :  { %v5114_v14 = vpop.xlane.xlu0 %944  ;;  %v422_v22 = vsub.f32 %v7432_v2, %v7431_v19  ;;  %v7443_v19 = vld [vmem:[#allocation46_spill] sm:$0xff]  ;;  %v7444_v2 = vld [vmem:[#allocation24_spill] sm:$0xff]  ;;  %v699_v47 = vcvt.f32.s32 %v4951_v53  ;;  %v713_v53 = vcvt.f32.s32 %v4979_v26 }
 0x272   :  { %vm946_vm2 = vcmp.eq.f32.partialorder %v4778_v25, %v5114_v14  ;;  %v982_v25 = vand.u32 65535, %v4803_v33  ;;  %v416_v33 = vsub.f32 %v7424_v41, %v7423_v51  ;;  %v7448_v6 = vld [vmem:[#allocation2_spill] sm:$0xff] }
 0x273   :  { %v947_v7 = vsel %vm946_vm2, %v942_v38, inf  ;;  %v7429_v38 = vld [vmem:[#allocation32_spill] sm:$0xff] }
 0x274   :  { %948 = vmin.xlane.f32.xlu0 %v947_v7  ;;  %v447_v36 = vmul.f32 1.442695, %v416_v33  ;;  %v420_v12 = vsub.f32 %v7430_v57, %v7429_v38  ;;  %v7437_v33 = vld [vmem:[#allocation40_spill] sm:$0xff]  ;;  %v7442_v38 = vld [vmem:[#allocation22_spill] sm:$0xff] }
 0x275   :  { %v5121_v28 = vpop.xlane.xlu0 %958 }
 0x276   :  { %vm960_vm3 = vcmp.eq.f32.partialorder %v4789_v31, %v5121_v28  ;;  %v984_v31 = vcvt.s32.f32 %v982_v25  ;;  %4091 = vpow2.f32 %v447_v36  ;;  %v7433_v25 = vld [vmem:[#allocation36_spill] sm:$0xff] }
 0x277   :  { %v961_v43 = vsel %vm960_vm3, %v956_v0, inf  ;;  %4093 = vpow2.f32 %v451_v30  ;;  %v455_v0 = vmul.f32 1.442695, %v420_v12  ;;  %v424_v18 = vsub.f32 %v7434_v42, %v7433_v25  ;;  %v7441_v30 = vld [vmem:[#allocation44_spill] sm:$0xff] }
 0x278   :  { %962 = vmin.xlane.f32.xlu1 %v961_v43  ;;  %v432_v57 = vsub.f32 %v7442_v38, %v7441_v30  ;;  %v7452_v30 = vld [vmem:[#allocation51_spill] sm:$0xff] }
 0x279   :  { %v5128_v56 = vpop.xlane.xlu0 %972  ;;  %4095 = vpow2.f32 %v455_v0  ;;  %v1419_v38 = vand.u32 4294901760, %v7452_v30 }
 0x27a   :  { %vm974_vm4 = vcmp.eq.f32.partialorder %v4800_v37, %v5128_v56  ;;  %v998_v37 = vcvt.s32.f32 %v996_v5  ;;  %v7436_v5 = vld [vmem:[#allocation16_spill] sm:$0xff]  ;;  %v479_v0 = vmul.f32 1.442695, %v432_v57 }
 0x27b   :  { %v975_v35 = vsel %vm974_vm4, %v970_v15, inf  ;;  %v5150_v7 = vpop.eup %4085  ;;  %v459_v15 = vmul.f32 1.442695, %v422_v22  ;;  %v426_v8 = vsub.f32 %v7436_v5, %v7435_v24  ;;  %v434_v22 = vsub.f32 %v7444_v2, %v7443_v19 }
 0x27c   :  { %976 = vmin.xlane.f32.xlu0 %v975_v35  ;;  %v5155_v43 = vpop.eup %4087  ;;  %v1420_v2 = vsub.f32 %v7452_v30, %v1419_v38 }
 0x27d   :  { %v5135_v3 = vpop.xlane.xlu0 %986  ;;  %v5160_v35 = vpop.eup %4089  ;;  %4097 = vpow2.f32 %v459_v15  ;;  %v467_v41 = vmul.f32 1.442695, %v426_v8  ;;  %v483_v25 = vmul.f32 1.442695, %v434_v22  ;;  %v685_v8 = vcvt.f32.s32 %v4923_v48  ;;  %v7454_v22 = vld [vmem:[#allocation53_spill] sm:$0xff] }
 0x27e   :  { %vm988_vm5 = vcmp.eq.f32.partialorder %v7425_v20, %v5135_v3  ;;  %v7438_v20 = vld [vmem:[#allocation18_spill] sm:$0xff]  ;;  %v1421_v11 = vand.u32 4294901760, %v1420_v2 }
 0x27f   :  { %v989_v61 = vsel %vm988_vm5, %v984_v31, inf  ;;  %v463_v31 = vmul.f32 1.442695, %v424_v18  ;;  %v671_v18 = vcvt.f32.s32 %v4895_v29 }
 0x280   :  { %990 = vmin.xlane.f32.xlu1 %v989_v61  ;;  %v428_v61 = vsub.f32 %v7438_v20, %v7437_v33 }
 0x281   :  { %v5142_v13 = vpop.xlane.xlu0 %1000  ;;  %4099 = vpow2.f32 %v463_v31  ;;  %v672_v5 = vshll.u32 %v671_v18, 16  ;;  %v700_v18 = vshll.u32 %v699_v47, 16  ;;  %v727_v47 = vcvt.f32.s32 %v5007_v32 }
 0x282   :  { %vm1002_vm6 = vcmp.eq.f32.partialorder %v7428_v40, %v5142_v13  ;;  %4101 = vpow2.f32 %v467_v41  ;;  %v471_v36 = vmul.f32 1.442695, %v428_v61 }
 0x283   :  { %v1003_v59 = vsel %vm1002_vm6, %v998_v37, inf  ;;  %v5165_v51 = vpop.eup %4091 }
 0x284   :  { %1004 = vmin.xlane.f32.xlu0 %v1003_v59  ;;  %v5170_v37 = vpop.eup %4093  ;;  %4103 = vpow2.f32 %v471_v36  ;;  %v475_v59 = vmul.f32 1.442695, %v430_v63  ;;  %v686_v36 = vshll.u32 %v685_v8, 16 }
 0x286   :  { %v5175_v40 = vpop.eup %4095  ;;  %4105 = vpow2.f32 %v475_v59 }
 0x287   :  { %4107 = vpow2.f32 %v479_v0 }
 0x288   :  { %485 = vadd.xlane.f32.xlu0 %v5150_v7  ;;  %4109 = vpow2.f32 %v483_v25  ;;  %v1426_v25 = vand.u32 4294901760, %v7454_v22 }
 0x28a   :  { %v5180_v12 = vpop.eup %4097 }
 0x28c   :  { %489 = vadd.xlane.f32.xlu0 %v5155_v43 }
 0x28e   :  { %v5185_v15 = vpop.eup %4099 }
 0x28f   :  { %v5188_v42 = vpop.eup %4101 }
 0x290   :  { %493 = vadd.xlane.f32.xlu0 %v5160_v35  ;;  %7445 = vst [vmem:[#allocation48_spill] sm:$0xff] %v5188_v42 }
 0x291   :  { %v5192_v31 = vpop.eup %4103 }
 0x292   :  { %7446 = vst [vmem:[#allocation28_spill] sm:$0xff] %v5192_v31 }
 0x293   :  { %v5196_v33 = vpop.eup %4105 }
 0x294   :  { %497 = vadd.xlane.f32.xlu0 %v5165_v51  ;;  %7447 = vst [vmem:[#allocation6_spill] sm:$0xff] %v5196_v33  ;;  %v5205_v59 = vpop.eup %4107 }
 0x295   :  { %7451 = vst [vmem:[#allocation47_spill] sm:$0xff] %v5205_v59 }
 0x298   :  { %501 = vadd.xlane.f32.xlu0 %v5170_v37 }
 0x29c   :  { %505 = vadd.xlane.f32.xlu0 %v5175_v40 }
 0x2a0   :  { %509 = vadd.xlane.f32.xlu0 %v5180_v12 }
 0x2a4   :  { %513 = vadd.xlane.f32.xlu0 %v5185_v15 }
 0x2a8   :  { %517 = vadd.xlane.f32.xlu0 %v5188_v42 }
 0x2ac   :  { %521 = vadd.xlane.f32.xlu0 %v5192_v31 }
 0x2ad   :  { %v669_v24 = vpop.xlane.xlu1 %668 }
 0x2ae   :  { %v670_v41 = vcvt.f32.s32 %v669_v24 }
 0x2b0   :  { %v673_v20 = vadd.s32 %v672_v5, %v670_v41  ;;  %525 = vadd.xlane.f32.xlu0 %v5196_v33  ;;  %v5224_v41 = vpop.eup %4109 }
 0x2b1   :  { %v683_v61 = vpop.xlane.xlu1 %682  ;;  %7457 = vst [vmem:[#allocation8_spill] sm:$0xff] %v5224_v41 }
 0x2b2   :  { %vm5201_vm7 = vcmp.eq.s32.totalorder %v7448_v6, %v673_v20  ;;  %v684_v63 = vcvt.f32.s32 %v683_v61  ;;  %v1427_v20 = vsub.f32 %v7454_v22, %v1426_v25  ;;  %v7458_v61 = vld [vmem:[#allocation55_spill] sm:$0xff] }
 0x2b3   :  { %v2969_v48 = vsel %vm5201_vm7, 1.0, %v7397_v60 }
 0x2b4   :  { %v5211_v57 = vsub.f32 %v2969_v48, %v2969_v48  ;;  %v687_v0 = vadd.s32 %v686_v36, %v684_v63  ;;  %529 = vadd.xlane.f32.xlu0 %v5205_v59  ;;  %v1433_v36 = vand.u32 4294901760, %v7458_v61  ;;  %v1428_v2 = vand.u32 4294901760, %v1427_v20 }
 0x2b5   :  { %v697_v19 = vpop.xlane.xlu1 %696  ;;  %v741_v20 = vcvt.f32.s32 %v5030_v45 }
 0x2b6   :  { %7453 = vst [vmem:[#allocation30_spill] sm:$0xff] %v5211_v57  ;;  %vm5218_vm8 = vcmp.eq.s32.totalorder %v7448_v6, %v687_v0  ;;  %v698_v5 = vcvt.f32.s32 %v697_v19  ;;  %3677 = vmatmul.mubr.f32.vlgmr.msra.gmra.mxu0 %v5211_v57  ;;  %v7256_v8 = vand.u32 4294901760, %v5211_v57  ;;  %v714_v0 = vshll.u32 %v713_v53, 16 }
 0x2b7   :  { %3679 = vmatprep.mubr.msk.f32.mxu0 %vm4211_vm0, %v7397_v60  ;;  %v2970_v26 = vsel %vm5218_vm8, 1.0, %v7397_v60  ;;  %3859 = vmatpush3.msra.mxu0 %v1419_v38  ;;  %v1434_v22 = vsub.f32 %v7458_v61, %v1433_v36  ;;  %v7259_v38 = vand.u32 4294901760, %v7460_v52  ;;  %v7463_v61 = vld [vmem:[#allocation59_spill] sm:$0xff] }
 0x2b8   :  { %v701_v63 = vadd.s32 %v700_v18, %v698_v5  ;;  %533 = vadd.xlane.f32.xlu0 %v5224_v41  ;;  %v5235_v48 = vsub.f32 %v2970_v26, %v2970_v26  ;;  %v1169_v30 = vsub.f32 %v5211_v57, %v7256_v8  ;;  %3860 = vmatprep.subr.mxu0 %v7397_v60 }
 0x2b9   :  { %v711_v19 = vpop.xlane.xlu1 %710  ;;  %3861 = vmatpush3.msra.mxu0 %v1426_v25  ;;  %v1441_v25 = vsub.f32 %v7460_v52, %v7259_v38  ;;  %v1435_v38 = vand.u32 4294901760, %v1434_v22 }
 0x2ba   :  { %7459 = vst [vmem:[#allocation49_spill] sm:$0xff] %v5235_v48  ;;  %vm5244_vm9 = vcmp.eq.s32.totalorder %v7448_v6, %v701_v63  ;;  %v712_v18 = vcvt.f32.s32 %v711_v19  ;;  %3680 = vmatmul.mubr.f32.gmra.mxu0 %v5235_v48  ;;  %v1170_v5 = vand.u32 4294901760, %v1169_v30  ;;  %v7260_v26 = vand.u32 4294901760, %v5235_v48  ;;  %3862 = vmatprep.subr.mxu0 %v7397_v60 }
 0x2bb   :  { %3682 = vmatprep.mubr.msk.f32.mxu0 %vm4211_vm0, %v7397_v60  ;;  %v2971_v53 = vsel %vm5244_vm9, 1.0, %v7397_v60  ;;  %v7261_v63 = vand.u32 4294901760, %v7463_v61  ;;  %3863 = vmatpush3.msra.mxu0 %v1433_v36  ;;  %v728_v30 = vshll.u32 %v727_v47, 16  ;;  %v7465_v47 = vld [vmem:[#allocation61_spill] sm:$0xff] }
 0x2bc   :  { %v715_v19 = vadd.s32 %v714_v0, %v712_v18  ;;  %3463 = vmatmul.mubr.f32.vlgmr.msra.gmra.mxu1 %v1170_v5  ;;  %v5260_v8 = vsub.f32 %v2971_v53, %v2971_v53  ;;  %v1179_v57 = vsub.f32 %v5235_v48, %v7260_v26  ;;  %3864 = vmatprep.subr.mxu0 %v7397_v60  ;;  %v7263_v0 = vand.u32 4294901760, %v7465_v47 }
 0x2bd   :  { %3538 = vmatpush3.msra.mxu1 %v1421_v11  ;;  %v725_v41 = vpop.xlane.xlu1 %724  ;;  %3465 = vmatprep.mubr.msk.f32.mxu1 %vm4211_vm0, %v7397_v60  ;;  %v1448_v36 = vsub.f32 %v7463_v61, %v7261_v63  ;;  %v7466_v18 = vmov 0  ;;  %v1442_v53 = vand.u32 4294901760, %v1441_v25 }
 0x2be   :  { %7464 = vst [vmem:[#allocation32_spill] sm:$0xff] %v5260_v8  ;;  %vm5274_vm10 = vcmp.eq.s32.totalorder %v7448_v6, %v715_v19  ;;  %v726_v5 = vcvt.f32.s32 %v725_v41  ;;  %3683 = vmatmul.mubr.f32.gmra.mxu0 %v5260_v8  ;;  %v1180_v11 = vand.u32 4294901760, %v1179_v57  ;;  %3539 = vmatprep.subr.mxu1 %v7397_v60  ;;  %v7264_v45 = vand.u32 4294901760, %v5260_v8 }
 0x2bf   :  { %v7467_v18 = vsel %vm5274_vm10, 4294967295, %v7466_v18  ;;  %3685 = vmatprep.mubr.msk.f32.mxu0 %vm4211_vm0, %v7397_v60  ;;  %v2972_v22 = vsel %vm5274_vm10, 1.0, %v7397_v60  ;;  %3540 = vmatpush3.msra.mxu1 %v1428_v2  ;;  %v1455_v41 = vsub.f32 %v7465_v47, %v7263_v0  ;;  %v7265_v19 = vand.u32 4294901760, %v4907_v44 }
 0x2c0   :  { %v755_v57 = vcvt.f32.s32 %v5042_v55  ;;  %v729_v26 = vadd.s32 %v728_v30, %v726_v5  ;;  %3466 = vmatmul.mubr.f32.gmra.mxu1 %v1180_v11  ;;  %v5291_v63 = vsub.f32 %v2972_v22, %v2972_v22  ;;  %v1189_v48 = vsub.f32 %v5260_v8, %v7264_v45  ;;  %3541 = vmatprep.subr.mxu1 %v7397_v60  ;;  %v7469_v30 = vld [vmem:[#allocation64_spill] sm:$0xff] }
 0x2c1   :  { %v742_v2 = vshll.u32 %v741_v20, 16  ;;  %v739_v25 = vpop.xlane.xlu1 %738  ;;  %3468 = vmatprep.mubr.msk.f32.mxu1 %vm4211_vm0, %v7397_v60  ;;  %3542 = vmatpush3.msra.mxu1 %v1435_v38  ;;  %v1449_v0 = vand.u32 4294901760, %v1448_v36  ;;  %v1462_v55 = vsub.f32 %v4907_v44, %v7265_v19  ;;  %v7268_v5 = vand.u32 4294901760, %v7469_v30 }
 0x2c2   :  { %7468 = vst [vmem:[#allocation10_spill] sm:$0xff] %v5291_v63  ;;  %vm5304_vm11 = vcmp.eq.s32.totalorder %v7448_v6, %v729_v26  ;;  %v7470_v11 = vmov 0  ;;  %v740_v22 = vcvt.f32.s32 %v739_v25  ;;  %3686 = vmatmul.mubr.f32.gmra.mxu0 %v5291_v63  ;;  %v1190_v20 = vand.u32 4294901760, %v1189_v48  ;;  %3543 = vmatprep.subr.mxu1 %v7397_v60 }
 0x2c3   :  { %v7471_v11 = vsel %vm5304_vm11, 4294967295, %v7470_v11  ;;  %3688 = vmatprep.mubr.msk.f32.mxu0 %vm4211_vm0, %v7397_v60  ;;  %v2973_v38 = vsel %vm5304_vm11, 1.0, %v7397_v60  ;;  %3544 = vmatpush3.msra.mxu1 %v1442_v53  ;;  %v1456_v26 = vand.u32 4294901760, %v1455_v41  ;;  %v1469_v36 = vsub.f32 %v7469_v30, %v7268_v5 }
 0x2c4   :  { %v7269_v25 = vand.u32 4294901760, %v4935_v4  ;;  %v756_v48 = vshll.u32 %v755_v57, 16  ;;  %v743_v19 = vadd.s32 %v742_v2, %v740_v22  ;;  %3469 = vmatmul.mubr.f32.gmra.mxu1 %v1190_v20  ;;  %v5320_v45 = vsub.f32 %v2973_v38, %v2973_v38  ;;  %3545 = vmatprep.subr.mxu1 %v7397_v60  ;;  %v7474_v2 = vld [vmem:[#allocation67_spill] sm:$0xff] }
 0x2c5   :  { %v7473_v8 = vand.u32 4294901760, %v5291_v63  ;;  %v769_v53 = vcvt.f32.s32 %v5049_v39  ;;  %v753_v41 = vpop.xlane.xlu1 %752  ;;  %3471 = vmatprep.mubr.msk.f32.mxu1 %vm4211_vm0, %v7397_v60  ;;  %3546 = vmatpush3.msra.mxu1 %v1449_v0  ;;  %v1463_v5 = vand.u32 4294901760, %v1462_v55  ;;  %v7273_v22 = vand.u32 4294901760, %v7474_v2 }
 0x2c6   :  { %7472 = vst [vmem:[#allocation34_spill] sm:$0xff] %v5320_v45  ;;  %v1476_v57 = vsub.f32 %v4935_v4, %v7269_v25  ;;  %vm5334_vm12 = vcmp.eq.s32.totalorder %v7448_v6, %v743_v19  ;;  %v7475_v20 = vmov 0  ;;  %3689 = vmatmul.mubr.f32.gmra.mxu0 %v5320_v45  ;;  %3547 = vmatprep.subr.mxu1 %v7397_v60  ;;  %v1470_v19 = vand.u32 4294901760, %v1469_v36 }
 0x2c7   :  { %v1199_v59 = vsub.f32 %v5291_v63, %v7473_v8  ;;  %v7476_v20 = vsel %vm5334_vm12, 4294967295, %v7475_v20  ;;  %v754_v8 = vcvt.f32.s32 %v753_v41  ;;  %3691 = vmatprep.mubr.msk.f32.mxu0 %vm4211_vm0, %v7397_v60  ;;  %v2974_v0 = vsel %vm5334_vm12, 1.0, %v7397_v60  ;;  %3548 = vmatpush3.msra.mxu1 %v1456_v26  ;;  %v7477_v41 = vld [vmem:[#allocation69_spill] sm:$0xff] }
 0x2c8   :  { %v1483_v55 = vsub.f32 %v7474_v2, %v7273_v22  ;;  %v7274_v25 = vand.u32 4294901760, %v7477_v41  ;;  %v5350_v38 = vsub.f32 %v2974_v0, %v2974_v0  ;;  %v7478_v63 = vand.u32 4294901760, %v5320_v45  ;;  %3549 = vmatprep.subr.mxu1 %v7397_v60 }
 0x2c9   :  { %v1200_v39 = vand.u32 4294901760, %v1199_v59  ;;  %v757_v59 = vadd.s32 %v756_v48, %v754_v8  ;;  %v770_v31 = vshll.u32 %v769_v53, 16  ;;  %v783_v26 = vcvt.f32.s32 %v5054_v1  ;;  %v767_v36 = vpop.xlane.xlu1 %766  ;;  %3550 = vmatpush3.msra.mxu1 %v1463_v5 }
 0x2ca   :  { %v1209_v33 = vsub.f32 %v5320_v45, %v7478_v63  ;;  %v1477_v22 = vand.u32 4294901760, %v1476_v57  ;;  %v1490_v48 = vsub.f32 %v7477_v41, %v7274_v25  ;;  %v7479_v8 = vmov 0  ;;  %3692 = vmatmul.mubr.f32.gmra.mxu0 %v5350_v38  ;;  %3551 = vmatprep.subr.mxu1 %v7397_v60 }
 0x2cb   :  { %3472 = vmatmul.mubr.f32.gmra.mxu1 %v1200_v39  ;;  %vm5363_vm13 = vcmp.eq.s32.totalorder %v7448_v6, %v757_v59  ;;  %v768_v63 = vcvt.f32.s32 %v767_v36  ;;  %v7277_v1 = vand.u32 4294901760, %v5350_v38  ;;  %3694 = vmatprep.mubr.msk.f32.mxu0 %vm4211_vm0, %v7397_v60  ;;  %v1484_v57 = vand.u32 4294901760, %v1483_v55  ;;  %v7481_v39 = vld [vmem:[#allocation71_spill] sm:$0xff] }
 0x2cc   :  { %3474 = vmatprep.mubr.msk.f32.mxu1 %vm4211_vm0, %v7397_v60  ;;  %v7480_v8 = vsel %vm5363_vm13, 4294967295, %v7479_v8  ;;  %v1210_v53 = vand.u32 4294901760, %v1209_v33  ;;  %v2975_v5 = vsel %vm5363_vm13, 1.0, %v7397_v60  ;;  %3552 = vmatpush3.msra.mxu1 %v1470_v19  ;;  %v1496_v0 = vand.u32 4294901760, %v7481_v39 }
 0x2cd   :  { %v771_v59 = vadd.s32 %v770_v31, %v768_v63  ;;  %v5376_v36 = vsub.f32 %v2975_v5, %v2975_v5  ;;  %v1219_v33 = vsub.f32 %v5350_v38, %v7277_v1  ;;  %3553 = vmatprep.subr.mxu1 %v7397_v60  ;;  %v784_v25 = vshll.u32 %v783_v26, 16  ;;  %v781_v42 = vpop.xlane.xlu0 %780 }
 0x2ce   :  { %v797_v45 = vcvt.f32.s32 %v5059_v21  ;;  %3554 = vmatpush3.msra.mxu1 %v1477_v22  ;;  %v1491_v19 = vand.u32 4294901760, %v1490_v48  ;;  %v1497_v31 = vsub.f32 %v7481_v39, %v1496_v0  ;;  %v7482_v55 = vmov 0 }
 0x2cf   :  { %3475 = vmatmul.mubr.f32.gmra.mxu1 %v1210_v53  ;;  %vm5389_vm14 = vcmp.eq.s32.totalorder %v7448_v6, %v771_v59  ;;  %v782_v63 = vcvt.f32.s32 %v781_v42  ;;  %3695 = vmatmul.mubr.f32.gmra.mxu0 %v5376_v36  ;;  %v1220_v26 = vand.u32 4294901760, %v1219_v33  ;;  %v7278_v21 = vand.u32 4294901760, %v5376_v36 }
 0x2d0   :  { %3477 = vmatprep.mubr.msk.f32.mxu1 %vm4211_vm0, %v7397_v60  ;;  %v7483_v55 = vsel %vm5389_vm14, 4294967295, %v7482_v55  ;;  %3555 = vmatprep.subr.mxu1 %v7397_v60  ;;  %v2976_v22 = vsel %vm5389_vm14, 1.0, %v7397_v60  ;;  %v798_v5 = vshll.u32 %v797_v45, 16  ;;  %v811_v59 = vcvt.f32.s32 %v5064_v54 }
 0x2d1   :  { %3697 = vmatprep.mubr.msk.f32.mxu0 %vm4211_vm0, %v7397_v60  ;;  %3556 = vmatpush3.msra.mxu1 %v1484_v57  ;;  %v785_v48 = vadd.s32 %v784_v25, %v782_v63  ;;  %v5401_v53 = vsub.f32 %v2976_v22, %v2976_v22  ;;  %v1229_v42 = vsub.f32 %v5376_v36, %v7278_v21  ;;  %v795_v33 = vpop.xlane.xlu1 %794  ;;  %v1498_v1 = vand.u32 4294901760, %v1497_v31 }
 0x2d2   :  { %3557 = vmatprep.subr.mxu1 %v7397_v60  ;;  %v7484_v25 = vmov 0  ;;  %v796_v57 = vcvt.f32.s32 %v795_v33  ;;  %v7486_v45 = vand.u32 4294901760, %v7460_v52  ;;  %v825_v33 = vcvt.f32.s32 %v5069_v49 }
 0x2d3   :  { %3478 = vmatmul.mubr.f32.gmra.mxu1 %v1220_v26  ;;  %vm5411_vm15 = vcmp.eq.s32.totalorder %v7448_v6, %v785_v48  ;;  %3698 = vmatmul.mubr.f32.gmra.mxu0 %v5401_v53  ;;  %v1230_v63 = vand.u32 4294901760, %v1229_v42  ;;  %v7279_v26 = vand.u32 4294901760, %v5401_v53  ;;  %v812_v42 = vshll.u32 %v811_v59, 16 }
 0x2d4   :  { %3480 = vmatprep.mubr.msk.f32.mxu1 %vm4211_vm0, %v7397_v60  ;;  %3558 = vmatpush3.msra.mxu1 %v1491_v19  ;;  %v7485_v25 = vsel %vm5411_vm15, 4294967295, %v7484_v25  ;;  %v2977_v54 = vsel %vm5411_vm15, 1.0, %v7397_v60  ;;  %v7281_v19 = vand.u32 4294901760, %v4991_v27  ;;  %v799_v31 = vadd.s32 %v798_v5, %v796_v57 }
 0x2d5   :  { %3559 = vmatprep.subr.mxu1 %v7397_v60  ;;  %3700 = vmatprep.mubr.msk.f32.mxu0 %vm4211_vm0, %v7397_v60  ;;  %v5426_v22 = vsub.f32 %v2977_v54, %v2977_v54  ;;  %v1239_v48 = vsub.f32 %v5401_v53, %v7279_v26  ;;  %v809_v21 = vpop.xlane.xlu0 %808  ;;  %v7487_v5 = vmov 0  ;;  %v7507_v39 = vand.u32 4294901760, %v4991_v27 }
 0x2d6   :  { %3865 = vmatpush3.msra.mxu0 %v7486_v45  ;;  %3560 = vmatpush3.msra.mxu1 %v1498_v1  ;;  %v1504_v52 = vsub.f32 %v4991_v27, %v7281_v19  ;;  %vm5439_vm1 = vcmp.eq.s32.totalorder %v7448_v6, %v799_v31  ;;  %v810_v57 = vcvt.f32.s32 %v809_v21  ;;  %v826_v31 = vshll.u32 %v825_v33, 16 }
 0x2d7   :  { %3481 = vmatmul.mubr.f32.gmra.mxu1 %v1230_v63  ;;  %3866 = vmatprep.subr.mxu0 %v7397_v60  ;;  %v7488_v5 = vsel %vm5439_vm1, 4294967295, %v7487_v5  ;;  %v1240_v59 = vand.u32 4294901760, %v1239_v48  ;;  %v7280_v49 = vand.u32 4294901760, %v5426_v22  ;;  %v2978_v1 = vsel %vm5439_vm1, 1.0, %v7397_v60 }
 0x2d8   :  { %3483 = vmatprep.mubr.msk.f32.mxu1 %vm4211_vm0, %v7397_v60  ;;  %3701 = vmatmul.mubr.f32.gmra.mxu0 %v5426_v22  ;;  %v7489_v63 = vand.u32 4294901760, %v7463_v61  ;;  %v813_v54 = vadd.s32 %v812_v42, %v810_v57  ;;  %v5453_v21 = vsub.f32 %v2978_v1, %v2978_v1  ;;  %v839_v48 = vcvt.f32.s32 %v5074_v23 }
 0x2d9   :  { %3561 = vmatprep.subr.mxu1 %v7397_v60  ;;  %3703 = vmatprep.mubr.msk.f32.mxu0 %vm4211_vm0, %v7397_v60  ;;  %v1249_v45 = vsub.f32 %v5426_v22, %v7280_v49  ;;  %v823_v26 = vpop.xlane.xlu1 %822  ;;  %v7490_v61 = vand.u32 4294901760, %v7465_v47  ;;  %v1505_v42 = vand.u32 4294901760, %v1504_v52  ;;  %v7491_v57 = vmov 0  ;;  %v7494_v52 = vld [vmem:[#allocation74_spill] sm:$0xff] }
 0x2da   :  { %3867 = vmatpush3.msra.mxu0 %v7489_v63  ;;  %vm5465_vm2 = vcmp.eq.s32.totalorder %v7448_v6, %v813_v54  ;;  %v7282_v33 = vand.u32 4294901760, %v5453_v21  ;;  %v7493_v47 = vand.u32 4294901760, %v4907_v44  ;;  %v1510_v63 = vand.u32 4294901760, %v7494_v52 }
 0x2db   :  { %3484 = vmatmul.mubr.f32.gmra.mxu1 %v1240_v59  ;;  %3868 = vmatprep.subr.mxu0 %v7397_v60  ;;  %v7492_v57 = vsel %vm5465_vm2, 4294967295, %v7491_v57  ;;  %v824_v59 = vcvt.f32.s32 %v823_v26  ;;  %v1250_v1 = vand.u32 4294901760, %v1249_v45  ;;  %v2979_v23 = vsel %vm5465_vm2, 1.0, %v7397_v60 }
 0x2dc   :  { %3486 = vmatprep.mubr.msk.f32.mxu1 %vm4211_vm0, %v7397_v60  ;;  %3869 = vmatpush3.msra.mxu0 %v7490_v61  ;;  %v5480_v54 = vsub.f32 %v2979_v23, %v2979_v23  ;;  %v1259_v45 = vsub.f32 %v5453_v21, %v7282_v33  ;;  %v840_v61 = vshll.u32 %v839_v48, 16  ;;  %v853_v49 = vcvt.f32.s32 %v5079_v62 }
 0x2dd   :  { %3704 = vmatmul.mubr.f32.gmra.mxu0 %v5453_v21  ;;  %3870 = vmatprep.subr.mxu0 %v7397_v60  ;;  %v827_v26 = vadd.s32 %v826_v31, %v824_v59  ;;  %v837_v19 = vpop.xlane.xlu0 %836  ;;  %v1511_v44 = vsub.f32 %v7494_v52, %v1510_v63  ;;  %v7495_v31 = vmov 0 }
 0x2de   :  { %3706 = vmatprep.mubr.msk.f32.mxu0 %vm4211_vm0, %v7397_v60  ;;  %3871 = vmatpush3.msra.mxu0 %v7493_v47  ;;  %v838_v59 = vcvt.f32.s32 %v837_v19  ;;  %v1260_v48 = vand.u32 4294901760, %v1259_v45  ;;  %v7283_v62 = vand.u32 4294901760, %v5480_v54  ;;  %v867_v45 = vcvt.f32.s32 %v5084_v9 }
 0x2df   :  { %3487 = vmatmul.mubr.f32.gmra.mxu1 %v1250_v1  ;;  %3872 = vmatprep.subr.mxu0 %v7397_v60  ;;  %vm5493_vm3 = vcmp.eq.s32.totalorder %v7448_v6, %v827_v26  ;;  %v7497_v1 = vand.u32 4294901760, %v7469_v30  ;;  %v854_v26 = vshll.u32 %v853_v49, 16  ;;  %v7498_v30 = vand.u32 4294901760, %v4935_v4 }
 0x2e0   :  { %3489 = vmatprep.mubr.msk.f32.mxu1 %vm4211_vm0, %v7397_v60  ;;  %3562 = vmatpush3.msra.mxu1 %v1505_v42  ;;  %v7496_v31 = vsel %vm5493_vm3, 4294967295, %v7495_v31  ;;  %v2980_v42 = vsel %vm5493_vm3, 1.0, %v7397_v60  ;;  %v841_v23 = vadd.s32 %v840_v61, %v838_v59  ;;  %v1269_v47 = vsub.f32 %v5480_v54, %v7283_v62 }
 0x2e1   :  { %3707 = vmatmul.mubr.f32.gmra.mxu0 %v5480_v54  ;;  %3563 = vmatprep.subr.mxu1 %v7397_v60  ;;  %v5507_v19 = vsub.f32 %v2980_v42, %v2980_v42  ;;  %v851_v33 = vpop.xlane.xlu1 %850  ;;  %v1512_v61 = vand.u32 4294901760, %v1511_v44  ;;  %v7499_v59 = vmov 0  ;;  %v7501_v9 = vand.u32 4294901760, %v7474_v2 }
 0x2e2   :  { %3709 = vmatprep.mubr.msk.f32.mxu0 %vm4211_vm0, %v7397_v60  ;;  %3873 = vmatpush3.msra.mxu0 %v7497_v1  ;;  %vm5519_vm4 = vcmp.eq.s32.totalorder %v7448_v6, %v841_v23  ;;  %v1270_v42 = vand.u32 4294901760, %v1269_v47  ;;  %v1517_v44 = vand.u32 4294901760, %v5019_v34  ;;  %v868_v47 = vshll.u32 %v867_v45, 16 }
 0x2e3   :  { %3490 = vmatmul.mubr.f32.gmra.mxu1 %v1260_v48  ;;  %3874 = vmatprep.subr.mxu0 %v7397_v60  ;;  %v7500_v59 = vsel %vm5519_vm4, 4294967295, %v7499_v59  ;;  %v852_v48 = vcvt.f32.s32 %v851_v33  ;;  %v7284_v49 = vand.u32 4294901760, %v5507_v19  ;;  %v2981_v4 = vsel %vm5519_vm4, 1.0, %v7397_v60 }
 0x2e4   :  { %3492 = vmatprep.mubr.msk.f32.mxu1 %vm4211_vm0, %v7397_v60  ;;  %3875 = vmatpush3.msra.mxu0 %v7498_v30  ;;  %v5534_v1 = vsub.f32 %v2981_v4, %v2981_v4  ;;  %v881_v30 = vcvt.f32.s32 %v5089_v46  ;;  %v1518_v2 = vsub.f32 %v5019_v34, %v1517_v44 }
 0x2e5   :  { %3710 = vmatmul.mubr.f32.gmra.mxu0 %v5507_v19  ;;  %3876 = vmatprep.subr.mxu0 %v7397_v60  ;;  %v855_v33 = vadd.s32 %v854_v26, %v852_v48  ;;  %v1279_v23 = vsub.f32 %v5507_v19, %v7284_v49  ;;  %v865_v62 = vpop.xlane.xlu0 %864  ;;  %v7502_v26 = vmov 0 }
 0x2e6   :  { %3712 = vmatprep.mubr.msk.f32.mxu0 %vm4211_vm0, %v7397_v60  ;;  %3877 = vmatpush3.msra.mxu0 %v7501_v9  ;;  %v866_v48 = vcvt.f32.s32 %v865_v62  ;;  %v7333_v46 = vand.u32 4294901760, %v5534_v1 }
 0x2e7   :  { %3493 = vmatmul.mubr.f32.gmra.mxu1 %v1270_v42  ;;  %3878 = vmatprep.subr.mxu0 %v7397_v60  ;;  %vm5547_vm5 = vcmp.eq.s32.totalorder %v7448_v6, %v855_v33  ;;  %v1280_v45 = vand.u32 4294901760, %v1279_v23  ;;  %v7504_v42 = vand.u32 4294901760, %v7477_v41  ;;  %v882_v33 = vshll.u32 %v881_v30, 16 }
 0x2e8   :  { %3495 = vmatprep.mubr.msk.f32.mxu1 %vm4211_vm0, %v7397_v60  ;;  %3564 = vmatpush3.msra.mxu1 %v1512_v61  ;;  %v7503_v26 = vsel %vm5547_vm5, 4294967295, %v7502_v26  ;;  %v2982_v61 = vsel %vm5547_vm5, 1.0, %v7397_v60  ;;  %v869_v4 = vadd.s32 %v868_v47, %v866_v48  ;;  %v1289_v9 = vsub.f32 %v5534_v1, %v7333_v46  ;;  %v7570_v46 = vld [vmem:[#allocation76_spill] sm:$0xff] }
 0x2e9   :  { %3713 = vmatmul.mubr.f32.gmra.mxu0 %v5534_v1  ;;  %3565 = vmatprep.subr.mxu1 %v7397_v60  ;;  %v5561_v62 = vsub.f32 %v2982_v61, %v2982_v61  ;;  %v895_v23 = vcvt.f32.s32 %v5094_v17  ;;  %v879_v49 = vpop.xlane.xlu1 %878  ;;  %v1519_v41 = vand.u32 4294901760, %v1518_v2  ;;  %v7505_v47 = vmov 0 }
 0x2ea   :  { %3715 = vmatprep.mubr.msk.f32.mxu0 %vm4211_vm0, %v7397_v60  ;;  %3879 = vmatpush3.msra.mxu0 %v7504_v42  ;;  %vm5573_vm6 = vcmp.eq.s32.totalorder %v7448_v6, %v869_v4  ;;  %v880_v48 = vcvt.f32.s32 %v879_v49  ;;  %v909_v4 = vcvt.f32.s32 %v5099_v50 }
 0x2eb   :  { %3496 = vmatmul.mubr.f32.gmra.mxu1 %v1280_v45  ;;  %3880 = vmatprep.subr.mxu0 %v7397_v60  ;;  %v7506_v47 = vsel %vm5573_vm6, 4294967295, %v7505_v47  ;;  %v1290_v45 = vand.u32 4294901760, %v1289_v9  ;;  %v7310_v30 = vand.u32 4294901760, %v5561_v62  ;;  %v2983_v17 = vsel %vm5573_vm6, 1.0, %v7397_v60 }
 0x2ec   :  { %3498 = vmatprep.mubr.msk.f32.mxu1 %vm4211_vm0, %v7397_v60  ;;  %3881 = vmatpush3.msra.mxu0 %v1496_v0  ;;  %v1524_v0 = vand.u32 4294901760, %v5028_v16  ;;  %v883_v49 = vadd.s32 %v882_v33, %v880_v48  ;;  %v5588_v2 = vsub.f32 %v2983_v17, %v2983_v17  ;;  %v896_v42 = vshll.u32 %v895_v23, 16 }
 0x2ed   :  { %3716 = vmatmul.mubr.f32.gmra.mxu0 %v5561_v62  ;;  %3882 = vmatprep.subr.mxu0 %v7397_v60  ;;  %v1299_v61 = vsub.f32 %v5561_v62, %v7310_v30  ;;  %v893_v9 = vpop.xlane.xlu0 %892  ;;  %v7508_v33 = vmov 0 }
 0x2ee   :  { %3718 = vmatprep.mubr.msk.f32.mxu0 %vm4211_vm0, %v7397_v60  ;;  %3883 = vmatpush3.msra.mxu0 %v7507_v39  ;;  %v1525_v27 = vsub.f32 %v5028_v16, %v1524_v0  ;;  %vm5599_vm12 = vcmp.eq.s32.totalorder %v7448_v6, %v883_v49  ;;  %v894_v48 = vcvt.f32.s32 %v893_v9  ;;  %v7306_v23 = vand.u32 4294901760, %v5588_v2 }
 0x2ef   :  { %3499 = vmatmul.mubr.f32.gmra.mxu1 %v1290_v45  ;;  %3884 = vmatprep.subr.mxu0 %v7397_v60  ;;  %v7509_v33 = vsel %vm5599_vm12, 4294967295, %v7508_v33  ;;  %v1300_v45 = vand.u32 4294901760, %v1299_v61  ;;  %v2984_v16 = vsel %vm5599_vm12, 1.0, %v7397_v60  ;;  %v910_v39 = vshll.u32 %v909_v4, 16 }
 0x2f0   :  { %3501 = vmatprep.mubr.msk.f32.mxu1 %vm4211_vm0, %v7397_v60  ;;  %3566 = vmatpush3.msra.mxu1 %v1519_v41  ;;  %7510 = vst [vmem:[#allocation12_spill] sm:$0xff] %v7509_v33  ;;  %v897_v50 = vadd.s32 %v896_v42, %v894_v48  ;;  %v5613_v41 = vsub.f32 %v2984_v16, %v2984_v16  ;;  %v923_v49 = vcvt.f32.s32 %v5104_v58  ;;  %v1526_v52 = vand.u32 4294901760, %v1525_v27 }
 0x2f1   :  { %3719 = vmatmul.mubr.f32.gmra.mxu0 %v5588_v2  ;;  %3567 = vmatprep.subr.mxu1 %v7397_v60  ;;  %v1309_v17 = vsub.f32 %v5588_v2, %v7306_v23  ;;  %v907_v61 = vpop.xlane.xlu1 %906  ;;  %v7529_v23 = vmov 0 }
 0x2f2   :  { %3721 = vmatprep.mubr.msk.f32.mxu0 %vm4211_vm0, %v7397_v60  ;;  %3885 = vmatpush3.msra.mxu0 %v1510_v63  ;;  %vm5625_vm13 = vcmp.eq.s32.totalorder %v7448_v6, %v897_v50  ;;  %v7511_v63 = vmov 0  ;;  %v908_v42 = vcvt.f32.s32 %v907_v61  ;;  %v7302_v4 = vand.u32 4294901760, %v5613_v41 }
 0x2f3   :  { %3502 = vmatmul.mubr.f32.gmra.mxu1 %v1300_v45  ;;  %3886 = vmatprep.subr.mxu0 %v7397_v60  ;;  %v7512_v63 = vsel %vm5625_vm13, 4294967295, %v7511_v63  ;;  %v1310_v9 = vand.u32 4294901760, %v1309_v17  ;;  %v2985_v34 = vsel %vm5625_vm13, 1.0, %v7397_v60  ;;  %v924_v48 = vshll.u32 %v923_v49, 16 }
 0x2f4   :  { %3504 = vmatprep.mubr.msk.f32.mxu1 %vm4211_vm0, %v7397_v60  ;;  %3887 = vmatpush3.msra.mxu0 %v1517_v44  ;;  %7513 = vst [vmem:[#allocation36_spill] sm:$0xff] %v7512_v63  ;;  %v911_v58 = vadd.s32 %v910_v39, %v908_v42  ;;  %v5637_v44 = vsub.f32 %v2985_v34, %v2985_v34  ;;  %v937_v45 = vcvt.f32.s32 %v5109_v10 }
 0x2f5   :  { %3722 = vmatmul.mubr.f32.gmra.mxu0 %v5613_v41  ;;  %3888 = vmatprep.subr.mxu0 %v7397_v60  ;;  %v1319_v27 = vsub.f32 %v5613_v41, %v7302_v4  ;;  %v921_v16 = vpop.xlane.xlu0 %920  ;;  %v7526_v4 = vmov 0 }
 0x2f6   :  { %3724 = vmatprep.mubr.msk.f32.mxu0 %vm4211_vm0, %v7397_v60  ;;  %3889 = vmatpush3.msra.mxu0 %v1524_v0  ;;  %vm5647_vm13 = vcmp.eq.s32.totalorder %v7448_v6, %v911_v58  ;;  %v7514_v0 = vmov 0  ;;  %v922_v50 = vcvt.f32.s32 %v921_v16  ;;  %v7298_v39 = vand.u32 4294901760, %v5637_v44 }
 0x2f7   :  { %3505 = vmatmul.mubr.f32.gmra.mxu1 %v1310_v9  ;;  %2872 = vmatprep.subr.mxu0 %v7397_v60  ;;  %v7515_v0 = vsel %vm5647_vm13, 4294967295, %v7514_v0  ;;  %v1320_v17 = vand.u32 4294901760, %v1319_v27  ;;  %v2986_v10 = vsel %vm5647_vm13, 1.0, %v7397_v60  ;;  %v938_v42 = vshll.u32 %v937_v45, 16 }
 0x2f8   :  { %3507 = vmatprep.mubr.msk.f32.mxu1 %vm4211_vm0, %v7397_v60  ;;  %3568 = vmatpush3.msra.mxu1 %v1526_v52  ;;  %7516 = vst [vmem:[#allocation14_spill] sm:$0xff] %v7515_v0  ;;  %v925_v49 = vadd.s32 %v924_v48, %v922_v50  ;;  %v5659_v61 = vsub.f32 %v2986_v10, %v2986_v10  ;;  %v951_v9 = vcvt.f32.s32 %v5114_v14  ;;  %v7517_v58 = vmov 0 }
 0x2f9   :  { %3725 = vmatmul.mubr.f32.gmra.mxu0 %v5637_v44  ;;  %3751 = vmatprep.subr.mxu1 %v7397_v60  ;;  %v1329_v52 = vsub.f32 %v5637_v44, %v7298_v39  ;;  %v935_v34 = vpop.xlane.xlu1 %934  ;;  %v7523_v39 = vmov 0 }
 0x2fa   :  { %3727 = vmatprep.mubr.msk.f32.mxu0 %vm4211_vm0, %v7397_v60  ;;  %vm5668_vm14 = vcmp.eq.s32.totalorder %v7448_v6, %v925_v49  ;;  %v936_v27 = vcvt.f32.s32 %v935_v34  ;;  %v7295_v16 = vand.u32 4294901760, %v5659_v61  ;;  %v952_v10 = vshll.u32 %v951_v9, 16 }
 0x2fb   :  { %3508 = vmatmul.mubr.f32.gmra.mxu1 %v1320_v17  ;;  %v7518_v58 = vsel %vm5668_vm14, 4294967295, %v7517_v58  ;;  %v1330_v48 = vand.u32 4294901760, %v1329_v52  ;;  %v2987_v14 = vsel %vm5668_vm14, 1.0, %v7397_v60  ;;  %v965_v49 = vcvt.f32.s32 %v5121_v28 }
 0x2fc   :  { %3510 = vmatprep.mubr.msk.f32.mxu1 %vm4211_vm0, %v7397_v60  ;;  %7519 = vst [vmem:[#allocation38_spill] sm:$0xff] %v7518_v58  ;;  %v939_v45 = vadd.s32 %v938_v42, %v936_v27  ;;  %v5679_v50 = vsub.f32 %v2987_v14, %v2987_v14  ;;  %v1339_v17 = vsub.f32 %v5659_v61, %v7295_v16  ;;  %v7520_v34 = vmov 0 }
 0x2fd   :  { %3728 = vmatmul.mubr.f32.gmra.mxu0 %v5659_v61  ;;  %v949_v52 = vpop.xlane.xlu0 %948 }
 0x2fe   :  { %3730 = vmatprep.mubr.msk.f32.mxu0 %vm4211_vm0, %v7397_v60  ;;  %vm5688_vm13 = vcmp.eq.s32.totalorder %v7448_v6, %v939_v45  ;;  %v950_v42 = vcvt.f32.s32 %v949_v52  ;;  %v1340_v27 = vand.u32 4294901760, %v1339_v17  ;;  %v966_v52 = vshll.u32 %v965_v49, 16 }
 0x2ff   :  { %3511 = vmatmul.mubr.f32.gmra.mxu1 %v1330_v48  ;;  %v7521_v34 = vsel %vm5688_vm13, 4294967295, %v7520_v34  ;;  %v7299_v48 = vand.u32 4294901760, %v5679_v50  ;;  %v2988_v28 = vsel %vm5688_vm13, 1.0, %v7397_v60  ;;  %v979_v17 = vcvt.f32.s32 %v5128_v56 }
 0x300   :  { %3513 = vmatprep.mubr.msk.f32.mxu1 %vm4211_vm0, %v7397_v60  ;;  %7522 = vst [vmem:[#allocation16_spill] sm:$0xff] %v7521_v34  ;;  %v953_v9 = vadd.s32 %v952_v10, %v950_v42  ;;  %v5699_v14 = vsub.f32 %v2988_v28, %v2988_v28 }
 0x301   :  { %3731 = vmatmul.mubr.f32.gmra.mxu0 %v5679_v50  ;;  %v1349_v45 = vsub.f32 %v5679_v50, %v7299_v48  ;;  %v963_v16 = vpop.xlane.xlu1 %962 }
 0x302   :  { %3733 = vmatprep.mubr.msk.f32.mxu0 %vm4211_vm0, %v7397_v60  ;;  %vm5708_vm14 = vcmp.eq.s32.totalorder %v7448_v6, %v953_v9  ;;  %v964_v10 = vcvt.f32.s32 %v963_v16  ;;  %v980_v9 = vshll.u32 %v979_v17, 16 }
 0x303   :  { %3514 = vmatmul.mubr.f32.gmra.mxu1 %v1340_v27  ;;  %v7524_v39 = vsel %vm5708_vm14, 4294967295, %v7523_v39  ;;  %v1350_v42 = vand.u32 4294901760, %v1349_v45  ;;  %v7303_v27 = vand.u32 4294901760, %v5699_v14  ;;  %v2989_v56 = vsel %vm5708_vm14, 1.0, %v7397_v60 }
 0x304   :  { %3516 = vmatprep.mubr.msk.f32.mxu1 %vm4211_vm0, %v7397_v60  ;;  %7525 = vst [vmem:[#allocation40_spill] sm:$0xff] %v7524_v39  ;;  %v967_v49 = vadd.s32 %v966_v52, %v964_v10  ;;  %v5719_v28 = vsub.f32 %v2989_v56, %v2989_v56  ;;  %v993_v45 = vcvt.f32.s32 %v5135_v3 }
 0x305   :  { %3734 = vmatmul.mubr.f32.gmra.mxu0 %v5699_v14  ;;  %v1359_v16 = vsub.f32 %v5699_v14, %v7303_v27  ;;  %v977_v48 = vpop.xlane.xlu0 %976 }
 0x306   :  { %3736 = vmatprep.mubr.msk.f32.mxu0 %vm4211_vm0, %v7397_v60  ;;  %vm5728_vm13 = vcmp.eq.s32.totalorder %v7448_v6, %v967_v49  ;;  %v978_v52 = vcvt.f32.s32 %v977_v48  ;;  %v994_v49 = vshll.u32 %v993_v45, 16 }
 0x307   :  { %3517 = vmatmul.mubr.f32.gmra.mxu1 %v1350_v42  ;;  %v7527_v4 = vsel %vm5728_vm13, 4294967295, %v7526_v4  ;;  %v1360_v10 = vand.u32 4294901760, %v1359_v16  ;;  %v7307_v42 = vand.u32 4294901760, %v5719_v28  ;;  %v2990_v3 = vsel %vm5728_vm13, 1.0, %v7397_v60 }
 0x308   :  { %3519 = vmatprep.mubr.msk.f32.mxu1 %vm4211_vm0, %v7397_v60  ;;  %7528 = vst [vmem:[#allocation18_spill] sm:$0xff] %v7527_v4  ;;  %v981_v17 = vadd.s32 %v980_v9, %v978_v52  ;;  %v5739_v56 = vsub.f32 %v2990_v3, %v2990_v3  ;;  %v1007_v16 = vcvt.f32.s32 %v5142_v13 }
 0x309   :  { %3737 = vmatmul.mubr.f32.gmra.mxu0 %v5719_v28  ;;  %v1369_v48 = vsub.f32 %v5719_v28, %v7307_v42  ;;  %v991_v27 = vpop.xlane.xlu1 %990 }
 0x30a   :  { %3739 = vmatprep.mubr.msk.f32.mxu0 %vm4211_vm0, %v7397_v60  ;;  %vm5748_vm14 = vcmp.eq.s32.totalorder %v7448_v6, %v981_v17  ;;  %v992_v9 = vcvt.f32.s32 %v991_v27  ;;  %v1008_v17 = vshll.u32 %v1007_v16, 16 }
 0x30b   :  { %3520 = vmatmul.mubr.f32.gmra.mxu1 %v1360_v10  ;;  %v7530_v23 = vsel %vm5748_vm14, 4294967295, %v7529_v23  ;;  %v1370_v52 = vand.u32 4294901760, %v1369_v48  ;;  %v7332_v10 = vand.u32 4294901760, %v5739_v56  ;;  %v2991_v13 = vsel %vm5748_vm14, 1.0, %v7397_v60 }
 0x30c   :  { %3522 = vmatprep.mubr.msk.f32.mxu1 %vm4211_vm0, %v7397_v60  ;;  %7531 = vst [vmem:[#allocation42_spill] sm:$0xff] %v7530_v23  ;;  %v995_v45 = vadd.s32 %v994_v49, %v992_v9  ;;  %v5759_v3 = vsub.f32 %v2991_v13, %v2991_v13  ;;  %v7532_v48 = vmov 0 }
 0x30d   :  { %3740 = vmatmul.mubr.f32.gmra.mxu0 %v5739_v56  ;;  %v1379_v27 = vsub.f32 %v5739_v56, %v7332_v10  ;;  %v1005_v42 = vpop.xlane.xlu0 %1004  ;;  %v7569_v10 = vld [vmem:[#allocation75_spill] sm:$0xff] }
 0x30e   :  { %3742 = vmatprep.mubr.msk.f32.mxu0 %vm4211_vm0, %v7397_v60  ;;  %vm5767_vm13 = vcmp.eq.s32.totalorder %v7448_v6, %v995_v45  ;;  %v1006_v30 = vcvt.f32.s32 %v1005_v42  ;;  %v7313_v9 = vand.u32 4294901760, %v5759_v3 }
 0x30f   :  { %3523 = vmatmul.mubr.f32.gmra.mxu1 %v1370_v52  ;;  %v7533_v48 = vsel %vm5767_vm13, 4294967295, %v7532_v48  ;;  %v1380_v49 = vand.u32 4294901760, %v1379_v27  ;;  %v2992_v16 = vsel %vm5767_vm13, 1.0, %v7397_v60 }
 0x310   :  { %3525 = vmatprep.mubr.msk.f32.mxu1 %vm4211_vm0, %v7397_v60  ;;  %7534 = vst [vmem:[#allocation20_spill] sm:$0xff] %v7533_v48  ;;  %v1009_v52 = vadd.s32 %v1008_v17, %v1006_v30  ;;  %v5778_v13 = vsub.f32 %v2992_v16, %v2992_v16  ;;  %v1389_v42 = vsub.f32 %v5759_v3, %v7313_v9 }
 0x311   :  { %3743 = vmatmul.mubr.f32.gmra.mxu0 %v5759_v3  ;;  %v486_v45 = vpop.xlane.xlu0 %485 }
 0x312   :  { %3745 = vmatprep.mubr.msk.f32.mxu0 %vm4211_vm0, %v7397_v60  ;;  %vm5786_vm14 = vcmp.eq.s32.totalorder %v7448_v6, %v1009_v52  ;;  %4111 = vrcp.f32 %v486_v45  ;;  %v1390_v30 = vand.u32 4294901760, %v1389_v42  ;;  %v7314_v17 = vand.u32 4294901760, %v5778_v13 }
 0x313   :  { %3526 = vmatmul.mubr.f32.gmra.mxu1 %v1380_v49  ;;  %v2993_v49 = vsel %vm5786_vm14, 1.0, %v7397_v60 }
 0x314   :  { %3528 = vmatprep.mubr.msk.f32.mxu1 %vm4211_vm0, %v7397_v60  ;;  %v5797_v16 = vsub.f32 %v2993_v49, %v2993_v49  ;;  %v1399_v52 = vsub.f32 %v5778_v13, %v7314_v17  ;;  %v7344_v17 = vmov 1.0  }
 0x315   :  { %3746 = vmatmul.mubr.f32.gmra.mxu0 %v5778_v13  ;;  %v490_v45 = vpop.xlane.xlu0 %489 }
 0x316   :  { %3748 = vmatprep.mubr.msk.f32.mxu0 %vm4211_vm0, %v7397_v60  ;;  %4113 = vrcp.f32 %v490_v45  ;;  %v1400_v42 = vand.u32 4294901760, %v1399_v52  ;;  %v7331_v9 = vand.u32 4294901760, %v5797_v16 }
 0x317   :  { %3529 = vmatmul.mubr.f32.gmra.mxu1 %v1390_v30 }
 0x318   :  { %3531 = vmatprep.mubr.msk.f32.mxu1 %vm4211_vm0, %v7397_v60  ;;  %v1409_v30 = vsub.f32 %v5797_v16, %v7331_v9  ;;  %v7568_v9 = vld [vmem:[#allocation73_spill] sm:$0xff] }
 0x319   :  { %3749 = vmatmul.mubr.f32.gmra.mxu0 %v5797_v16  ;;  %v494_v49 = vpop.xlane.xlu0 %493 }
 0x31a   :  { %3890 = vmatprep.mubr.msk.f32.mxu0 %vm4211_vm0, %v7397_v60  ;;  %4115 = vrcp.f32 %v494_v49  ;;  %v1410_v52 = vand.u32 4294901760, %v1409_v30  ;;  %v7537_v49 = vld [vmem:[#allocation50_spill] sm:$0xff] }
 0x31b   :  { %3532 = vmatmul.mubr.f32.gmra.mxu1 %v1400_v42 }
 0x31c   :  { %3534 = vmatprep.mubr.msk.f32.mxu1 %vm4211_vm0, %v7397_v60 }
 0x31d   :  { %3891 = vmatmul.mubr.msk.f32.vlgmr.msra.gmra.mxu0 %vm5201_vm7, %v7344_v17  ;;  %v498_v45 = vpop.xlane.xlu0 %497 }
 0x31e   :  { %3069 = vmatpush1.msk.msra.mxu0 %vm5599_vm12, %v7344_v17  ;;  %3893 = vmatprep.mubr.msk.f32.mxu0 %vm4211_vm0, %v7397_v60  ;;  %4117 = vrcp.f32 %v498_v45  ;;  %vm7539_vm12 = vnez %v7483_v55 }
 0x31f   :  { %2874 = vmatprep.subr.mxu0 %v7397_v60  ;;  %3535 = vmatmul.mubr.f32.gmra.mxu1 %v1410_v52  ;;  %v4112_v42 = vpop.eup %4111 }
 0x320   :  { %3070 = vmatpush1.msk.msra.mxu0 %vm5573_vm6, %v7344_v17  ;;  %3569 = vmatprep.mubr.msk.f32.mxu1 %vm4211_vm0, %v7397_v60  ;;  %v560_v30 = vmul.f32 %v4112_v42, %v5150_v7  ;;  %vm7540_vm6 = vnez %v7480_v8 }
 0x321   :  { %2876 = vmatprep.subr.mxu0 %v7397_v60  ;;  %3894 = vmatmul.mubr.msk.f32.gmra.mxu0 %vm5218_vm8, %v7344_v17  ;;  %v502_v52 = vpop.xlane.xlu0 %501 }
 0x322   :  { %3071 = vmatpush1.msk.msra.mxu0 %vm5547_vm5, %v7344_v17  ;;  %3896 = vmatprep.mubr.msk.f32.mxu0 %vm4211_vm0, %v7397_v60  ;;  %585 = vst [vmem:[%s7147_s5] sm:$0xff] %v560_v30  ;;  %4119 = vrcp.f32 %v502_v52  ;;  %v7538_v52 = vld [vmem:[#allocation52_spill] sm:$0xff]  ;;  %vm7542_vm5 = vnez %v7476_v20 }
 0x323   :  { %2878 = vmatprep.subr.mxu0 %v7397_v60  ;;  %3570 = vmatmul.mubr.msk.f32.vlgmr.msra.gmra.mxu1 %vm5201_vm7, %v7344_v17  ;;  %v4114_v7 = vpop.eup %4113 }
 0x324   :  { %3752 = vmatpush3.msra.mxu1 %v7537_v49  ;;  %3072 = vmatpush1.msk.msra.mxu0 %vm5519_vm4, %v7344_v17  ;;  %v562_v45 = vmul.f32 %v4114_v7, %v5155_v43 }
 0x325   :  { %2880 = vmatprep.subr.mxu0 %v7397_v60  ;;  %3897 = vmatmul.mubr.msk.f32.gmra.mxu0 %vm5244_vm9, %v7344_v17  ;;  %v506_v42 = vpop.xlane.xlu0 %505 }
 0x326   :  { %3073 = vmatpush1.msk.msra.mxu0 %vm5493_vm3, %v7344_v17  ;;  %3572 = vmatprep.mubr.msk.f32.mxu1 %vm4211_vm0, %v7397_v60  ;;  %587 = vst [vmem:[%s7147_s5 + $0x10] sm:$0xff] %v562_v45  ;;  %4121 = vrcp.f32 %v506_v42 }
 0x327   :  { %2882 = vmatprep.subr.mxu0 %v7397_v60  ;;  %3573 = vmatmul.mubr.msk.f32.gmra.mxu1 %vm5218_vm8, %v7344_v17  ;;  %v4116_v43 = vpop.eup %4115 }
 0x328   :  { %3074 = vmatpush1.msk.msra.mxu0 %vm5465_vm2, %v7344_v17  ;;  %3899 = vmatprep.mubr.msk.f32.mxu0 %vm4211_vm0, %v7397_v60  ;;  %v564_v30 = vmul.f32 %v4116_v43, %v5160_v35  ;;  %v7541_v43 = vld [vmem:[#allocation54_spill] sm:$0xff] }
 0x329   :  { %2884 = vmatprep.subr.mxu0 %v7397_v60  ;;  %3753 = vmatprep.subr.mxu1 %v7397_v60  ;;  %v510_v7 = vpop.xlane.xlu0 %509 }
 0x32a   :  { %3900 = vmatmul.mubr.msk.f32.gmra.mxu0 %vm5274_vm10, %v7344_v17  ;;  %3575 = vmatprep.mubr.msk.f32.mxu1 %vm4211_vm0, %v7397_v60  ;;  %589 = vst [vmem:[%s7147_s5 + $0x20] sm:$0xff] %v564_v30  ;;  %4123 = vrcp.f32 %v510_v7 }
 0x32b   :  { %3075 = vmatpush1.msk.msra.mxu0 %vm5439_vm1, %v7344_v17  ;;  %3754 = vmatpush3.msra.mxu1 %v7538_v52  ;;  %v4118_v35 = vpop.eup %4117 }
 0x32c   :  { %2886 = vmatprep.subr.mxu0 %v7397_v60  ;;  %3576 = vmatmul.mubr.msk.f32.gmra.mxu1 %vm5244_vm9, %v7344_v17  ;;  %v566_v45 = vmul.f32 %v4118_v35, %v5165_v51 }
 0x32d   :  { %3076 = vmatpush1.msk.msra.mxu0 %vm5411_vm15, %v7344_v17  ;;  %3902 = vmatprep.mubr.msk.f32.mxu0 %vm4211_vm0, %v7397_v60  ;;  %v514_v42 = vpop.xlane.xlu0 %513 }
 0x32e   :  { %2888 = vmatprep.subr.mxu0 %v7397_v60  ;;  %3903 = vmatmul.mubr.msk.f32.gmra.mxu0 %vm5304_vm11, %v7344_v17  ;;  %591 = vst [vmem:[%s7147_s5 + $0x30] sm:$0xff] %v566_v45  ;;  %4125 = vrcp.f32 %v514_v42 }
 0x32f   :  { %3077 = vmatpush1.msk.msra.mxu0 %vm7539_vm12, %v7344_v17  ;;  %3578 = vmatprep.mubr.msk.f32.mxu1 %vm4211_vm0, %v7397_v60  ;;  %v4120_v51 = vpop.eup %4119 }
 0x330   :  { %2890 = vmatprep.subr.mxu0 %v7397_v60  ;;  %3579 = vmatmul.mubr.msk.f32.gmra.mxu1 %vm5274_vm10, %v7344_v17  ;;  %v568_v30 = vmul.f32 %v4120_v51, %v5170_v37 }
 0x331   :  { %3755 = vmatprep.subr.mxu1 %v7397_v60  ;;  %3078 = vmatpush1.msk.msra.mxu0 %vm7540_vm6, %v7344_v17  ;;  %v518_v7 = vpop.xlane.xlu0 %517 }
 0x332   :  { %3756 = vmatpush3.msra.mxu1 %v7541_v43  ;;  %3905 = vmatprep.mubr.msk.f32.mxu0 %vm4211_vm0, %v7397_v60  ;;  %593 = vst [vmem:[%s7147_s5 + $0x40] sm:$0xff] %v568_v30  ;;  %4127 = vrcp.f32 %v518_v7 }
 0x333   :  { %2892 = vmatprep.subr.mxu0 %v7397_v60  ;;  %3906 = vmatmul.mubr.msk.f32.gmra.mxu0 %vm7542_vm5, %v7344_v17  ;;  %v4122_v37 = vpop.eup %4121 }
 0x334   :  { %3079 = vmatpush1.msk.msra.mxu0 %vm7542_vm5, %v7344_v17  ;;  %3581 = vmatprep.mubr.msk.f32.mxu1 %vm4211_vm0, %v7397_v60  ;;  %v570_v35 = vmul.f32 %v4122_v37, %v5175_v40  ;;  %v7543_v40 = vld [vmem:[#allocation56_spill] sm:$0xff]  ;;  %v7544_v37 = vld [vmem:[#allocation58_spill] sm:$0xff] }
 0x335   :  { %2894 = vmatprep.subr.mxu0 %v7397_v60  ;;  %3582 = vmatmul.mubr.msk.f32.gmra.mxu1 %vm5304_vm11, %v7344_v17  ;;  %v522_v45 = vpop.xlane.xlu0 %521 }
 0x336   :  { %3080 = vmatpush1.msk.msra.mxu0 %vm5304_vm11, %v7344_v17  ;;  %3908 = vmatprep.mubr.msk.f32.mxu0 %vm4211_vm0, %v7397_v60  ;;  %595 = vst [vmem:[%s7147_s5 + $0x50] sm:$0xff] %v570_v35  ;;  %4129 = vrcp.f32 %v522_v45  ;;  %v7545_v45 = vld [vmem:[#allocation48_spill] sm:$0xff]  ;;  %vm7556_vm11 = vnez %v7515_v0 }
 0x337   :  { %2896 = vmatprep.subr.mxu0 %v7397_v60  ;;  %3757 = vmatprep.subr.mxu1 %v7397_v60  ;;  %v4124_v42 = vpop.eup %4123 }
 0x338   :  { %3909 = vmatmul.mubr.msk.f32.gmra.mxu0 %vm7540_vm6, %v7344_v17  ;;  %3584 = vmatprep.mubr.msk.f32.mxu1 %vm4211_vm0, %v7397_v60  ;;  %v572_v51 = vmul.f32 %v4124_v42, %v5180_v12 }
 0x339   :  { %3081 = vmatpush1.msk.msra.mxu0 %vm5274_vm10, %v7344_v17  ;;  %3758 = vmatpush3.msra.mxu1 %v7543_v40  ;;  %v526_v30 = vpop.xlane.xlu0 %525  ;;  %vm7558_vm10 = vnez %v7512_v63 }
 0x33a   :  { %2898 = vmatprep.subr.mxu0 %v7397_v60  ;;  %3585 = vmatmul.mubr.msk.f32.gmra.mxu1 %vm7542_vm5, %v7344_v17  ;;  %597 = vst [vmem:[%s7147_s5 + $0x60] sm:$0xff] %v572_v51  ;;  %4131 = vrcp.f32 %v526_v30  ;;  %vm7552_vm5 = vnez %v7521_v34 }
 0x33b   :  { %3082 = vmatpush1.msk.msra.mxu0 %vm5244_vm9, %v7344_v17  ;;  %3911 = vmatprep.mubr.msk.f32.mxu0 %vm4211_vm0, %v7397_v60  ;;  %v4126_v12 = vpop.eup %4125 }
 0x33c   :  { %2900 = vmatprep.subr.mxu0 %v7397_v60  ;;  %3912 = vmatmul.mubr.msk.f32.gmra.mxu0 %vm7539_vm12, %v7344_v17  ;;  %v574_v7 = vmul.f32 %v4126_v12, %v5185_v15  ;;  %v7547_v12 = vld [vmem:[#allocation28_spill] sm:$0xff] }
 0x33d   :  { %3083 = vmatpush1.msk.msra.mxu0 %vm5218_vm8, %v7344_v17  ;;  %3587 = vmatprep.mubr.msk.f32.mxu1 %vm4211_vm0, %v7397_v60  ;;  %v530_v35 = vpop.xlane.xlu0 %529 }
 0x33e   :  { %2902 = vmatprep.subr.mxu0 %v7397_v60  ;;  %3588 = vmatmul.mubr.msk.f32.gmra.mxu1 %vm7540_vm6, %v7344_v17  ;;  %599 = vst [vmem:[%s7147_s5 + $0x70] sm:$0xff] %v574_v7  ;;  %4133 = vrcp.f32 %v530_v35  ;;  %vm7548_vm6 = vnez %v7527_v4  ;;  %v7549_v35 = vld [vmem:[#allocation60_spill] sm:$0xff] }
 0x33f   :  { %3759 = vmatprep.subr.mxu1 %v7397_v60  ;;  %3084 = vmatpush1.msk.msra.mxu0 %vm5201_vm7, %v7344_v17  ;;  %v4128_v15 = vpop.eup %4127 }
 0x340   :  { %3760 = vmatpush3.msra.mxu1 %v7544_v37  ;;  %3914 = vmatprep.mubr.msk.f32.mxu0 %vm4211_vm0, %v7397_v60  ;;  %v576_v42 = vmul.f32 %v4128_v15, %v7545_v45  ;;  %v7550_v45 = vld [vmem:[#allocation6_spill] sm:$0xff] }
 0x341   :  { %2918 = vmatprep.subr.mxu0 %v7397_v60  ;;  %3915 = vmatmul.mubr.msk.f32.gmra.mxu0 %vm5411_vm15, %v7344_v17  ;;  %v534_v51 = vpop.xlane.xlu0 %533 }
 0x342   :  { %3085 = vmatpush2.msk.msra.mxu0 %vm5786_vm14, %v7344_v17  ;;  %3590 = vmatprep.mubr.msk.f32.mxu1 %vm4211_vm0, %v7397_v60  ;;  %601 = vst [vmem:[%s7147_s5 + $0x80] sm:$0xff] %v576_v42  ;;  %4135 = vrcp.f32 %v534_v51 }
 0x343   :  { %2920 = vmatprep.subr.mxu0 %v7397_v60  ;;  %3591 = vmatmul.mubr.msk.f32.gmra.mxu1 %vm7539_vm12, %v7344_v17  ;;  %v4130_v30 = vpop.eup %4129  ;;  %vm7546_vm12 = vnez %v7530_v23 }
 0x344   :  { %3086 = vmatpush2.msk.msra.mxu0 %vm5767_vm13, %v7344_v17  ;;  %3917 = vmatprep.mubr.msk.f32.mxu0 %vm4211_vm0, %v7397_v60  ;;  %v578_v7 = vmul.f32 %v4130_v30, %v7547_v12  ;;  %v7553_v30 = vld [vmem:[#allocation47_spill] sm:$0xff] }
 0x345   :  { %2922 = vmatprep.subr.mxu0 %v7397_v60  ;;  %3918 = vmatmul.mubr.msk.f32.gmra.mxu0 %vm5439_vm1, %v7344_v17 }
 0x346   :  { %3087 = vmatpush2.msk.msra.mxu0 %vm7546_vm12, %v7344_v17  ;;  %3593 = vmatprep.mubr.msk.f32.mxu1 %vm4211_vm0, %v7397_v60  ;;  %603 = vst [vmem:[%s7147_s5 + $0x90] sm:$0xff] %v578_v7  ;;  %v7554_v7 = vld [vmem:[#allocation62_spill] sm:$0xff] }
 0x347   :  { %3761 = vmatprep.subr.mxu1 %v7397_v60  ;;  %2924 = vmatprep.subr.mxu0 %v7397_v60  ;;  %v4132_v15 = vpop.eup %4131 }
 0x348   :  { %3594 = vmatmul.mubr.msk.f32.gmra.mxu1 %vm5411_vm15, %v7344_v17  ;;  %3088 = vmatpush2.msk.msra.mxu0 %vm7548_vm6, %v7344_v17  ;;  %v580_v42 = vmul.f32 %v4132_v15, %v7550_v45  ;;  %vm7551_vm15 = vnez %v7524_v39  ;;  %v7557_v45 = vld [vmem:[#allocation8_spill] sm:$0xff] }
 0x349   :  { %3762 = vmatpush3.msra.mxu1 %v7549_v35  ;;  %3920 = vmatprep.mubr.msk.f32.mxu0 %vm4211_vm0, %v7397_v60 }
 0x34a   :  { %2926 = vmatprep.subr.mxu0 %v7397_v60  ;;  %3921 = vmatmul.mubr.msk.f32.gmra.mxu0 %vm5465_vm2, %v7344_v17  ;;  %605 = vst [vmem:[%s7147_s5 + $0xa0] sm:$0xff] %v580_v42 }
 0x34b   :  { %3089 = vmatpush2.msk.msra.mxu0 %vm7551_vm15, %v7344_v17  ;;  %3596 = vmatprep.mubr.msk.f32.mxu1 %vm4211_vm0, %v7397_v60  ;;  %v4134_v51 = vpop.eup %4133 }
 0x34c   :  { %2928 = vmatprep.subr.mxu0 %v7397_v60  ;;  %3597 = vmatmul.mubr.msk.f32.gmra.mxu1 %vm5439_vm1, %v7344_v17  ;;  %v582_v12 = vmul.f32 %v4134_v51, %v7553_v30  ;;  %vm7555_vm1 = vnez %v7518_v58  ;;  %v7559_v51 = vld [vmem:[#allocation63_spill] sm:$0xff]  ;;  %v7561_v30 = vld [vmem:[#allocation65_spill] sm:$0xff] }
 0x34d   :  { %3090 = vmatpush2.msk.msra.mxu0 %vm7552_vm5, %v7344_v17  ;;  %3763 = vmatprep.subr.mxu1 %v7397_v60 }
 0x34e   :  { %3923 = vmatprep.mubr.msk.f32.mxu0 %vm4211_vm0, %v7397_v60  ;;  %2930 = vmatprep.subr.mxu0 %v7397_v60  ;;  %607 = vst [vmem:[%s7147_s5 + $0xb0] sm:$0xff] %v582_v12  ;;  %v7563_v12 = vld [vmem:[#allocation66_spill] sm:$0xff] }
 0x34f   :  { %3764 = vmatpush3.msra.mxu1 %v7554_v7  ;;  %3924 = vmatmul.mubr.msk.f32.gmra.mxu0 %vm5493_vm3, %v7344_v17  ;;  %v4136_v15 = vpop.eup %4135 }
 0x350   :  { %3091 = vmatpush2.msk.msra.mxu0 %vm7555_vm1, %v7344_v17  ;;  %3599 = vmatprep.mubr.msk.f32.mxu1 %vm4211_vm0, %v7397_v60  ;;  %v584_v42 = vmul.f32 %v4136_v15, %v7557_v45  ;;  %v7564_v15 = vld [vmem:[#allocation68_spill] sm:$0xff]  ;;  %v7566_v45 = vld [vmem:[#allocation70_spill] sm:$0xff] }
 0x351   :  { %2932 = vmatprep.subr.mxu0 %v7397_v60  ;;  %3600 = vmatmul.mubr.msk.f32.gmra.mxu1 %vm5465_vm2, %v7344_v17  ;;  %vm7560_vm2 = vnez %v7503_v26 }
 0x352   :  { %3092 = vmatpush2.msk.msra.mxu0 %vm7556_vm11, %v7344_v17  ;;  %3926 = vmatprep.mubr.msk.f32.mxu0 %vm4211_vm0, %v7397_v60  ;;  %609 = vst [vmem:[%s7147_s5 + $0xc0] sm:$0xff] %v584_v42  ;;  %v7567_v42 = vld [vmem:[#allocation72_spill] sm:$0xff] }
 0x353   :  { %2934 = vmatprep.subr.mxu0 %v7397_v60  ;;  %3927 = vmatmul.mubr.msk.f32.gmra.mxu0 %vm5519_vm4, %v7344_v17 }
 0x354   :  { %3093 = vmatpush2.msk.msra.mxu0 %vm7558_vm10, %v7344_v17  ;;  %3602 = vmatprep.mubr.msk.f32.mxu1 %vm4211_vm0, %v7397_v60 }
 0x355   :  { %3765 = vmatprep.subr.mxu1 %v7397_v60  ;;  %3603 = vmatmul.mubr.msk.f32.gmra.mxu1 %vm5493_vm3, %v7344_v17  ;;  %vm7562_vm3 = vnez %v7506_v47 }
 0x356   :  { %3766 = vmatpush3.msra.mxu1 %v7559_v51  ;;  %3929 = vmatprep.mubr.msk.f32.mxu0 %vm4211_vm0, %v7397_v60 }
 0x357   :  { %3930 = vmatmul.mubr.msk.f32.gmra.mxu0 %vm7560_vm2, %v7344_v17  ;;  %3605 = vmatprep.mubr.msk.f32.mxu1 %vm4211_vm0, %v7397_v60 }
 0x358   :  { %3767 = vmatprep.subr.mxu1 %v7397_v60  ;;  %3932 = vmatprep.mubr.msk.f32.mxu0 %vm4211_vm0, %v7397_v60 }
 0x359   :  { %3606 = vmatmul.mubr.msk.f32.gmra.mxu1 %vm5519_vm4, %v7344_v17  ;;  %vm7565_vm4 = vnez %v7509_v33 }
 0x35a   :  { %3768 = vmatpush3.msra.mxu1 %v7561_v30  ;;  %3608 = vmatprep.mubr.msk.f32.mxu1 %vm4211_vm0, %v7397_v60 }
 0x35b   :  { %3933 = vmatmul.mubr.msk.f32.gmra.mxu0 %vm7562_vm3, %v7344_v17  ;;  %3769 = vmatprep.subr.mxu1 %v7397_v60 }
 0x35c   :  { %3935 = vmatprep.mubr.msk.f32.mxu0 %vm4211_vm0, %v7397_v60  ;;  %3770 = vmatpush3.msra.mxu1 %v7563_v12 }
 0x35d   :  { %3609 = vmatmul.mubr.msk.f32.gmra.mxu1 %vm7560_vm2, %v7344_v17  ;;  %3771 = vmatprep.subr.mxu1 %v7397_v60 }
 0x35e   :  { %3611 = vmatprep.mubr.msk.f32.mxu1 %vm4211_vm0, %v7397_v60  ;;  %3772 = vmatpush3.msra.mxu1 %v7564_v15 }
 0x35f   :  { %3936 = vmatmul.mubr.msk.f32.gmra.mxu0 %vm7565_vm4, %v7344_v17  ;;  %3773 = vmatprep.subr.mxu1 %v7397_v60 }
 0x360   :  { %3938 = vmatprep.mubr.msk.f32.mxu0 %vm4211_vm0, %v7397_v60  ;;  %3774 = vmatpush3.msra.mxu1 %v7566_v45 }
 0x361   :  { %3612 = vmatmul.mubr.msk.f32.gmra.mxu1 %vm7562_vm3, %v7344_v17  ;;  %3775 = vmatprep.subr.mxu1 %v7397_v60 }
 0x362   :  { %3614 = vmatprep.mubr.msk.f32.mxu1 %vm4211_vm0, %v7397_v60  ;;  %3776 = vmatpush3.msra.mxu1 %v7567_v42 }
 0x363   :  { %3939 = vmatmul.mubr.msk.f32.gmra.mxu0 %vm7558_vm10, %v7344_v17  ;;  %3777 = vmatprep.subr.mxu1 %v7397_v60 }
 0x364   :  { %3941 = vmatprep.mubr.msk.f32.mxu0 %vm4211_vm0, %v7397_v60  ;;  %3778 = vmatpush3.msra.mxu1 %v7568_v9 }
 0x365   :  { %3615 = vmatmul.mubr.msk.f32.gmra.mxu1 %vm7565_vm4, %v7344_v17  ;;  %3779 = vmatprep.subr.mxu1 %v7397_v60 }
 0x366   :  { %3617 = vmatprep.mubr.msk.f32.mxu1 %vm4211_vm0, %v7397_v60  ;;  %3780 = vmatpush3.msra.mxu1 %v7569_v10 }
 0x367   :  { %3942 = vmatmul.mubr.msk.f32.gmra.mxu0 %vm7556_vm11, %v7344_v17  ;;  %3781 = vmatprep.subr.mxu1 %v7397_v60 }
 0x368   :  { %3944 = vmatprep.mubr.msk.f32.mxu0 %vm4211_vm0, %v7397_v60  ;;  %3782 = vmatpush3.msra.mxu1 %v7570_v46 }
 0x369   :  { %3618 = vmatmul.mubr.msk.f32.gmra.mxu1 %vm7558_vm10, %v7344_v17  ;;  %3965 = vmatprep.subr.mxu1 %v7397_v60 }
 0x36a   :  { %3620 = vmatprep.mubr.msk.f32.mxu1 %vm4211_vm0, %v7397_v60 }
 0x36b   :  { %3945 = vmatmul.mubr.msk.f32.gmra.mxu0 %vm7555_vm1, %v7344_v17 }
 0x36c   :  { %3947 = vmatprep.mubr.msk.f32.mxu0 %vm4211_vm0, %v7397_v60 }
 0x36d   :  { %3621 = vmatmul.mubr.msk.f32.gmra.mxu1 %vm7556_vm11, %v7344_v17 }
 0x36e   :  { %3623 = vmatprep.mubr.msk.f32.mxu1 %vm4211_vm0, %v7397_v60 }
 0x36f   :  { %3948 = vmatmul.mubr.msk.f32.gmra.mxu0 %vm7552_vm5, %v7344_v17 }
 0x370   :  { %3950 = vmatprep.mubr.msk.f32.mxu0 %vm4211_vm0, %v7397_v60 }
 0x371   :  { %3624 = vmatmul.mubr.msk.f32.gmra.mxu1 %vm7555_vm1, %v7344_v17 }
 0x372   :  { %3626 = vmatprep.mubr.msk.f32.mxu1 %vm4211_vm0, %v7397_v60 }
 0x373   :  { %3951 = vmatmul.mubr.msk.f32.gmra.mxu0 %vm7551_vm15, %v7344_v17 }
 0x374   :  { %3953 = vmatprep.mubr.msk.f32.mxu0 %vm4211_vm0, %v7397_v60 }
 0x375   :  { %3627 = vmatmul.mubr.msk.f32.gmra.mxu1 %vm7552_vm5, %v7344_v17 }
 0x376   :  { %3629 = vmatprep.mubr.msk.f32.mxu1 %vm4211_vm0, %v7397_v60  ;;  %v6211_v6 = vpop.f32.mrf.mxu0 }
 0x377   :  { %3954 = vmatmul.mubr.msk.f32.gmra.mxu0 %vm7548_vm6, %v7344_v17  ;;  %7571 = vst [vmem:[#allocation44_spill] sm:$0xff] %v6211_v6 }
 0x378   :  { %3956 = vmatprep.mubr.msk.f32.mxu0 %vm4211_vm0, %v7397_v60  ;;  %v3678_v34 = vpop.f32.mrf.mxu0 }
 0x379   :  { %3630 = vmatmul.mubr.msk.f32.gmra.mxu1 %vm7551_vm15, %v7344_v17 }
 0x37a   :  { %3632 = vmatprep.mubr.msk.f32.mxu1 %vm4211_vm0, %v7397_v60  ;;  %v6223_v58 = vpop.f32.mrf.mxu0 }
 0x37b   :  { %3957 = vmatmul.mubr.msk.f32.gmra.mxu0 %vm7546_vm12, %v7344_v17  ;;  %7572 = vst [vmem:[#allocation22_spill] sm:$0xff] %v6223_v58 }
 0x37c   :  { %3959 = vmatprep.mubr.msk.f32.mxu0 %vm4211_vm0, %v7397_v60  ;;  %v6230_v6 = vpop.f32.mrf.mxu1  ;;  %v3681_v39 = vpop.f32.mrf.mxu0 }
 0x37d   :  { %3633 = vmatmul.mubr.msk.f32.gmra.mxu1 %vm7548_vm6, %v7344_v17  ;;  %7573 = vst [vmem:[#allocation46_spill] sm:$0xff] %v6230_v6 }
 0x37e   :  { %3635 = vmatprep.mubr.msk.f32.mxu1 %vm4211_vm0, %v7397_v60  ;;  %v3464_v34 = vpop.f32.mrf.mxu1  ;;  %v6237_v4 = vpop.f32.mrf.mxu0 }
 0x37f   :  { %3960 = vmatmul.mubr.msk.f32.gmra.mxu0 %vm5767_vm13, %v7344_v17  ;;  %7574 = vst [vmem:[#allocation24_spill] sm:$0xff] %v6237_v4 }
 0x380   :  { %3962 = vmatprep.mubr.msk.f32.mxu0 %vm4211_vm0, %v7397_v60  ;;  %v6244_v58 = vpop.f32.mrf.mxu1  ;;  %v3684_v39 = vpop.f32.mrf.mxu0 }
 0x381   :  { %3636 = vmatmul.mubr.msk.f32.gmra.mxu1 %vm7546_vm12, %v7344_v17  ;;  %7575 = vst [vmem:[#allocation51_spill] sm:$0xff] %v6244_v58 }
 0x382   :  { %3638 = vmatprep.mubr.msk.f32.mxu1 %vm4211_vm0, %v7397_v60  ;;  %v3467_v6 = vpop.f32.mrf.mxu1  ;;  %v6249_v23 = vpop.f32.mrf.mxu0 }
 0x383   :  { %3963 = vmatmul.mubr.msk.f32.gmra.mxu0 %vm5786_vm14, %v7344_v17  ;;  %7576 = vst [vmem:[#allocation53_spill] sm:$0xff] %v6249_v23  ;;  %v7577_v23 = vld [vmem:[#allocation30_spill] sm:$0xff] }
 0x384   :  { %v6253_v34 = vpop.f32.mrf.mxu1  ;;  %v3687_v4 = vpop.f32.mrf.mxu0  ;;  %v7578_v48 = vand.u32 4294901760, %v7577_v23 }
 0x385   :  { %3639 = vmatmul.mubr.msk.f32.gmra.mxu1 %vm5767_vm13, %v7344_v17 }
 0x386   :  { %3641 = vmatprep.mubr.msk.f32.mxu1 %vm4211_vm0, %v7397_v60  ;;  %v3470_v0 = vpop.f32.mrf.mxu1  ;;  %v6258_v58 = vpop.f32.mrf.mxu0 }
 0x388   :  { %v3690_v6 = vpop.f32.mrf.mxu0 }
 0x389   :  { %3642 = vmatmul.mubr.msk.f32.gmra.mxu1 %vm5786_vm14, %v7344_v17  ;;  %v7579_v17 = vld [vmem:[#allocation49_spill] sm:$0xff] }
 0x38a   :  { %3783 = vmatprep.mubr.msk.f32.mxu1 %vm4211_vm0, %v7397_v60  ;;  %v6266_v33 = vpop.f32.mrf.mxu0  ;;  %v7580_v6 = vand.u32 4294901760, %v7579_v17 }
 0x38b   :  { %v6262_v39 = vpop.f32.mrf.mxu1 }
 0x38c   :  { %v3693_v0 = vpop.f32.mrf.mxu0 }
 0x38d   :  { %3784 = vmatmul.mubr.f32.vlgmr.msra.gmra.mxu1 %v7578_v48  ;;  %v3473_v63 = vpop.f32.mrf.mxu1 }
 0x38e   :  { %3966 = vmatpush3.msra.mxu1 %v7537_v49  ;;  %3786 = vmatprep.mubr.msk.f32.mxu1 %vm4211_vm0, %v7397_v60 }
 0x38f   :  { %3967 = vmatprep.subr.mxu1 %v7397_v60  ;;  %v6272_v4 = vpop.f32.mrf.mxu1  ;;  %v6277_v48 = vpop.f32.mrf.mxu0 }
 0x390   :  { %3968 = vmatpush3.msra.mxu1 %v7538_v52  ;;  %v7581_v52 = vld [vmem:[#allocation32_spill] sm:$0xff] }
 0x391   :  { %3787 = vmatmul.mubr.f32.gmra.mxu1 %v7580_v6  ;;  %v3476_v23 = vpop.f32.mrf.mxu1  ;;  %3969 = vmatprep.subr.mxu1 %v7397_v60  ;;  %v3696_v49 = vpop.f32.mrf.mxu0  ;;  %v7582_v17 = vand.u32 4294901760, %v7581_v52 }
 0x392   :  { %3789 = vmatprep.mubr.msk.f32.mxu1 %vm4211_vm0, %v7397_v60  ;;  %3970 = vmatpush3.msra.mxu1 %v7541_v43 }
 0x393   :  { %v6283_v63 = vpop.f32.mrf.mxu1  ;;  %3971 = vmatprep.subr.mxu1 %v7397_v60  ;;  %v6289_v6 = vpop.f32.mrf.mxu0 }
 0x394   :  { %3972 = vmatpush3.msra.mxu1 %v7543_v40  ;;  %v7583_v40 = vld [vmem:[#allocation10_spill] sm:$0xff] }
 0x395   :  { %3790 = vmatmul.mubr.f32.gmra.mxu1 %v7582_v17  ;;  %v3479_v0 = vpop.f32.mrf.mxu1  ;;  %3973 = vmatprep.subr.mxu1 %v7397_v60  ;;  %v3699_v23 = vpop.f32.mrf.mxu0  ;;  %v7584_v49 = vand.u32 4294901760, %v7583_v40 }
 0x396   :  { %3792 = vmatprep.mubr.msk.f32.mxu1 %vm4211_vm0, %v7397_v60  ;;  %3974 = vmatpush3.msra.mxu1 %v7544_v37 }
 0x397   :  { %v6295_v43 = vpop.f32.mrf.mxu1  ;;  %3975 = vmatprep.subr.mxu1 %v7397_v60 }
 0x398   :  { %3976 = vmatpush3.msra.mxu1 %v7549_v35  ;;  %v6301_v17 = vpop.f32.mrf.mxu0  ;;  %v7585_v35 = vld [vmem:[#allocation34_spill] sm:$0xff] }
 0x399   :  { %3793 = vmatmul.mubr.f32.gmra.mxu1 %v7584_v49  ;;  %v3482_v52 = vpop.f32.mrf.mxu1  ;;  %3977 = vmatprep.subr.mxu1 %v7397_v60  ;;  %v7586_v23 = vand.u32 4294901760, %v7585_v35 }
 0x39a   :  { %3795 = vmatprep.mubr.msk.f32.mxu1 %vm4211_vm0, %v7397_v60  ;;  %3978 = vmatpush3.msra.mxu1 %v7554_v7  ;;  %v3702_v0 = vpop.f32.mrf.mxu0 }
 0x39b   :  { %v6307_v37 = vpop.f32.mrf.mxu1  ;;  %3979 = vmatprep.subr.mxu1 %v7397_v60 }
 0x39c   :  { %3980 = vmatpush3.msra.mxu1 %v7559_v51  ;;  %v7587_v51 = vand.u32 4294901760, %v5350_v38  ;;  %v7588_v38 = vand.u32 4294901760, %v5376_v36  ;;  %v7589_v36 = vand.u32 4294901760, %v5401_v53  ;;  %v7590_v53 = vand.u32 4294901760, %v5426_v22 }
 0x39d   :  { %3796 = vmatmul.mubr.f32.gmra.mxu1 %v7586_v23  ;;  %v3485_v40 = vpop.f32.mrf.mxu1  ;;  %v6313_v49 = vpop.f32.mrf.mxu0  ;;  %3981 = vmatprep.subr.mxu1 %v7397_v60 }
 0x39e   :  { %3798 = vmatprep.mubr.msk.f32.mxu1 %vm4211_vm0, %v7397_v60  ;;  %3982 = vmatpush3.msra.mxu1 %v7561_v30 }
 0x39f   :  { %v6319_v7 = vpop.f32.mrf.mxu1  ;;  %v3705_v52 = vpop.f32.mrf.mxu0  ;;  %3983 = vmatprep.subr.mxu1 %v7397_v60 }
 0x3a0   :  { %3984 = vmatpush3.msra.mxu1 %v7563_v12 }
 0x3a1   :  { %3799 = vmatmul.mubr.f32.gmra.mxu1 %v7587_v51  ;;  %v3488_v0 = vpop.f32.mrf.mxu1  ;;  %v6325_v35 = vpop.f32.mrf.mxu0  ;;  %3985 = vmatprep.subr.mxu1 %v7397_v60 }
 0x3a2   :  { %3801 = vmatprep.mubr.msk.f32.mxu1 %vm4211_vm0, %v7397_v60  ;;  %3986 = vmatpush3.msra.mxu1 %v7564_v15 }
 0x3a3   :  { %v6331_v30 = vpop.f32.mrf.mxu1  ;;  %v3708_v23 = vpop.f32.mrf.mxu0  ;;  %3987 = vmatprep.subr.mxu1 %v7397_v60 }
 0x3a4   :  { %3988 = vmatpush3.msra.mxu1 %v7566_v45 }
 0x3a5   :  { %3802 = vmatmul.mubr.f32.gmra.mxu1 %v7588_v38  ;;  %v3491_v12 = vpop.f32.mrf.mxu1  ;;  %v6337_v40 = vpop.f32.mrf.mxu0  ;;  %3989 = vmatprep.subr.mxu1 %v7397_v60 }
 0x3a6   :  { %3804 = vmatprep.mubr.msk.f32.mxu1 %vm4211_vm0, %v7397_v60  ;;  %3990 = vmatpush3.msra.mxu1 %v7567_v42 }
 0x3a7   :  { %v6343_v15 = vpop.f32.mrf.mxu1  ;;  %v3711_v52 = vpop.f32.mrf.mxu0  ;;  %3991 = vmatprep.subr.mxu1 %v7397_v60 }
 0x3a8   :  { %3992 = vmatpush3.msra.mxu1 %v7568_v9 }
 0x3a9   :  { %3805 = vmatmul.mubr.f32.gmra.mxu1 %v7589_v36  ;;  %v3494_v45 = vpop.f32.mrf.mxu1  ;;  %v6349_v51 = vpop.f32.mrf.mxu0  ;;  %3993 = vmatprep.subr.mxu1 %v7397_v60 }
 0x3aa   :  { %3807 = vmatprep.mubr.msk.f32.mxu1 %vm4211_vm0, %v7397_v60  ;;  %3994 = vmatpush3.msra.mxu1 %v7569_v10  ;;  %v7591_v10 = vand.u32 4294901760, %v5453_v21  ;;  %v7592_v45 = vand.u32 4294901760, %v5480_v54 }
 0x3ab   :  { %v6355_v42 = vpop.f32.mrf.mxu1  ;;  %v3714_v0 = vpop.f32.mrf.mxu0  ;;  %3995 = vmatprep.subr.mxu1 %v7397_v60 }
 0x3ac   :  { %3996 = vmatpush3.msra.mxu1 %v7570_v46 }
 0x3ad   :  { %3808 = vmatmul.mubr.f32.gmra.mxu1 %v7590_v53  ;;  %v3497_v9 = vpop.f32.mrf.mxu1  ;;  %v6361_v23 = vpop.f32.mrf.mxu0 }
 0x3ae   :  { %3810 = vmatprep.mubr.msk.f32.mxu1 %vm4211_vm0, %v7397_v60 }
 0x3af   :  { %v6365_v38 = vpop.f32.mrf.mxu1  ;;  %v3717_v12 = vpop.f32.mrf.mxu0 }
 0x3b0   :  { %v7594_v12 = vand.u32 4294901760, %v5507_v19 }
 0x3b1   :  { %3811 = vmatmul.mubr.f32.gmra.mxu1 %v7591_v10  ;;  %v3500_v52 = vpop.f32.mrf.mxu1  ;;  %v6369_v36 = vpop.f32.mrf.mxu0 }
 0x3b2   :  { %3813 = vmatprep.mubr.msk.f32.mxu1 %vm4211_vm0, %v7397_v60 }
 0x3b3   :  { %v6373_v22 = vpop.f32.mrf.mxu1  ;;  %v3720_v46 = vpop.f32.mrf.mxu0 }
 0x3b5   :  { %3814 = vmatmul.mubr.f32.gmra.mxu1 %v7592_v45  ;;  %v3503_v0 = vpop.f32.mrf.mxu1  ;;  %v6377_v53 = vpop.f32.mrf.mxu0  ;;  %v7596_v45 = vand.u32 4294901760, %v5534_v1 }
 0x3b6   :  { %7593 = vst [vmem:[#allocation55_spill] sm:$0xff] %v6377_v53  ;;  %3816 = vmatprep.mubr.msk.f32.mxu1 %vm4211_vm0, %v7397_v60 }
 0x3b7   :  { %v6381_v21 = vpop.f32.mrf.mxu1  ;;  %v3723_v9 = vpop.f32.mrf.mxu0 }
 0x3b9   :  { %3817 = vmatmul.mubr.f32.gmra.mxu1 %v7594_v12  ;;  %v3506_v10 = vpop.f32.mrf.mxu1  ;;  %v6385_v52 = vpop.f32.mrf.mxu0  ;;  %v7598_v12 = vand.u32 4294901760, %v5561_v62 }
 0x3ba   :  { %7595 = vst [vmem:[#allocation57_spill] sm:$0xff] %v6385_v52  ;;  %3819 = vmatprep.mubr.msk.f32.mxu1 %vm4211_vm0, %v7397_v60 }
 0x3bb   :  { %v6389_v54 = vpop.f32.mrf.mxu1  ;;  %v3726_v46 = vpop.f32.mrf.mxu0 }
 0x3bd   :  { %3820 = vmatmul.mubr.f32.gmra.mxu1 %v7596_v45  ;;  %v3509_v0 = vpop.f32.mrf.mxu1  ;;  %v6393_v53 = vpop.f32.mrf.mxu0  ;;  %v7600_v45 = vand.u32 4294901760, %v5588_v2 }
 0x3be   :  { %7597 = vst [vmem:[#allocation59_spill] sm:$0xff] %v6393_v53  ;;  %3822 = vmatprep.mubr.msk.f32.mxu1 %vm4211_vm0, %v7397_v60 }
 0x3bf   :  { %v6397_v19 = vpop.f32.mrf.mxu1  ;;  %v3729_v9 = vpop.f32.mrf.mxu0 }
 0x3c1   :  { %3823 = vmatmul.mubr.f32.gmra.mxu1 %v7598_v12  ;;  %v3512_v10 = vpop.f32.mrf.mxu1  ;;  %v6401_v52 = vpop.f32.mrf.mxu0  ;;  %v7602_v12 = vand.u32 4294901760, %v5613_v41 }
 0x3c2   :  { %7599 = vst [vmem:[#allocation61_spill] sm:$0xff] %v6401_v52  ;;  %3825 = vmatprep.mubr.msk.f32.mxu1 %vm4211_vm0, %v7397_v60 }
 0x3c3   :  { %v6405_v1 = vpop.f32.mrf.mxu1  ;;  %v3732_v46 = vpop.f32.mrf.mxu0 }
 0x3c5   :  { %3826 = vmatmul.mubr.f32.gmra.mxu1 %v7600_v45  ;;  %v3515_v0 = vpop.f32.mrf.mxu1  ;;  %v6409_v53 = vpop.f32.mrf.mxu0  ;;  %v7604_v45 = vand.u32 4294901760, %v5637_v44 }
 0x3c6   :  { %7601 = vst [vmem:[#allocation64_spill] sm:$0xff] %v6409_v53  ;;  %3828 = vmatprep.mubr.msk.f32.mxu1 %vm4211_vm0, %v7397_v60 }
 0x3c7   :  { %v6413_v62 = vpop.f32.mrf.mxu1  ;;  %v3735_v9 = vpop.f32.mrf.mxu0 }
 0x3c9   :  { %3829 = vmatmul.mubr.f32.gmra.mxu1 %v7602_v12  ;;  %v3518_v10 = vpop.f32.mrf.mxu1  ;;  %v6417_v52 = vpop.f32.mrf.mxu0  ;;  %v7607_v12 = vand.u32 4294901760, %v5659_v61 }
 0x3ca   :  { %7603 = vst [vmem:[#allocation67_spill] sm:$0xff] %v6417_v52  ;;  %3831 = vmatprep.mubr.msk.f32.mxu1 %vm4211_vm0, %v7397_v60 }
 0x3cb   :  { %v6421_v2 = vpop.f32.mrf.mxu1  ;;  %v3738_v46 = vpop.f32.mrf.mxu0 }
 0x3cd   :  { %3832 = vmatmul.mubr.f32.gmra.mxu1 %v7604_v45  ;;  %v3521_v0 = vpop.f32.mrf.mxu1  ;;  %v6425_v53 = vpop.f32.mrf.mxu0  ;;  %v7610_v45 = vand.u32 4294901760, %v5679_v50 }
 0x3ce   :  { %7605 = vst [vmem:[#allocation69_spill] sm:$0xff] %v6425_v53  ;;  %3834 = vmatprep.mubr.msk.f32.mxu1 %vm4211_vm0, %v7397_v60 }
 0x3cf   :  { %v6429_v41 = vpop.f32.mrf.mxu1  ;;  %v3741_v9 = vpop.f32.mrf.mxu0 }
 0x3d0   :  { %7606 = vst [vmem:[#allocation71_spill] sm:$0xff] %v6429_v41 }
 0x3d1   :  { %3835 = vmatmul.mubr.f32.gmra.mxu1 %v7607_v12  ;;  %v3524_v10 = vpop.f32.mrf.mxu1  ;;  %v6433_v52 = vpop.f32.mrf.mxu0  ;;  %v7613_v12 = vand.u32 4294901760, %v5699_v14 }
 0x3d2   :  { %7608 = vst [vmem:[#allocation74_spill] sm:$0xff] %v6433_v52  ;;  %3837 = vmatprep.mubr.msk.f32.mxu1 %vm4211_vm0, %v7397_v60 }
 0x3d3   :  { %v6437_v44 = vpop.f32.mrf.mxu1  ;;  %v3744_v46 = vpop.f32.mrf.mxu0 }
 0x3d4   :  { %7609 = vst [vmem:[#allocation50_spill] sm:$0xff] %v6437_v44 }
 0x3d5   :  { %3838 = vmatmul.mubr.f32.gmra.mxu1 %v7610_v45  ;;  %v3527_v0 = vpop.f32.mrf.mxu1  ;;  %v6441_v53 = vpop.f32.mrf.mxu0  ;;  %v7616_v45 = vand.u32 4294901760, %v5719_v28 }
 0x3d6   :  { %7611 = vst [vmem:[#allocation52_spill] sm:$0xff] %v6441_v53  ;;  %3840 = vmatprep.mubr.msk.f32.mxu1 %vm4211_vm0, %v7397_v60 }
 0x3d7   :  { %v6445_v61 = vpop.f32.mrf.mxu1  ;;  %v3747_v9 = vpop.f32.mrf.mxu0 }
 0x3d8   :  { %7612 = vst [vmem:[#allocation54_spill] sm:$0xff] %v6445_v61 }
 0x3d9   :  { %3841 = vmatmul.mubr.f32.gmra.mxu1 %v7613_v12  ;;  %v3530_v10 = vpop.f32.mrf.mxu1  ;;  %v6449_v52 = vpop.f32.mrf.mxu0  ;;  %v7619_v12 = vand.u32 4294901760, %v5739_v56 }
 0x3da   :  { %7614 = vst [vmem:[#allocation56_spill] sm:$0xff] %v6449_v52  ;;  %3843 = vmatprep.mubr.msk.f32.mxu1 %vm4211_vm0, %v7397_v60 }
 0x3db   :  { %v6453_v50 = vpop.f32.mrf.mxu1  ;;  %v3750_v46 = vpop.f32.mrf.mxu0 }
 0x3dc   :  { %7615 = vst [vmem:[#allocation58_spill] sm:$0xff] %v6453_v50 }
 0x3dd   :  { %3844 = vmatmul.mubr.f32.gmra.mxu1 %v7616_v45  ;;  %v3533_v0 = vpop.f32.mrf.mxu1  ;;  %v6457_v53 = vpop.f32.mrf.mxu0  ;;  %v7621_v45 = vand.u32 4294901760, %v5759_v3 }
 0x3de   :  { %7617 = vst [vmem:[#allocation48_spill] sm:$0xff] %v6457_v53  ;;  %3846 = vmatprep.mubr.msk.f32.mxu1 %vm4211_vm0, %v7397_v60 }
 0x3df   :  { %v6461_v14 = vpop.f32.mrf.mxu1  ;;  %v3892_v9 = vpop.f32.mrf.mxu0 }
 0x3e0   :  { %7618 = vst [vmem:[#allocation28_spill] sm:$0xff] %v6461_v14 }
 0x3e1   :  { %3847 = vmatmul.mubr.f32.gmra.mxu1 %v7619_v12  ;;  %v3536_v10 = vpop.f32.mrf.mxu1  ;;  %v6465_v52 = vpop.f32.mrf.mxu0  ;;  %v7623_v12 = vand.u32 4294901760, %v5778_v13 }
 0x3e2   :  { %7620 = vst [vmem:[#allocation60_spill] sm:$0xff] %v6465_v52  ;;  %3849 = vmatprep.mubr.msk.f32.mxu1 %vm4211_vm0, %v7397_v60 }
 0x3e3   :  { %v6469_v28 = vpop.f32.mrf.mxu1  ;;  %v3895_v46 = vpop.f32.mrf.mxu0 }
 0x3e5   :  { %3850 = vmatmul.mubr.f32.gmra.mxu1 %v7621_v45  ;;  %v3571_v0 = vpop.f32.mrf.mxu1  ;;  %v6473_v53 = vpop.f32.mrf.mxu0 }
 0x3e6   :  { %7622 = vst [vmem:[#allocation6_spill] sm:$0xff] %v6473_v53  ;;  %3852 = vmatprep.mubr.msk.f32.mxu1 %vm4211_vm0, %v7397_v60  ;;  %v7625_v0 = vand.u32 4294901760, %v5797_v16 }
 0x3e7   :  { %v6477_v56 = vpop.f32.mrf.mxu1  ;;  %v3898_v9 = vpop.f32.mrf.mxu0 }
 0x3e9   :  { %3853 = vmatmul.mubr.f32.gmra.mxu1 %v7623_v12  ;;  %v3574_v10 = vpop.f32.mrf.mxu1 }
 0x3ea   :  { %3855 = vmatprep.mubr.msk.f32.mxu1 %vm4211_vm0, %v7397_v60  ;;  %v6483_v46 = vpop.f32.mrf.mxu0  ;;  %v7627_v10 = vmov 1.0  }
 0x3eb   :  { %7624 = vst [vmem:[#allocation47_spill] sm:$0xff] %v6483_v46 }
 0x3ec   :  { %v6485_v3 = vpop.f32.mrf.mxu1  ;;  %v3901_v45 = vpop.f32.mrf.mxu0 }
 0x3ed   :  { %3856 = vmatmul.mubr.f32.gmra.mxu1 %v7625_v0 }
 0x3ee   :  { %3997 = vmatprep.mubr.msk.f32.mxu1 %vm4211_vm0, %v7397_v60  ;;  %v3577_v53 = vpop.f32.mrf.mxu1  ;;  %v6491_v9 = vpop.f32.mrf.mxu0 }
 0x3ef   :  { %7626 = vst [vmem:[#allocation62_spill] sm:$0xff] %v6491_v9 }
 0x3f0   :  { %v6493_v13 = vpop.f32.mrf.mxu1  ;;  %v3904_v12 = vpop.f32.mrf.mxu0 }
 0x3f1   :  { %3998 = vmatmul.mubr.msk.f32.vlgmr.msra.gmra.mxu1 %vm5201_vm7, %v7627_v10  ;;  %vm7631_vm7 = vnez %v7467_v18 }
 0x3f2   :  { %4000 = vmatprep.mubr.msk.f32.mxu1 %vm4211_vm0, %v7397_v60  ;;  %v3580_v45 = vpop.f32.mrf.mxu1 }
 0x3f3   :  { %v6500_v46 = vpop.f32.mrf.mxu0 }
 0x3f4   :  { %7628 = vst [vmem:[#allocation8_spill] sm:$0xff] %v6500_v46 }
 0x3f5   :  { %4001 = vmatmul.mubr.msk.f32.gmra.mxu1 %vm5218_vm8, %v7627_v10  ;;  %v6505_v16 = vpop.f32.mrf.mxu1  ;;  %v3907_v53 = vpop.f32.mrf.mxu0  ;;  %vm7632_vm8 = vnez %v7471_v11 }
 0x3f6   :  { %4003 = vmatprep.mubr.msk.f32.mxu1 %vm4211_vm0, %v7397_v60 }
 0x3f7   :  { %v3583_v0 = vpop.f32.mrf.mxu1 }
 0x3f8   :  { %v6509_v12 = vpop.f32.mrf.mxu0 }
 0x3f9   :  { %7629 = vst [vmem:[#allocation63_spill] sm:$0xff] %v6509_v12  ;;  %4004 = vmatmul.mubr.msk.f32.gmra.mxu1 %vm5244_vm9, %v7627_v10  ;;  %vm7634_vm9 = vnez %v7476_v20 }
 0x3fa   :  { %4006 = vmatprep.mubr.msk.f32.mxu1 %vm4211_vm0, %v7397_v60  ;;  %v6516_v29 = vpop.f32.mrf.mxu1  ;;  %v3910_v24 = vpop.f32.mrf.mxu0 }
 0x3fc   :  { %v3586_v45 = vpop.f32.mrf.mxu1  ;;  %v6518_v46 = vpop.f32.mrf.mxu0 }
 0x3fd   :  { %7630 = vst [vmem:[#allocation65_spill] sm:$0xff] %v6518_v46  ;;  %4007 = vmatmul.mubr.msk.f32.gmra.mxu1 %vm7631_vm7, %v7627_v10  ;;  %vm7636_vm7 = vnez %v7480_v8 }
 0x3fe   :  { %4009 = vmatprep.mubr.msk.f32.mxu1 %vm4211_vm0, %v7397_v60  ;;  %v6525_v53 = vpop.f32.mrf.mxu1  ;;  %v3913_v32 = vpop.f32.mrf.mxu0 }
 0x400   :  { %v3589_v0 = vpop.f32.mrf.mxu1 }
 0x401   :  { %4010 = vmatmul.mubr.msk.f32.gmra.mxu1 %vm7632_vm8, %v7627_v10  ;;  %v6530_v12 = vpop.f32.mrf.mxu0  ;;  %vm7638_vm8 = vnez %v7483_v55 }
 0x402   :  { %7633 = vst [vmem:[#allocation66_spill] sm:$0xff] %v6530_v12  ;;  %4012 = vmatprep.mubr.msk.f32.mxu1 %vm4211_vm0, %v7397_v60 }
 0x403   :  { %v6534_v24 = vpop.f32.mrf.mxu1  ;;  %v3916_v18 = vpop.f32.mrf.mxu0 }
 0x405   :  { %4013 = vmatmul.mubr.msk.f32.gmra.mxu1 %vm7634_vm9, %v7627_v10  ;;  %v3592_v45 = vpop.f32.mrf.mxu1  ;;  %v6539_v46 = vpop.f32.mrf.mxu0  ;;  %vm7640_vm9 = vnez %v7485_v25 }
 0x406   :  { %7635 = vst [vmem:[#allocation68_spill] sm:$0xff] %v6539_v46  ;;  %4015 = vmatprep.mubr.msk.f32.mxu1 %vm4211_vm0, %v7397_v60 }
 0x407   :  { %v3919_v11 = vpop.f32.mrf.mxu0 }
 0x408   :  { %v6543_v32 = vpop.f32.mrf.mxu1 }
 0x409   :  { %4016 = vmatmul.mubr.msk.f32.gmra.mxu1 %vm7636_vm7, %v7627_v10  ;;  %vm7642_vm7 = vnez %v7488_v5 }
 0x40a   :  { %v3595_v0 = vpop.f32.mrf.mxu1  ;;  %v6548_v12 = vpop.f32.mrf.mxu0  ;;  %4018 = vmatprep.mubr.msk.f32.mxu1 %vm4211_vm0, %v7397_v60 }
 0x40b   :  { %7637 = vst [vmem:[#allocation70_spill] sm:$0xff] %v6548_v12 }
 0x40c   :  { %v6552_v20 = vpop.f32.mrf.mxu1  ;;  %v3922_v18 = vpop.f32.mrf.mxu0 }
 0x40d   :  { %4019 = vmatmul.mubr.msk.f32.gmra.mxu1 %vm7638_vm8, %v7627_v10  ;;  %vm7644_vm8 = vnez %v7492_v57 }
 0x40e   :  { %v3598_v45 = vpop.f32.mrf.mxu1  ;;  %4021 = vmatprep.mubr.msk.f32.mxu1 %vm4211_vm0, %v7397_v60 }
 0x40f   :  { %v6559_v11 = vpop.f32.mrf.mxu0 }
 0x410   :  { %7639 = vst [vmem:[#allocation72_spill] sm:$0xff] %v6559_v11 }
 0x411   :  { %v6561_v8 = vpop.f32.mrf.mxu1  ;;  %v3925_v0 = vpop.f32.mrf.mxu0  ;;  %4022 = vmatmul.mubr.msk.f32.gmra.mxu1 %vm7640_vm9, %v7627_v10  ;;  %vm7646_vm9 = vnez %v7496_v31 }
 0x412   :  { %4024 = vmatprep.mubr.msk.f32.mxu1 %vm4211_vm0, %v7397_v60 }
 0x413   :  { %v3601_v18 = vpop.f32.mrf.mxu1  ;;  %v6568_v12 = vpop.f32.mrf.mxu0 }
 0x414   :  { %7641 = vst [vmem:[#allocation73_spill] sm:$0xff] %v6568_v12 }
 0x415   :  { %v6570_v55 = vpop.f32.mrf.mxu1  ;;  %v3928_v45 = vpop.f32.mrf.mxu0  ;;  %4025 = vmatmul.mubr.msk.f32.gmra.mxu1 %vm7642_vm7, %v7627_v10  ;;  %vm7648_vm7 = vnez %v7500_v59 }
 0x416   :  { %4027 = vmatprep.mubr.msk.f32.mxu1 %vm4211_vm0, %v7397_v60 }
 0x417   :  { %v3604_v0 = vpop.f32.mrf.mxu1  ;;  %v6577_v11 = vpop.f32.mrf.mxu0 }
 0x418   :  { %7643 = vst [vmem:[#allocation75_spill] sm:$0xff] %v6577_v11 }
 0x419   :  { %v6579_v25 = vpop.f32.mrf.mxu1  ;;  %v3931_v46 = vpop.f32.mrf.mxu0  ;;  %4028 = vmatmul.mubr.msk.f32.gmra.mxu1 %vm7644_vm8, %v7627_v10 }
 0x41a   :  { %4030 = vmatprep.mubr.msk.f32.mxu1 %vm4211_vm0, %v7397_v60 }
 0x41b   :  { %v3607_v18 = vpop.f32.mrf.mxu1  ;;  %v6586_v45 = vpop.f32.mrf.mxu0 }
 0x41c   :  { %7645 = vst [vmem:[#allocation76_spill] sm:$0xff] %v6586_v45 }
 0x41d   :  { %v6588_v5 = vpop.f32.mrf.mxu1  ;;  %v3934_v12 = vpop.f32.mrf.mxu0  ;;  %4031 = vmatmul.mubr.msk.f32.gmra.mxu1 %vm7646_vm9, %v7627_v10 }
 0x41e   :  { %4033 = vmatprep.mubr.msk.f32.mxu1 %vm4211_vm0, %v7397_v60 }
 0x41f   :  { %v3610_v46 = vpop.f32.mrf.mxu1  ;;  %v6595_v0 = vpop.f32.mrf.mxu0 }
 0x420   :  { %7647 = vst [vmem:[#allocation30_spill] sm:$0xff] %v6595_v0 }
 0x421   :  { %v6597_v57 = vpop.f32.mrf.mxu1  ;;  %v3937_v11 = vpop.f32.mrf.mxu0  ;;  %4034 = vmatmul.mubr.msk.f32.gmra.mxu1 %vm7648_vm7, %v7627_v10 }
 0x422   :  { %4036 = vmatprep.mubr.msk.f32.mxu1 %vm4211_vm0, %v7397_v60 }
 0x423   :  { %v3613_v12 = vpop.f32.mrf.mxu1  ;;  %v6604_v18 = vpop.f32.mrf.mxu0 }
 0x424   :  { %7649 = vst [vmem:[#allocation49_spill] sm:$0xff] %v6604_v18 }
 0x425   :  { %v6606_v31 = vpop.f32.mrf.mxu1  ;;  %v3940_v45 = vpop.f32.mrf.mxu0  ;;  %4037 = vmatmul.mubr.msk.f32.gmra.mxu1 %vm7560_vm2, %v7627_v10 }
 0x426   :  { %4039 = vmatprep.mubr.msk.f32.mxu1 %vm4211_vm0, %v7397_v60 }
 0x427   :  { %v3616_v11 = vpop.f32.mrf.mxu1  ;;  %v6613_v46 = vpop.f32.mrf.mxu0 }
 0x428   :  { %7650 = vst [vmem:[#allocation32_spill] sm:$0xff] %v6613_v46 }
 0x429   :  { %v6615_v59 = vpop.f32.mrf.mxu1  ;;  %v3943_v0 = vpop.f32.mrf.mxu0  ;;  %4040 = vmatmul.mubr.msk.f32.gmra.mxu1 %vm7562_vm3, %v7627_v10 }
 0x42a   :  { %4042 = vmatprep.mubr.msk.f32.mxu1 %vm4211_vm0, %v7397_v60 }
 0x42b   :  { %v3619_v45 = vpop.f32.mrf.mxu1  ;;  %v6622_v12 = vpop.f32.mrf.mxu0 }
 0x42c   :  { %7651 = vst [vmem:[#allocation10_spill] sm:$0xff] %v6622_v12 }
 0x42d   :  { %v6624_v26 = vpop.f32.mrf.mxu1  ;;  %v3946_v18 = vpop.f32.mrf.mxu0  ;;  %4043 = vmatmul.mubr.msk.f32.gmra.mxu1 %vm7565_vm4, %v7627_v10 }
 0x42e   :  { %4045 = vmatprep.mubr.msk.f32.mxu1 %vm4211_vm0, %v7397_v60 }
 0x42f   :  { %v3622_v0 = vpop.f32.mrf.mxu1  ;;  %v6631_v46 = vpop.f32.mrf.mxu0 }
 0x430   :  { %7653 = vst [vmem:[#allocation34_spill] sm:$0xff] %v6631_v46 }
 0x431   :  { %v6633_v47 = vpop.f32.mrf.mxu1  ;;  %v3949_v9 = vpop.f32.mrf.mxu0  ;;  %4046 = vmatmul.mubr.msk.f32.gmra.mxu1 %vm7558_vm10, %v7627_v10 }
 0x432   :  { %4048 = vmatprep.mubr.msk.f32.mxu1 %vm4211_vm0, %v7397_v60 }
 0x433   :  { %v3625_v18 = vpop.f32.mrf.mxu1  ;;  %v6640_v12 = vpop.f32.mrf.mxu0 }
 0x434   :  { %7655 = vst [vmem:[#allocation12_spill] sm:$0xff] %v6640_v12 }
 0x435   :  { %v6642_v11 = vpop.f32.mrf.mxu1  ;;  %v3952_v52 = vpop.f32.mrf.mxu0  ;;  %4049 = vmatmul.mubr.msk.f32.gmra.mxu1 %vm7556_vm11, %v7627_v10 }
 0x436   :  { %4051 = vmatprep.mubr.msk.f32.mxu1 %vm4211_vm0, %v7397_v60 }
 0x437   :  { %v3628_v9 = vpop.f32.mrf.mxu1  ;;  %v6649_v46 = vpop.f32.mrf.mxu0 }
 0x438   :  { %7657 = vst [vmem:[#allocation36_spill] sm:$0xff] %v6649_v46 }
 0x439   :  { %v6651_v45 = vpop.f32.mrf.mxu1  ;;  %v3955_v14 = vpop.f32.mrf.mxu0  ;;  %4052 = vmatmul.mubr.msk.f32.gmra.mxu1 %vm7555_vm1, %v7627_v10 }
 0x43a   :  { %7658 = vst [vmem:[#allocation14_spill] sm:$0xff] %v6651_v45  ;;  %4054 = vmatprep.mubr.msk.f32.mxu1 %vm4211_vm0, %v7397_v60 }
 0x43b   :  { %v3631_v52 = vpop.f32.mrf.mxu1  ;;  %v6658_v12 = vpop.f32.mrf.mxu0 }
 0x43c   :  { %7660 = vst [vmem:[#allocation38_spill] sm:$0xff] %v6658_v12 }
 0x43d   :  { %v6660_v0 = vpop.f32.mrf.mxu1  ;;  %v3958_v50 = vpop.f32.mrf.mxu0  ;;  %4055 = vmatmul.mubr.msk.f32.gmra.mxu1 %vm7552_vm5, %v7627_v10 }
 0x43e   :  { %7661 = vst [vmem:[#allocation77_spill] sm:$0xff] %v6660_v0  ;;  %4057 = vmatprep.mubr.msk.f32.mxu1 %vm4211_vm0, %v7397_v60 }
 0x43f   :  { %v3634_v14 = vpop.f32.mrf.mxu1  ;;  %v6667_v46 = vpop.f32.mrf.mxu0 }
 0x440   :  { %7663 = vst [vmem:[#allocation16_spill] sm:$0xff] %v6667_v46  ;;  %v7669_v46 = vld [vmem:[#allocation46_spill] sm:$0xff] }
 0x441   :  { %v6669_v18 = vpop.f32.mrf.mxu1  ;;  %v3961_v61 = vpop.f32.mrf.mxu0  ;;  %4058 = vmatmul.mubr.msk.f32.gmra.mxu1 %vm7551_vm15, %v7627_v10  ;;  %v1564_v52 = vadd.f32 %v6469_v28, %v7669_v46 }
 0x442   :  { %7664 = vst [vmem:[#allocation78_spill] sm:$0xff] %v6669_v18  ;;  %4060 = vmatprep.mubr.msk.f32.mxu1 %vm4211_vm0, %v7397_v60 }
 0x443   :  { %v3637_v50 = vpop.f32.mrf.mxu1  ;;  %v6676_v12 = vpop.f32.mrf.mxu0 }
 0x444   :  { %7666 = vst [vmem:[#allocation40_spill] sm:$0xff] %v6676_v12  ;;  %v7672_v12 = vld [vmem:[#allocation51_spill] sm:$0xff]  ;;  %v1576_v50 = vadd.f32 %v6485_v3, %v6253_v34  ;;  %v1588_v34 = vadd.f32 %v6505_v16, %v6272_v4  ;;  %v7677_v3 = vld [vmem:[#allocation53_spill] sm:$0xff] }
 0x445   :  { %v6678_v9 = vpop.f32.mrf.mxu1  ;;  %v3964_v0 = vpop.f32.mrf.mxu0  ;;  %4061 = vmatmul.mubr.msk.f32.gmra.mxu1 %vm7548_vm6, %v7627_v10  ;;  %v1570_v14 = vadd.f32 %v6477_v56, %v7672_v12 }
 0x446   :  { %7667 = vst [vmem:[#allocation79_spill] sm:$0xff] %v6678_v9  ;;  %4063 = vmatprep.mubr.msk.f32.mxu1 %vm4211_vm0, %v7397_v60  ;;  %v7673_v9 = vld [vmem:[#allocation44_spill] sm:$0xff] }
 0x447   :  { %v3640_v61 = vpop.f32.mrf.mxu1  ;;  %v1812_v44 = vadd.f32 %v7673_v9, %v1564_v52 }
 0x449   :  { %v6687_v18 = vpop.f32.mrf.mxu1  ;;  %4064 = vmatmul.mubr.msk.f32.gmra.mxu1 %vm7546_vm12, %v7627_v10 }
 0x44a   :  { %7670 = vst [vmem:[#allocation18_spill] sm:$0xff] %v6687_v18  ;;  %4066 = vmatprep.mubr.msk.f32.mxu1 %vm4211_vm0, %v7397_v60 }
 0x44b   :  { %v3643_v0 = vpop.f32.mrf.mxu1 }
 0x44c   :  { %v7675_v0 = vld [vmem:[#allocation22_spill] sm:$0xff] }
 0x44d   :  { %v2068_v45 = vpop.f32.mrf.mxu1  ;;  %4067 = vmatmul.mubr.msk.f32.gmra.mxu1 %vm5767_vm13, %v7627_v10  ;;  %v1819_v18 = vadd.f32 %v7675_v0, %v1570_v14 }
 0x44e   :  { %v6700_v28 = vadd.f32 %v2068_v45, %v1812_v44  ;;  %4069 = vmatprep.mubr.msk.f32.mxu1 %vm4211_vm0, %v7397_v60  ;;  %v1582_v44 = vadd.f32 %v6493_v13, %v6262_v39  ;;  %v7676_v45 = vld [vmem:[#allocation24_spill] sm:$0xff]  ;;  %v1840_v39 = vadd.f32 %v6258_v58, %v1588_v34  ;;  %vm2868_vm0 = vcmask 588800  }
 0x44f   :  { %v3785_v46 = vpop.f32.mrf.mxu1  ;;  %v1826_v9 = vadd.f32 %v7676_v45, %v1576_v50  ;;  %3094 = vmatprep.mubr.msk.f32.mxu0 %vm2868_vm0, %v7627_v10 }
 0x450   :  { %v1833_v14 = vadd.f32 %v7677_v3, %v1582_v44  ;;  %v1618_v3 = vadd.f32 %v6552_v20, %v6331_v30  ;;  %2937 = vmatmul.mubr.f32.vlgmr.msra.gmra.mxu0 %v7627_v10 }
 0x451   :  { %v2076_v41 = vpop.f32.mrf.mxu1  ;;  %4070 = vmatmul.mubr.msk.f32.gmra.mxu1 %vm5786_vm14, %v7627_v10 }
 0x452   :  { %v6710_v56 = vadd.f32 %v2076_v41, %v1819_v18  ;;  %v1594_v18 = vadd.f32 %v6516_v29, %v6283_v63 }
 0x453   :  { %v3788_v12 = vpop.f32.mrf.mxu1 }
 0x454   :  { %v1600_v12 = vadd.f32 %v6525_v53, %v6295_v43  ;;  %v1847_v4 = vadd.f32 %v6266_v33, %v1594_v18  ;;  %v1630_v18 = vadd.f32 %v6570_v55, %v6355_v42 }
 0x455   :  { %v2084_v60 = vpop.f32.mrf.mxu1 }
 0x456   :  { %v6715_v52 = vadd.f32 %v2084_v60, %v1826_v9  ;;  %v1606_v9 = vadd.f32 %v6534_v24, %v6307_v37  ;;  %v1854_v63 = vadd.f32 %v6277_v48, %v1600_v12  ;;  %v1642_v12 = vadd.f32 %v6588_v5, %v6373_v22 }
 0x457   :  { %v3791_v61 = vpop.f32.mrf.mxu1 }
 0x458   :  { %v1612_v61 = vadd.f32 %v6543_v32, %v6319_v7  ;;  %v1861_v43 = vadd.f32 %v6289_v6, %v1606_v9  ;;  %v1875_v7 = vadd.f32 %v6313_v49, %v1618_v3  ;;  %v1654_v9 = vadd.f32 %v6606_v31, %v6389_v54 }
 0x459   :  { %v2092_v46 = vpop.f32.mrf.mxu1  ;;  %v1672_v3 = vadd.f32 %v6633_v47, %v6413_v62 }
 0x45a   :  { %v6720_v27 = vadd.f32 %v2092_v46, %v1833_v14  ;;  %v1868_v37 = vadd.f32 %v6301_v17, %v1612_v61  ;;  %v1624_v46 = vadd.f32 %v6561_v8, %v6343_v15  ;;  %v1889_v15 = vadd.f32 %v6337_v40, %v1630_v18  ;;  %v7682_v18 = vld [vmem:[#allocation71_spill] sm:$0xff] }
 0x45b   :  { %v3794_v41 = vpop.f32.mrf.mxu1 }
 0x45c   :  { %v1882_v30 = vadd.f32 %v6325_v35, %v1624_v46  ;;  %v1678_v46 = vadd.f32 %v6642_v11, %v6421_v2 }
 0x45d   :  { %v2100_v13 = vpop.f32.mrf.mxu1 }
 0x45e   :  { %v6725_v50 = vadd.f32 %v2100_v13, %v1840_v39  ;;  %v1636_v13 = vadd.f32 %v6579_v25, %v6365_v38  ;;  %v1903_v38 = vadd.f32 %v6361_v23, %v1642_v12 }
 0x45f   :  { %v3797_v0 = vpop.f32.mrf.mxu1 }
 0x460   :  { %v1896_v42 = vadd.f32 %v6349_v51, %v1636_v13 }
 0x461   :  { %v2108_v16 = vpop.f32.mrf.mxu1 }
 0x462   :  { %v6730_v44 = vadd.f32 %v2108_v16, %v1847_v4  ;;  %v1648_v16 = vadd.f32 %v6597_v57, %v6381_v21 }
 0x463   :  { %v3800_v45 = vpop.f32.mrf.mxu1 }
 0x464   :  { %v1910_v22 = vadd.f32 %v6369_v36, %v1648_v16  ;;  %v7688_v16 = vld [vmem:[#allocation54_spill] sm:$0xff] }
 0x465   :  { %v2116_v29 = vpop.f32.mrf.mxu1 }
 0x466   :  { %v6735_v58 = vadd.f32 %v2116_v29, %v1854_v63  ;;  %v1660_v29 = vadd.f32 %v6615_v59, %v6397_v19 }
 0x467   :  { %v3803_v60 = vpop.f32.mrf.mxu1 }
 0x468   :  { %v7678_v60 = vld [vmem:[#allocation55_spill] sm:$0xff] }
 0x469   :  { %v2124_v53 = vpop.f32.mrf.mxu1  ;;  %v1917_v21 = vadd.f32 %v7678_v60, %v1654_v9  ;;  %v7692_v60 = vld [vmem:[#allocation79_spill] sm:$0xff] }
 0x46a   :  { %v6740_v33 = vadd.f32 %v2124_v53, %v1861_v43  ;;  %v1666_v43 = vadd.f32 %v6624_v26, %v6405_v1  ;;  %v7679_v53 = vld [vmem:[#allocation57_spill] sm:$0xff] }
 0x46b   :  { %v3806_v34 = vpop.f32.mrf.mxu1  ;;  %v1924_v54 = vadd.f32 %v7679_v53, %v1660_v29  ;;  %v7691_v29 = vld [vmem:[#allocation58_spill] sm:$0xff] }
 0x46d   :  { %v2132_v24 = vpop.f32.mrf.mxu1 }
 0x46e   :  { %v6745_v48 = vadd.f32 %v2132_v24, %v1868_v37  ;;  %v7680_v37 = vld [vmem:[#allocation59_spill] sm:$0xff] }
 0x46f   :  { %v3809_v14 = vpop.f32.mrf.mxu1  ;;  %v1931_v19 = vadd.f32 %v7680_v37, %v1666_v43  ;;  %v7696_v37 = vld [vmem:[#allocation52_spill] sm:$0xff] }
 0x471   :  { %v2140_v32 = vpop.f32.mrf.mxu1 }
 0x472   :  { %v6750_v6 = vadd.f32 %v2140_v32, %v1875_v7  ;;  %v7681_v7 = vld [vmem:[#allocation61_spill] sm:$0xff] }
 0x473   :  { %v3812_v41 = vpop.f32.mrf.mxu1  ;;  %v1938_v1 = vadd.f32 %v7681_v7, %v1672_v3 }
 0x475   :  { %v2148_v20 = vpop.f32.mrf.mxu1 }
 0x476   :  { %v6755_v17 = vadd.f32 %v2148_v20, %v1882_v30  ;;  %v7683_v30 = vld [vmem:[#allocation14_spill] sm:$0xff] }
 0x477   :  { %v3815_v39 = vpop.f32.mrf.mxu1  ;;  %v1684_v20 = vadd.f32 %v7683_v30, %v7682_v18  ;;  %v7698_v18 = vld [vmem:[#allocation48_spill] sm:$0xff] }
 0x478   :  { %v7684_v39 = vld [vmem:[#allocation64_spill] sm:$0xff]  ;;  %v2380_v30 = vadd.f32 %v7698_v18, %v6700_v28  ;;  %v4186_v28 = vld [vmem:[%s7144_s0 + $0x8] sm:$0xff] }
 0x479   :  { %v2156_v8 = vpop.f32.mrf.mxu1  ;;  %v1945_v62 = vadd.f32 %v7684_v39, %v1678_v46  ;;  %v7697_v46 = vld [vmem:[#allocation56_spill] sm:$0xff] }
 0x47a   :  { %v6760_v49 = vadd.f32 %v2156_v8, %v1889_v15  ;;  %v7685_v8 = vld [vmem:[#allocation50_spill] sm:$0xff] }
 0x47b   :  { %v3818_v0 = vpop.f32.mrf.mxu1 }
 0x47c   :  { %v7686_v0 = vld [vmem:[#allocation77_spill] sm:$0xff] }
 0x47d   :  { %v2164_v55 = vpop.f32.mrf.mxu1  ;;  %v1690_v12 = vadd.f32 %v7686_v0, %v7685_v8  ;;  %v4185_v0 = vld [vmem:[%s7144_s0] sm:$0xff] }
 0x47e   :  { %v6765_v35 = vadd.f32 %v2164_v55, %v1896_v42  ;;  %v7687_v42 = vld [vmem:[#allocation67_spill] sm:$0xff] }
 0x47f   :  { %v3821_v4 = vpop.f32.mrf.mxu1  ;;  %v1952_v2 = vadd.f32 %v7687_v42, %v1684_v20 }
 0x481   :  { %v2172_v25 = vpop.f32.mrf.mxu1 }
 0x482   :  { %v6770_v40 = vadd.f32 %v2172_v25, %v1903_v38  ;;  %v7689_v38 = vld [vmem:[#allocation78_spill] sm:$0xff] }
 0x483   :  { %v3824_v45 = vpop.f32.mrf.mxu1  ;;  %v1696_v25 = vadd.f32 %v7689_v38, %v7688_v16 }
 0x484   :  { %v7690_v45 = vld [vmem:[#allocation69_spill] sm:$0xff] }
 0x485   :  { %v2180_v5 = vpop.f32.mrf.mxu1  ;;  %v1959_v9 = vadd.f32 %v7690_v45, %v1690_v12 }
 0x486   :  { %v6775_v51 = vadd.f32 %v2180_v5, %v1910_v22 }
 0x487   :  { %v3827_v63 = vpop.f32.mrf.mxu1 }
 0x489   :  { %v2188_v57 = vpop.f32.mrf.mxu1 }
 0x48a   :  { %v6780_v23 = vadd.f32 %v2188_v57, %v1917_v21  ;;  %v1702_v21 = vadd.f32 %v7692_v60, %v7691_v29  ;;  %v7693_v57 = vld [vmem:[#allocation74_spill] sm:$0xff]  ;;  %v7701_v60 = vld [vmem:[#allocation47_spill] sm:$0xff] }
 0x48b   :  { %v3830_v61 = vpop.f32.mrf.mxu1 }
 0x48c   :  { %v1966_v61 = vadd.f32 %v7693_v57, %v1696_v25 }
 0x48d   :  { %v2196_v31 = vpop.f32.mrf.mxu1 }
 0x48e   :  { %v6785_v36 = vadd.f32 %v2196_v31, %v1924_v54  ;;  %v7694_v31 = vld [vmem:[#allocation28_spill] sm:$0xff] }
 0x48f   :  { %v3833_v34 = vpop.f32.mrf.mxu1 }
 0x490   :  { %v7695_v34 = vld [vmem:[#allocation18_spill] sm:$0xff] }
 0x491   :  { %v2204_v59 = vpop.f32.mrf.mxu1  ;;  %v1708_v3 = vadd.f32 %v7695_v34, %v7694_v31  ;;  %v4188_v31 = vld [vmem:[%s7144_s0 + $0x18] sm:$0xff] }
 0x492   :  { %v6790_v24 = vadd.f32 %v2204_v59, %v1931_v19  ;;  %v1973_v19 = vadd.f32 %v7696_v37, %v1702_v21  ;;  %v2398_v21 = vadd.f32 %v7701_v60, %v6720_v27 }
 0x493   :  { %v3836_v14 = vpop.f32.mrf.mxu1  ;;  %v1980_v7 = vadd.f32 %v7697_v46, %v1708_v3  ;;  %v7702_v3 = vld [vmem:[#allocation62_spill] sm:$0xff] }
 0x494   :  { %v2404_v37 = vadd.f32 %v7702_v3, %v6725_v50 }
 0x495   :  { %v2212_v26 = vpop.f32.mrf.mxu1 }
 0x496   :  { %v6795_v32 = vadd.f32 %v2212_v26, %v1938_v1 }
 0x497   :  { %v3839_v41 = vpop.f32.mrf.mxu1 }
 0x499   :  { %v2220_v47 = vpop.f32.mrf.mxu1 }
 0x49a   :  { %v6800_v13 = vadd.f32 %v2220_v47, %v1945_v62  ;;  %v7699_v47 = vld [vmem:[#allocation60_spill] sm:$0xff] }
 0x49b   :  { %v3842_v15 = vpop.f32.mrf.mxu1 }
 0x49c   :  { %v2386_v15 = vadd.f32 %v7699_v47, %v6710_v56  ;;  %v4190_v47 = vld [vmem:[%s7144_s0 + $0x28] sm:$0xff] }
 0x49d   :  { %v2228_v11 = vpop.f32.mrf.mxu1 }
 0x49e   :  { %v6805_v55 = vadd.f32 %v2228_v11, %v1952_v2 }
 0x49f   :  { %v3845_v4 = vpop.f32.mrf.mxu1 }
 0x4a0   :  { %v7700_v4 = vld [vmem:[#allocation6_spill] sm:$0xff] }
 0x4a1   :  { %v2236_v22 = vpop.f32.mrf.mxu1  ;;  %v2392_v56 = vadd.f32 %v7700_v4, %v6715_v52 }
 0x4a2   :  { %v6812_v5 = vadd.f32 %v2236_v22, %v1959_v9 }
 0x4a3   :  { %v3848_v63 = vpop.f32.mrf.mxu1 }
 0x4a4   :  { %v4187_v63 = vld [vmem:[%s7144_s0 + $0x10] sm:$0xff] }
 0x4a5   :  { %v2244_v43 = vpop.f32.mrf.mxu1 }
 0x4a6   :  { %v6817_v53 = vadd.f32 %v2244_v43, %v1966_v61 }
 0x4a7   :  { %v3851_v54 = vpop.f32.mrf.mxu1 }
 0x4a9   :  { %v2252_v59 = vpop.f32.mrf.mxu1 }
 0x4aa   :  { %v6822_v10 = vadd.f32 %v2252_v59, %v1973_v19 }
 0x4ab   :  { %v3854_v14 = vpop.f32.mrf.mxu1 }
 0x4ad   :  { %v2260_v1 = vpop.f32.mrf.mxu1 }
 0x4ae   :  { %v6825_v26 = vadd.f32 %v2260_v1, %v1980_v7  ;;  %v4189_v7 = vld [vmem:[%s7144_s0 + $0x20] sm:$0xff] }
 0x4af   :  { %v3857_v41 = vpop.f32.mrf.mxu1 }
 0x4b0   :  { %v7703_v41 = vld [vmem:[#allocation8_spill] sm:$0xff] }
 0x4b1   :  { %v2610_v20 = vpop.f32.mrf.mxu1  ;;  %v2410_v18 = vadd.f32 %v7703_v41, %v6730_v44 }
 0x4b2   :  { %v2611_v39 = vadd.f32 %v2610_v20, %v2380_v30 }
 0x4b3   :  { %v3999_v62 = vpop.f32.mrf.mxu1 }
 0x4b4   :  { %2758 = vst [vmem:[%s7148_s4] sm:$0xff] %v2611_v39  ;;  %v2783_v12 = vsub.f32 %v2611_v39, %v4185_v0 }
 0x4b5   :  { %v2616_v8 = vpop.f32.mrf.mxu1 }
 0x4b6   :  { %v2617_v42 = vadd.f32 %v2616_v8, %v2386_v15  ;;  %v2810_v38 = vmul.f32 %v2783_v12, %v2783_v12  ;;  %v7704_v8 = vld [vmem:[#allocation63_spill] sm:$0xff] }
 0x4b7   :  { %v4002_v2 = vpop.f32.mrf.mxu1  ;;  %v2416_v0 = vadd.f32 %v7704_v8, %v6735_v58 }
 0x4b8   :  { %2759 = vst [vmem:[%s7148_s4 + $0x8] sm:$0xff] %v2617_v42  ;;  %v2784_v11 = vsub.f32 %v2617_v42, %v4186_v28 }
 0x4b9   :  { %v2622_v16 = vpop.f32.mrf.mxu1 }
 0x4ba   :  { %v2811_v25 = vmul.f32 %v2784_v11, %v2784_v11  ;;  %v2623_v45 = vadd.f32 %v2622_v16, %v2392_v56  ;;  %v4191_v11 = vld [vmem:[%s7144_s0 + $0x30] sm:$0xff]  ;;  %v7705_v56 = vld [vmem:[#allocation65_spill] sm:$0xff] }
 0x4bb   :  { %v4005_v9 = vpop.f32.mrf.mxu1  ;;  %v2422_v16 = vadd.f32 %v7705_v56, %v6740_v33 }
 0x4bc   :  { %v2835_v22 = vadd.f32 %v2811_v25, %v2810_v38  ;;  %2760 = vst [vmem:[%s7148_s4 + $0x10] sm:$0xff] %v2623_v45  ;;  %v2785_v29 = vsub.f32 %v2623_v45, %v4187_v63 }
 0x4bd   :  { %v2628_v57 = vpop.f32.mrf.mxu1 }
 0x4be   :  { %v2812_v52 = vmul.f32 %v2785_v29, %v2785_v29  ;;  %v2629_v61 = vadd.f32 %v2628_v57, %v2398_v21  ;;  %v7706_v29 = vld [vmem:[#allocation66_spill] sm:$0xff] }
 0x4bf   :  { %v4008_v43 = vpop.f32.mrf.mxu1  ;;  %v2428_v60 = vadd.f32 %v7706_v29, %v6745_v48  ;;  %v4198_v29 = vld [vmem:[%s7144_s0 + $0x68] sm:$0xff] }
 0x4c0   :  { %v2836_v54 = vadd.f32 %v2835_v22, %v2812_v52  ;;  %2761 = vst [vmem:[%s7148_s4 + $0x18] sm:$0xff] %v2629_v61  ;;  %v2786_v34 = vsub.f32 %v2629_v61, %v4188_v31  ;;  %v4192_v22 = vld [vmem:[%s7144_s0 + $0x38] sm:$0xff]  ;;  %v4193_v43 = vld [vmem:[%s7144_s0 + $0x40] sm:$0xff]  ;;  %v7707_v31 = vld [vmem:[#allocation68_spill] sm:$0xff] }
 0x4c1   :  { %v2634_v19 = vpop.f32.mrf.mxu1 }
 0x4c2   :  { %v2813_v59 = vmul.f32 %v2786_v34, %v2786_v34  ;;  %v2635_v27 = vadd.f32 %v2634_v19, %v2404_v37  ;;  %v2434_v34 = vadd.f32 %v7707_v31, %v6750_v6 }
 0x4c3   :  { %v4011_v14 = vpop.f32.mrf.mxu1 }
 0x4c4   :  { %v2837_v46 = vadd.f32 %v2836_v54, %v2813_v59  ;;  %2762 = vst [vmem:[%s7148_s4 + $0x20] sm:$0xff] %v2635_v27  ;;  %v2787_v1 = vsub.f32 %v2635_v27, %v4189_v7  ;;  %v4194_v27 = vld [vmem:[%s7144_s0 + $0x48] sm:$0xff] }
 0x4c5   :  { %v2640_v30 = vpop.f32.mrf.mxu1 }
 0x4c6   :  { %v2814_v20 = vmul.f32 %v2787_v1, %v2787_v1  ;;  %v2641_v50 = vadd.f32 %v2640_v30, %v2410_v18 }
 0x4c7   :  { %v4014_v39 = vpop.f32.mrf.mxu1 }
 0x4c8   :  { %v2838_v62 = vadd.f32 %v2837_v46, %v2814_v20  ;;  %2763 = vst [vmem:[%s7148_s4 + $0x28] sm:$0xff] %v2641_v50  ;;  %v2788_v15 = vsub.f32 %v2641_v50, %v4190_v47  ;;  %v7708_v46 = vld [vmem:[#allocation70_spill] sm:$0xff]  ;;  %v4195_v20 = vld [vmem:[%s7144_s0 + $0x50] sm:$0xff] }
 0x4c9   :  { %v2646_v12 = vpop.f32.mrf.mxu1  ;;  %v2440_v7 = vadd.f32 %v7708_v46, %v6755_v17  ;;  %v7709_v39 = vld [vmem:[#allocation72_spill] sm:$0xff]  ;;  %v7714_v46 = vld [vmem:[#allocation49_spill] sm:$0xff] }
 0x4ca   :  { %v2815_v42 = vmul.f32 %v2788_v15, %v2788_v15  ;;  %v2647_v44 = vadd.f32 %v2646_v12, %v2416_v0  ;;  %v4196_v12 = vld [vmem:[%s7144_s0 + $0x58] sm:$0xff] }
 0x4cb   :  { %v4017_v2 = vpop.f32.mrf.mxu1 }
 0x4cc   :  { %v2839_v28 = vadd.f32 %v2838_v62, %v2815_v42  ;;  %2764 = vst [vmem:[%s7148_s4 + $0x30] sm:$0xff] %v2647_v44  ;;  %v2789_v4 = vsub.f32 %v2647_v44, %v4191_v11  ;;  %v2446_v62 = vadd.f32 %v7709_v39, %v6760_v49  ;;  %v7710_v44 = vld [vmem:[#allocation73_spill] sm:$0xff] }
 0x4cd   :  { %v2652_v38 = vpop.f32.mrf.mxu1  ;;  %v2452_v2 = vadd.f32 %v7710_v44, %v6765_v35 }
 0x4ce   :  { %v2816_v25 = vmul.f32 %v2789_v4, %v2789_v4  ;;  %v2653_v58 = vadd.f32 %v2652_v38, %v2422_v16  ;;  %v4197_v16 = vld [vmem:[%s7144_s0 + $0x60] sm:$0xff] }
 0x4cf   :  { %v4020_v45 = vpop.f32.mrf.mxu1 }
 0x4d0   :  { %v2840_v9 = vadd.f32 %v2839_v28, %v2816_v25  ;;  %2765 = vst [vmem:[%s7148_s4 + $0x38] sm:$0xff] %v2653_v58  ;;  %v2790_v63 = vsub.f32 %v2653_v58, %v4192_v22  ;;  %v7711_v25 = vld [vmem:[#allocation75_spill] sm:$0xff] }
 0x4d1   :  { %v2658_v21 = vpop.f32.mrf.mxu1  ;;  %v2458_v58 = vadd.f32 %v7711_v25, %v6770_v40 }
 0x4d2   :  { %v2817_v57 = vmul.f32 %v2790_v63, %v2790_v63  ;;  %v2659_v33 = vadd.f32 %v2658_v21, %v2428_v60  ;;  %v7712_v21 = vld [vmem:[#allocation76_spill] sm:$0xff] }
 0x4d3   :  { %v4023_v52 = vpop.f32.mrf.mxu1 }
 0x4d4   :  { %v2841_v61 = vadd.f32 %v2840_v9, %v2817_v57  ;;  %2766 = vst [vmem:[%s7148_s4 + $0x40] sm:$0xff] %v2659_v33  ;;  %v2791_v54 = vsub.f32 %v2659_v33, %v4193_v43  ;;  %v2464_v57 = vadd.f32 %v7712_v21, %v6775_v51 }
 0x4d5   :  { %v2664_v3 = vpop.f32.mrf.mxu1 }
 0x4d6   :  { %v2818_v37 = vmul.f32 %v2791_v54, %v2791_v54  ;;  %v2665_v48 = vadd.f32 %v2664_v3, %v2434_v34  ;;  %v4199_v54 = vld [vmem:[%s7144_s0 + $0x70] sm:$0xff]  ;;  %v7713_v34 = vld [vmem:[#allocation30_spill] sm:$0xff] }
 0x4d7   :  { %v4026_v19 = vpop.f32.mrf.mxu1  ;;  %v2470_v3 = vadd.f32 %v7713_v34, %v6780_v23  ;;  %v7721_v34 = vld [vmem:[#allocation3_spill] sm:$0xff] }
 0x4d8   :  { %v2842_v59 = vadd.f32 %v2841_v61, %v2818_v37  ;;  %2767 = vst [vmem:[%s7148_s4 + $0x48] sm:$0xff] %v2665_v48  ;;  %v2792_v14 = vsub.f32 %v2665_v48, %v4194_v27  ;;  %v4200_v27 = vld [vmem:[%s7144_s0 + $0x78] sm:$0xff] }
 0x4d9   :  { %v2670_v1 = vpop.f32.mrf.mxu1 }
 0x4da   :  { %v2819_v41 = vmul.f32 %v2792_v14, %v2792_v14  ;;  %v2671_v6 = vadd.f32 %v2670_v1, %v2440_v7  ;;  %v2476_v7 = vadd.f32 %v7714_v46, %v6785_v36 }
 0x4db   :  { %v4029_v18 = vpop.f32.mrf.mxu1 }
 0x4dc   :  { %v2843_v30 = vadd.f32 %v2842_v59, %v2819_v41  ;;  %2768 = vst [vmem:[%s7148_s4 + $0x50] sm:$0xff] %v2671_v6  ;;  %v2793_v50 = vsub.f32 %v2671_v6, %v4195_v20 }
 0x4dd   :  { %v2676_v47 = vpop.f32.mrf.mxu1 }
 0x4de   :  { %v2820_v15 = vmul.f32 %v2793_v50, %v2793_v50  ;;  %v2677_v17 = vadd.f32 %v2676_v47, %v2446_v62  ;;  %v7715_v50 = vld [vmem:[#allocation32_spill] sm:$0xff] }
 0x4df   :  { %v4032_v8 = vpop.f32.mrf.mxu1  ;;  %v2482_v39 = vadd.f32 %v7715_v50, %v6790_v24 }
 0x4e0   :  { %v2844_v0 = vadd.f32 %v2843_v30, %v2820_v15  ;;  %2769 = vst [vmem:[%s7148_s4 + $0x58] sm:$0xff] %v2677_v17  ;;  %v2794_v42 = vsub.f32 %v2677_v17, %v4196_v12  ;;  %v4201_v30 = vld [vmem:[%s7144_s0 + $0x80] sm:$0xff]  ;;  %v4202_v8 = vld [vmem:[%s7144_s0 + $0x88] sm:$0xff] }
 0x4e1   :  { %v2682_v28 = vpop.f32.mrf.mxu1  ;;  %v7716_v12 = vld [vmem:[#allocation10_spill] sm:$0xff] }
 0x4e2   :  { %v2821_v11 = vmul.f32 %v2794_v42, %v2794_v42  ;;  %v2683_v49 = vadd.f32 %v2682_v28, %v2452_v2  ;;  %v2488_v42 = vadd.f32 %v7716_v12, %v6795_v32 }
 0x4e3   :  { %v4035_v4 = vpop.f32.mrf.mxu1 }
 0x4e4   :  { %v2845_v56 = vadd.f32 %v2844_v0, %v2821_v11  ;;  %2770 = vst [vmem:[%s7148_s4 + $0x60] sm:$0xff] %v2683_v49  ;;  %v2795_v38 = vsub.f32 %v2683_v49, %v4197_v16  ;;  %v4203_v49 = vld [vmem:[%s7144_s0 + $0x90] sm:$0xff] }
 0x4e5   :  { %v2688_v45 = vpop.f32.mrf.mxu1 }
 0x4e6   :  { %v2822_v9 = vmul.f32 %v2795_v38, %v2795_v38  ;;  %v2689_v35 = vadd.f32 %v2688_v45, %v2458_v58 }
 0x4e7   :  { %v4038_v22 = vpop.f32.mrf.mxu1 }
 0x4e8   :  { %v2846_v63 = vadd.f32 %v2845_v56, %v2822_v9  ;;  %2771 = vst [vmem:[%s7148_s4 + $0x68] sm:$0xff] %v2689_v35  ;;  %v2796_v60 = vsub.f32 %v2689_v35, %v4198_v29  ;;  %v7717_v56 = vld [vmem:[#allocation34_spill] sm:$0xff]  ;;  %v4204_v9 = vld [vmem:[%s7144_s0 + $0x98] sm:$0xff]  ;;  %v7718_v22 = vld [vmem:[#allocation12_spill] sm:$0xff] }
 0x4e9   :  { %v2694_v33 = vpop.f32.mrf.mxu1  ;;  %v2494_v16 = vadd.f32 %v7717_v56, %v6800_v13  ;;  %v7729_v56 = vld [vmem:[#allocation29_spill] sm:$0xff] }
 0x4ea   :  { %v2823_v52 = vmul.f32 %v2796_v60, %v2796_v60  ;;  %v2695_v40 = vadd.f32 %v2694_v33, %v2464_v57  ;;  %v4205_v33 = vld [vmem:[%s7144_s0 + $0xa0] sm:$0xff] }
 0x4eb   :  { %v4041_v61 = vpop.f32.mrf.mxu1 }
 0x4ec   :  { %v2847_v43 = vadd.f32 %v2846_v63, %v2823_v52  ;;  %2772 = vst [vmem:[%s7148_s4 + $0x70] sm:$0xff] %v2695_v40  ;;  %v2797_v31 = vsub.f32 %v2695_v40, %v4199_v54  ;;  %v2500_v63 = vadd.f32 %v7718_v22, %v6805_v55  ;;  %v7719_v40 = vld [vmem:[#allocation36_spill] sm:$0xff] }
 0x4ed   :  { %v2700_v37 = vpop.f32.mrf.mxu1  ;;  %v2506_v61 = vadd.f32 %v7719_v40, %v6812_v5  ;;  %v7735_v40 = vld [vmem:[#allocation35_spill] sm:$0xff] }
 0x4ee   :  { %v2824_v48 = vmul.f32 %v2797_v31, %v2797_v31  ;;  %v2701_v51 = vadd.f32 %v2700_v37, %v2470_v3  ;;  %v7720_v31 = vld [vmem:[#allocation25_spill] sm:$0xff] }
 0x4ef   :  { %v4044_v19 = vpop.f32.mrf.mxu1  ;;  %v411_v3 = vsub.f32 %v7721_v34, %v7720_v31  ;;  %v7738_v31 = vld [vmem:[#allocation15_spill] sm:$0xff] }
 0x4f0   :  { %v2848_v59 = vadd.f32 %v2847_v43, %v2824_v48  ;;  %2773 = vst [vmem:[%s7148_s4 + $0x78] sm:$0xff] %v2701_v51  ;;  %v2798_v14 = vsub.f32 %v2701_v51, %v4200_v27  ;;  %v4206_v51 = vld [vmem:[%s7144_s0 + $0xa8] sm:$0xff] }
 0x4f1   :  { %v2706_v1 = vpop.f32.mrf.mxu1 }
 0x4f2   :  { %v2825_v41 = vmul.f32 %v2798_v14, %v2798_v14  ;;  %v2707_v23 = vadd.f32 %v2706_v1, %v2476_v7  ;;  %v437_v7 = vmul.f32 1.442695, %v411_v3  ;;  %v7723_v1 = vld [vmem:[#allocation26_spill] sm:$0xff] }
 0x4f3   :  { %v4047_v6 = vpop.f32.mrf.mxu1 }
 0x4f4   :  { %v2849_v18 = vadd.f32 %v2848_v59, %v2825_v41  ;;  %2774 = vst [vmem:[%s7148_s4 + $0x80] sm:$0xff] %v2707_v23  ;;  %v2799_v20 = vsub.f32 %v2707_v23, %v4201_v30  ;;  %v7722_v59 = vld [vmem:[#allocation38_spill] sm:$0xff]  ;;  %v7724_v41 = vld [vmem:[#allocation4_spill] sm:$0xff]  ;;  %4137 = vpow2.f32 %v437_v7 }
 0x4f5   :  { %v2712_v62 = vpop.f32.mrf.mxu1  ;;  %v2512_v5 = vadd.f32 %v7722_v59, %v6817_v53  ;;  %v413_v23 = vsub.f32 %v7724_v41, %v7723_v1  ;;  %v4207_v30 = vld [vmem:[%s7144_s0 + $0xb0] sm:$0xff]  ;;  %v7743_v41 = vld [vmem:[#allocation43_spill] sm:$0xff] }
 0x4f6   :  { %v2826_v47 = vmul.f32 %v2799_v20, %v2799_v20  ;;  %v2713_v36 = vadd.f32 %v2712_v62, %v2482_v39  ;;  %v7725_v53 = vld [vmem:[#allocation16_spill] sm:$0xff] }
 0x4f7   :  { %v4050_v15 = vpop.f32.mrf.mxu1  ;;  %v2518_v50 = vadd.f32 %v7725_v53, %v6822_v10  ;;  %v7728_v10 = vld [vmem:[#allocation40_spill] sm:$0xff]  ;;  %v7746_v53 = vld [vmem:[#allocation23_spill] sm:$0xff] }
 0x4f8   :  { %v2850_v17 = vadd.f32 %v2849_v18, %v2826_v47  ;;  %2775 = vst [vmem:[%s7148_s4 + $0x88] sm:$0xff] %v2713_v36  ;;  %v2800_v0 = vsub.f32 %v2713_v36, %v4202_v8  ;;  %v441_v36 = vmul.f32 1.442695, %v413_v23  ;;  %v7727_v8 = vld [vmem:[#allocation5_spill] sm:$0xff] }
 0x4f9   :  { %v2718_v44 = vpop.f32.mrf.mxu1  ;;  %v7744_v23 = vld [vmem:[#allocation21_spill] sm:$0xff] }
 0x4fa   :  { %v2827_v2 = vmul.f32 %v2800_v0, %v2800_v0  ;;  %v2719_v24 = vadd.f32 %v2718_v44, %v2488_v42  ;;  %v4208_v42 = vld [vmem:[%s7144_s0 + $0xb8] sm:$0xff]  ;;  %4139 = vpow2.f32 %v441_v36 }
 0x4fb   :  { %v4053_v28 = vpop.f32.mrf.mxu1 }
 0x4fc   :  { %v2851_v11 = vadd.f32 %v2850_v17, %v2827_v2  ;;  %2776 = vst [vmem:[%s7148_s4 + $0x90] sm:$0xff] %v2719_v24  ;;  %v2801_v4 = vsub.f32 %v2719_v24, %v4203_v49  ;;  %v7726_v17 = vld [vmem:[#allocation27_spill] sm:$0xff]  ;;  %v2524_v2 = vadd.f32 %v7728_v10, %v6825_v26 }
 0x4fd   :  { %v2724_v38 = vpop.f32.mrf.mxu1  ;;  %v415_v0 = vsub.f32 %v7727_v8, %v7726_v17 }
 0x4fe   :  { %v2828_v25 = vmul.f32 %v2801_v4, %v2801_v4  ;;  %v2725_v32 = vadd.f32 %v2724_v38, %v2494_v16  ;;  %v7730_v16 = vld [vmem:[#allocation7_spill] sm:$0xff] }
 0x4ff   :  { %v4056_v58 = vpop.f32.mrf.mxu1  ;;  %v445_v4 = vmul.f32 1.442695, %v415_v0  ;;  %v417_v38 = vsub.f32 %v7730_v16, %v7729_v56 }
 0x500   :  { %v2852_v45 = vadd.f32 %v2851_v11, %v2828_v25  ;;  %2777 = vst [vmem:[%s7148_s4 + $0x98] sm:$0xff] %v2725_v32  ;;  %v2802_v35 = vsub.f32 %v2725_v32, %v4204_v9  ;;  %v4209_v25 = vld [vmem:[%s7144_s0 + $0xc0] sm:$0xff]  ;;  %v7731_v9 = vld [vmem:[#allocation31_spill] sm:$0xff] }
 0x501   :  { %v2730_v29 = vpop.f32.mrf.mxu1  ;;  %4141 = vpow2.f32 %v445_v4 }
 0x502   :  { %v2829_v60 = vmul.f32 %v2802_v35, %v2802_v35  ;;  %v2731_v13 = vadd.f32 %v2730_v29, %v2500_v63  ;;  %v7732_v35 = vld [vmem:[#allocation9_spill] sm:$0xff]  ;;  %v7037_v29 = vpop.eup %4137 }
 0x503   :  { %v4059_v21 = vpop.f32.mrf.mxu1  ;;  %v419_v22 = vsub.f32 %v7732_v35, %v7731_v9 }
 0x504   :  { %v2853_v57 = vadd.f32 %v2852_v45, %v2829_v60  ;;  %2778 = vst [vmem:[%s7148_s4 + $0xa0] sm:$0xff] %v2731_v13  ;;  %v2803_v52 = vsub.f32 %v2731_v13, %v4205_v33  ;;  %v449_v45 = vmul.f32 1.442695, %v417_v38  ;;  %v7733_v13 = vld [vmem:[#allocation33_spill] sm:$0xff]  ;;  %v7734_v21 = vld [vmem:[#allocation11_spill] sm:$0xff] }
 0x505   :  { %v2736_v43 = vpop.f32.mrf.mxu1  ;;  %v453_v60 = vmul.f32 1.442695, %v419_v22 }
 0x506   :  { %v2830_v54 = vmul.f32 %v2803_v52, %v2803_v52  ;;  %v2737_v55 = vadd.f32 %v2736_v43, %v2506_v61  ;;  %4143 = vpow2.f32 %v449_v45  ;;  %v7736_v61 = vld [vmem:[#allocation13_spill] sm:$0xff] }
 0x507   :  { %v4062_v37 = vpop.f32.mrf.mxu1  ;;  %v7042_v33 = vpop.eup %4139  ;;  %4145 = vpow2.f32 %v453_v60  ;;  %v423_v43 = vsub.f32 %v7736_v61, %v7735_v40 }
 0x508   :  { %v2854_v48 = vadd.f32 %v2853_v57, %v2830_v54  ;;  %2779 = vst [vmem:[%s7148_s4 + $0xa8] sm:$0xff] %v2737_v55  ;;  %v2804_v19 = vsub.f32 %v2737_v55, %v4206_v51  ;;  %v421_v57 = vsub.f32 %v7734_v21, %v7733_v13  ;;  %v7737_v55 = vld [vmem:[#allocation37_spill] sm:$0xff] }
 0x509   :  { %v2742_v27 = vpop.f32.mrf.mxu1  ;;  %v461_v54 = vmul.f32 1.442695, %v423_v43  ;;  %v425_v34 = vsub.f32 %v7738_v31, %v7737_v55  ;;  %v7740_v51 = vld [vmem:[#allocation17_spill] sm:$0xff] }
 0x50a   :  { %v2831_v14 = vmul.f32 %v2804_v19, %v2804_v19  ;;  %v2743_v46 = vadd.f32 %v2742_v27, %v2512_v5  ;;  %v457_v52 = vmul.f32 1.442695, %v421_v57  ;;  %v7741_v27 = vld [vmem:[#allocation41_spill] sm:$0xff] }
 0x50b   :  { %v4065_v6 = vpop.f32.mrf.mxu1  ;;  %v465_v37 = vmul.f32 1.442695, %v425_v34 }
 0x50c   :  { %v2855_v18 = vadd.f32 %v2854_v48, %v2831_v14  ;;  %2780 = vst [vmem:[%s7148_s4 + $0xb0] sm:$0xff] %v2743_v46  ;;  %v2805_v20 = vsub.f32 %v2743_v46, %v4207_v30  ;;  %4147 = vpow2.f32 %v457_v52  ;;  %v7739_v48 = vld [vmem:[#allocation39_spill] sm:$0xff]  ;;  %v431_v6 = vsub.f32 %v7744_v23, %v7743_v41 }
 0x50d   :  { %v2748_v39 = vpop.f32.mrf.mxu1  ;;  %4149 = vpow2.f32 %v461_v54  ;;  %v427_v19 = vsub.f32 %v7740_v51, %v7739_v48  ;;  %v7742_v14 = vld [vmem:[#allocation19_spill] sm:$0xff]  ;;  %v7747_v51 = vlaneseq }
 0x50e   :  { %v2832_v62 = vmul.f32 %v2805_v20, %v2805_v20  ;;  %v2749_v47 = vadd.f32 %v2748_v39, %v2518_v50  ;;  %v7049_v3 = vpop.eup %4141  ;;  %4151 = vpow2.f32 %v465_v37  ;;  %v429_v46 = vsub.f32 %v7742_v14, %v7741_v27  ;;  %v7745_v20 = vld [vmem:[#allocation45_spill] sm:$0xff]  ;;  %v7748_v27 = vld [vmem:[#allocation2_spill] sm:$0xff] }
 0x50f   :  { %v4068_v15 = vpop.f32.mrf.mxu1  ;;  %v469_v5 = vmul.f32 1.442695, %v427_v19  ;;  %v477_v30 = vmul.f32 1.442695, %v431_v6  ;;  %v433_v50 = vsub.f32 %v7746_v53, %v7745_v20  ;;  %v2809_v19 = vshrl.u32 %v7747_v51, 7 }
 0x510   :  { %v2856_v12 = vadd.f32 %v2855_v18, %v2832_v62  ;;  %2781 = vst [vmem:[%s7148_s4 + $0xb8] sm:$0xff] %v2749_v47  ;;  %v2806_v44 = vsub.f32 %v2749_v47, %v4208_v42  ;;  %v473_v1 = vmul.f32 1.442695, %v429_v46  ;;  %v7087_v0 = vpop.f32.mrf.mxu0  ;;  %vm2943_vm11 = vcmp.eq.s32.totalorder %v7748_v27, 0 }
 0x511   :  { %v2754_v24 = vpop.f32.mrf.mxu1  ;;  %4153 = vpow2.f32 %v469_v5  ;;  %v481_v62 = vmul.f32 1.442695, %v433_v50  ;;  %vm2942_vm10 = vcmp.eq.s32.totalorder %v2809_v19, 1 }
 0x512   :  { %v2833_v28 = vmul.f32 %v2806_v44, %v2806_v44  ;;  %v2755_v11 = vadd.f32 %v2754_v24, %v2524_v2  ;;  %4155 = vpow2.f32 %v473_v1  ;;  %vm2944_vm12 = vmand %vm2942_vm10, %vm2943_vm11 }
 0x513   :  { %v4071_v49 = vpop.f32.mrf.mxu1  ;;  %v7054_v59 = vpop.eup %4143  ;;  %4157 = vpow2.f32 %v477_v30 }
 0x514   :  { %2782 = vst [vmem:[%s7148_s4 + $0xc0] sm:$0xff] %v2755_v11  ;;  %v2807_v32 = vsub.f32 %v2755_v11, %v4209_v25  ;;  %v2857_v58 = vadd.f32 %v2856_v12, %v2833_v28  ;;  %v7059_v7 = vpop.eup %4145  ;;  %4159 = vpow2.f32 %v481_v62  ;;  %v2940_v12 = vpop.f32.mrf.mxu0 }
 0x516   :  { %v2834_v26 = vmul.f32 %v2807_v32, %v2807_v32 }
 0x518   :  { %v2858_v63 = vadd.f32 %v2857_v58, %v2834_v26 }
 0x519   :  { %v7064_v18 = vpop.eup %4147 }
 0x51a   :  { %2859 = vadd.xlane.f32.xlu1 %v2858_v63  ;;  %v7069_v39 = vpop.eup %4149 }
 0x51b   :  { %v7072_v47 = vpop.eup %4151 }
 0x51e   :  { %487 = vadd.xlane.f32.xlu1 %v7037_v29  ;;  %v7075_v36 = vpop.eup %4153 }
 0x51f   :  { %v7078_v15 = vpop.eup %4155 }
 0x520   :  { %v7081_v17 = vpop.eup %4157 }
 0x521   :  { %v7084_v8 = vpop.eup %4159 }
 0x522   :  { %491 = vadd.xlane.f32.xlu1 %v7042_v33 }
 0x526   :  { %495 = vadd.xlane.f32.xlu1 %v7049_v3 }
 0x52a   :  { %499 = vadd.xlane.f32.xlu1 %v7054_v59 }
 0x52e   :  { %503 = vadd.xlane.f32.xlu1 %v7059_v7 }
 0x532   :  { %507 = vadd.xlane.f32.xlu1 %v7064_v18 }
 0x536   :  { %511 = vadd.xlane.f32.xlu1 %v7069_v39 }
 0x53a   :  { %515 = vadd.xlane.f32.xlu1 %v7072_v47 }
 0x53e   :  { %519 = vadd.xlane.f32.xlu1 %v7075_v36 }
 0x542   :  { %523 = vadd.xlane.f32.xlu1 %v7078_v15 }
 0x546   :  { %527 = vadd.xlane.f32.xlu1 %v7081_v17 }
 0x54a   :  { %531 = vadd.xlane.f32.xlu1 %v7084_v8 }
 0x5a3   :  { %v2860_v42 = vpop.xlane.xlu1 %2859 }
 0x5a4   :  { %v2861_v44 = vrot.slane %v2860_v42, 4 }
 0x5a6   :  { %v2862_v10 = vadd.f32 %v2861_v44, %v2860_v42 }
 0x5a7   :  { %v488_v2 = vpop.xlane.xlu1 %487 }
 0x5a8   :  { %v2863_v24 = vrot.slane %v2862_v10, 2  ;;  %4161 = vrcp.f32 %v488_v2 }
 0x5aa   :  { %v2864_v28 = vadd.f32 %v2863_v24, %v2862_v10 }
 0x5ab   :  { %v492_v11 = vpop.xlane.xlu1 %491 }
 0x5ac   :  { %4163 = vrcp.f32 %v492_v11  ;;  %v2865_v49 = vrot.slane %v2864_v28, 1 }
 0x5ae   :  { %v2866_v4 = vadd.f32 %v2865_v49, %v2864_v28 }
 0x5af   :  { %v496_v56 = vpop.xlane.xlu1 %495 }
 0x5b0   :  { %4165 = vrcp.f32 %v496_v56  ;;  %4072 = vpush %v2866_v4 }
 0x5b3   :  { %v500_v16 = vpop.xlane.xlu1 %499 }
 0x5b4   :  { %4167 = vrcp.f32 %v500_v16 }
 0x5b5   :  { %v4162_v38 = vpop.eup %4161 }
 0x5b6   :  { %v561_v25 = vmul.f32 %v4162_v38, %v7037_v29 }
 0x5b7   :  { %v504_v32 = vpop.xlane.xlu1 %503 }
 0x5b8   :  { %586 = vst [vmem:[%s7147_s5 + $0x8] sm:$0xff] %v561_v25  ;;  %4169 = vrcp.f32 %v504_v32 }
 0x5b9   :  { %v4164_v58 = vpop.eup %4163 }
 0x5ba   :  { %v563_v26 = vmul.f32 %v4164_v58, %v7042_v33 }
 0x5bb   :  { %v508_v45 = vpop.xlane.xlu1 %507 }
 0x5bc   :  { %588 = vst [vmem:[%s7147_s5 + $0x18] sm:$0xff] %v563_v26  ;;  %4171 = vrcp.f32 %v508_v45 }
 0x5bd   :  { %v4166_v9 = vpop.eup %4165 }
 0x5be   :  { %v565_v35 = vmul.f32 %v4166_v9, %v7049_v3 }
 0x5bf   :  { %v512_v22 = vpop.xlane.xlu1 %511 }
 0x5c0   :  { %590 = vst [vmem:[%s7147_s5 + $0x28] sm:$0xff] %v565_v35  ;;  %4173 = vrcp.f32 %v512_v22 }
 0x5c1   :  { %v4168_v63 = vpop.eup %4167 }
 0x5c2   :  { %v567_v29 = vmul.f32 %v4168_v63, %v7054_v59 }
 0x5c3   :  { %v516_v60 = vpop.xlane.xlu1 %515 }
 0x5c4   :  { %592 = vst [vmem:[%s7147_s5 + $0x38] sm:$0xff] %v567_v29  ;;  %4175 = vrcp.f32 %v516_v60 }
 0x5c5   :  { %v4170_v13 = vpop.eup %4169 }
 0x5c6   :  { %v569_v21 = vmul.f32 %v4170_v13, %v7059_v7 }
 0x5c7   :  { %v520_v57 = vpop.xlane.xlu1 %519 }
 0x5c8   :  { %594 = vst [vmem:[%s7147_s5 + $0x48] sm:$0xff] %v569_v21  ;;  %4177 = vrcp.f32 %v520_v57 }
 0x5c9   :  { %v4172_v33 = vpop.eup %4171 }
 0x5ca   :  { %v571_v52 = vmul.f32 %v4172_v33, %v7064_v18 }
 0x5cb   :  { %v524_v40 = vpop.xlane.xlu1 %523 }
 0x5cc   :  { %596 = vst [vmem:[%s7147_s5 + $0x58] sm:$0xff] %v571_v52  ;;  %4179 = vrcp.f32 %v524_v40 }
 0x5cd   :  { %v4174_v61 = vpop.eup %4173 }
 0x5ce   :  { %v573_v43 = vmul.f32 %v4174_v61, %v7069_v39 }
 0x5cf   :  { %v528_v54 = vpop.xlane.xlu1 %527 }
 0x5d0   :  { %598 = vst [vmem:[%s7147_s5 + $0x68] sm:$0xff] %v573_v43  ;;  %4181 = vrcp.f32 %v528_v54 }
 0x5d1   :  { %v4176_v55 = vpop.eup %4175 }
 0x5d2   :  { %v575_v31 = vmul.f32 %v4176_v55, %v7072_v47 }
 0x5d3   :  { %v532_v34 = vpop.xlane.xlu1 %531 }
 0x5d4   :  { %600 = vst [vmem:[%s7147_s5 + $0x78] sm:$0xff] %v575_v31  ;;  %4183 = vrcp.f32 %v532_v34 }
 0x5d5   :  { %v4178_v3 = vpop.eup %4177 }
 0x5d6   :  { %v577_v37 = vmul.f32 %v4178_v3, %v7075_v36 }
 0x5d8   :  { %602 = vst [vmem:[%s7147_s5 + $0x88] sm:$0xff] %v577_v37 }
 0x5d9   :  { %v4180_v48 = vpop.eup %4179 }
 0x5da   :  { %v579_v59 = vmul.f32 %v4180_v48, %v7078_v15 }
 0x5dc   :  { %604 = vst [vmem:[%s7147_s5 + $0x98] sm:$0xff] %v579_v59 }
 0x5dd   :  { %v4182_v5 = vpop.eup %4181 }
 0x5de   :  { %v581_v14 = vmul.f32 %v4182_v5, %v7081_v17 }
 0x5e0   :  { %606 = vst [vmem:[%s7147_s5 + $0xa8] sm:$0xff] %v581_v14 }
 0x5e1   :  { %v4184_v46 = vpop.eup %4183  ;;  %s4073_s29 = spop %4072 }
 0x5e2   :  { %v583_v7 = vmul.f32 %v4184_v46, %v7084_v8  ;;  %v2945_v1 = vstv %s4073_s29 }
 0x5e3   :  { %v2946_v41 = vsel %vm2944_vm12, %v2945_v1, %v7087_v0 }
 0x5e4   :  { %608 = vst [vmem:[%s7147_s5 + $0xb8] sm:$0xff] %v583_v7  ;;  %2947 = vst [vmem:[%s7149_s6] sm:$0xff] %v2946_v41 }

// kernel: _codebook_forward_impl.1
= control target key start
LH: loop header
LB: loop body
LE: loop exit
PB: predicated region body
PF: predicated region fallthrough
CT: control target
= control target key end

     0   :  { %v7151_v0 = vmov 0.0   ;;  %vm4211_vm0 = vmmov 0   ;;  %v7150_v47 = vlaneseq  ;;  %s7143_s1 = inlined_call_operand.vmem [shape: bf16[128,128], index: 1, kind: input, shape index: {}]   ;;  %s7144_s0 = inlined_call_operand.vmem [shape: f32[200,128], index: 0, kind: input, shape index: {}]   ;;  %s7145_s3 = inlined_call_operand.vmem [shape: f32[1,128], index: 3, kind: input, shape index: {}]   ;;  %s7146_s2 = inlined_call_operand.vmem [shape: f32[128,128], index: 2, kind: input, shape index: {}]   ;;  %s7147_s5 = inlined_call_operand.vmem [shape: f32[200,128], index: 5, kind: output, shape index: {1}]   ;;  %s7148_s4 = inlined_call_operand.vmem [shape: f32[200,128], index: 4, kind: output, shape index: {0}]   ;;  %s7149_s6 = inlined_call_operand.vmem [shape: f32[8,128], index: 6, kind: output, shape index: {2}]  }
   0x1   :  { %3362 = vmatprep.subr.bf16.mxu0 %v7151_v0  ;;  %v4077_v1 = vld [vmem:[%s7143_s1 + $0x38] sm:$0xff]   ;;  %3378 = vmatprep.mubr.msk.bf16.mxu0 %vm4211_vm0, %v7151_v0  ;;  %v4078_v2 = vld [vmem:[%s7143_s1 + $0x30] sm:$0xff]   ;;  %v4079_v3 = vld [vmem:[%s7143_s1 + $0x28] sm:$0xff]  }
   0x2   :  { %3430 = vmatprep.subr.mxu1 %v7151_v0  ;;  %3462 = vmatprep.mubr.msk.f32.mxu1 %vm4211_vm0, %v7151_v0  ;;  %v4080_v4 = vld [vmem:[%s7143_s1 + $0x20] sm:$0xff]   ;;  %v4081_v5 = vld [vmem:[%s7143_s1 + $0x18] sm:$0xff]   ;;  %v4082_v6 = vld [vmem:[%s7143_s1 + $0x10] sm:$0xff]   ;;  %v4388_v48 = vand.u32 127, %v7150_v47 }
   0x3   :  { %3363 = vmatpush3.bf16.xpose.msra.mxu0 %v4077_v1  ;;  %v4083_v7 = vld [vmem:[%s7143_s1 + $0x8] sm:$0xff]   ;;  %v4084_v8 = vld [vmem:[%s7143_s1] sm:$0xff]   ;;  %v23_v12 = vld [vmem:[%s7144_s0 + $0x10] sm:$0xff] }
   0x4   :  { %3364 = vmatprep.subr.bf16.mxu0 %v7151_v0  ;;  %v21_v9 = vld [vmem:[%s7144_s0] sm:$0xff]  ;;  %v22_v10 = vld [vmem:[%s7144_s0 + $0x8] sm:$0xff]  ;;  %v24_v13 = vld [vmem:[%s7144_s0 + $0x18] sm:$0xff]  ;;  %7346 = vst [vmem:[#allocation2_spill] sm:$0xff] %v4388_v48  ;;  %vm334_vm1 = vcmp.lt.s32.totalorder %v4388_v48, 8 }
   0x5   :  { %v79_v11 = vpack.c.bf16 %v22_v10, %v21_v9  ;;  %v80_v14 = vpack.c.bf16 %v24_v13, %v23_v12  ;;  %v25_v15 = vld [vmem:[%s7144_s0 + $0x20] sm:$0xff]  ;;  %v26_v16 = vld [vmem:[%s7144_s0 + $0x28] sm:$0xff]  ;;  %v27_v18 = vld [vmem:[%s7144_s0 + $0x30] sm:$0xff] }
   0x6   :  { %v81_v17 = vpack.c.bf16 %v26_v16, %v25_v15  ;;  %v28_v19 = vld [vmem:[%s7144_s0 + $0x38] sm:$0xff]  ;;  %v29_v21 = vld [vmem:[%s7144_s0 + $0x40] sm:$0xff]  ;;  %v30_v22 = vld [vmem:[%s7144_s0 + $0x48] sm:$0xff] }
   0x7   :  { %v82_v20 = vpack.c.bf16 %v28_v19, %v27_v18  ;;  %v83_v23 = vpack.c.bf16 %v30_v22, %v29_v21  ;;  %v31_v24 = vld [vmem:[%s7144_s0 + $0x50] sm:$0xff]  ;;  %v32_v25 = vld [vmem:[%s7144_s0 + $0x58] sm:$0xff]  ;;  %v33_v27 = vld [vmem:[%s7144_s0 + $0x60] sm:$0xff] }
   0x8   :  { %v84_v26 = vpack.c.bf16 %v32_v25, %v31_v24  ;;  %v34_v28 = vld [vmem:[%s7144_s0 + $0x68] sm:$0xff]  ;;  %v35_v30 = vld [vmem:[%s7144_s0 + $0x70] sm:$0xff]  ;;  %v36_v31 = vld [vmem:[%s7144_s0 + $0x78] sm:$0xff] }
   0x9   :  { %v85_v29 = vpack.c.bf16 %v34_v28, %v33_v27  ;;  %v86_v32 = vpack.c.bf16 %v36_v31, %v35_v30  ;;  %v37_v33 = vld [vmem:[%s7144_s0 + $0x80] sm:$0xff]  ;;  %v38_v34 = vld [vmem:[%s7144_s0 + $0x88] sm:$0xff]  ;;  %v39_v36 = vld [vmem:[%s7144_s0 + $0x90] sm:$0xff] }
   0xa   :  { %v87_v35 = vpack.c.bf16 %v38_v34, %v37_v33  ;;  %v40_v37 = vld [vmem:[%s7144_s0 + $0x98] sm:$0xff]  ;;  %v41_v39 = vld [vmem:[%s7144_s0 + $0xa0] sm:$0xff]  ;;  %v42_v40 = vld [vmem:[%s7144_s0 + $0xa8] sm:$0xff] }
   0xb   :  { %3365 = vmatpush3.bf16.xpose.msra.mxu0 %v4078_v2  ;;  %v88_v38 = vpack.c.bf16 %v40_v37, %v39_v36  ;;  %v89_v41 = vpack.c.bf16 %v42_v40, %v41_v39  ;;  %v43_v42 = vld [vmem:[%s7144_s0 + $0xb0] sm:$0xff]  ;;  %v44_v43 = vld [vmem:[%s7144_s0 + $0xb8] sm:$0xff]  ;;  %v45_v45 = vld [vmem:[%s7144_s0 + $0xc0] sm:$0xff] }
   0xc   :  { %3366 = vmatprep.subr.bf16.mxu0 %v7151_v0  ;;  %v90_v44 = vpack.c.bf16 %v44_v43, %v43_v42  ;;  %v91_v46 = vpack.c.bf16 %v45_v45, %v45_v45  ;;  %v4393_v49 = vld [vmem:[%s7145_s3] ss:$0 sm:$0xff] }
  0x13   :  { %3367 = vmatpush3.bf16.xpose.msra.mxu0 %v4079_v3 }
  0x14   :  { %3368 = vmatprep.subr.bf16.mxu0 %v7151_v0 }
  0x1b   :  { %3369 = vmatpush3.bf16.xpose.msra.mxu0 %v4080_v4 }
  0x1c   :  { %3370 = vmatprep.subr.bf16.mxu0 %v7151_v0 }
  0x23   :  { %3371 = vmatpush3.bf16.xpose.msra.mxu0 %v4081_v5 }
  0x24   :  { %3372 = vmatprep.subr.bf16.mxu0 %v7151_v0 }
  0x2b   :  { %3373 = vmatpush3.bf16.xpose.msra.mxu0 %v4082_v6 }
  0x2c   :  { %3374 = vmatprep.subr.bf16.mxu0 %v7151_v0 }
  0x33   :  { %3375 = vmatpush3.bf16.xpose.msra.mxu0 %v4083_v7 }
  0x34   :  { %3376 = vmatprep.subr.bf16.mxu0 %v7151_v0 }
  0x3b   :  { %3377 = vmatpush3.bf16.xpose.msra.mxu0 %v4084_v8 }
  0x3c   :  { %3644 = vmatprep.subr.mxu0 %v7151_v0 }
  0x42   :  { %3379 = vmatmul.mubr.bf16.vlgmr.msra.gmra.mxu0 %v79_v11 }
  0x43   :  { %3382 = vmatprep.mubr.msk.bf16.mxu0 %vm4211_vm0, %v7151_v0 }
  0x4a   :  { %3383 = vmatmul.mubr.bf16.gmra.mxu0 %v80_v14 }
  0x4b   :  { %3386 = vmatprep.mubr.msk.bf16.mxu0 %vm4211_vm0, %v7151_v0 }
  0x52   :  { %3387 = vmatmul.mubr.bf16.gmra.mxu0 %v81_v17 }
  0x53   :  { %3390 = vmatprep.mubr.msk.bf16.mxu0 %vm4211_vm0, %v7151_v0 }
  0x5a   :  { %3391 = vmatmul.mubr.bf16.gmra.mxu0 %v82_v20 }
  0x5b   :  { %3394 = vmatprep.mubr.msk.bf16.mxu0 %vm4211_vm0, %v7151_v0 }
  0x62   :  { %3395 = vmatmul.mubr.bf16.gmra.mxu0 %v83_v23 }
  0x63   :  { %3398 = vmatprep.mubr.msk.bf16.mxu0 %vm4211_vm0, %v7151_v0 }
  0x6a   :  { %3399 = vmatmul.mubr.bf16.gmra.mxu0 %v84_v26 }
  0x6b   :  { %3402 = vmatprep.mubr.msk.bf16.mxu0 %vm4211_vm0, %v7151_v0 }
  0x72   :  { %3403 = vmatmul.mubr.bf16.gmra.mxu0 %v85_v29 }
  0x73   :  { %3406 = vmatprep.mubr.msk.bf16.mxu0 %vm4211_vm0, %v7151_v0 }
  0x7a   :  { %3407 = vmatmul.mubr.bf16.gmra.mxu0 %v86_v32 }
  0x7b   :  { %3410 = vmatprep.mubr.msk.bf16.mxu0 %vm4211_vm0, %v7151_v0 }
  0x82   :  { %3411 = vmatmul.mubr.bf16.gmra.mxu0 %v87_v35 }
  0x83   :  { %3414 = vmatprep.mubr.msk.bf16.mxu0 %vm4211_vm0, %v7151_v0 }
  0x8a   :  { %3415 = vmatmul.mubr.bf16.gmra.mxu0 %v88_v38 }
  0x8b   :  { %3418 = vmatprep.mubr.msk.bf16.mxu0 %vm4211_vm0, %v7151_v0 }
  0x92   :  { %3419 = vmatmul.mubr.bf16.gmra.mxu0 %v89_v41 }
  0x93   :  { %3422 = vmatprep.mubr.msk.bf16.mxu0 %vm4211_vm0, %v7151_v0 }
  0x9a   :  { %3423 = vmatmul.mubr.bf16.gmra.mxu0 %v90_v44 }
  0x9b   :  { %3426 = vmatprep.mubr.msk.bf16.mxu0 %vm4211_vm0, %v7151_v0 }
  0xa2   :  { %3427 = vmatmul.mubr.bf16.gmra.mxu0 %v91_v46 }
  0xa3   :  { %3676 = vmatprep.mubr.msk.f32.mxu0 %vm4211_vm0, %v7151_v0 }
 0x102   :  { %v174_v50 = vpop.f32.mrf.mxu0 }
 0x103   :  { %v276_v51 = vmul.f32 2.0, %v174_v50 }
 0x104   :  { %v3380_v52 = vpop.f32.mrf.mxu0 }
 0x105   :  { %v307_v53 = vsub.f32 %v276_v51, %v4393_v49 }
 0x106   :  { %v177_v54 = vpop.f32.mrf.mxu0 }
 0x107   :  { %v277_v55 = vmul.f32 2.0, %v177_v54  ;;  %v4399_v56 = vsel %vm334_vm1, %v307_v53, -1e+30 }
 0x108   :  { %360 = vmax.xlane.f32.xlu0 %v4399_v56  ;;  %v3381_v57 = vpop.f32.mrf.mxu0 }
 0x109   :  { %v308_v58 = vsub.f32 %v277_v55, %v4393_v49 }
 0x10a   :  { %v182_v59 = vpop.f32.mrf.mxu0 }
 0x10b   :  { %v278_v60 = vmul.f32 2.0, %v182_v59  ;;  %v4405_v61 = vsel %vm334_vm1, %v308_v58, -1e+30 }
 0x10c   :  { %7347 = vst [vmem:[#allocation3_spill] sm:$0xff] %v4405_v61  ;;  %362 = vmax.xlane.f32.xlu0 %v4405_v61  ;;  %v3384_v62 = vpop.f32.mrf.mxu0 }
 0x10d   :  { %v309_v63 = vsub.f32 %v278_v60, %v4393_v49 }
 0x10e   :  { %v185_v1 = vpop.f32.mrf.mxu0 }
 0x10f   :  { %v279_v2 = vmul.f32 2.0, %v185_v1  ;;  %v4411_v3 = vsel %vm334_vm1, %v309_v63, -1e+30 }
 0x110   :  { %364 = vmax.xlane.f32.xlu1 %v4411_v3  ;;  %v3385_v4 = vpop.f32.mrf.mxu0 }
 0x111   :  { %v310_v5 = vsub.f32 %v279_v2, %v4393_v49 }
 0x112   :  { %v190_v6 = vpop.f32.mrf.mxu0 }
 0x113   :  { %v280_v7 = vmul.f32 2.0, %v190_v6  ;;  %v4417_v8 = vsel %vm334_vm1, %v310_v5, -1e+30 }
 0x114   :  { %7348 = vst [vmem:[#allocation4_spill] sm:$0xff] %v4417_v8  ;;  %366 = vmax.xlane.f32.xlu1 %v4417_v8  ;;  %v3388_v9 = vpop.f32.mrf.mxu0 }
 0x115   :  { %v311_v10 = vsub.f32 %v280_v7, %v4393_v49 }
 0x116   :  { %v193_v11 = vpop.f32.mrf.mxu0 }
 0x117   :  { %v281_v12 = vmul.f32 2.0, %v193_v11  ;;  %v4423_v13 = vsel %vm334_vm1, %v311_v10, -1e+30 }
 0x118   :  { %368 = vmax.xlane.f32.xlu0 %v4423_v13  ;;  %v3389_v14 = vpop.f32.mrf.mxu0 }
 0x119   :  { %v312_v15 = vsub.f32 %v281_v12, %v4393_v49 }
 0x11a   :  { %v198_v16 = vpop.f32.mrf.mxu0 }
 0x11b   :  { %v282_v17 = vmul.f32 2.0, %v198_v16  ;;  %v4429_v18 = vsel %vm334_vm1, %v312_v15, -1e+30 }
 0x11c   :  { %7349 = vst [vmem:[#allocation5_spill] sm:$0xff] %v4429_v18  ;;  %370 = vmax.xlane.f32.xlu1 %v4429_v18  ;;  %v3392_v19 = vpop.f32.mrf.mxu0 }
 0x11d   :  { %v313_v20 = vsub.f32 %v282_v17, %v4393_v49 }
 0x11e   :  { %v201_v21 = vpop.f32.mrf.mxu0 }
 0x11f   :  { %v283_v22 = vmul.f32 2.0, %v201_v21  ;;  %v4435_v23 = vsel %vm334_vm1, %v313_v20, -1e+30 }
 0x120   :  { %7350 = vst [vmem:[#allocation6_spill] sm:$0xff] %v4435_v23  ;;  %372 = vmax.xlane.f32.xlu0 %v4435_v23  ;;  %v3393_v24 = vpop.f32.mrf.mxu0 }
 0x121   :  { %v314_v25 = vsub.f32 %v283_v22, %v4393_v49 }
 0x122   :  { %v206_v26 = vpop.f32.mrf.mxu0 }
 0x123   :  { %v284_v27 = vmul.f32 2.0, %v206_v26  ;;  %v4441_v28 = vsel %vm334_vm1, %v314_v25, -1e+30 }
 0x124   :  { %7351 = vst [vmem:[#allocation7_spill] sm:$0xff] %v4441_v28  ;;  %374 = vmax.xlane.f32.xlu1 %v4441_v28  ;;  %v3396_v29 = vpop.f32.mrf.mxu0 }
 0x125   :  { %v315_v30 = vsub.f32 %v284_v27, %v4393_v49 }
 0x126   :  { %v209_v31 = vpop.f32.mrf.mxu0 }
 0x127   :  { %v285_v32 = vmul.f32 2.0, %v209_v31  ;;  %v4447_v33 = vsel %vm334_vm1, %v315_v30, -1e+30 }
 0x128   :  { %7352 = vst [vmem:[#allocation8_spill] sm:$0xff] %v4447_v33  ;;  %376 = vmax.xlane.f32.xlu0 %v4447_v33  ;;  %v3397_v34 = vpop.f32.mrf.mxu0 }
 0x129   :  { %v316_v35 = vsub.f32 %v285_v32, %v4393_v49 }
 0x12a   :  { %v214_v36 = vpop.f32.mrf.mxu0 }
 0x12b   :  { %v286_v37 = vmul.f32 2.0, %v214_v36  ;;  %v4453_v38 = vsel %vm334_vm1, %v316_v35, -1e+30 }
 0x12c   :  { %7353 = vst [vmem:[#allocation9_spill] sm:$0xff] %v4453_v38  ;;  %378 = vmax.xlane.f32.xlu1 %v4453_v38  ;;  %v3400_v39 = vpop.f32.mrf.mxu0 }
 0x12d   :  { %v317_v40 = vsub.f32 %v286_v37, %v4393_v49 }
 0x12e   :  { %v217_v41 = vpop.f32.mrf.mxu0 }
 0x12f   :  { %v287_v42 = vmul.f32 2.0, %v217_v41  ;;  %v4459_v43 = vsel %vm334_vm1, %v317_v40, -1e+30 }
 0x130   :  { %7354 = vst [vmem:[#allocation10_spill] sm:$0xff] %v4459_v43  ;;  %380 = vmax.xlane.f32.xlu0 %v4459_v43  ;;  %v3401_v44 = vpop.f32.mrf.mxu0 }
 0x131   :  { %v318_v45 = vsub.f32 %v287_v42, %v4393_v49 }
 0x132   :  { %v222_v46 = vpop.f32.mrf.mxu0 }
 0x133   :  { %v288_v50 = vmul.f32 2.0, %v222_v46  ;;  %v4465_v51 = vsel %vm334_vm1, %v318_v45, -1e+30 }
 0x134   :  { %7355 = vst [vmem:[#allocation11_spill] sm:$0xff] %v4465_v51  ;;  %382 = vmax.xlane.f32.xlu1 %v4465_v51  ;;  %v3404_v52 = vpop.f32.mrf.mxu0 }
 0x135   :  { %v319_v53 = vsub.f32 %v288_v50, %v4393_v49 }
 0x136   :  { %v225_v54 = vpop.f32.mrf.mxu0 }
 0x137   :  { %v289_v55 = vmul.f32 2.0, %v225_v54  ;;  %v4471_v57 = vsel %vm334_vm1, %v319_v53, -1e+30 }
 0x138   :  { %7356 = vst [vmem:[#allocation12_spill] sm:$0xff] %v4471_v57  ;;  %384 = vmax.xlane.f32.xlu0 %v4471_v57  ;;  %v3405_v58 = vpop.f32.mrf.mxu0 }
 0x139   :  { %v320_v59 = vsub.f32 %v289_v55, %v4393_v49 }
 0x13a   :  { %v230_v60 = vpop.f32.mrf.mxu0 }
 0x13b   :  { %v290_v62 = vmul.f32 2.0, %v230_v60  ;;  %v4477_v63 = vsel %vm334_vm1, %v320_v59, -1e+30 }
 0x13c   :  { %7357 = vst [vmem:[#allocation13_spill] sm:$0xff] %v4477_v63  ;;  %386 = vmax.xlane.f32.xlu1 %v4477_v63  ;;  %v3408_v1 = vpop.f32.mrf.mxu0 }
 0x13d   :  { %v321_v2 = vsub.f32 %v290_v62, %v4393_v49 }
 0x13e   :  { %v233_v4 = vpop.f32.mrf.mxu0 }
 0x13f   :  { %v291_v5 = vmul.f32 2.0, %v233_v4  ;;  %v4483_v6 = vsel %vm334_vm1, %v321_v2, -1e+30 }
 0x140   :  { %7358 = vst [vmem:[#allocation14_spill] sm:$0xff] %v4483_v6  ;;  %388 = vmax.xlane.f32.xlu0 %v4483_v6  ;;  %v3409_v7 = vpop.f32.mrf.mxu0 }
 0x141   :  { %v322_v9 = vsub.f32 %v291_v5, %v4393_v49 }
 0x142   :  { %v238_v10 = vpop.f32.mrf.mxu0 }
 0x143   :  { %v292_v11 = vmul.f32 2.0, %v238_v10  ;;  %v4489_v12 = vsel %vm334_vm1, %v322_v9, -1e+30 }
 0x144   :  { %7359 = vst [vmem:[#allocation15_spill] sm:$0xff] %v4489_v12  ;;  %390 = vmax.xlane.f32.xlu1 %v4489_v12  ;;  %v3412_v14 = vpop.f32.mrf.mxu0 }
 0x145   :  { %v323_v15 = vsub.f32 %v292_v11, %v4393_v49 }
 0x146   :  { %v241_v16 = vpop.f32.mrf.mxu0 }
 0x147   :  { %v293_v17 = vmul.f32 2.0, %v241_v16  ;;  %v4495_v19 = vsel %vm334_vm1, %v323_v15, -1e+30 }
 0x148   :  { %7360 = vst [vmem:[#allocation16_spill] sm:$0xff] %v4495_v19  ;;  %392 = vmax.xlane.f32.xlu0 %v4495_v19  ;;  %v3413_v20 = vpop.f32.mrf.mxu0 }
 0x149   :  { %v324_v21 = vsub.f32 %v293_v17, %v4393_v49 }
 0x14a   :  { %v246_v22 = vpop.f32.mrf.mxu0 }
 0x14b   :  { %v294_v24 = vmul.f32 2.0, %v246_v22  ;;  %v4501_v25 = vsel %vm334_vm1, %v324_v21, -1e+30 }
 0x14c   :  { %7361 = vst [vmem:[#allocation17_spill] sm:$0xff] %v4501_v25  ;;  %394 = vmax.xlane.f32.xlu1 %v4501_v25  ;;  %v3416_v26 = vpop.f32.mrf.mxu0 }
 0x14d   :  { %v325_v27 = vsub.f32 %v294_v24, %v4393_v49 }
 0x14e   :  { %v249_v29 = vpop.f32.mrf.mxu0 }
 0x14f   :  { %v295_v30 = vmul.f32 2.0, %v249_v29  ;;  %v4507_v31 = vsel %vm334_vm1, %v325_v27, -1e+30 }
 0x150   :  { %7362 = vst [vmem:[#allocation18_spill] sm:$0xff] %v4507_v31  ;;  %396 = vmax.xlane.f32.xlu0 %v4507_v31  ;;  %v3417_v32 = vpop.f32.mrf.mxu0 }
 0x151   :  { %v326_v34 = vsub.f32 %v295_v30, %v4393_v49 }
 0x152   :  { %v254_v35 = vpop.f32.mrf.mxu0 }
 0x153   :  { %v296_v36 = vmul.f32 2.0, %v254_v35  ;;  %v4513_v37 = vsel %vm334_vm1, %v326_v34, -1e+30 }
 0x154   :  { %7363 = vst [vmem:[#allocation19_spill] sm:$0xff] %v4513_v37  ;;  %398 = vmax.xlane.f32.xlu1 %v4513_v37  ;;  %v3420_v39 = vpop.f32.mrf.mxu0 }
 0x155   :  { %v327_v40 = vsub.f32 %v296_v36, %v4393_v49 }
 0x156   :  { %v257_v41 = vpop.f32.mrf.mxu0 }
 0x157   :  { %v297_v42 = vmul.f32 2.0, %v257_v41  ;;  %v4519_v44 = vsel %vm334_vm1, %v327_v40, -1e+30 }
 0x158   :  { %7364 = vst [vmem:[#allocation20_spill] sm:$0xff] %v4519_v44  ;;  %400 = vmax.xlane.f32.xlu1 %v4519_v44  ;;  %v3421_v45 = vpop.f32.mrf.mxu0 }
 0x159   :  { %v328_v46 = vsub.f32 %v297_v42, %v4393_v49 }
 0x15a   :  { %v262_v50 = vpop.f32.mrf.mxu0 }
 0x15b   :  { %v298_v52 = vmul.f32 2.0, %v262_v50  ;;  %v4525_v53 = vsel %vm334_vm1, %v328_v46, -1e+30 }
 0x15c   :  { %7365 = vst [vmem:[#allocation21_spill] sm:$0xff] %v4525_v53  ;;  %402 = vmax.xlane.f32.xlu1 %v4525_v53  ;;  %v3424_v54 = vpop.f32.mrf.mxu0 }
 0x15d   :  { %v329_v55 = vsub.f32 %v298_v52, %v4393_v49 }
 0x15e   :  { %v265_v58 = vpop.f32.mrf.mxu0 }
 0x15f   :  { %v299_v59 = vmul.f32 2.0, %v265_v58  ;;  %v4531_v60 = vsel %vm334_vm1, %v329_v55, -1e+30 }
 0x160   :  { %7366 = vst [vmem:[#allocation22_spill] sm:$0xff] %v4531_v60  ;;  %404 = vmax.xlane.f32.xlu1 %v4531_v60  ;;  %v3425_v62 = vpop.f32.mrf.mxu0 }
 0x161   :  { %v330_v1 = vsub.f32 %v299_v59, %v4393_v49 }
 0x162   :  { %v270_v2 = vpop.f32.mrf.mxu0 }
 0x163   :  { %v300_v4 = vmul.f32 2.0, %v270_v2  ;;  %v4537_v5 = vsel %vm334_vm1, %v330_v1, -1e+30 }
 0x164   :  { %7367 = vst [vmem:[#allocation23_spill] sm:$0xff] %v4537_v5  ;;  %406 = vmax.xlane.f32.xlu1 %v4537_v5  ;;  %v3428_v7 = vpop.f32.mrf.mxu0 }
 0x165   :  { %v331_v9 = vsub.f32 %v300_v4, %v4393_v49 }
 0x166   :  { %v273_v10 = vpop.f32.mrf.mxu0 }
 0x167   :  { %v4543_v11 = vsel %vm334_vm1, %v331_v9, -1e+30 }
 0x168   :  { %7368 = vst [vmem:[#allocation24_spill] sm:$0xff] %v4543_v11  ;;  %408 = vmax.xlane.f32.xlu1 %v4543_v11  ;;  %v3429_v14 = vpop.f32.mrf.mxu0 }
 0x191   :  { %v4546_v15 = vpop.xlane.xlu0 %360 }
 0x192   :  { %vm610_vm2 = vcmp.eq.f32.partialorder %v4399_v56, %v4546_v15 }
 0x193   :  { %v4551_v16 = vsel %vm610_vm2, %v4388_v48, 128 }
 0x194   :  { %v661_v17 = vshra.s32 %v4551_v16, 16 }
 0x195   :  { %v4554_v20 = vpop.xlane.xlu0 %362 }
 0x196   :  { %7369 = vst [vmem:[#allocation25_spill] sm:$0xff] %v4554_v20  ;;  %vm611_vm3 = vcmp.eq.f32.partialorder %v4405_v61, %v4554_v20  ;;  %v4558_v49 = vcvt.s32.f32 %v661_v17 }
 0x197   :  { %v4561_v21 = vsel %vm611_vm3, %v4388_v48, 128 }
 0x198   :  { %664 = vmin.xlane.f32.xlu0 %v4558_v49  ;;  %v675_v22 = vshra.s32 %v4561_v21, 16 }
 0x199   :  { %v4565_v24 = vpop.xlane.xlu1 %364 }
 0x19a   :  { %vm612_vm4 = vcmp.eq.f32.partialorder %v4411_v3, %v4565_v24  ;;  %v4569_v26 = vcvt.s32.f32 %v675_v22 }
 0x19b   :  { %v4572_v27 = vsel %vm612_vm4, %v4388_v48, 128 }
 0x19c   :  { %678 = vmin.xlane.f32.xlu0 %v4569_v26  ;;  %v689_v29 = vshra.s32 %v4572_v27, 16 }
 0x19d   :  { %v4576_v30 = vpop.xlane.xlu1 %366 }
 0x19e   :  { %7370 = vst [vmem:[#allocation26_spill] sm:$0xff] %v4576_v30  ;;  %vm613_vm5 = vcmp.eq.f32.partialorder %v4417_v8, %v4576_v30  ;;  %v4580_v32 = vcvt.s32.f32 %v689_v29 }
 0x19f   :  { %v4583_v34 = vsel %vm613_vm5, %v4388_v48, 128 }
 0x1a0   :  { %692 = vmin.xlane.f32.xlu0 %v4580_v32  ;;  %v703_v35 = vshra.s32 %v4583_v34, 16 }
 0x1a1   :  { %v4587_v36 = vpop.xlane.xlu0 %368 }
 0x1a2   :  { %vm614_vm6 = vcmp.eq.f32.partialorder %v4423_v13, %v4587_v36  ;;  %v4591_v39 = vcvt.s32.f32 %v703_v35 }
 0x1a3   :  { %v4594_v40 = vsel %vm614_vm6, %v4388_v48, 128 }
 0x1a4   :  { %706 = vmin.xlane.f32.xlu0 %v4591_v39  ;;  %v717_v41 = vshra.s32 %v4594_v40, 16 }
 0x1a5   :  { %v4598_v42 = vpop.xlane.xlu1 %370 }
 0x1a6   :  { %7371 = vst [vmem:[#allocation27_spill] sm:$0xff] %v4598_v42  ;;  %vm615_vm7 = vcmp.eq.f32.partialorder %v4429_v18, %v4598_v42  ;;  %v4602_v45 = vcvt.s32.f32 %v717_v41 }
 0x1a7   :  { %v4605_v46 = vsel %vm615_vm7, %v4388_v48, 128 }
 0x1a8   :  { %720 = vmin.xlane.f32.xlu0 %v4602_v45  ;;  %v731_v50 = vshra.s32 %v4605_v46, 16 }
 0x1a9   :  { %v4609_v52 = vpop.xlane.xlu0 %372 }
 0x1aa   :  { %7372 = vst [vmem:[#allocation28_spill] sm:$0xff] %v4609_v52  ;;  %vm616_vm8 = vcmp.eq.f32.partialorder %v4435_v23, %v4609_v52  ;;  %v4613_v54 = vcvt.s32.f32 %v731_v50  ;;  %v674_v52 = vand.u32 65535, %v4561_v21 }
 0x1ab   :  { %v4616_v55 = vsel %vm616_vm8, %v4388_v48, 128 }
 0x1ac   :  { %734 = vmin.xlane.f32.xlu0 %v4613_v54  ;;  %v745_v58 = vshra.s32 %v4616_v55, 16 }
 0x1ad   :  { %v4620_v59 = vpop.xlane.xlu1 %374 }
 0x1ae   :  { %7373 = vst [vmem:[#allocation29_spill] sm:$0xff] %v4620_v59  ;;  %vm617_vm9 = vcmp.eq.f32.partialorder %v4441_v28, %v4620_v59  ;;  %v4624_v62 = vcvt.s32.f32 %v745_v58 }
 0x1af   :  { %v4627_v1 = vsel %vm617_vm9, %v4388_v48, 128 }
 0x1b0   :  { %748 = vmin.xlane.f32.xlu1 %v4624_v62  ;;  %v759_v2 = vshra.s32 %v4627_v1, 16 }
 0x1b1   :  { %v4631_v4 = vpop.xlane.xlu0 %376 }
 0x1b2   :  { %7374 = vst [vmem:[#allocation30_spill] sm:$0xff] %v4631_v4  ;;  %vm618_vm10 = vcmp.eq.f32.partialorder %v4447_v33, %v4631_v4  ;;  %v4635_v7 = vcvt.s32.f32 %v759_v2 }
 0x1b3   :  { %v4638_v9 = vsel %vm618_vm10, %v4388_v48, 128 }
 0x1b4   :  { %762 = vmin.xlane.f32.xlu0 %v4635_v7  ;;  %v773_v10 = vshra.s32 %v4638_v9, 16 }
 0x1b5   :  { %v4642_v14 = vpop.xlane.xlu1 %378 }
 0x1b6   :  { %7375 = vst [vmem:[#allocation31_spill] sm:$0xff] %v4642_v14  ;;  %vm619_vm11 = vcmp.eq.f32.partialorder %v4453_v38, %v4642_v14  ;;  %v4646_v17 = vcvt.s32.f32 %v773_v10 }
 0x1b7   :  { %v4649_v22 = vsel %vm619_vm11, %v4388_v48, 128 }
 0x1b8   :  { %776 = vmin.xlane.f32.xlu1 %v4646_v17  ;;  %v787_v29 = vshra.s32 %v4649_v22, 16 }
 0x1b9   :  { %v4653_v35 = vpop.xlane.xlu0 %380 }
 0x1ba   :  { %7376 = vst [vmem:[#allocation32_spill] sm:$0xff] %v4653_v35  ;;  %vm620_vm12 = vcmp.eq.f32.partialorder %v4459_v43, %v4653_v35  ;;  %v4657_v41 = vcvt.s32.f32 %v787_v29 }
 0x1bb   :  { %v4660_v50 = vsel %vm620_vm12, %v4388_v48, 128 }
 0x1bc   :  { %790 = vmin.xlane.f32.xlu0 %v4657_v41  ;;  %v801_v58 = vshra.s32 %v4660_v50, 16 }
 0x1bd   :  { %v4664_v2 = vpop.xlane.xlu1 %382 }
 0x1be   :  { %7377 = vst [vmem:[#allocation33_spill] sm:$0xff] %v4664_v2  ;;  %vm621_vm13 = vcmp.eq.f32.partialorder %v4465_v51, %v4664_v2  ;;  %v4668_v10 = vcvt.s32.f32 %v801_v58 }
 0x1bf   :  { %v4671_v47 = vsel %vm621_vm13, %v4388_v48, 128 }
 0x1c0   :  { %804 = vmin.xlane.f32.xlu1 %v4668_v10  ;;  %v815_v29 = vshra.s32 %v4671_v47, 16 }
 0x1c1   :  { %v4675_v0 = vpop.xlane.xlu0 %384 }
 0x1c2   :  { %7378 = vst [vmem:[#allocation34_spill] sm:$0xff] %v4675_v0  ;;  %vm622_vm14 = vcmp.eq.f32.partialorder %v4471_v57, %v4675_v0  ;;  %v4679_v38 = vcvt.s32.f32 %v815_v29 }
 0x1c3   :  { %v4682_v14 = vsel %vm622_vm14, %v4388_v48, 128 }
 0x1c4   :  { %818 = vmin.xlane.f32.xlu0 %v4679_v38  ;;  %v829_v58 = vshra.s32 %v4682_v14, 16 }
 0x1c5   :  { %v4686_v51 = vpop.xlane.xlu1 %386 }
 0x1c6   :  { %7379 = vst [vmem:[#allocation35_spill] sm:$0xff] %v4686_v51  ;;  %vm623_vm15 = vcmp.eq.f32.partialorder %v4477_v63, %v4686_v51  ;;  %v4690_v2 = vcvt.s32.f32 %v829_v58 }
 0x1c7   :  { %v4693_v28 = vsel %vm623_vm15, %v4388_v48, 128 }
 0x1c8   :  { %832 = vmin.xlane.f32.xlu1 %v4690_v2  ;;  %v843_v29 = vshra.s32 %v4693_v28, 16 }
 0x1c9   :  { %v4697_v59 = vpop.xlane.xlu0 %388 }
 0x1ca   :  { %7380 = vst [vmem:[#allocation36_spill] sm:$0xff] %v4697_v59  ;;  %vm624_vm1 = vcmp.eq.f32.partialorder %v4483_v6, %v4697_v59  ;;  %v4701_v18 = vcvt.s32.f32 %v843_v29 }
 0x1cb   :  { %v4704_v42 = vsel %vm624_vm1, %v4388_v48, 128 }
 0x1cc   :  { %846 = vmin.xlane.f32.xlu0 %v4701_v18  ;;  %v857_v58 = vshra.s32 %v4704_v42, 16 }
 0x1cd   :  { %v4708_v63 = vpop.xlane.xlu1 %390 }
 0x1ce   :  { %7381 = vst [vmem:[#allocation37_spill] sm:$0xff] %v4708_v63  ;;  %vm625_vm2 = vcmp.eq.f32.partialorder %v4489_v12, %v4708_v63  ;;  %v4712_v51 = vcvt.s32.f32 %v857_v58 }
 0x1cf   :  { %v4715_v8 = vsel %vm625_vm2, %v4388_v48, 128 }
 0x1d0   :  { %860 = vmin.xlane.f32.xlu1 %v4712_v51  ;;  %v871_v29 = vshra.s32 %v4715_v8, 16 }
 0x1d1   :  { %v4719_v30 = vpop.xlane.xlu0 %392 }
 0x1d2   :  { %7382 = vst [vmem:[#allocation38_spill] sm:$0xff] %v4719_v30  ;;  %vm626_vm3 = vcmp.eq.f32.partialorder %v4495_v19, %v4719_v30  ;;  %v4723_v61 = vcvt.s32.f32 %v871_v29 }
 0x1d3   :  { %v4726_v20 = vsel %vm626_vm3, %v4388_v48, 128 }
 0x1d4   :  { %874 = vmin.xlane.f32.xlu0 %v4723_v61  ;;  %v885_v58 = vshra.s32 %v4726_v20, 16 }
 0x1d5   :  { %v4730_v12 = vpop.xlane.xlu1 %394 }
 0x1d6   :  { %7383 = vst [vmem:[#allocation39_spill] sm:$0xff] %v4730_v12  ;;  %vm627_vm4 = vcmp.eq.f32.partialorder %v4501_v25, %v4730_v12  ;;  %v4734_v63 = vcvt.s32.f32 %v885_v58 }
 0x1d7   :  { %v4737_v6 = vsel %vm627_vm4, %v4388_v48, 128 }
 0x1d8   :  { %888 = vmin.xlane.f32.xlu1 %v4734_v63  ;;  %v899_v29 = vshra.s32 %v4737_v6, 16 }
 0x1d9   :  { %v4741_v19 = vpop.xlane.xlu0 %396 }
 0x1da   :  { %7384 = vst [vmem:[#allocation40_spill] sm:$0xff] %v4741_v19  ;;  %vm628_vm5 = vcmp.eq.f32.partialorder %v4507_v31, %v4741_v19  ;;  %v4745_v30 = vcvt.s32.f32 %v899_v29 }
 0x1db   :  { %v4748_v59 = vsel %vm628_vm5, %v4388_v48, 128 }
 0x1dc   :  { %902 = vmin.xlane.f32.xlu0 %v4745_v30  ;;  %v913_v58 = vshra.s32 %v4748_v59, 16 }
 0x1dd   :  { %v4752_v25 = vpop.xlane.xlu1 %398 }
 0x1de   :  { %7385 = vst [vmem:[#allocation41_spill] sm:$0xff] %v4752_v25  ;;  %vm629_vm6 = vcmp.eq.f32.partialorder %v4513_v37, %v4752_v25  ;;  %v4756_v12 = vcvt.s32.f32 %v913_v58 }
 0x1df   :  { %v4759_v57 = vsel %vm629_vm6, %v4388_v48, 128 }
 0x1e0   :  { %916 = vmin.xlane.f32.xlu0 %v4756_v12  ;;  %v927_v29 = vshra.s32 %v4759_v57, 16 }
 0x1e1   :  { %v4763_v31 = vpop.xlane.xlu1 %400 }
 0x1e2   :  { %7386 = vst [vmem:[#allocation42_spill] sm:$0xff] %v4763_v31  ;;  %vm630_vm7 = vcmp.eq.f32.partialorder %v4519_v44, %v4763_v31  ;;  %v4767_v19 = vcvt.s32.f32 %v927_v29 }
 0x1e3   :  { %v4770_v0 = vsel %vm630_vm7, %v4388_v48, 128 }
 0x1e4   :  { %930 = vmin.xlane.f32.xlu0 %v4767_v19  ;;  %v941_v58 = vshra.s32 %v4770_v0, 16 }
 0x1e5   :  { %v4774_v37 = vpop.xlane.xlu1 %402 }
 0x1e6   :  { %7387 = vst [vmem:[#allocation43_spill] sm:$0xff] %v4774_v37  ;;  %vm631_vm8 = vcmp.eq.f32.partialorder %v4525_v53, %v4774_v37  ;;  %v4778_v25 = vcvt.s32.f32 %v941_v58 }
 0x1e7   :  { %v4781_v43 = vsel %vm631_vm8, %v4388_v48, 128 }
 0x1e8   :  { %944 = vmin.xlane.f32.xlu0 %v4778_v25  ;;  %v955_v29 = vshra.s32 %v4781_v43, 16 }
 0x1e9   :  { %v4785_v44 = vpop.xlane.xlu1 %404 }
 0x1ea   :  { %7388 = vst [vmem:[#allocation44_spill] sm:$0xff] %v4785_v44  ;;  %vm632_vm9 = vcmp.eq.f32.partialorder %v4531_v60, %v4785_v44  ;;  %v4789_v31 = vcvt.s32.f32 %v955_v29 }
 0x1eb   :  { %v4792_v35 = vsel %vm632_vm9, %v4388_v48, 128 }
 0x1ec   :  { %958 = vmin.xlane.f32.xlu0 %v4789_v31  ;;  %v969_v58 = vshra.s32 %v4792_v35, 16 }
 0x1ed   :  { %v4796_v53 = vpop.xlane.xlu1 %406 }
 0x1ee   :  { %7389 = vst [vmem:[#allocation45_spill] sm:$0xff] %v4796_v53  ;;  %vm633_vm10 = vcmp.eq.f32.partialorder %v4537_v5, %v4796_v53  ;;  %v4800_v37 = vcvt.s32.f32 %v969_v58  ;;  %v77_v53 = vld [vmem:[%s7146_s2 + $0x78] sm:$0xff] }
 0x1ef   :  { %v4803_v33 = vsel %vm633_vm10, %v4388_v48, 128  ;;  %v4824_v23 = vand.u32 4294901760, %v77_v53 }
 0x1f0   :  { %972 = vmin.xlane.f32.xlu0 %v4800_v37  ;;  %v983_v29 = vshra.s32 %v4803_v33, 16 }
 0x1f1   :  { %v4807_v60 = vpop.xlane.xlu1 %408  ;;  %7394 = vst [vmem:[#allocation50_spill] sm:$0xff] %v4824_v23  ;;  %3431 = vmatpush3.msra.mxu1 %v4824_v23 }
 0x1f2   :  { %7390 = vst [vmem:[#allocation46_spill] sm:$0xff] %v4807_v60  ;;  %vm634_vm11 = vcmp.eq.f32.partialorder %v4543_v11, %v4807_v60  ;;  %v4811_v44 = vcvt.s32.f32 %v983_v29  ;;  %v76_v29 = vld [vmem:[%s7146_s2 + $0x70] sm:$0xff]  ;;  %v7397_v60 = vmov 0.0  }
 0x1f3   :  { %v4814_v4 = vsel %vm634_vm11, %v4388_v48, 128  ;;  %v4830_v48 = vsub.f32 %v77_v53, %v4824_v23  ;;  %v4832_v11 = vand.u32 4294901760, %v76_v29  ;;  %3432 = vmatprep.subr.mxu1 %v7397_v60  ;;  %v74_v53 = vld [vmem:[%s7146_s2 + $0x60] sm:$0xff] }
 0x1f4   :  { %7391 = vst [vmem:[#allocation47_spill] sm:$0xff] %v4811_v44  ;;  %7392 = vst [vmem:[#allocation48_spill] sm:$0xff] %v4814_v4  ;;  %986 = vmin.xlane.f32.xlu0 %v4811_v44  ;;  %v997_v58 = vshra.s32 %v4814_v4, 16  ;;  %v70_v4 = vld [vmem:[%s7146_s2 + $0x40] sm:$0xff] }
 0x1f5   :  { %7395 = vst [vmem:[#allocation51_spill] sm:$0xff] %v4830_v48  ;;  %7396 = vst [vmem:[#allocation52_spill] sm:$0xff] %v4832_v11  ;;  %3645 = vmatpush3.msra.mxu0 %v4830_v48  ;;  %3433 = vmatpush3.msra.mxu1 %v4832_v11  ;;  %v4855_v48 = vand.u32 4294901760, %v74_v53 }
 0x1f6   :  { %v4818_v5 = vcvt.s32.f32 %v997_v58  ;;  %v75_v58 = vld [vmem:[%s7146_s2 + $0x68] sm:$0xff]  ;;  %3646 = vmatprep.subr.mxu0 %v7397_v60  ;;  %3434 = vmatprep.subr.mxu1 %v7397_v60 }
 0x1f7   :  { %v4843_v44 = vand.u32 4294901760, %v75_v58  ;;  %7401 = vst [vmem:[#allocation56_spill] sm:$0xff] %v4855_v48 }
 0x1f8   :  { %7393 = vst [vmem:[#allocation49_spill] sm:$0xff] %v4818_v5  ;;  %1000 = vmin.xlane.f32.xlu0 %v4818_v5  ;;  %v4841_v5 = vsub.f32 %v76_v29, %v4832_v11  ;;  %v73_v29 = vld [vmem:[%s7146_s2 + $0x58] sm:$0xff]  ;;  %v4865_v11 = vsub.f32 %v74_v53, %v4855_v48 }
 0x1f9   :  { %7399 = vst [vmem:[#allocation54_spill] sm:$0xff] %v4843_v44  ;;  %v4853_v23 = vsub.f32 %v75_v58, %v4843_v44  ;;  %3435 = vmatpush3.msra.mxu1 %v4843_v44  ;;  %v660_v58 = vand.u32 65535, %v4551_v16  ;;  %v72_v44 = vld [vmem:[%s7146_s2 + $0x50] sm:$0xff]  ;;  %v71_v16 = vld [vmem:[%s7146_s2 + $0x48] sm:$0xff] }
 0x1fa   :  { %7398 = vst [vmem:[#allocation53_spill] sm:$0xff] %v4841_v5  ;;  %3647 = vmatpush3.msra.mxu0 %v4841_v5  ;;  %3436 = vmatprep.subr.mxu1 %v7397_v60  ;;  %7402 = vst [vmem:[#allocation57_spill] sm:$0xff] %v4865_v11  ;;  %v4867_v5 = vand.u32 4294901760, %v73_v29  ;;  %v4880_v53 = vand.u32 4294901760, %v72_v44 }
 0x1fb   :  { %7400 = vst [vmem:[#allocation55_spill] sm:$0xff] %v4853_v23  ;;  %3648 = vmatprep.subr.mxu0 %v7397_v60  ;;  %3437 = vmatpush3.msra.mxu1 %v4855_v48 }
 0x1fc   :  { %3649 = vmatpush3.msra.mxu0 %v4853_v23  ;;  %7403 = vst [vmem:[#allocation58_spill] sm:$0xff] %v4867_v5  ;;  %3438 = vmatprep.subr.mxu1 %v7397_v60  ;;  %v4878_v23 = vsub.f32 %v73_v29, %v4867_v5  ;;  %7405 = vst [vmem:[#allocation60_spill] sm:$0xff] %v4880_v53  ;;  %v4890_v48 = vsub.f32 %v72_v44, %v4880_v53 }
 0x1fd   :  { %3650 = vmatprep.subr.mxu0 %v7397_v60  ;;  %3439 = vmatpush3.msra.mxu1 %v4867_v5  ;;  %v662_v5 = vcvt.s32.f32 %v660_v58  ;;  %v69_v58 = vld [vmem:[%s7146_s2 + $0x38] sm:$0xff] }
 0x1fe   :  { %3651 = vmatpush3.msra.mxu0 %v4865_v11  ;;  %7404 = vst [vmem:[#allocation59_spill] sm:$0xff] %v4878_v23  ;;  %3440 = vmatprep.subr.mxu1 %v7397_v60  ;;  %7406 = vst [vmem:[#allocation61_spill] sm:$0xff] %v4890_v48  ;;  %v4892_v11 = vand.u32 4294901760, %v71_v16 }
 0x1ff   :  { %3652 = vmatprep.subr.mxu0 %v7397_v60  ;;  %3441 = vmatpush3.msra.mxu1 %v4880_v53  ;;  %v4909_v53 = vand.u32 4294901760, %v70_v4 }
 0x200   :  { %3653 = vmatpush3.msra.mxu0 %v4878_v23  ;;  %7407 = vst [vmem:[#allocation62_spill] sm:$0xff] %v4892_v11  ;;  %3442 = vmatprep.subr.mxu1 %v7397_v60  ;;  %v4907_v44 = vsub.f32 %v71_v16, %v4892_v11  ;;  %v4921_v16 = vand.u32 4294901760, %v69_v58  ;;  %v68_v23 = vld [vmem:[%s7146_s2 + $0x30] sm:$0xff] }
 0x201   :  { %3654 = vmatprep.subr.mxu0 %v7397_v60  ;;  %7408 = vst [vmem:[#allocation63_spill] sm:$0xff] %v4909_v53  ;;  %3443 = vmatpush3.msra.mxu1 %v4892_v11  ;;  %v676_v11 = vcvt.s32.f32 %v674_v52  ;;  %v67_v52 = vld [vmem:[%s7146_s2 + $0x28] sm:$0xff] }
 0x202   :  { %3655 = vmatpush3.msra.mxu0 %v4890_v48  ;;  %3444 = vmatprep.subr.mxu1 %v7397_v60  ;;  %7410 = vst [vmem:[#allocation65_spill] sm:$0xff] %v4921_v16 }
 0x203   :  { %3656 = vmatprep.subr.mxu0 %v7397_v60  ;;  %3445 = vmatpush3.msra.mxu1 %v4909_v53 }
 0x204   :  { %3657 = vmatpush3.msra.mxu0 %v4907_v44  ;;  %3446 = vmatprep.subr.mxu1 %v7397_v60 }
 0x205   :  { %3658 = vmatprep.subr.mxu0 %v7397_v60  ;;  %3447 = vmatpush3.msra.mxu1 %v4921_v16 }
 0x206   :  { %3448 = vmatprep.subr.mxu1 %v7397_v60 }
 0x221   :  { %v4895_v29 = vpop.xlane.xlu0 %664 }
 0x222   :  { %vm666_vm12 = vcmp.eq.f32.partialorder %v4558_v49, %v4895_v29  ;;  %v4919_v49 = vsub.f32 %v70_v4, %v4909_v53  ;;  %v4935_v4 = vsub.f32 %v69_v58, %v4921_v16  ;;  %v4949_v58 = vand.u32 4294901760, %v67_v52 }
 0x223   :  { %v667_v21 = vsel %vm666_vm12, %v662_v5, inf  ;;  %v688_v5 = vand.u32 65535, %v4572_v27 }
 0x224   :  { %668 = vmin.xlane.f32.xlu1 %v667_v21  ;;  %7409 = vst [vmem:[#allocation64_spill] sm:$0xff] %v4919_v49  ;;  %3659 = vmatpush3.msra.mxu0 %v4919_v49  ;;  %v4937_v21 = vand.u32 4294901760, %v68_v23  ;;  %7413 = vst [vmem:[#allocation68_spill] sm:$0xff] %v4949_v58 }
 0x225   :  { %v4923_v48 = vpop.xlane.xlu0 %678  ;;  %3660 = vmatprep.subr.mxu0 %v7397_v60  ;;  %v690_v49 = vcvt.s32.f32 %v688_v5  ;;  %v65_v5 = vld [vmem:[%s7146_s2 + $0x18] sm:$0xff] }
 0x226   :  { %vm680_vm13 = vcmp.eq.f32.partialorder %v4569_v26, %v4923_v48  ;;  %7411 = vst [vmem:[#allocation66_spill] sm:$0xff] %v4937_v21  ;;  %3661 = vmatpush3.msra.mxu0 %v4935_v4  ;;  %v4947_v26 = vsub.f32 %v68_v23, %v4937_v21  ;;  %v4963_v23 = vsub.f32 %v67_v52, %v4949_v58  ;;  %v4977_v52 = vand.u32 4294901760, %v65_v5 }
 0x227   :  { %v681_v27 = vsel %vm680_vm13, %v676_v11, inf  ;;  %v702_v11 = vand.u32 65535, %v4583_v34  ;;  %3662 = vmatprep.subr.mxu0 %v7397_v60  ;;  %3449 = vmatpush3.msra.mxu1 %v4937_v21 }
 0x228   :  { %682 = vmin.xlane.f32.xlu1 %v681_v27  ;;  %7412 = vst [vmem:[#allocation67_spill] sm:$0xff] %v4947_v26  ;;  %v66_v27 = vld [vmem:[%s7146_s2 + $0x20] sm:$0xff]  ;;  %3663 = vmatpush3.msra.mxu0 %v4947_v26  ;;  %7414 = vst [vmem:[#allocation69_spill] sm:$0xff] %v4963_v23 }
 0x229   :  { %v4951_v53 = vpop.xlane.xlu0 %692  ;;  %v4965_v16 = vand.u32 4294901760, %v66_v27  ;;  %3664 = vmatprep.subr.mxu0 %v7397_v60  ;;  %3450 = vmatprep.subr.mxu1 %v7397_v60  ;;  %7417 = vst [vmem:[#allocation72_spill] sm:$0xff] %v4977_v52  ;;  %v704_v21 = vcvt.s32.f32 %v702_v11 }
 0x22a   :  { %vm694_vm14 = vcmp.eq.f32.partialorder %v4580_v32, %v4951_v53  ;;  %3665 = vmatpush3.msra.mxu0 %v4963_v23  ;;  %3451 = vmatpush3.msra.mxu1 %v4949_v58  ;;  %v63_v58 = vld [vmem:[%s7146_s2 + $0x8] sm:$0xff] }
 0x22b   :  { %7415 = vst [vmem:[#allocation70_spill] sm:$0xff] %v4965_v16  ;;  %v695_v34 = vsel %vm694_vm14, %v690_v49, inf  ;;  %v4975_v32 = vsub.f32 %v66_v27, %v4965_v16  ;;  %v716_v49 = vand.u32 65535, %v4594_v40  ;;  %3666 = vmatprep.subr.mxu0 %v7397_v60  ;;  %v4991_v27 = vsub.f32 %v65_v5, %v4977_v52  ;;  %3452 = vmatprep.subr.mxu1 %v7397_v60 }
 0x22c   :  { %696 = vmin.xlane.f32.xlu1 %v695_v34  ;;  %v64_v34 = vld [vmem:[%s7146_s2 + $0x10] sm:$0xff]  ;;  %3453 = vmatpush3.msra.mxu1 %v4965_v16  ;;  %v5005_v5 = vand.u32 4294901760, %v63_v58 }
 0x22d   :  { %7416 = vst [vmem:[#allocation71_spill] sm:$0xff] %v4975_v32  ;;  %v4979_v26 = vpop.xlane.xlu0 %706  ;;  %3667 = vmatpush3.msra.mxu0 %v4975_v32  ;;  %v4994_v11 = vand.u32 4294901760, %v64_v34  ;;  %v718_v23 = vcvt.s32.f32 %v716_v49  ;;  %3454 = vmatprep.subr.mxu1 %v7397_v60 }
 0x22e   :  { %vm708_vm15 = vcmp.eq.f32.partialorder %v4591_v39, %v4979_v26  ;;  %3668 = vmatprep.subr.mxu0 %v7397_v60  ;;  %7420 = vst [vmem:[#allocation75_spill] sm:$0xff] %v5005_v5  ;;  %3455 = vmatpush3.msra.mxu1 %v4977_v52  ;;  %v7460_v52 = vld [vmem:[#allocation57_spill] sm:$0xff] }
 0x22f   :  { %7418 = vst [vmem:[#allocation73_spill] sm:$0xff] %v4994_v11  ;;  %v709_v40 = vsel %vm708_vm15, %v704_v21, inf  ;;  %3669 = vmatpush3.msra.mxu0 %v4991_v27  ;;  %v5003_v39 = vsub.f32 %v64_v34, %v4994_v11  ;;  %v730_v21 = vand.u32 65535, %v4605_v46  ;;  %v5019_v34 = vsub.f32 %v63_v58, %v5005_v5  ;;  %3456 = vmatprep.subr.mxu1 %v7397_v60 }
 0x230   :  { %710 = vmin.xlane.f32.xlu1 %v709_v40  ;;  %3670 = vmatprep.subr.mxu0 %v7397_v60  ;;  %v62_v40 = vld [vmem:[%s7146_s2] sm:$0xff]  ;;  %v744_v58 = vand.u32 65535, %v4616_v55 }
 0x231   :  { %7419 = vst [vmem:[#allocation74_spill] sm:$0xff] %v5003_v39  ;;  %v5007_v32 = vpop.xlane.xlu0 %720  ;;  %3671 = vmatpush3.msra.mxu0 %v5003_v39  ;;  %v5022_v49 = vand.u32 4294901760, %v62_v40  ;;  %v732_v39 = vcvt.s32.f32 %v730_v21  ;;  %3457 = vmatpush3.msra.mxu1 %v4994_v11 }
 0x232   :  { %vm722_vm1 = vcmp.eq.f32.partialorder %v4602_v45, %v5007_v32  ;;  %3672 = vmatprep.subr.mxu0 %v7397_v60  ;;  %3458 = vmatprep.subr.mxu1 %v7397_v60  ;;  %v746_v21 = vcvt.s32.f32 %v744_v58 }
 0x233   :  { %7421 = vst [vmem:[#allocation76_spill] sm:$0xff] %v5022_v49  ;;  %v723_v46 = vsel %vm722_vm1, %v718_v23, inf  ;;  %3673 = vmatpush3.msra.mxu0 %v5019_v34  ;;  %v5028_v16 = vsub.f32 %v62_v40, %v5022_v49  ;;  %3459 = vmatpush3.msra.mxu1 %v5005_v5  ;;  %v758_v40 = vand.u32 65535, %v4627_v1  ;;  %v786_v5 = vand.u32 65535, %v4649_v22 }
 0x234   :  { %724 = vmin.xlane.f32.xlu1 %v723_v46  ;;  %3674 = vmatprep.subr.mxu0 %v7397_v60  ;;  %v814_v22 = vand.u32 65535, %v4671_v47  ;;  %v842_v47 = vand.u32 65535, %v4693_v28  ;;  %v870_v28 = vand.u32 65535, %v4715_v8  ;;  %v898_v8 = vand.u32 65535, %v4737_v6 }
 0x235   :  { %v5030_v45 = vpop.xlane.xlu0 %734  ;;  %3675 = vmatpush3.msra.mxu0 %v5028_v16  ;;  %3460 = vmatprep.subr.mxu1 %v7397_v60  ;;  %v760_v46 = vcvt.s32.f32 %v758_v40  ;;  %v788_v40 = vcvt.s32.f32 %v786_v5  ;;  %v926_v6 = vand.u32 65535, %v4759_v57  ;;  %v954_v57 = vand.u32 65535, %v4781_v43 }
 0x236   :  { %vm736_vm2 = vcmp.eq.f32.partialorder %v4613_v54, %v5030_v45  ;;  %3858 = vmatprep.subr.mxu0 %v7397_v60  ;;  %3461 = vmatpush3.msra.mxu1 %v5022_v49  ;;  %v816_v5 = vcvt.s32.f32 %v814_v22  ;;  %v872_v22 = vcvt.s32.f32 %v870_v28 }
 0x237   :  { %v737_v23 = vsel %vm736_vm2, %v732_v39, inf  ;;  %3537 = vmatprep.subr.mxu1 %v7397_v60 }
 0x238   :  { %738 = vmin.xlane.f32.xlu1 %v737_v23  ;;  %v772_v23 = vand.u32 65535, %v4638_v9  ;;  %v800_v9 = vand.u32 65535, %v4660_v50  ;;  %v828_v50 = vand.u32 65535, %v4682_v14  ;;  %v856_v14 = vand.u32 65535, %v4704_v42 }
 0x239   :  { %v5042_v55 = vpop.xlane.xlu1 %748  ;;  %v884_v42 = vand.u32 65535, %v4726_v20  ;;  %v912_v20 = vand.u32 65535, %v4748_v59  ;;  %v940_v59 = vand.u32 65535, %v4770_v0  ;;  %v956_v0 = vcvt.s32.f32 %v954_v57  ;;  %v7430_v57 = vld [vmem:[#allocation10_spill] sm:$0xff] }
 0x23a   :  { %vm750_vm3 = vcmp.eq.f32.partialorder %v4624_v62, %v5042_v55  ;;  %v774_v49 = vcvt.s32.f32 %v772_v23 }
 0x23b   :  { %v751_v54 = vsel %vm750_vm3, %v746_v21, inf }
 0x23c   :  { %752 = vmin.xlane.f32.xlu1 %v751_v54 }
 0x23d   :  { %v5049_v39 = vpop.xlane.xlu0 %762 }
 0x23e   :  { %vm764_vm4 = vcmp.eq.f32.partialorder %v4635_v7, %v5049_v39 }
 0x23f   :  { %v765_v58 = vsel %vm764_vm4, %v760_v46, inf  ;;  %v802_v46 = vcvt.s32.f32 %v800_v9 }
 0x240   :  { %766 = vmin.xlane.f32.xlu1 %v765_v58  ;;  %v830_v58 = vcvt.s32.f32 %v828_v50 }
 0x241   :  { %v5054_v1 = vpop.xlane.xlu1 %776 }
 0x242   :  { %vm778_vm5 = vcmp.eq.f32.partialorder %v4646_v17, %v5054_v1 }
 0x243   :  { %v779_v62 = vsel %vm778_vm5, %v774_v49, inf }
 0x244   :  { %780 = vmin.xlane.f32.xlu0 %v779_v62 }
 0x245   :  { %v5059_v21 = vpop.xlane.xlu0 %790 }
 0x246   :  { %vm792_vm6 = vcmp.eq.f32.partialorder %v4657_v41, %v5059_v21 }
 0x247   :  { %v793_v7 = vsel %vm792_vm6, %v788_v40, inf  ;;  %v844_v40 = vcvt.s32.f32 %v842_v47  ;;  %v914_v47 = vcvt.s32.f32 %v912_v20  ;;  %v7425_v20 = vld [vmem:[#allocation47_spill] sm:$0xff] }
 0x248   :  { %794 = vmin.xlane.f32.xlu1 %v793_v7  ;;  %v858_v7 = vcvt.s32.f32 %v856_v14 }
 0x249   :  { %v5064_v54 = vpop.xlane.xlu1 %804 }
 0x24a   :  { %vm806_vm7 = vcmp.eq.f32.partialorder %v4668_v10, %v5064_v54 }
 0x24b   :  { %v807_v17 = vsel %vm806_vm7, %v802_v46, inf }
 0x24c   :  { %808 = vmin.xlane.f32.xlu0 %v807_v17 }
 0x24d   :  { %v5069_v49 = vpop.xlane.xlu0 %818 }
 0x24e   :  { %vm820_vm8 = vcmp.eq.f32.partialorder %v4679_v38, %v5069_v49 }
 0x24f   :  { %v821_v41 = vsel %vm820_vm8, %v816_v5, inf  ;;  %v886_v5 = vcvt.s32.f32 %v884_v42 }
 0x250   :  { %822 = vmin.xlane.f32.xlu1 %v821_v41  ;;  %v900_v41 = vcvt.s32.f32 %v898_v8 }
 0x251   :  { %v5074_v23 = vpop.xlane.xlu1 %832 }
 0x252   :  { %vm834_vm9 = vcmp.eq.f32.partialorder %v4690_v2, %v5074_v23 }
 0x253   :  { %v835_v10 = vsel %vm834_vm9, %v830_v58, inf }
 0x254   :  { %836 = vmin.xlane.f32.xlu0 %v835_v10 }
 0x255   :  { %v5079_v62 = vpop.xlane.xlu0 %846 }
 0x256   :  { %vm848_vm10 = vcmp.eq.f32.partialorder %v4701_v18, %v5079_v62 }
 0x257   :  { %v849_v38 = vsel %vm848_vm10, %v844_v40, inf  ;;  %v928_v40 = vcvt.s32.f32 %v926_v6  ;;  %v7427_v6 = vld [vmem:[#allocation8_spill] sm:$0xff] }
 0x258   :  { %850 = vmin.xlane.f32.xlu1 %v849_v38  ;;  %v942_v38 = vcvt.s32.f32 %v940_v59 }
 0x259   :  { %v5084_v9 = vpop.xlane.xlu1 %860 }
 0x25a   :  { %vm862_vm11 = vcmp.eq.f32.partialorder %v4712_v51, %v5084_v9 }
 0x25b   :  { %v863_v2 = vsel %vm862_vm11, %v858_v7, inf }
 0x25c   :  { %864 = vmin.xlane.f32.xlu0 %v863_v2 }
 0x25d   :  { %v5089_v46 = vpop.xlane.xlu0 %874 }
 0x25e   :  { %vm876_vm12 = vcmp.eq.f32.partialorder %v4723_v61, %v5089_v46 }
 0x25f   :  { %v877_v18 = vsel %vm876_vm12, %v872_v22, inf  ;;  %v412_v22 = vsub.f32 %v4411_v3, %v4565_v24  ;;  %v7422_v24 = vld [vmem:[#allocation48_spill] sm:$0xff] }
 0x260   :  { %878 = vmin.xlane.f32.xlu1 %v877_v18  ;;  %v414_v18 = vsub.f32 %v4423_v13, %v4587_v36 }
 0x261   :  { %v5094_v17 = vpop.xlane.xlu1 %888  ;;  %v439_v42 = vmul.f32 1.442695, %v412_v22 }
 0x262   :  { %vm890_vm13 = vcmp.eq.f32.partialorder %v4734_v63, %v5094_v17  ;;  %v443_v8 = vmul.f32 1.442695, %v414_v18 }
 0x263   :  { %v891_v51 = vsel %vm890_vm13, %v886_v5, inf  ;;  %v996_v5 = vand.u32 65535, %v7422_v24  ;;  %v7435_v24 = vld [vmem:[#allocation38_spill] sm:$0xff] }
 0x264   :  { %892 = vmin.xlane.f32.xlu0 %v891_v51  ;;  %v7423_v51 = vld [vmem:[#allocation28_spill] sm:$0xff] }
 0x265   :  { %v5099_v50 = vpop.xlane.xlu0 %902 }
 0x266   :  { %vm904_vm14 = vcmp.eq.f32.partialorder %v4745_v30, %v5099_v50 }
 0x267   :  { %v905_v61 = vsel %vm904_vm14, %v900_v41, inf  ;;  %v7424_v41 = vld [vmem:[#allocation6_spill] sm:$0xff] }
 0x268   :  { %906 = vmin.xlane.f32.xlu1 %v905_v61 }
 0x269   :  { %v5104_v58 = vpop.xlane.xlu0 %916 }
 0x26a   :  { %vm918_vm15 = vcmp.eq.f32.partialorder %v4756_v12, %v5104_v58  ;;  %v410_v12 = vsub.f32 %v4399_v56, %v4546_v15 }
 0x26b   :  { %v919_v63 = vsel %vm918_vm15, %v914_v47, inf  ;;  %v7426_v47 = vld [vmem:[#allocation30_spill] sm:$0xff] }
 0x26c   :  { %920 = vmin.xlane.f32.xlu0 %v919_v63  ;;  %v435_v2 = vmul.f32 1.442695, %v410_v12  ;;  %v418_v63 = vsub.f32 %v7427_v6, %v7426_v47  ;;  %v7439_v47 = vld [vmem:[#allocation42_spill] sm:$0xff]  ;;  %v7440_v6 = vld [vmem:[#allocation20_spill] sm:$0xff] }
 0x26d   :  { %v5109_v10 = vpop.xlane.xlu0 %930 }
 0x26e   :  { %vm932_vm1 = vcmp.eq.f32.partialorder %v4767_v19, %v5109_v10  ;;  %v968_v19 = vand.u32 65535, %v4792_v35  ;;  %4085 = vpow2.f32 %v435_v2  ;;  %v7432_v2 = vld [vmem:[#allocation12_spill] sm:$0xff] }
 0x26f   :  { %v933_v30 = vsel %vm932_vm1, %v928_v40, inf  ;;  %4087 = vpow2.f32 %v439_v42  ;;  %v7428_v40 = vld [vmem:[#allocation49_spill] sm:$0xff]  ;;  %v7434_v42 = vld [vmem:[#allocation14_spill] sm:$0xff] }
 0x270   :  { %934 = vmin.xlane.f32.xlu1 %v933_v30  ;;  %v970_v15 = vcvt.s32.f32 %v968_v19  ;;  %4089 = vpow2.f32 %v443_v8  ;;  %v451_v30 = vmul.f32 1.442695, %v418_v63  ;;  %v7431_v19 = vld [vmem:[#allocation34_spill] sm:$0xff]  ;;  %v430_v63 = vsub.f32 %v7440_v6, %v7439_v47 }
 0x271   :  { %v5114_v14 = vpop.xlane.xlu0 %944  ;;  %v422_v22 = vsub.f32 %v7432_v2, %v7431_v19  ;;  %v7443_v19 = vld [vmem:[#allocation46_spill] sm:$0xff]  ;;  %v7444_v2 = vld [vmem:[#allocation24_spill] sm:$0xff]  ;;  %v699_v47 = vcvt.f32.s32 %v4951_v53  ;;  %v713_v53 = vcvt.f32.s32 %v4979_v26 }
 0x272   :  { %vm946_vm2 = vcmp.eq.f32.partialorder %v4778_v25, %v5114_v14  ;;  %v982_v25 = vand.u32 65535, %v4803_v33  ;;  %v416_v33 = vsub.f32 %v7424_v41, %v7423_v51  ;;  %v7448_v6 = vld [vmem:[#allocation2_spill] sm:$0xff] }
 0x273   :  { %v947_v7 = vsel %vm946_vm2, %v942_v38, inf  ;;  %v7429_v38 = vld [vmem:[#allocation32_spill] sm:$0xff] }
 0x274   :  { %948 = vmin.xlane.f32.xlu0 %v947_v7  ;;  %v447_v36 = vmul.f32 1.442695, %v416_v33  ;;  %v420_v12 = vsub.f32 %v7430_v57, %v7429_v38  ;;  %v7437_v33 = vld [vmem:[#allocation40_spill] sm:$0xff]  ;;  %v7442_v38 = vld [vmem:[#allocation22_spill] sm:$0xff] }
 0x275   :  { %v5121_v28 = vpop.xlane.xlu0 %958 }
 0x276   :  { %vm960_vm3 = vcmp.eq.f32.partialorder %v4789_v31, %v5121_v28  ;;  %v984_v31 = vcvt.s32.f32 %v982_v25  ;;  %4091 = vpow2.f32 %v447_v36  ;;  %v7433_v25 = vld [vmem:[#allocation36_spill] sm:$0xff] }
 0x277   :  { %v961_v43 = vsel %vm960_vm3, %v956_v0, inf  ;;  %4093 = vpow2.f32 %v451_v30  ;;  %v455_v0 = vmul.f32 1.442695, %v420_v12  ;;  %v424_v18 = vsub.f32 %v7434_v42, %v7433_v25  ;;  %v7441_v30 = vld [vmem:[#allocation44_spill] sm:$0xff] }
 0x278   :  { %962 = vmin.xlane.f32.xlu1 %v961_v43  ;;  %v432_v57 = vsub.f32 %v7442_v38, %v7441_v30  ;;  %v7452_v30 = vld [vmem:[#allocation51_spill] sm:$0xff] }
 0x279   :  { %v5128_v56 = vpop.xlane.xlu0 %972  ;;  %4095 = vpow2.f32 %v455_v0  ;;  %v1419_v38 = vand.u32 4294901760, %v7452_v30 }
 0x27a   :  { %vm974_vm4 = vcmp.eq.f32.partialorder %v4800_v37, %v5128_v56  ;;  %v998_v37 = vcvt.s32.f32 %v996_v5  ;;  %v7436_v5 = vld [vmem:[#allocation16_spill] sm:$0xff]  ;;  %v479_v0 = vmul.f32 1.442695, %v432_v57 }
 0x27b   :  { %v975_v35 = vsel %vm974_vm4, %v970_v15, inf  ;;  %v5150_v7 = vpop.eup %4085  ;;  %v459_v15 = vmul.f32 1.442695, %v422_v22  ;;  %v426_v8 = vsub.f32 %v7436_v5, %v7435_v24  ;;  %v434_v22 = vsub.f32 %v7444_v2, %v7443_v19 }
 0x27c   :  { %976 = vmin.xlane.f32.xlu0 %v975_v35  ;;  %v5155_v43 = vpop.eup %4087  ;;  %v1420_v2 = vsub.f32 %v7452_v30, %v1419_v38 }
 0x27d   :  { %v5135_v3 = vpop.xlane.xlu0 %986  ;;  %v5160_v35 = vpop.eup %4089  ;;  %4097 = vpow2.f32 %v459_v15  ;;  %v467_v41 = vmul.f32 1.442695, %v426_v8  ;;  %v483_v25 = vmul.f32 1.442695, %v434_v22  ;;  %v685_v8 = vcvt.f32.s32 %v4923_v48  ;;  %v7454_v22 = vld [vmem:[#allocation53_spill] sm:$0xff] }
 0x27e   :  { %vm988_vm5 = vcmp.eq.f32.partialorder %v7425_v20, %v5135_v3  ;;  %v7438_v20 = vld [vmem:[#allocation18_spill] sm:$0xff]  ;;  %v1421_v11 = vand.u32 4294901760, %v1420_v2 }
 0x27f   :  { %v989_v61 = vsel %vm988_vm5, %v984_v31, inf  ;;  %v463_v31 = vmul.f32 1.442695, %v424_v18  ;;  %v671_v18 = vcvt.f32.s32 %v4895_v29 }
 0x280   :  { %990 = vmin.xlane.f32.xlu1 %v989_v61  ;;  %v428_v61 = vsub.f32 %v7438_v20, %v7437_v33 }
 0x281   :  { %v5142_v13 = vpop.xlane.xlu0 %1000  ;;  %4099 = vpow2.f32 %v463_v31  ;;  %v672_v5 = vshll.u32 %v671_v18, 16  ;;  %v700_v18 = vshll.u32 %v699_v47, 16  ;;  %v727_v47 = vcvt.f32.s32 %v5007_v32 }
 0x282   :  { %vm1002_vm6 = vcmp.eq.f32.partialorder %v7428_v40, %v5142_v13  ;;  %4101 = vpow2.f32 %v467_v41  ;;  %v471_v36 = vmul.f32 1.442695, %v428_v61 }
 0x283   :  { %v1003_v59 = vsel %vm1002_vm6, %v998_v37, inf  ;;  %v5165_v51 = vpop.eup %4091 }
 0x284   :  { %1004 = vmin.xlane.f32.xlu0 %v1003_v59  ;;  %v5170_v37 = vpop.eup %4093  ;;  %4103 = vpow2.f32 %v471_v36  ;;  %v475_v59 = vmul.f32 1.442695, %v430_v63  ;;  %v686_v36 = vshll.u32 %v685_v8, 16 }
 0x286   :  { %v5175_v40 = vpop.eup %4095  ;;  %4105 = vpow2.f32 %v475_v59 }
 0x287   :  { %4107 = vpow2.f32 %v479_v0 }
 0x288   :  { %485 = vadd.xlane.f32.xlu0 %v5150_v7  ;;  %4109 = vpow2.f32 %v483_v25  ;;  %v1426_v25 = vand.u32 4294901760, %v7454_v22 }
 0x28a   :  { %v5180_v12 = vpop.eup %4097 }
 0x28c   :  { %489 = vadd.xlane.f32.xlu0 %v5155_v43 }
 0x28e   :  { %v5185_v15 = vpop.eup %4099 }
 0x28f   :  { %v5188_v42 = vpop.eup %4101 }
 0x290   :  { %493 = vadd.xlane.f32.xlu0 %v5160_v35  ;;  %7445 = vst [vmem:[#allocation48_spill] sm:$0xff] %v5188_v42 }
 0x291   :  { %v5192_v31 = vpop.eup %4103 }
 0x292   :  { %7446 = vst [vmem:[#allocation28_spill] sm:$0xff] %v5192_v31 }
 0x293   :  { %v5196_v33 = vpop.eup %4105 }
 0x294   :  { %497 = vadd.xlane.f32.xlu0 %v5165_v51  ;;  %7447 = vst [vmem:[#allocation6_spill] sm:$0xff] %v5196_v33  ;;  %v5205_v59 = vpop.eup %4107 }
 0x295   :  { %7451 = vst [vmem:[#allocation47_spill] sm:$0xff] %v5205_v59 }
 0x298   :  { %501 = vadd.xlane.f32.xlu0 %v5170_v37 }
 0x29c   :  { %505 = vadd.xlane.f32.xlu0 %v5175_v40 }
 0x2a0   :  { %509 = vadd.xlane.f32.xlu0 %v5180_v12 }
 0x2a4   :  { %513 = vadd.xlane.f32.xlu0 %v5185_v15 }
 0x2a8   :  { %517 = vadd.xlane.f32.xlu0 %v5188_v42 }
 0x2ac   :  { %521 = vadd.xlane.f32.xlu0 %v5192_v31 }
 0x2ad   :  { %v669_v24 = vpop.xlane.xlu1 %668 }
 0x2ae   :  { %v670_v41 = vcvt.f32.s32 %v669_v24 }
 0x2b0   :  { %v673_v20 = vadd.s32 %v672_v5, %v670_v41  ;;  %525 = vadd.xlane.f32.xlu0 %v5196_v33  ;;  %v5224_v41 = vpop.eup %4109 }
 0x2b1   :  { %v683_v61 = vpop.xlane.xlu1 %682  ;;  %7457 = vst [vmem:[#allocation8_spill] sm:$0xff] %v5224_v41 }
 0x2b2   :  { %vm5201_vm7 = vcmp.eq.s32.totalorder %v7448_v6, %v673_v20  ;;  %v684_v63 = vcvt.f32.s32 %v683_v61  ;;  %v1427_v20 = vsub.f32 %v7454_v22, %v1426_v25  ;;  %v7458_v61 = vld [vmem:[#allocation55_spill] sm:$0xff] }
 0x2b3   :  { %v2969_v48 = vsel %vm5201_vm7, 1.0, %v7397_v60 }
 0x2b4   :  { %v5211_v57 = vsub.f32 %v2969_v48, %v2969_v48  ;;  %v687_v0 = vadd.s32 %v686_v36, %v684_v63  ;;  %529 = vadd.xlane.f32.xlu0 %v5205_v59  ;;  %v1433_v36 = vand.u32 4294901760, %v7458_v61  ;;  %v1428_v2 = vand.u32 4294901760, %v1427_v20 }
 0x2b5   :  { %v697_v19 = vpop.xlane.xlu1 %696  ;;  %v741_v20 = vcvt.f32.s32 %v5030_v45 }
 0x2b6   :  { %7453 = vst [vmem:[#allocation30_spill] sm:$0xff] %v5211_v57  ;;  %vm5218_vm8 = vcmp.eq.s32.totalorder %v7448_v6, %v687_v0  ;;  %v698_v5 = vcvt.f32.s32 %v697_v19  ;;  %3677 = vmatmul.mubr.f32.vlgmr.msra.gmra.mxu0 %v5211_v57  ;;  %v7256_v8 = vand.u32 4294901760, %v5211_v57  ;;  %v714_v0 = vshll.u32 %v713_v53, 16 }
 0x2b7   :  { %3679 = vmatprep.mubr.msk.f32.mxu0 %vm4211_vm0, %v7397_v60  ;;  %v2970_v26 = vsel %vm5218_vm8, 1.0, %v7397_v60  ;;  %3859 = vmatpush3.msra.mxu0 %v1419_v38  ;;  %v1434_v22 = vsub.f32 %v7458_v61, %v1433_v36  ;;  %v7259_v38 = vand.u32 4294901760, %v7460_v52  ;;  %v7463_v61 = vld [vmem:[#allocation59_spill] sm:$0xff] }
 0x2b8   :  { %v701_v63 = vadd.s32 %v700_v18, %v698_v5  ;;  %533 = vadd.xlane.f32.xlu0 %v5224_v41  ;;  %v5235_v48 = vsub.f32 %v2970_v26, %v2970_v26  ;;  %v1169_v30 = vsub.f32 %v5211_v57, %v7256_v8  ;;  %3860 = vmatprep.subr.mxu0 %v7397_v60 }
 0x2b9   :  { %v711_v19 = vpop.xlane.xlu1 %710  ;;  %3861 = vmatpush3.msra.mxu0 %v1426_v25  ;;  %v1441_v25 = vsub.f32 %v7460_v52, %v7259_v38  ;;  %v1435_v38 = vand.u32 4294901760, %v1434_v22 }
 0x2ba   :  { %7459 = vst [vmem:[#allocation49_spill] sm:$0xff] %v5235_v48  ;;  %vm5244_vm9 = vcmp.eq.s32.totalorder %v7448_v6, %v701_v63  ;;  %v712_v18 = vcvt.f32.s32 %v711_v19  ;;  %3680 = vmatmul.mubr.f32.gmra.mxu0 %v5235_v48  ;;  %v1170_v5 = vand.u32 4294901760, %v1169_v30  ;;  %v7260_v26 = vand.u32 4294901760, %v5235_v48  ;;  %3862 = vmatprep.subr.mxu0 %v7397_v60 }
 0x2bb   :  { %3682 = vmatprep.mubr.msk.f32.mxu0 %vm4211_vm0, %v7397_v60  ;;  %v2971_v53 = vsel %vm5244_vm9, 1.0, %v7397_v60  ;;  %v7261_v63 = vand.u32 4294901760, %v7463_v61  ;;  %3863 = vmatpush3.msra.mxu0 %v1433_v36  ;;  %v728_v30 = vshll.u32 %v727_v47, 16  ;;  %v7465_v47 = vld [vmem:[#allocation61_spill] sm:$0xff] }
 0x2bc   :  { %v715_v19 = vadd.s32 %v714_v0, %v712_v18  ;;  %3463 = vmatmul.mubr.f32.vlgmr.msra.gmra.mxu1 %v1170_v5  ;;  %v5260_v8 = vsub.f32 %v2971_v53, %v2971_v53  ;;  %v1179_v57 = vsub.f32 %v5235_v48, %v7260_v26  ;;  %3864 = vmatprep.subr.mxu0 %v7397_v60  ;;  %v7263_v0 = vand.u32 4294901760, %v7465_v47 }
 0x2bd   :  { %3538 = vmatpush3.msra.mxu1 %v1421_v11  ;;  %v725_v41 = vpop.xlane.xlu1 %724  ;;  %3465 = vmatprep.mubr.msk.f32.mxu1 %vm4211_vm0, %v7397_v60  ;;  %v1448_v36 = vsub.f32 %v7463_v61, %v7261_v63  ;;  %v7466_v18 = vmov 0  ;;  %v1442_v53 = vand.u32 4294901760, %v1441_v25 }
 0x2be   :  { %7464 = vst [vmem:[#allocation32_spill] sm:$0xff] %v5260_v8  ;;  %vm5274_vm10 = vcmp.eq.s32.totalorder %v7448_v6, %v715_v19  ;;  %v726_v5 = vcvt.f32.s32 %v725_v41  ;;  %3683 = vmatmul.mubr.f32.gmra.mxu0 %v5260_v8  ;;  %v1180_v11 = vand.u32 4294901760, %v1179_v57  ;;  %3539 = vmatprep.subr.mxu1 %v7397_v60  ;;  %v7264_v45 = vand.u32 4294901760, %v5260_v8 }
 0x2bf   :  { %v7467_v18 = vsel %vm5274_vm10, 4294967295, %v7466_v18  ;;  %3685 = vmatprep.mubr.msk.f32.mxu0 %vm4211_vm0, %v7397_v60  ;;  %v2972_v22 = vsel %vm5274_vm10, 1.0, %v7397_v60  ;;  %3540 = vmatpush3.msra.mxu1 %v1428_v2  ;;  %v1455_v41 = vsub.f32 %v7465_v47, %v7263_v0  ;;  %v7265_v19 = vand.u32 4294901760, %v4907_v44 }
 0x2c0   :  { %v755_v57 = vcvt.f32.s32 %v5042_v55  ;;  %v729_v26 = vadd.s32 %v728_v30, %v726_v5  ;;  %3466 = vmatmul.mubr.f32.gmra.mxu1 %v1180_v11  ;;  %v5291_v63 = vsub.f32 %v2972_v22, %v2972_v22  ;;  %v1189_v48 = vsub.f32 %v5260_v8, %v7264_v45  ;;  %3541 = vmatprep.subr.mxu1 %v7397_v60  ;;  %v7469_v30 = vld [vmem:[#allocation64_spill] sm:$0xff] }
 0x2c1   :  { %v742_v2 = vshll.u32 %v741_v20, 16  ;;  %v739_v25 = vpop.xlane.xlu1 %738  ;;  %3468 = vmatprep.mubr.msk.f32.mxu1 %vm4211_vm0, %v7397_v60  ;;  %3542 = vmatpush3.msra.mxu1 %v1435_v38  ;;  %v1449_v0 = vand.u32 4294901760, %v1448_v36  ;;  %v1462_v55 = vsub.f32 %v4907_v44, %v7265_v19  ;;  %v7268_v5 = vand.u32 4294901760, %v7469_v30 }
 0x2c2   :  { %7468 = vst [vmem:[#allocation10_spill] sm:$0xff] %v5291_v63  ;;  %vm5304_vm11 = vcmp.eq.s32.totalorder %v7448_v6, %v729_v26  ;;  %v7470_v11 = vmov 0  ;;  %v740_v22 = vcvt.f32.s32 %v739_v25  ;;  %3686 = vmatmul.mubr.f32.gmra.mxu0 %v5291_v63  ;;  %v1190_v20 = vand.u32 4294901760, %v1189_v48  ;;  %3543 = vmatprep.subr.mxu1 %v7397_v60 }
 0x2c3   :  { %v7471_v11 = vsel %vm5304_vm11, 4294967295, %v7470_v11  ;;  %3688 = vmatprep.mubr.msk.f32.mxu0 %vm4211_vm0, %v7397_v60  ;;  %v2973_v38 = vsel %vm5304_vm11, 1.0, %v7397_v60  ;;  %3544 = vmatpush3.msra.mxu1 %v1442_v53  ;;  %v1456_v26 = vand.u32 4294901760, %v1455_v41  ;;  %v1469_v36 = vsub.f32 %v7469_v30, %v7268_v5 }
 0x2c4   :  { %v7269_v25 = vand.u32 4294901760, %v4935_v4  ;;  %v756_v48 = vshll.u32 %v755_v57, 16  ;;  %v743_v19 = vadd.s32 %v742_v2, %v740_v22  ;;  %3469 = vmatmul.mubr.f32.gmra.mxu1 %v1190_v20  ;;  %v5320_v45 = vsub.f32 %v2973_v38, %v2973_v38  ;;  %3545 = vmatprep.subr.mxu1 %v7397_v60  ;;  %v7474_v2 = vld [vmem:[#allocation67_spill] sm:$0xff] }
 0x2c5   :  { %v7473_v8 = vand.u32 4294901760, %v5291_v63  ;;  %v769_v53 = vcvt.f32.s32 %v5049_v39  ;;  %v753_v41 = vpop.xlane.xlu1 %752  ;;  %3471 = vmatprep.mubr.msk.f32.mxu1 %vm4211_vm0, %v7397_v60  ;;  %3546 = vmatpush3.msra.mxu1 %v1449_v0  ;;  %v1463_v5 = vand.u32 4294901760, %v1462_v55  ;;  %v7273_v22 = vand.u32 4294901760, %v7474_v2 }
 0x2c6   :  { %7472 = vst [vmem:[#allocation34_spill] sm:$0xff] %v5320_v45  ;;  %v1476_v57 = vsub.f32 %v4935_v4, %v7269_v25  ;;  %vm5334_vm12 = vcmp.eq.s32.totalorder %v7448_v6, %v743_v19  ;;  %v7475_v20 = vmov 0  ;;  %3689 = vmatmul.mubr.f32.gmra.mxu0 %v5320_v45  ;;  %3547 = vmatprep.subr.mxu1 %v7397_v60  ;;  %v1470_v19 = vand.u32 4294901760, %v1469_v36 }
 0x2c7   :  { %v1199_v59 = vsub.f32 %v5291_v63, %v7473_v8  ;;  %v7476_v20 = vsel %vm5334_vm12, 4294967295, %v7475_v20  ;;  %v754_v8 = vcvt.f32.s32 %v753_v41  ;;  %3691 = vmatprep.mubr.msk.f32.mxu0 %vm4211_vm0, %v7397_v60  ;;  %v2974_v0 = vsel %vm5334_vm12, 1.0, %v7397_v60  ;;  %3548 = vmatpush3.msra.mxu1 %v1456_v26  ;;  %v7477_v41 = vld [vmem:[#allocation69_spill] sm:$0xff] }
 0x2c8   :  { %v1483_v55 = vsub.f32 %v7474_v2, %v7273_v22  ;;  %v7274_v25 = vand.u32 4294901760, %v7477_v41  ;;  %v5350_v38 = vsub.f32 %v2974_v0, %v2974_v0  ;;  %v7478_v63 = vand.u32 4294901760, %v5320_v45  ;;  %3549 = vmatprep.subr.mxu1 %v7397_v60 }
 0x2c9   :  { %v1200_v39 = vand.u32 4294901760, %v1199_v59  ;;  %v757_v59 = vadd.s32 %v756_v48, %v754_v8  ;;  %v770_v31 = vshll.u32 %v769_v53, 16  ;;  %v783_v26 = vcvt.f32.s32 %v5054_v1  ;;  %v767_v36 = vpop.xlane.xlu1 %766  ;;  %3550 = vmatpush3.msra.mxu1 %v1463_v5 }
 0x2ca   :  { %v1209_v33 = vsub.f32 %v5320_v45, %v7478_v63  ;;  %v1477_v22 = vand.u32 4294901760, %v1476_v57  ;;  %v1490_v48 = vsub.f32 %v7477_v41, %v7274_v25  ;;  %v7479_v8 = vmov 0  ;;  %3692 = vmatmul.mubr.f32.gmra.mxu0 %v5350_v38  ;;  %3551 = vmatprep.subr.mxu1 %v7397_v60 }
 0x2cb   :  { %3472 = vmatmul.mubr.f32.gmra.mxu1 %v1200_v39  ;;  %vm5363_vm13 = vcmp.eq.s32.totalorder %v7448_v6, %v757_v59  ;;  %v768_v63 = vcvt.f32.s32 %v767_v36  ;;  %v7277_v1 = vand.u32 4294901760, %v5350_v38  ;;  %3694 = vmatprep.mubr.msk.f32.mxu0 %vm4211_vm0, %v7397_v60  ;;  %v1484_v57 = vand.u32 4294901760, %v1483_v55  ;;  %v7481_v39 = vld [vmem:[#allocation71_spill] sm:$0xff] }
 0x2cc   :  { %3474 = vmatprep.mubr.msk.f32.mxu1 %vm4211_vm0, %v7397_v60  ;;  %v7480_v8 = vsel %vm5363_vm13, 4294967295, %v7479_v8  ;;  %v1210_v53 = vand.u32 4294901760, %v1209_v33  ;;  %v2975_v5 = vsel %vm5363_vm13, 1.0, %v7397_v60  ;;  %3552 = vmatpush3.msra.mxu1 %v1470_v19  ;;  %v1496_v0 = vand.u32 4294901760, %v7481_v39 }
 0x2cd   :  { %v771_v59 = vadd.s32 %v770_v31, %v768_v63  ;;  %v5376_v36 = vsub.f32 %v2975_v5, %v2975_v5  ;;  %v1219_v33 = vsub.f32 %v5350_v38, %v7277_v1  ;;  %3553 = vmatprep.subr.mxu1 %v7397_v60  ;;  %v784_v25 = vshll.u32 %v783_v26, 16  ;;  %v781_v42 = vpop.xlane.xlu0 %780 }
 0x2ce   :  { %v797_v45 = vcvt.f32.s32 %v5059_v21  ;;  %3554 = vmatpush3.msra.mxu1 %v1477_v22  ;;  %v1491_v19 = vand.u32 4294901760, %v1490_v48  ;;  %v1497_v31 = vsub.f32 %v7481_v39, %v1496_v0  ;;  %v7482_v55 = vmov 0 }
 0x2cf   :  { %3475 = vmatmul.mubr.f32.gmra.mxu1 %v1210_v53  ;;  %vm5389_vm14 = vcmp.eq.s32.totalorder %v7448_v6, %v771_v59  ;;  %v782_v63 = vcvt.f32.s32 %v781_v42  ;;  %3695 = vmatmul.mubr.f32.gmra.mxu0 %v5376_v36  ;;  %v1220_v26 = vand.u32 4294901760, %v1219_v33  ;;  %v7278_v21 = vand.u32 4294901760, %v5376_v36 }
 0x2d0   :  { %3477 = vmatprep.mubr.msk.f32.mxu1 %vm4211_vm0, %v7397_v60  ;;  %v7483_v55 = vsel %vm5389_vm14, 4294967295, %v7482_v55  ;;  %3555 = vmatprep.subr.mxu1 %v7397_v60  ;;  %v2976_v22 = vsel %vm5389_vm14, 1.0, %v7397_v60  ;;  %v798_v5 = vshll.u32 %v797_v45, 16  ;;  %v811_v59 = vcvt.f32.s32 %v5064_v54 }
 0x2d1   :  { %3697 = vmatprep.mubr.msk.f32.mxu0 %vm4211_vm0, %v7397_v60  ;;  %3556 = vmatpush3.msra.mxu1 %v1484_v57  ;;  %v785_v48 = vadd.s32 %v784_v25, %v782_v63  ;;  %v5401_v53 = vsub.f32 %v2976_v22, %v2976_v22  ;;  %v1229_v42 = vsub.f32 %v5376_v36, %v7278_v21  ;;  %v795_v33 = vpop.xlane.xlu1 %794  ;;  %v1498_v1 = vand.u32 4294901760, %v1497_v31 }
 0x2d2   :  { %3557 = vmatprep.subr.mxu1 %v7397_v60  ;;  %v7484_v25 = vmov 0  ;;  %v796_v57 = vcvt.f32.s32 %v795_v33  ;;  %v7486_v45 = vand.u32 4294901760, %v7460_v52  ;;  %v825_v33 = vcvt.f32.s32 %v5069_v49 }
 0x2d3   :  { %3478 = vmatmul.mubr.f32.gmra.mxu1 %v1220_v26  ;;  %vm5411_vm15 = vcmp.eq.s32.totalorder %v7448_v6, %v785_v48  ;;  %3698 = vmatmul.mubr.f32.gmra.mxu0 %v5401_v53  ;;  %v1230_v63 = vand.u32 4294901760, %v1229_v42  ;;  %v7279_v26 = vand.u32 4294901760, %v5401_v53  ;;  %v812_v42 = vshll.u32 %v811_v59, 16 }
 0x2d4   :  { %3480 = vmatprep.mubr.msk.f32.mxu1 %vm4211_vm0, %v7397_v60  ;;  %3558 = vmatpush3.msra.mxu1 %v1491_v19  ;;  %v7485_v25 = vsel %vm5411_vm15, 4294967295, %v7484_v25  ;;  %v2977_v54 = vsel %vm5411_vm15, 1.0, %v7397_v60  ;;  %v7281_v19 = vand.u32 4294901760, %v4991_v27  ;;  %v799_v31 = vadd.s32 %v798_v5, %v796_v57 }
 0x2d5   :  { %3559 = vmatprep.subr.mxu1 %v7397_v60  ;;  %3700 = vmatprep.mubr.msk.f32.mxu0 %vm4211_vm0, %v7397_v60  ;;  %v5426_v22 = vsub.f32 %v2977_v54, %v2977_v54  ;;  %v1239_v48 = vsub.f32 %v5401_v53, %v7279_v26  ;;  %v809_v21 = vpop.xlane.xlu0 %808  ;;  %v7487_v5 = vmov 0  ;;  %v7507_v39 = vand.u32 4294901760, %v4991_v27 }
 0x2d6   :  { %3865 = vmatpush3.msra.mxu0 %v7486_v45  ;;  %3560 = vmatpush3.msra.mxu1 %v1498_v1  ;;  %v1504_v52 = vsub.f32 %v4991_v27, %v7281_v19  ;;  %vm5439_vm1 = vcmp.eq.s32.totalorder %v7448_v6, %v799_v31  ;;  %v810_v57 = vcvt.f32.s32 %v809_v21  ;;  %v826_v31 = vshll.u32 %v825_v33, 16 }
 0x2d7   :  { %3481 = vmatmul.mubr.f32.gmra.mxu1 %v1230_v63  ;;  %3866 = vmatprep.subr.mxu0 %v7397_v60  ;;  %v7488_v5 = vsel %vm5439_vm1, 4294967295, %v7487_v5  ;;  %v1240_v59 = vand.u32 4294901760, %v1239_v48  ;;  %v7280_v49 = vand.u32 4294901760, %v5426_v22  ;;  %v2978_v1 = vsel %vm5439_vm1, 1.0, %v7397_v60 }
 0x2d8   :  { %3483 = vmatprep.mubr.msk.f32.mxu1 %vm4211_vm0, %v7397_v60  ;;  %3701 = vmatmul.mubr.f32.gmra.mxu0 %v5426_v22  ;;  %v7489_v63 = vand.u32 4294901760, %v7463_v61  ;;  %v813_v54 = vadd.s32 %v812_v42, %v810_v57  ;;  %v5453_v21 = vsub.f32 %v2978_v1, %v2978_v1  ;;  %v839_v48 = vcvt.f32.s32 %v5074_v23 }
 0x2d9   :  { %3561 = vmatprep.subr.mxu1 %v7397_v60  ;;  %3703 = vmatprep.mubr.msk.f32.mxu0 %vm4211_vm0, %v7397_v60  ;;  %v1249_v45 = vsub.f32 %v5426_v22, %v7280_v49  ;;  %v823_v26 = vpop.xlane.xlu1 %822  ;;  %v7490_v61 = vand.u32 4294901760, %v7465_v47  ;;  %v1505_v42 = vand.u32 4294901760, %v1504_v52  ;;  %v7491_v57 = vmov 0  ;;  %v7494_v52 = vld [vmem:[#allocation74_spill] sm:$0xff] }
 0x2da   :  { %3867 = vmatpush3.msra.mxu0 %v7489_v63  ;;  %vm5465_vm2 = vcmp.eq.s32.totalorder %v7448_v6, %v813_v54  ;;  %v7282_v33 = vand.u32 4294901760, %v5453_v21  ;;  %v7493_v47 = vand.u32 4294901760, %v4907_v44  ;;  %v1510_v63 = vand.u32 4294901760, %v7494_v52 }
 0x2db   :  { %3484 = vmatmul.mubr.f32.gmra.mxu1 %v1240_v59  ;;  %3868 = vmatprep.subr.mxu0 %v7397_v60  ;;  %v7492_v57 = vsel %vm5465_vm2, 4294967295, %v7491_v57  ;;  %v824_v59 = vcvt.f32.s32 %v823_v26  ;;  %v1250_v1 = vand.u32 4294901760, %v1249_v45  ;;  %v2979_v23 = vsel %vm5465_vm2, 1.0, %v7397_v60 }
 0x2dc   :  { %3486 = vmatprep.mubr.msk.f32.mxu1 %vm4211_vm0, %v7397_v60  ;;  %3869 = vmatpush3.msra.mxu0 %v7490_v61  ;;  %v5480_v54 = vsub.f32 %v2979_v23, %v2979_v23  ;;  %v1259_v45 = vsub.f32 %v5453_v21, %v7282_v33  ;;  %v840_v61 = vshll.u32 %v839_v48, 16  ;;  %v853_v49 = vcvt.f32.s32 %v5079_v62 }
 0x2dd   :  { %3704 = vmatmul.mubr.f32.gmra.mxu0 %v5453_v21  ;;  %3870 = vmatprep.subr.mxu0 %v7397_v60  ;;  %v827_v26 = vadd.s32 %v826_v31, %v824_v59  ;;  %v837_v19 = vpop.xlane.xlu0 %836  ;;  %v1511_v44 = vsub.f32 %v7494_v52, %v1510_v63  ;;  %v7495_v31 = vmov 0 }
 0x2de   :  { %3706 = vmatprep.mubr.msk.f32.mxu0 %vm4211_vm0, %v7397_v60  ;;  %3871 = vmatpush3.msra.mxu0 %v7493_v47  ;;  %v838_v59 = vcvt.f32.s32 %v837_v19  ;;  %v1260_v48 = vand.u32 4294901760, %v1259_v45  ;;  %v7283_v62 = vand.u32 4294901760, %v5480_v54  ;;  %v867_v45 = vcvt.f32.s32 %v5084_v9 }
 0x2df   :  { %3487 = vmatmul.mubr.f32.gmra.mxu1 %v1250_v1  ;;  %3872 = vmatprep.subr.mxu0 %v7397_v60  ;;  %vm5493_vm3 = vcmp.eq.s32.totalorder %v7448_v6, %v827_v26  ;;  %v7497_v1 = vand.u32 4294901760, %v7469_v30  ;;  %v854_v26 = vshll.u32 %v853_v49, 16  ;;  %v7498_v30 = vand.u32 4294901760, %v4935_v4 }
 0x2e0   :  { %3489 = vmatprep.mubr.msk.f32.mxu1 %vm4211_vm0, %v7397_v60  ;;  %3562 = vmatpush3.msra.mxu1 %v1505_v42  ;;  %v7496_v31 = vsel %vm5493_vm3, 4294967295, %v7495_v31  ;;  %v2980_v42 = vsel %vm5493_vm3, 1.0, %v7397_v60  ;;  %v841_v23 = vadd.s32 %v840_v61, %v838_v59  ;;  %v1269_v47 = vsub.f32 %v5480_v54, %v7283_v62 }
 0x2e1   :  { %3707 = vmatmul.mubr.f32.gmra.mxu0 %v5480_v54  ;;  %3563 = vmatprep.subr.mxu1 %v7397_v60  ;;  %v5507_v19 = vsub.f32 %v2980_v42, %v2980_v42  ;;  %v851_v33 = vpop.xlane.xlu1 %850  ;;  %v1512_v61 = vand.u32 4294901760, %v1511_v44  ;;  %v7499_v59 = vmov 0  ;;  %v7501_v9 = vand.u32 4294901760, %v7474_v2 }
 0x2e2   :  { %3709 = vmatprep.mubr.msk.f32.mxu0 %vm4211_vm0, %v7397_v60  ;;  %3873 = vmatpush3.msra.mxu0 %v7497_v1  ;;  %vm5519_vm4 = vcmp.eq.s32.totalorder %v7448_v6, %v841_v23  ;;  %v1270_v42 = vand.u32 4294901760, %v1269_v47  ;;  %v1517_v44 = vand.u32 4294901760, %v5019_v34  ;;  %v868_v47 = vshll.u32 %v867_v45, 16 }
 0x2e3   :  { %3490 = vmatmul.mubr.f32.gmra.mxu1 %v1260_v48  ;;  %3874 = vmatprep.subr.mxu0 %v7397_v60  ;;  %v7500_v59 = vsel %vm5519_vm4, 4294967295, %v7499_v59  ;;  %v852_v48 = vcvt.f32.s32 %v851_v33  ;;  %v7284_v49 = vand.u32 4294901760, %v5507_v19  ;;  %v2981_v4 = vsel %vm5519_vm4, 1.0, %v7397_v60 }
 0x2e4   :  { %3492 = vmatprep.mubr.msk.f32.mxu1 %vm4211_vm0, %v7397_v60  ;;  %3875 = vmatpush3.msra.mxu0 %v7498_v30  ;;  %v5534_v1 = vsub.f32 %v2981_v4, %v2981_v4  ;;  %v881_v30 = vcvt.f32.s32 %v5089_v46  ;;  %v1518_v2 = vsub.f32 %v5019_v34, %v1517_v44 }
 0x2e5   :  { %3710 = vmatmul.mubr.f32.gmra.mxu0 %v5507_v19  ;;  %3876 = vmatprep.subr.mxu0 %v7397_v60  ;;  %v855_v33 = vadd.s32 %v854_v26, %v852_v48  ;;  %v1279_v23 = vsub.f32 %v5507_v19, %v7284_v49  ;;  %v865_v62 = vpop.xlane.xlu0 %864  ;;  %v7502_v26 = vmov 0 }
 0x2e6   :  { %3712 = vmatprep.mubr.msk.f32.mxu0 %vm4211_vm0, %v7397_v60  ;;  %3877 = vmatpush3.msra.mxu0 %v7501_v9  ;;  %v866_v48 = vcvt.f32.s32 %v865_v62  ;;  %v7333_v46 = vand.u32 4294901760, %v5534_v1 }
 0x2e7   :  { %3493 = vmatmul.mubr.f32.gmra.mxu1 %v1270_v42  ;;  %3878 = vmatprep.subr.mxu0 %v7397_v60  ;;  %vm5547_vm5 = vcmp.eq.s32.totalorder %v7448_v6, %v855_v33  ;;  %v1280_v45 = vand.u32 4294901760, %v1279_v23  ;;  %v7504_v42 = vand.u32 4294901760, %v7477_v41  ;;  %v882_v33 = vshll.u32 %v881_v30, 16 }
 0x2e8   :  { %3495 = vmatprep.mubr.msk.f32.mxu1 %vm4211_vm0, %v7397_v60  ;;  %3564 = vmatpush3.msra.mxu1 %v1512_v61  ;;  %v7503_v26 = vsel %vm5547_vm5, 4294967295, %v7502_v26  ;;  %v2982_v61 = vsel %vm5547_vm5, 1.0, %v7397_v60  ;;  %v869_v4 = vadd.s32 %v868_v47, %v866_v48  ;;  %v1289_v9 = vsub.f32 %v5534_v1, %v7333_v46  ;;  %v7570_v46 = vld [vmem:[#allocation76_spill] sm:$0xff] }
 0x2e9   :  { %3713 = vmatmul.mubr.f32.gmra.mxu0 %v5534_v1  ;;  %3565 = vmatprep.subr.mxu1 %v7397_v60  ;;  %v5561_v62 = vsub.f32 %v2982_v61, %v2982_v61  ;;  %v895_v23 = vcvt.f32.s32 %v5094_v17  ;;  %v879_v49 = vpop.xlane.xlu1 %878  ;;  %v1519_v41 = vand.u32 4294901760, %v1518_v2  ;;  %v7505_v47 = vmov 0 }
 0x2ea   :  { %3715 = vmatprep.mubr.msk.f32.mxu0 %vm4211_vm0, %v7397_v60  ;;  %3879 = vmatpush3.msra.mxu0 %v7504_v42  ;;  %vm5573_vm6 = vcmp.eq.s32.totalorder %v7448_v6, %v869_v4  ;;  %v880_v48 = vcvt.f32.s32 %v879_v49  ;;  %v909_v4 = vcvt.f32.s32 %v5099_v50 }
 0x2eb   :  { %3496 = vmatmul.mubr.f32.gmra.mxu1 %v1280_v45  ;;  %3880 = vmatprep.subr.mxu0 %v7397_v60  ;;  %v7506_v47 = vsel %vm5573_vm6, 4294967295, %v7505_v47  ;;  %v1290_v45 = vand.u32 4294901760, %v1289_v9  ;;  %v7310_v30 = vand.u32 4294901760, %v5561_v62  ;;  %v2983_v17 = vsel %vm5573_vm6, 1.0, %v7397_v60 }
 0x2ec   :  { %3498 = vmatprep.mubr.msk.f32.mxu1 %vm4211_vm0, %v7397_v60  ;;  %3881 = vmatpush3.msra.mxu0 %v1496_v0  ;;  %v1524_v0 = vand.u32 4294901760, %v5028_v16  ;;  %v883_v49 = vadd.s32 %v882_v33, %v880_v48  ;;  %v5588_v2 = vsub.f32 %v2983_v17, %v2983_v17  ;;  %v896_v42 = vshll.u32 %v895_v23, 16 }
 0x2ed   :  { %3716 = vmatmul.mubr.f32.gmra.mxu0 %v5561_v62  ;;  %3882 = vmatprep.subr.mxu0 %v7397_v60  ;;  %v1299_v61 = vsub.f32 %v5561_v62, %v7310_v30  ;;  %v893_v9 = vpop.xlane.xlu0 %892  ;;  %v7508_v33 = vmov 0 }
 0x2ee   :  { %3718 = vmatprep.mubr.msk.f32.mxu0 %vm4211_vm0, %v7397_v60  ;;  %3883 = vmatpush3.msra.mxu0 %v7507_v39  ;;  %v1525_v27 = vsub.f32 %v5028_v16, %v1524_v0  ;;  %vm5599_vm12 = vcmp.eq.s32.totalorder %v7448_v6, %v883_v49  ;;  %v894_v48 = vcvt.f32.s32 %v893_v9  ;;  %v7306_v23 = vand.u32 4294901760, %v5588_v2 }
 0x2ef   :  { %3499 = vmatmul.mubr.f32.gmra.mxu1 %v1290_v45  ;;  %3884 = vmatprep.subr.mxu0 %v7397_v60  ;;  %v7509_v33 = vsel %vm5599_vm12, 4294967295, %v7508_v33  ;;  %v1300_v45 = vand.u32 4294901760, %v1299_v61  ;;  %v2984_v16 = vsel %vm5599_vm12, 1.0, %v7397_v60  ;;  %v910_v39 = vshll.u32 %v909_v4, 16 }
 0x2f0   :  { %3501 = vmatprep.mubr.msk.f32.mxu1 %vm4211_vm0, %v7397_v60  ;;  %3566 = vmatpush3.msra.mxu1 %v1519_v41  ;;  %7510 = vst [vmem:[#allocation12_spill] sm:$0xff] %v7509_v33  ;;  %v897_v50 = vadd.s32 %v896_v42, %v894_v48  ;;  %v5613_v41 = vsub.f32 %v2984_v16, %v2984_v16  ;;  %v923_v49 = vcvt.f32.s32 %v5104_v58  ;;  %v1526_v52 = vand.u32 4294901760, %v1525_v27 }
 0x2f1   :  { %3719 = vmatmul.mubr.f32.gmra.mxu0 %v5588_v2  ;;  %3567 = vmatprep.subr.mxu1 %v7397_v60  ;;  %v1309_v17 = vsub.f32 %v5588_v2, %v7306_v23  ;;  %v907_v61 = vpop.xlane.xlu1 %906  ;;  %v7529_v23 = vmov 0 }
 0x2f2   :  { %3721 = vmatprep.mubr.msk.f32.mxu0 %vm4211_vm0, %v7397_v60  ;;  %3885 = vmatpush3.msra.mxu0 %v1510_v63  ;;  %vm5625_vm13 = vcmp.eq.s32.totalorder %v7448_v6, %v897_v50  ;;  %v7511_v63 = vmov 0  ;;  %v908_v42 = vcvt.f32.s32 %v907_v61  ;;  %v7302_v4 = vand.u32 4294901760, %v5613_v41 }
 0x2f3   :  { %3502 = vmatmul.mubr.f32.gmra.mxu1 %v1300_v45  ;;  %3886 = vmatprep.subr.mxu0 %v7397_v60  ;;  %v7512_v63 = vsel %vm5625_vm13, 4294967295, %v7511_v63  ;;  %v1310_v9 = vand.u32 4294901760, %v1309_v17  ;;  %v2985_v34 = vsel %vm5625_vm13, 1.0, %v7397_v60  ;;  %v924_v48 = vshll.u32 %v923_v49, 16 }
 0x2f4   :  { %3504 = vmatprep.mubr.msk.f32.mxu1 %vm4211_vm0, %v7397_v60  ;;  %3887 = vmatpush3.msra.mxu0 %v1517_v44  ;;  %7513 = vst [vmem:[#allocation36_spill] sm:$0xff] %v7512_v63  ;;  %v911_v58 = vadd.s32 %v910_v39, %v908_v42  ;;  %v5637_v44 = vsub.f32 %v2985_v34, %v2985_v34  ;;  %v937_v45 = vcvt.f32.s32 %v5109_v10 }
 0x2f5   :  { %3722 = vmatmul.mubr.f32.gmra.mxu0 %v5613_v41  ;;  %3888 = vmatprep.subr.mxu0 %v7397_v60  ;;  %v1319_v27 = vsub.f32 %v5613_v41, %v7302_v4  ;;  %v921_v16 = vpop.xlane.xlu0 %920  ;;  %v7526_v4 = vmov 0 }
 0x2f6   :  { %3724 = vmatprep.mubr.msk.f32.mxu0 %vm4211_vm0, %v7397_v60  ;;  %3889 = vmatpush3.msra.mxu0 %v1524_v0  ;;  %vm5647_vm13 = vcmp.eq.s32.totalorder %v7448_v6, %v911_v58  ;;  %v7514_v0 = vmov 0  ;;  %v922_v50 = vcvt.f32.s32 %v921_v16  ;;  %v7298_v39 = vand.u32 4294901760, %v5637_v44 }
 0x2f7   :  { %3505 = vmatmul.mubr.f32.gmra.mxu1 %v1310_v9  ;;  %2872 = vmatprep.subr.mxu0 %v7397_v60  ;;  %v7515_v0 = vsel %vm5647_vm13, 4294967295, %v7514_v0  ;;  %v1320_v17 = vand.u32 4294901760, %v1319_v27  ;;  %v2986_v10 = vsel %vm5647_vm13, 1.0, %v7397_v60  ;;  %v938_v42 = vshll.u32 %v937_v45, 16 }
 0x2f8   :  { %3507 = vmatprep.mubr.msk.f32.mxu1 %vm4211_vm0, %v7397_v60  ;;  %3568 = vmatpush3.msra.mxu1 %v1526_v52  ;;  %7516 = vst [vmem:[#allocation14_spill] sm:$0xff] %v7515_v0  ;;  %v925_v49 = vadd.s32 %v924_v48, %v922_v50  ;;  %v5659_v61 = vsub.f32 %v2986_v10, %v2986_v10  ;;  %v951_v9 = vcvt.f32.s32 %v5114_v14  ;;  %v7517_v58 = vmov 0 }
 0x2f9   :  { %3725 = vmatmul.mubr.f32.gmra.mxu0 %v5637_v44  ;;  %3751 = vmatprep.subr.mxu1 %v7397_v60  ;;  %v1329_v52 = vsub.f32 %v5637_v44, %v7298_v39  ;;  %v935_v34 = vpop.xlane.xlu1 %934  ;;  %v7523_v39 = vmov 0 }
 0x2fa   :  { %3727 = vmatprep.mubr.msk.f32.mxu0 %vm4211_vm0, %v7397_v60  ;;  %vm5668_vm14 = vcmp.eq.s32.totalorder %v7448_v6, %v925_v49  ;;  %v936_v27 = vcvt.f32.s32 %v935_v34  ;;  %v7295_v16 = vand.u32 4294901760, %v5659_v61  ;;  %v952_v10 = vshll.u32 %v951_v9, 16 }
 0x2fb   :  { %3508 = vmatmul.mubr.f32.gmra.mxu1 %v1320_v17  ;;  %v7518_v58 = vsel %vm5668_vm14, 4294967295, %v7517_v58  ;;  %v1330_v48 = vand.u32 4294901760, %v1329_v52  ;;  %v2987_v14 = vsel %vm5668_vm14, 1.0, %v7397_v60  ;;  %v965_v49 = vcvt.f32.s32 %v5121_v28 }
 0x2fc   :  { %3510 = vmatprep.mubr.msk.f32.mxu1 %vm4211_vm0, %v7397_v60  ;;  %7519 = vst [vmem:[#allocation38_spill] sm:$0xff] %v7518_v58  ;;  %v939_v45 = vadd.s32 %v938_v42, %v936_v27  ;;  %v5679_v50 = vsub.f32 %v2987_v14, %v2987_v14  ;;  %v1339_v17 = vsub.f32 %v5659_v61, %v7295_v16  ;;  %v7520_v34 = vmov 0 }
 0x2fd   :  { %3728 = vmatmul.mubr.f32.gmra.mxu0 %v5659_v61  ;;  %v949_v52 = vpop.xlane.xlu0 %948 }
 0x2fe   :  { %3730 = vmatprep.mubr.msk.f32.mxu0 %vm4211_vm0, %v7397_v60  ;;  %vm5688_vm13 = vcmp.eq.s32.totalorder %v7448_v6, %v939_v45  ;;  %v950_v42 = vcvt.f32.s32 %v949_v52  ;;  %v1340_v27 = vand.u32 4294901760, %v1339_v17  ;;  %v966_v52 = vshll.u32 %v965_v49, 16 }
 0x2ff   :  { %3511 = vmatmul.mubr.f32.gmra.mxu1 %v1330_v48  ;;  %v7521_v34 = vsel %vm5688_vm13, 4294967295, %v7520_v34  ;;  %v7299_v48 = vand.u32 4294901760, %v5679_v50  ;;  %v2988_v28 = vsel %vm5688_vm13, 1.0, %v7397_v60  ;;  %v979_v17 = vcvt.f32.s32 %v5128_v56 }
 0x300   :  { %3513 = vmatprep.mubr.msk.f32.mxu1 %vm4211_vm0, %v7397_v60  ;;  %7522 = vst [vmem:[#allocation16_spill] sm:$0xff] %v7521_v34  ;;  %v953_v9 = vadd.s32 %v952_v10, %v950_v42  ;;  %v5699_v14 = vsub.f32 %v2988_v28, %v2988_v28 }
 0x301   :  { %3731 = vmatmul.mubr.f32.gmra.mxu0 %v5679_v50  ;;  %v1349_v45 = vsub.f32 %v5679_v50, %v7299_v48  ;;  %v963_v16 = vpop.xlane.xlu1 %962 }
 0x302   :  { %3733 = vmatprep.mubr.msk.f32.mxu0 %vm4211_vm0, %v7397_v60  ;;  %vm5708_vm14 = vcmp.eq.s32.totalorder %v7448_v6, %v953_v9  ;;  %v964_v10 = vcvt.f32.s32 %v963_v16  ;;  %v980_v9 = vshll.u32 %v979_v17, 16 }
 0x303   :  { %3514 = vmatmul.mubr.f32.gmra.mxu1 %v1340_v27  ;;  %v7524_v39 = vsel %vm5708_vm14, 4294967295, %v7523_v39  ;;  %v1350_v42 = vand.u32 4294901760, %v1349_v45  ;;  %v7303_v27 = vand.u32 4294901760, %v5699_v14  ;;  %v2989_v56 = vsel %vm5708_vm14, 1.0, %v7397_v60 }
 0x304   :  { %3516 = vmatprep.mubr.msk.f32.mxu1 %vm4211_vm0, %v7397_v60  ;;  %7525 = vst [vmem:[#allocation40_spill] sm:$0xff] %v7524_v39  ;;  %v967_v49 = vadd.s32 %v966_v52, %v964_v10  ;;  %v5719_v28 = vsub.f32 %v2989_v56, %v2989_v56  ;;  %v993_v45 = vcvt.f32.s32 %v5135_v3 }
 0x305   :  { %3734 = vmatmul.mubr.f32.gmra.mxu0 %v5699_v14  ;;  %v1359_v16 = vsub.f32 %v5699_v14, %v7303_v27  ;;  %v977_v48 = vpop.xlane.xlu0 %976 }
 0x306   :  { %3736 = vmatprep.mubr.msk.f32.mxu0 %vm4211_vm0, %v7397_v60  ;;  %vm5728_vm13 = vcmp.eq.s32.totalorder %v7448_v6, %v967_v49  ;;  %v978_v52 = vcvt.f32.s32 %v977_v48  ;;  %v994_v49 = vshll.u32 %v993_v45, 16 }
 0x307   :  { %3517 = vmatmul.mubr.f32.gmra.mxu1 %v1350_v42  ;;  %v7527_v4 = vsel %vm5728_vm13, 4294967295, %v7526_v4  ;;  %v1360_v10 = vand.u32 4294901760, %v1359_v16  ;;  %v7307_v42 = vand.u32 4294901760, %v5719_v28  ;;  %v2990_v3 = vsel %vm5728_vm13, 1.0, %v7397_v60 }
 0x308   :  { %3519 = vmatprep.mubr.msk.f32.mxu1 %vm4211_vm0, %v7397_v60  ;;  %7528 = vst [vmem:[#allocation18_spill] sm:$0xff] %v7527_v4  ;;  %v981_v17 = vadd.s32 %v980_v9, %v978_v52  ;;  %v5739_v56 = vsub.f32 %v2990_v3, %v2990_v3  ;;  %v1007_v16 = vcvt.f32.s32 %v5142_v13 }
 0x309   :  { %3737 = vmatmul.mubr.f32.gmra.mxu0 %v5719_v28  ;;  %v1369_v48 = vsub.f32 %v5719_v28, %v7307_v42  ;;  %v991_v27 = vpop.xlane.xlu1 %990 }
 0x30a   :  { %3739 = vmatprep.mubr.msk.f32.mxu0 %vm4211_vm0, %v7397_v60  ;;  %vm5748_vm14 = vcmp.eq.s32.totalorder %v7448_v6, %v981_v17  ;;  %v992_v9 = vcvt.f32.s32 %v991_v27  ;;  %v1008_v17 = vshll.u32 %v1007_v16, 16 }
 0x30b   :  { %3520 = vmatmul.mubr.f32.gmra.mxu1 %v1360_v10  ;;  %v7530_v23 = vsel %vm5748_vm14, 4294967295, %v7529_v23  ;;  %v1370_v52 = vand.u32 4294901760, %v1369_v48  ;;  %v7332_v10 = vand.u32 4294901760, %v5739_v56  ;;  %v2991_v13 = vsel %vm5748_vm14, 1.0, %v7397_v60 }
 0x30c   :  { %3522 = vmatprep.mubr.msk.f32.mxu1 %vm4211_vm0, %v7397_v60  ;;  %7531 = vst [vmem:[#allocation42_spill] sm:$0xff] %v7530_v23  ;;  %v995_v45 = vadd.s32 %v994_v49, %v992_v9  ;;  %v5759_v3 = vsub.f32 %v2991_v13, %v2991_v13  ;;  %v7532_v48 = vmov 0 }
 0x30d   :  { %3740 = vmatmul.mubr.f32.gmra.mxu0 %v5739_v56  ;;  %v1379_v27 = vsub.f32 %v5739_v56, %v7332_v10  ;;  %v1005_v42 = vpop.xlane.xlu0 %1004  ;;  %v7569_v10 = vld [vmem:[#allocation75_spill] sm:$0xff] }
 0x30e   :  { %3742 = vmatprep.mubr.msk.f32.mxu0 %vm4211_vm0, %v7397_v60  ;;  %vm5767_vm13 = vcmp.eq.s32.totalorder %v7448_v6, %v995_v45  ;;  %v1006_v30 = vcvt.f32.s32 %v1005_v42  ;;  %v7313_v9 = vand.u32 4294901760, %v5759_v3 }
 0x30f   :  { %3523 = vmatmul.mubr.f32.gmra.mxu1 %v1370_v52  ;;  %v7533_v48 = vsel %vm5767_vm13, 4294967295, %v7532_v48  ;;  %v1380_v49 = vand.u32 4294901760, %v1379_v27  ;;  %v2992_v16 = vsel %vm5767_vm13, 1.0, %v7397_v60 }
 0x310   :  { %3525 = vmatprep.mubr.msk.f32.mxu1 %vm4211_vm0, %v7397_v60  ;;  %7534 = vst [vmem:[#allocation20_spill] sm:$0xff] %v7533_v48  ;;  %v1009_v52 = vadd.s32 %v1008_v17, %v1006_v30  ;;  %v5778_v13 = vsub.f32 %v2992_v16, %v2992_v16  ;;  %v1389_v42 = vsub.f32 %v5759_v3, %v7313_v9 }
 0x311   :  { %3743 = vmatmul.mubr.f32.gmra.mxu0 %v5759_v3  ;;  %v486_v45 = vpop.xlane.xlu0 %485 }
 0x312   :  { %3745 = vmatprep.mubr.msk.f32.mxu0 %vm4211_vm0, %v7397_v60  ;;  %vm5786_vm14 = vcmp.eq.s32.totalorder %v7448_v6, %v1009_v52  ;;  %4111 = vrcp.f32 %v486_v45  ;;  %v1390_v30 = vand.u32 4294901760, %v1389_v42  ;;  %v7314_v17 = vand.u32 4294901760, %v5778_v13 }
 0x313   :  { %3526 = vmatmul.mubr.f32.gmra.mxu1 %v1380_v49  ;;  %v2993_v49 = vsel %vm5786_vm14, 1.0, %v7397_v60 }
 0x314   :  { %3528 = vmatprep.mubr.msk.f32.mxu1 %vm4211_vm0, %v7397_v60  ;;  %v5797_v16 = vsub.f32 %v2993_v49, %v2993_v49  ;;  %v1399_v52 = vsub.f32 %v5778_v13, %v7314_v17  ;;  %v7344_v17 = vmov 1.0  }
 0x315   :  { %3746 = vmatmul.mubr.f32.gmra.mxu0 %v5778_v13  ;;  %v490_v45 = vpop.xlane.xlu0 %489 }
 0x316   :  { %3748 = vmatprep.mubr.msk.f32.mxu0 %vm4211_vm0, %v7397_v60  ;;  %4113 = vrcp.f32 %v490_v45  ;;  %v1400_v42 = vand.u32 4294901760, %v1399_v52  ;;  %v7331_v9 = vand.u32 4294901760, %v5797_v16 }
 0x317   :  { %3529 = vmatmul.mubr.f32.gmra.mxu1 %v1390_v30 }
 0x318   :  { %3531 = vmatprep.mubr.msk.f32.mxu1 %vm4211_vm0, %v7397_v60  ;;  %v1409_v30 = vsub.f32 %v5797_v16, %v7331_v9  ;;  %v7568_v9 = vld [vmem:[#allocation73_spill] sm:$0xff] }
 0x319   :  { %3749 = vmatmul.mubr.f32.gmra.mxu0 %v5797_v16  ;;  %v494_v49 = vpop.xlane.xlu0 %493 }
 0x31a   :  { %3890 = vmatprep.mubr.msk.f32.mxu0 %vm4211_vm0, %v7397_v60  ;;  %4115 = vrcp.f32 %v494_v49  ;;  %v1410_v52 = vand.u32 4294901760, %v1409_v30  ;;  %v7537_v49 = vld [vmem:[#allocation50_spill] sm:$0xff] }
 0x31b   :  { %3532 = vmatmul.mubr.f32.gmra.mxu1 %v1400_v42 }
 0x31c   :  { %3534 = vmatprep.mubr.msk.f32.mxu1 %vm4211_vm0, %v7397_v60 }
 0x31d   :  { %3891 = vmatmul.mubr.msk.f32.vlgmr.msra.gmra.mxu0 %vm5201_vm7, %v7344_v17  ;;  %v498_v45 = vpop.xlane.xlu0 %497 }
 0x31e   :  { %3069 = vmatpush1.msk.msra.mxu0 %vm5599_vm12, %v7344_v17  ;;  %3893 = vmatprep.mubr.msk.f32.mxu0 %vm4211_vm0, %v7397_v60  ;;  %4117 = vrcp.f32 %v498_v45  ;;  %vm7539_vm12 = vnez %v7483_v55 }
 0x31f   :  { %2874 = vmatprep.subr.mxu0 %v7397_v60  ;;  %3535 = vmatmul.mubr.f32.gmra.mxu1 %v1410_v52  ;;  %v4112_v42 = vpop.eup %4111 }
 0x320   :  { %3070 = vmatpush1.msk.msra.mxu0 %vm5573_vm6, %v7344_v17  ;;  %3569 = vmatprep.mubr.msk.f32.mxu1 %vm4211_vm0, %v7397_v60  ;;  %v560_v30 = vmul.f32 %v4112_v42, %v5150_v7  ;;  %vm7540_vm6 = vnez %v7480_v8 }
 0x321   :  { %2876 = vmatprep.subr.mxu0 %v7397_v60  ;;  %3894 = vmatmul.mubr.msk.f32.gmra.mxu0 %vm5218_vm8, %v7344_v17  ;;  %v502_v52 = vpop.xlane.xlu0 %501 }
 0x322   :  { %3071 = vmatpush1.msk.msra.mxu0 %vm5547_vm5, %v7344_v17  ;;  %3896 = vmatprep.mubr.msk.f32.mxu0 %vm4211_vm0, %v7397_v60  ;;  %585 = vst [vmem:[%s7147_s5] sm:$0xff] %v560_v30  ;;  %4119 = vrcp.f32 %v502_v52  ;;  %v7538_v52 = vld [vmem:[#allocation52_spill] sm:$0xff]  ;;  %vm7542_vm5 = vnez %v7476_v20 }
 0x323   :  { %2878 = vmatprep.subr.mxu0 %v7397_v60  ;;  %3570 = vmatmul.mubr.msk.f32.vlgmr.msra.gmra.mxu1 %vm5201_vm7, %v7344_v17  ;;  %v4114_v7 = vpop.eup %4113 }
 0x324   :  { %3752 = vmatpush3.msra.mxu1 %v7537_v49  ;;  %3072 = vmatpush1.msk.msra.mxu0 %vm5519_vm4, %v7344_v17  ;;  %v562_v45 = vmul.f32 %v4114_v7, %v5155_v43 }
 0x325   :  { %2880 = vmatprep.subr.mxu0 %v7397_v60  ;;  %3897 = vmatmul.mubr.msk.f32.gmra.mxu0 %vm5244_vm9, %v7344_v17  ;;  %v506_v42 = vpop.xlane.xlu0 %505 }
 0x326   :  { %3073 = vmatpush1.msk.msra.mxu0 %vm5493_vm3, %v7344_v17  ;;  %3572 = vmatprep.mubr.msk.f32.mxu1 %vm4211_vm0, %v7397_v60  ;;  %587 = vst [vmem:[%s7147_s5 + $0x10] sm:$0xff] %v562_v45  ;;  %4121 = vrcp.f32 %v506_v42 }
 0x327   :  { %2882 = vmatprep.subr.mxu0 %v7397_v60  ;;  %3573 = vmatmul.mubr.msk.f32.gmra.mxu1 %vm5218_vm8, %v7344_v17  ;;  %v4116_v43 = vpop.eup %4115 }
 0x328   :  { %3074 = vmatpush1.msk.msra.mxu0 %vm5465_vm2, %v7344_v17  ;;  %3899 = vmatprep.mubr.msk.f32.mxu0 %vm4211_vm0, %v7397_v60  ;;  %v564_v30 = vmul.f32 %v4116_v43, %v5160_v35  ;;  %v7541_v43 = vld [vmem:[#allocation54_spill] sm:$0xff] }
 0x329   :  { %2884 = vmatprep.subr.mxu0 %v7397_v60  ;;  %3753 = vmatprep.subr.mxu1 %v7397_v60  ;;  %v510_v7 = vpop.xlane.xlu0 %509 }
 0x32a   :  { %3900 = vmatmul.mubr.msk.f32.gmra.mxu0 %vm5274_vm10, %v7344_v17  ;;  %3575 = vmatprep.mubr.msk.f32.mxu1 %vm4211_vm0, %v7397_v60  ;;  %589 = vst [vmem:[%s7147_s5 + $0x20] sm:$0xff] %v564_v30  ;;  %4123 = vrcp.f32 %v510_v7 }
 0x32b   :  { %3075 = vmatpush1.msk.msra.mxu0 %vm5439_vm1, %v7344_v17  ;;  %3754 = vmatpush3.msra.mxu1 %v7538_v52  ;;  %v4118_v35 = vpop.eup %4117 }
 0x32c   :  { %2886 = vmatprep.subr.mxu0 %v7397_v60  ;;  %3576 = vmatmul.mubr.msk.f32.gmra.mxu1 %vm5244_vm9, %v7344_v17  ;;  %v566_v45 = vmul.f32 %v4118_v35, %v5165_v51 }
 0x32d   :  { %3076 = vmatpush1.msk.msra.mxu0 %vm5411_vm15, %v7344_v17  ;;  %3902 = vmatprep.mubr.msk.f32.mxu0 %vm4211_vm0, %v7397_v60  ;;  %v514_v42 = vpop.xlane.xlu0 %513 }
 0x32e   :  { %2888 = vmatprep.subr.mxu0 %v7397_v60  ;;  %3903 = vmatmul.mubr.msk.f32.gmra.mxu0 %vm5304_vm11, %v7344_v17  ;;  %591 = vst [vmem:[%s7147_s5 + $0x30] sm:$0xff] %v566_v45  ;;  %4125 = vrcp.f32 %v514_v42 }
 0x32f   :  { %3077 = vmatpush1.msk.msra.mxu0 %vm7539_vm12, %v7344_v17  ;;  %3578 = vmatprep.mubr.msk.f32.mxu1 %vm4211_vm0, %v7397_v60  ;;  %v4120_v51 = vpop.eup %4119 }
 0x330   :  { %2890 = vmatprep.subr.mxu0 %v7397_v60  ;;  %3579 = vmatmul.mubr.msk.f32.gmra.mxu1 %vm5274_vm10, %v7344_v17  ;;  %v568_v30 = vmul.f32 %v4120_v51, %v5170_v37 }
 0x331   :  { %3755 = vmatprep.subr.mxu1 %v7397_v60  ;;  %3078 = vmatpush1.msk.msra.mxu0 %vm7540_vm6, %v7344_v17  ;;  %v518_v7 = vpop.xlane.xlu0 %517 }
 0x332   :  { %3756 = vmatpush3.msra.mxu1 %v7541_v43  ;;  %3905 = vmatprep.mubr.msk.f32.mxu0 %vm4211_vm0, %v7397_v60  ;;  %593 = vst [vmem:[%s7147_s5 + $0x40] sm:$0xff] %v568_v30  ;;  %4127 = vrcp.f32 %v518_v7 }
 0x333   :  { %2892 = vmatprep.subr.mxu0 %v7397_v60  ;;  %3906 = vmatmul.mubr.msk.f32.gmra.mxu0 %vm7542_vm5, %v7344_v17  ;;  %v4122_v37 = vpop.eup %4121 }
 0x334   :  { %3079 = vmatpush1.msk.msra.mxu0 %vm7542_vm5, %v7344_v17  ;;  %3581 = vmatprep.mubr.msk.f32.mxu1 %vm4211_vm0, %v7397_v60  ;;  %v570_v35 = vmul.f32 %v4122_v37, %v5175_v40  ;;  %v7543_v40 = vld [vmem:[#allocation56_spill] sm:$0xff]  ;;  %v7544_v37 = vld [vmem:[#allocation58_spill] sm:$0xff] }
 0x335   :  { %2894 = vmatprep.subr.mxu0 %v7397_v60  ;;  %3582 = vmatmul.mubr.msk.f32.gmra.mxu1 %vm5304_vm11, %v7344_v17  ;;  %v522_v45 = vpop.xlane.xlu0 %521 }
 0x336   :  { %3080 = vmatpush1.msk.msra.mxu0 %vm5304_vm11, %v7344_v17  ;;  %3908 = vmatprep.mubr.msk.f32.mxu0 %vm4211_vm0, %v7397_v60  ;;  %595 = vst [vmem:[%s7147_s5 + $0x50] sm:$0xff] %v570_v35  ;;  %4129 = vrcp.f32 %v522_v45  ;;  %v7545_v45 = vld [vmem:[#allocation48_spill] sm:$0xff]  ;;  %vm7556_vm11 = vnez %v7515_v0 }
 0x337   :  { %2896 = vmatprep.subr.mxu0 %v7397_v60  ;;  %3757 = vmatprep.subr.mxu1 %v7397_v60  ;;  %v4124_v42 = vpop.eup %4123 }
 0x338   :  { %3909 = vmatmul.mubr.msk.f32.gmra.mxu0 %vm7540_vm6, %v7344_v17  ;;  %3584 = vmatprep.mubr.msk.f32.mxu1 %vm4211_vm0, %v7397_v60  ;;  %v572_v51 = vmul.f32 %v4124_v42, %v5180_v12 }
 0x339   :  { %3081 = vmatpush1.msk.msra.mxu0 %vm5274_vm10, %v7344_v17  ;;  %3758 = vmatpush3.msra.mxu1 %v7543_v40  ;;  %v526_v30 = vpop.xlane.xlu0 %525  ;;  %vm7558_vm10 = vnez %v7512_v63 }
 0x33a   :  { %2898 = vmatprep.subr.mxu0 %v7397_v60  ;;  %3585 = vmatmul.mubr.msk.f32.gmra.mxu1 %vm7542_vm5, %v7344_v17  ;;  %597 = vst [vmem:[%s7147_s5 + $0x60] sm:$0xff] %v572_v51  ;;  %4131 = vrcp.f32 %v526_v30  ;;  %vm7552_vm5 = vnez %v7521_v34 }
 0x33b   :  { %3082 = vmatpush1.msk.msra.mxu0 %vm5244_vm9, %v7344_v17  ;;  %3911 = vmatprep.mubr.msk.f32.mxu0 %vm4211_vm0, %v7397_v60  ;;  %v4126_v12 = vpop.eup %4125 }
 0x33c   :  { %2900 = vmatprep.subr.mxu0 %v7397_v60  ;;  %3912 = vmatmul.mubr.msk.f32.gmra.mxu0 %vm7539_vm12, %v7344_v17  ;;  %v574_v7 = vmul.f32 %v4126_v12, %v5185_v15  ;;  %v7547_v12 = vld [vmem:[#allocation28_spill] sm:$0xff] }
 0x33d   :  { %3083 = vmatpush1.msk.msra.mxu0 %vm5218_vm8, %v7344_v17  ;;  %3587 = vmatprep.mubr.msk.f32.mxu1 %vm4211_vm0, %v7397_v60  ;;  %v530_v35 = vpop.xlane.xlu0 %529 }
 0x33e   :  { %2902 = vmatprep.subr.mxu0 %v7397_v60  ;;  %3588 = vmatmul.mubr.msk.f32.gmra.mxu1 %vm7540_vm6, %v7344_v17  ;;  %599 = vst [vmem:[%s7147_s5 + $0x70] sm:$0xff] %v574_v7  ;;  %4133 = vrcp.f32 %v530_v35  ;;  %vm7548_vm6 = vnez %v7527_v4  ;;  %v7549_v35 = vld [vmem:[#allocation60_spill] sm:$0xff] }
 0x33f   :  { %3759 = vmatprep.subr.mxu1 %v7397_v60  ;;  %3084 = vmatpush1.msk.msra.mxu0 %vm5201_vm7, %v7344_v17  ;;  %v4128_v15 = vpop.eup %4127 }
 0x340   :  { %3760 = vmatpush3.msra.mxu1 %v7544_v37  ;;  %3914 = vmatprep.mubr.msk.f32.mxu0 %vm4211_vm0, %v7397_v60  ;;  %v576_v42 = vmul.f32 %v4128_v15, %v7545_v45  ;;  %v7550_v45 = vld [vmem:[#allocation6_spill] sm:$0xff] }
 0x341   :  { %2918 = vmatprep.subr.mxu0 %v7397_v60  ;;  %3915 = vmatmul.mubr.msk.f32.gmra.mxu0 %vm5411_vm15, %v7344_v17  ;;  %v534_v51 = vpop.xlane.xlu0 %533 }
 0x342   :  { %3085 = vmatpush2.msk.msra.mxu0 %vm5786_vm14, %v7344_v17  ;;  %3590 = vmatprep.mubr.msk.f32.mxu1 %vm4211_vm0, %v7397_v60  ;;  %601 = vst [vmem:[%s7147_s5 + $0x80] sm:$0xff] %v576_v42  ;;  %4135 = vrcp.f32 %v534_v51 }
 0x343   :  { %2920 = vmatprep.subr.mxu0 %v7397_v60  ;;  %3591 = vmatmul.mubr.msk.f32.gmra.mxu1 %vm7539_vm12, %v7344_v17  ;;  %v4130_v30 = vpop.eup %4129  ;;  %vm7546_vm12 = vnez %v7530_v23 }
 0x344   :  { %3086 = vmatpush2.msk.msra.mxu0 %vm5767_vm13, %v7344_v17  ;;  %3917 = vmatprep.mubr.msk.f32.mxu0 %vm4211_vm0, %v7397_v60  ;;  %v578_v7 = vmul.f32 %v4130_v30, %v7547_v12  ;;  %v7553_v30 = vld [vmem:[#allocation47_spill] sm:$0xff] }
 0x345   :  { %2922 = vmatprep.subr.mxu0 %v7397_v60  ;;  %3918 = vmatmul.mubr.msk.f32.gmra.mxu0 %vm5439_vm1, %v7344_v17 }
 0x346   :  { %3087 = vmatpush2.msk.msra.mxu0 %vm7546_vm12, %v7344_v17  ;;  %3593 = vmatprep.mubr.msk.f32.mxu1 %vm4211_vm0, %v7397_v60  ;;  %603 = vst [vmem:[%s7147_s5 + $0x90] sm:$0xff] %v578_v7  ;;  %v7554_v7 = vld [vmem:[#allocation62_spill] sm:$0xff] }
 0x347   :  { %3761 = vmatprep.subr.mxu1 %v7397_v60  ;;  %2924 = vmatprep.subr.mxu0 %v7397_v60  ;;  %v4132_v15 = vpop.eup %4131 }
 0x348   :  { %3594 = vmatmul.mubr.msk.f32.gmra.mxu1 %vm5411_vm15, %v7344_v17  ;;  %3088 = vmatpush2.msk.msra.mxu0 %vm7548_vm6, %v7344_v17  ;;  %v580_v42 = vmul.f32 %v4132_v15, %v7550_v45  ;;  %vm7551_vm15 = vnez %v7524_v39  ;;  %v7557_v45 = vld [vmem:[#allocation8_spill] sm:$0xff] }
 0x349   :  { %3762 = vmatpush3.msra.mxu1 %v7549_v35  ;;  %3920 = vmatprep.mubr.msk.f32.mxu0 %vm4211_vm0, %v7397_v60 }
 0x34a   :  { %2926 = vmatprep.subr.mxu0 %v7397_v60  ;;  %3921 = vmatmul.mubr.msk.f32.gmra.mxu0 %vm5465_vm2, %v7344_v17  ;;  %605 = vst [vmem:[%s7147_s5 + $0xa0] sm:$0xff] %v580_v42 }
 0x34b   :  { %3089 = vmatpush2.msk.msra.mxu0 %vm7551_vm15, %v7344_v17  ;;  %3596 = vmatprep.mubr.msk.f32.mxu1 %vm4211_vm0, %v7397_v60  ;;  %v4134_v51 = vpop.eup %4133 }
 0x34c   :  { %2928 = vmatprep.subr.mxu0 %v7397_v60  ;;  %3597 = vmatmul.mubr.msk.f32.gmra.mxu1 %vm5439_vm1, %v7344_v17  ;;  %v582_v12 = vmul.f32 %v4134_v51, %v7553_v30  ;;  %vm7555_vm1 = vnez %v7518_v58  ;;  %v7559_v51 = vld [vmem:[#allocation63_spill] sm:$0xff]  ;;  %v7561_v30 = vld [vmem:[#allocation65_spill] sm:$0xff] }
 0x34d   :  { %3090 = vmatpush2.msk.msra.mxu0 %vm7552_vm5, %v7344_v17  ;;  %3763 = vmatprep.subr.mxu1 %v7397_v60 }
 0x34e   :  { %3923 = vmatprep.mubr.msk.f32.mxu0 %vm4211_vm0, %v7397_v60  ;;  %2930 = vmatprep.subr.mxu0 %v7397_v60  ;;  %607 = vst [vmem:[%s7147_s5 + $0xb0] sm:$0xff] %v582_v12  ;;  %v7563_v12 = vld [vmem:[#allocation66_spill] sm:$0xff] }
 0x34f   :  { %3764 = vmatpush3.msra.mxu1 %v7554_v7  ;;  %3924 = vmatmul.mubr.msk.f32.gmra.mxu0 %vm5493_vm3, %v7344_v17  ;;  %v4136_v15 = vpop.eup %4135 }
 0x350   :  { %3091 = vmatpush2.msk.msra.mxu0 %vm7555_vm1, %v7344_v17  ;;  %3599 = vmatprep.mubr.msk.f32.mxu1 %vm4211_vm0, %v7397_v60  ;;  %v584_v42 = vmul.f32 %v4136_v15, %v7557_v45  ;;  %v7564_v15 = vld [vmem:[#allocation68_spill] sm:$0xff]  ;;  %v7566_v45 = vld [vmem:[#allocation70_spill] sm:$0xff] }
 0x351   :  { %2932 = vmatprep.subr.mxu0 %v7397_v60  ;;  %3600 = vmatmul.mubr.msk.f32.gmra.mxu1 %vm5465_vm2, %v7344_v17  ;;  %vm7560_vm2 = vnez %v7503_v26 }
 0x352   :  { %3092 = vmatpush2.msk.msra.mxu0 %vm7556_vm11, %v7344_v17  ;;  %3926 = vmatprep.mubr.msk.f32.mxu0 %vm4211_vm0, %v7397_v60  ;;  %609 = vst [vmem:[%s7147_s5 + $0xc0] sm:$0xff] %v584_v42  ;;  %v7567_v42 = vld [vmem:[#allocation72_spill] sm:$0xff] }
 0x353   :  { %2934 = vmatprep.subr.mxu0 %v7397_v60  ;;  %3927 = vmatmul.mubr.msk.f32.gmra.mxu0 %vm5519_vm4, %v7344_v17 }
 0x354   :  { %3093 = vmatpush2.msk.msra.mxu0 %vm7558_vm10, %v7344_v17  ;;  %3602 = vmatprep.mubr.msk.f32.mxu1 %vm4211_vm0, %v7397_v60 }
 0x355   :  { %3765 = vmatprep.subr.mxu1 %v7397_v60  ;;  %3603 = vmatmul.mubr.msk.f32.gmra.mxu1 %vm5493_vm3, %v7344_v17  ;;  %vm7562_vm3 = vnez %v7506_v47 }
 0x356   :  { %3766 = vmatpush3.msra.mxu1 %v7559_v51  ;;  %3929 = vmatprep.mubr.msk.f32.mxu0 %vm4211_vm0, %v7397_v60 }
 0x357   :  { %3930 = vmatmul.mubr.msk.f32.gmra.mxu0 %vm7560_vm2, %v7344_v17  ;;  %3605 = vmatprep.mubr.msk.f32.mxu1 %vm4211_vm0, %v7397_v60 }
 0x358   :  { %3767 = vmatprep.subr.mxu1 %v7397_v60  ;;  %3932 = vmatprep.mubr.msk.f32.mxu0 %vm4211_vm0, %v7397_v60 }
 0x359   :  { %3606 = vmatmul.mubr.msk.f32.gmra.mxu1 %vm5519_vm4, %v7344_v17  ;;  %vm7565_vm4 = vnez %v7509_v33 }
 0x35a   :  { %3768 = vmatpush3.msra.mxu1 %v7561_v30  ;;  %3608 = vmatprep.mubr.msk.f32.mxu1 %vm4211_vm0, %v7397_v60 }
 0x35b   :  { %3933 = vmatmul.mubr.msk.f32.gmra.mxu0 %vm7562_vm3, %v7344_v17  ;;  %3769 = vmatprep.subr.mxu1 %v7397_v60 }
 0x35c   :  { %3935 = vmatprep.mubr.msk.f32.mxu0 %vm4211_vm0, %v7397_v60  ;;  %3770 = vmatpush3.msra.mxu1 %v7563_v12 }
 0x35d   :  { %3609 = vmatmul.mubr.msk.f32.gmra.mxu1 %vm7560_vm2, %v7344_v17  ;;  %3771 = vmatprep.subr.mxu1 %v7397_v60 }
 0x35e   :  { %3611 = vmatprep.mubr.msk.f32.mxu1 %vm4211_vm0, %v7397_v60  ;;  %3772 = vmatpush3.msra.mxu1 %v7564_v15 }
 0x35f   :  { %3936 = vmatmul.mubr.msk.f32.gmra.mxu0 %vm7565_vm4, %v7344_v17  ;;  %3773 = vmatprep.subr.mxu1 %v7397_v60 }
 0x360   :  { %3938 = vmatprep.mubr.msk.f32.mxu0 %vm4211_vm0, %v7397_v60  ;;  %3774 = vmatpush3.msra.mxu1 %v7566_v45 }
 0x361   :  { %3612 = vmatmul.mubr.msk.f32.gmra.mxu1 %vm7562_vm3, %v7344_v17  ;;  %3775 = vmatprep.subr.mxu1 %v7397_v60 }
 0x362   :  { %3614 = vmatprep.mubr.msk.f32.mxu1 %vm4211_vm0, %v7397_v60  ;;  %3776 = vmatpush3.msra.mxu1 %v7567_v42 }
 0x363   :  { %3939 = vmatmul.mubr.msk.f32.gmra.mxu0 %vm7558_vm10, %v7344_v17  ;;  %3777 = vmatprep.subr.mxu1 %v7397_v60 }
 0x364   :  { %3941 = vmatprep.mubr.msk.f32.mxu0 %vm4211_vm0, %v7397_v60  ;;  %3778 = vmatpush3.msra.mxu1 %v7568_v9 }
 0x365   :  { %3615 = vmatmul.mubr.msk.f32.gmra.mxu1 %vm7565_vm4, %v7344_v17  ;;  %3779 = vmatprep.subr.mxu1 %v7397_v60 }
 0x366   :  { %3617 = vmatprep.mubr.msk.f32.mxu1 %vm4211_vm0, %v7397_v60  ;;  %3780 = vmatpush3.msra.mxu1 %v7569_v10 }
 0x367   :  { %3942 = vmatmul.mubr.msk.f32.gmra.mxu0 %vm7556_vm11, %v7344_v17  ;;  %3781 = vmatprep.subr.mxu1 %v7397_v60 }
 0x368   :  { %3944 = vmatprep.mubr.msk.f32.mxu0 %vm4211_vm0, %v7397_v60  ;;  %3782 = vmatpush3.msra.mxu1 %v7570_v46 }
 0x369   :  { %3618 = vmatmul.mubr.msk.f32.gmra.mxu1 %vm7558_vm10, %v7344_v17  ;;  %3965 = vmatprep.subr.mxu1 %v7397_v60 }
 0x36a   :  { %3620 = vmatprep.mubr.msk.f32.mxu1 %vm4211_vm0, %v7397_v60 }
 0x36b   :  { %3945 = vmatmul.mubr.msk.f32.gmra.mxu0 %vm7555_vm1, %v7344_v17 }
 0x36c   :  { %3947 = vmatprep.mubr.msk.f32.mxu0 %vm4211_vm0, %v7397_v60 }
 0x36d   :  { %3621 = vmatmul.mubr.msk.f32.gmra.mxu1 %vm7556_vm11, %v7344_v17 }
 0x36e   :  { %3623 = vmatprep.mubr.msk.f32.mxu1 %vm4211_vm0, %v7397_v60 }
 0x36f   :  { %3948 = vmatmul.mubr.msk.f32.gmra.mxu0 %vm7552_vm5, %v7344_v17 }
 0x370   :  { %3950 = vmatprep.mubr.msk.f32.mxu0 %vm4211_vm0, %v7397_v60 }
 0x371   :  { %3624 = vmatmul.mubr.msk.f32.gmra.mxu1 %vm7555_vm1, %v7344_v17 }
 0x372   :  { %3626 = vmatprep.mubr.msk.f32.mxu1 %vm4211_vm0, %v7397_v60 }
 0x373   :  { %3951 = vmatmul.mubr.msk.f32.gmra.mxu0 %vm7551_vm15, %v7344_v17 }
 0x374   :  { %3953 = vmatprep.mubr.msk.f32.mxu0 %vm4211_vm0, %v7397_v60 }
 0x375   :  { %3627 = vmatmul.mubr.msk.f32.gmra.mxu1 %vm7552_vm5, %v7344_v17 }
 0x376   :  { %3629 = vmatprep.mubr.msk.f32.mxu1 %vm4211_vm0, %v7397_v60  ;;  %v6211_v6 = vpop.f32.mrf.mxu0 }
 0x377   :  { %3954 = vmatmul.mubr.msk.f32.gmra.mxu0 %vm7548_vm6, %v7344_v17  ;;  %7571 = vst [vmem:[#allocation44_spill] sm:$0xff] %v6211_v6 }
 0x378   :  { %3956 = vmatprep.mubr.msk.f32.mxu0 %vm4211_vm0, %v7397_v60  ;;  %v3678_v34 = vpop.f32.mrf.mxu0 }
 0x379   :  { %3630 = vmatmul.mubr.msk.f32.gmra.mxu1 %vm7551_vm15, %v7344_v17 }
 0x37a   :  { %3632 = vmatprep.mubr.msk.f32.mxu1 %vm4211_vm0, %v7397_v60  ;;  %v6223_v58 = vpop.f32.mrf.mxu0 }
 0x37b   :  { %3957 = vmatmul.mubr.msk.f32.gmra.mxu0 %vm7546_vm12, %v7344_v17  ;;  %7572 = vst [vmem:[#allocation22_spill] sm:$0xff] %v6223_v58 }
 0x37c   :  { %3959 = vmatprep.mubr.msk.f32.mxu0 %vm4211_vm0, %v7397_v60  ;;  %v6230_v6 = vpop.f32.mrf.mxu1  ;;  %v3681_v39 = vpop.f32.mrf.mxu0 }
 0x37d   :  { %3633 = vmatmul.mubr.msk.f32.gmra.mxu1 %vm7548_vm6, %v7344_v17  ;;  %7573 = vst [vmem:[#allocation46_spill] sm:$0xff] %v6230_v6 }
 0x37e   :  { %3635 = vmatprep.mubr.msk.f32.mxu1 %vm4211_vm0, %v7397_v60  ;;  %v3464_v34 = vpop.f32.mrf.mxu1  ;;  %v6237_v4 = vpop.f32.mrf.mxu0 }
 0x37f   :  { %3960 = vmatmul.mubr.msk.f32.gmra.mxu0 %vm5767_vm13, %v7344_v17  ;;  %7574 = vst [vmem:[#allocation24_spill] sm:$0xff] %v6237_v4 }
 0x380   :  { %3962 = vmatprep.mubr.msk.f32.mxu0 %vm4211_vm0, %v7397_v60  ;;  %v6244_v58 = vpop.f32.mrf.mxu1  ;;  %v3684_v39 = vpop.f32.mrf.mxu0 }
 0x381   :  { %3636 = vmatmul.mubr.msk.f32.gmra.mxu1 %vm7546_vm12, %v7344_v17  ;;  %7575 = vst [vmem:[#allocation51_spill] sm:$0xff] %v6244_v58 }
 0x382   :  { %3638 = vmatprep.mubr.msk.f32.mxu1 %vm4211_vm0, %v7397_v60  ;;  %v3467_v6 = vpop.f32.mrf.mxu1  ;;  %v6249_v23 = vpop.f32.mrf.mxu0 }
 0x383   :  { %3963 = vmatmul.mubr.msk.f32.gmra.mxu0 %vm5786_vm14, %v7344_v17  ;;  %7576 = vst [vmem:[#allocation53_spill] sm:$0xff] %v6249_v23  ;;  %v7577_v23 = vld [vmem:[#allocation30_spill] sm:$0xff] }
 0x384   :  { %v6253_v34 = vpop.f32.mrf.mxu1  ;;  %v3687_v4 = vpop.f32.mrf.mxu0  ;;  %v7578_v48 = vand.u32 4294901760, %v7577_v23 }
 0x385   :  { %3639 = vmatmul.mubr.msk.f32.gmra.mxu1 %vm5767_vm13, %v7344_v17 }
 0x386   :  { %3641 = vmatprep.mubr.msk.f32.mxu1 %vm4211_vm0, %v7397_v60  ;;  %v3470_v0 = vpop.f32.mrf.mxu1  ;;  %v6258_v58 = vpop.f32.mrf.mxu0 }
 0x388   :  { %v3690_v6 = vpop.f32.mrf.mxu0 }
 0x389   :  { %3642 = vmatmul.mubr.msk.f32.gmra.mxu1 %vm5786_vm14, %v7344_v17  ;;  %v7579_v17 = vld [vmem:[#allocation49_spill] sm:$0xff] }
 0x38a   :  { %3783 = vmatprep.mubr.msk.f32.mxu1 %vm4211_vm0, %v7397_v60  ;;  %v6266_v33 = vpop.f32.mrf.mxu0  ;;  %v7580_v6 = vand.u32 4294901760, %v7579_v17 }
 0x38b   :  { %v6262_v39 = vpop.f32.mrf.mxu1 }
 0x38c   :  { %v3693_v0 = vpop.f32.mrf.mxu0 }
 0x38d   :  { %3784 = vmatmul.mubr.f32.vlgmr.msra.gmra.mxu1 %v7578_v48  ;;  %v3473_v63 = vpop.f32.mrf.mxu1 }
 0x38e   :  { %3966 = vmatpush3.msra.mxu1 %v7537_v49  ;;  %3786 = vmatprep.mubr.msk.f32.mxu1 %vm4211_vm0, %v7397_v60 }
 0x38f   :  { %3967 = vmatprep.subr.mxu1 %v7397_v60  ;;  %v6272_v4 = vpop.f32.mrf.mxu1  ;;  %v6277_v48 = vpop.f32.mrf.mxu0 }
 0x390   :  { %3968 = vmatpush3.msra.mxu1 %v7538_v52  ;;  %v7581_v52 = vld [vmem:[#allocation32_spill] sm:$0xff] }
 0x391   :  { %3787 = vmatmul.mubr.f32.gmra.mxu1 %v7580_v6  ;;  %v3476_v23 = vpop.f32.mrf.mxu1  ;;  %3969 = vmatprep.subr.mxu1 %v7397_v60  ;;  %v3696_v49 = vpop.f32.mrf.mxu0  ;;  %v7582_v17 = vand.u32 4294901760, %v7581_v52 }
 0x392   :  { %3789 = vmatprep.mubr.msk.f32.mxu1 %vm4211_vm0, %v7397_v60  ;;  %3970 = vmatpush3.msra.mxu1 %v7541_v43 }
 0x393   :  { %v6283_v63 = vpop.f32.mrf.mxu1  ;;  %3971 = vmatprep.subr.mxu1 %v7397_v60  ;;  %v6289_v6 = vpop.f32.mrf.mxu0 }
 0x394   :  { %3972 = vmatpush3.msra.mxu1 %v7543_v40  ;;  %v7583_v40 = vld [vmem:[#allocation10_spill] sm:$0xff] }
 0x395   :  { %3790 = vmatmul.mubr.f32.gmra.mxu1 %v7582_v17  ;;  %v3479_v0 = vpop.f32.mrf.mxu1  ;;  %3973 = vmatprep.subr.mxu1 %v7397_v60  ;;  %v3699_v23 = vpop.f32.mrf.mxu0  ;;  %v7584_v49 = vand.u32 4294901760, %v7583_v40 }
 0x396   :  { %3792 = vmatprep.mubr.msk.f32.mxu1 %vm4211_vm0, %v7397_v60  ;;  %3974 = vmatpush3.msra.mxu1 %v7544_v37 }
 0x397   :  { %v6295_v43 = vpop.f32.mrf.mxu1  ;;  %3975 = vmatprep.subr.mxu1 %v7397_v60 }
 0x398   :  { %3976 = vmatpush3.msra.mxu1 %v7549_v35  ;;  %v6301_v17 = vpop.f32.mrf.mxu0  ;;  %v7585_v35 = vld [vmem:[#allocation34_spill] sm:$0xff] }
 0x399   :  { %3793 = vmatmul.mubr.f32.gmra.mxu1 %v7584_v49  ;;  %v3482_v52 = vpop.f32.mrf.mxu1  ;;  %3977 = vmatprep.subr.mxu1 %v7397_v60  ;;  %v7586_v23 = vand.u32 4294901760, %v7585_v35 }
 0x39a   :  { %3795 = vmatprep.mubr.msk.f32.mxu1 %vm4211_vm0, %v7397_v60  ;;  %3978 = vmatpush3.msra.mxu1 %v7554_v7  ;;  %v3702_v0 = vpop.f32.mrf.mxu0 }
 0x39b   :  { %v6307_v37 = vpop.f32.mrf.mxu1  ;;  %3979 = vmatprep.subr.mxu1 %v7397_v60 }
 0x39c   :  { %3980 = vmatpush3.msra.mxu1 %v7559_v51  ;;  %v7587_v51 = vand.u32 4294901760, %v5350_v38  ;;  %v7588_v38 = vand.u32 4294901760, %v5376_v36  ;;  %v7589_v36 = vand.u32 4294901760, %v5401_v53  ;;  %v7590_v53 = vand.u32 4294901760, %v5426_v22 }
 0x39d   :  { %3796 = vmatmul.mubr.f32.gmra.mxu1 %v7586_v23  ;;  %v3485_v40 = vpop.f32.mrf.mxu1  ;;  %v6313_v49 = vpop.f32.mrf.mxu0  ;;  %3981 = vmatprep.subr.mxu1 %v7397_v60 }
 0x39e   :  { %3798 = vmatprep.mubr.msk.f32.mxu1 %vm4211_vm0, %v7397_v60  ;;  %3982 = vmatpush3.msra.mxu1 %v7561_v30 }
 0x39f   :  { %v6319_v7 = vpop.f32.mrf.mxu1  ;;  %v3705_v52 = vpop.f32.mrf.mxu0  ;;  %3983 = vmatprep.subr.mxu1 %v7397_v60 }
 0x3a0   :  { %3984 = vmatpush3.msra.mxu1 %v7563_v12 }
 0x3a1   :  { %3799 = vmatmul.mubr.f32.gmra.mxu1 %v7587_v51  ;;  %v3488_v0 = vpop.f32.mrf.mxu1  ;;  %v6325_v35 = vpop.f32.mrf.mxu0  ;;  %3985 = vmatprep.subr.mxu1 %v7397_v60 }
 0x3a2   :  { %3801 = vmatprep.mubr.msk.f32.mxu1 %vm4211_vm0, %v7397_v60  ;;  %3986 = vmatpush3.msra.mxu1 %v7564_v15 }
 0x3a3   :  { %v6331_v30 = vpop.f32.mrf.mxu1  ;;  %v3708_v23 = vpop.f32.mrf.mxu0  ;;  %3987 = vmatprep.subr.mxu1 %v7397_v60 }
 0x3a4   :  { %3988 = vmatpush3.msra.mxu1 %v7566_v45 }
 0x3a5   :  { %3802 = vmatmul.mubr.f32.gmra.mxu1 %v7588_v38  ;;  %v3491_v12 = vpop.f32.mrf.mxu1  ;;  %v6337_v40 = vpop.f32.mrf.mxu0  ;;  %3989 = vmatprep.subr.mxu1 %v7397_v60 }
 0x3a6   :  { %3804 = vmatprep.mubr.msk.f32.mxu1 %vm4211_vm0, %v7397_v60  ;;  %3990 = vmatpush3.msra.mxu1 %v7567_v42 }
 0x3a7   :  { %v6343_v15 = vpop.f32.mrf.mxu1  ;;  %v3711_v52 = vpop.f32.mrf.mxu0  ;;  %3991 = vmatprep.subr.mxu1 %v7397_v60 }
 0x3a8   :  { %3992 = vmatpush3.msra.mxu1 %v7568_v9 }
 0x3a9   :  { %3805 = vmatmul.mubr.f32.gmra.mxu1 %v7589_v36  ;;  %v3494_v45 = vpop.f32.mrf.mxu1  ;;  %v6349_v51 = vpop.f32.mrf.mxu0  ;;  %3993 = vmatprep.subr.mxu1 %v7397_v60 }
 0x3aa   :  { %3807 = vmatprep.mubr.msk.f32.mxu1 %vm4211_vm0, %v7397_v60  ;;  %3994 = vmatpush3.msra.mxu1 %v7569_v10  ;;  %v7591_v10 = vand.u32 4294901760, %v5453_v21  ;;  %v7592_v45 = vand.u32 4294901760, %v5480_v54 }
 0x3ab   :  { %v6355_v42 = vpop.f32.mrf.mxu1  ;;  %v3714_v0 = vpop.f32.mrf.mxu0  ;;  %3995 = vmatprep.subr.mxu1 %v7397_v60 }
 0x3ac   :  { %3996 = vmatpush3.msra.mxu1 %v7570_v46 }
 0x3ad   :  { %3808 = vmatmul.mubr.f32.gmra.mxu1 %v7590_v53  ;;  %v3497_v9 = vpop.f32.mrf.mxu1  ;;  %v6361_v23 = vpop.f32.mrf.mxu0 }
 0x3ae   :  { %3810 = vmatprep.mubr.msk.f32.mxu1 %vm4211_vm0, %v7397_v60 }
 0x3af   :  { %v6365_v38 = vpop.f32.mrf.mxu1  ;;  %v3717_v12 = vpop.f32.mrf.mxu0 }
 0x3b0   :  { %v7594_v12 = vand.u32 4294901760, %v5507_v19 }
 0x3b1   :  { %3811 = vmatmul.mubr.f32.gmra.mxu1 %v7591_v10  ;;  %v3500_v52 = vpop.f32.mrf.mxu1  ;;  %v6369_v36 = vpop.f32.mrf.mxu0 }
 0x3b2   :  { %3813 = vmatprep.mubr.msk.f32.mxu1 %vm4211_vm0, %v7397_v60 }
 0x3b3   :  { %v6373_v22 = vpop.f32.mrf.mxu1  ;;  %v3720_v46 = vpop.f32.mrf.mxu0 }
 0x3b5   :  { %3814 = vmatmul.mubr.f32.gmra.mxu1 %v7592_v45  ;;  %v3503_v0 = vpop.f32.mrf.mxu1  ;;  %v6377_v53 = vpop.f32.mrf.mxu0  ;;  %v7596_v45 = vand.u32 4294901760, %v5534_v1 }
 0x3b6   :  { %7593 = vst [vmem:[#allocation55_spill] sm:$0xff] %v6377_v53  ;;  %3816 = vmatprep.mubr.msk.f32.mxu1 %vm4211_vm0, %v7397_v60 }
 0x3b7   :  { %v6381_v21 = vpop.f32.mrf.mxu1  ;;  %v3723_v9 = vpop.f32.mrf.mxu0 }
 0x3b9   :  { %3817 = vmatmul.mubr.f32.gmra.mxu1 %v7594_v12  ;;  %v3506_v10 = vpop.f32.mrf.mxu1  ;;  %v6385_v52 = vpop.f32.mrf.mxu0  ;;  %v7598_v12 = vand.u32 4294901760, %v5561_v62 }
 0x3ba   :  { %7595 = vst [vmem:[#allocation57_spill] sm:$0xff] %v6385_v52  ;;  %3819 = vmatprep.mubr.msk.f32.mxu1 %vm4211_vm0, %v7397_v60 }
 0x3bb   :  { %v6389_v54 = vpop.f32.mrf.mxu1  ;;  %v3726_v46 = vpop.f32.mrf.mxu0 }
 0x3bd   :  { %3820 = vmatmul.mubr.f32.gmra.mxu1 %v7596_v45  ;;  %v3509_v0 = vpop.f32.mrf.mxu1  ;;  %v6393_v53 = vpop.f32.mrf.mxu0  ;;  %v7600_v45 = vand.u32 4294901760, %v5588_v2 }
 0x3be   :  { %7597 = vst [vmem:[#allocation59_spill] sm:$0xff] %v6393_v53  ;;  %3822 = vmatprep.mubr.msk.f32.mxu1 %vm4211_vm0, %v7397_v60 }
 0x3bf   :  { %v6397_v19 = vpop.f32.mrf.mxu1  ;;  %v3729_v9 = vpop.f32.mrf.mxu0 }
 0x3c1   :  { %3823 = vmatmul.mubr.f32.gmra.mxu1 %v7598_v12  ;;  %v3512_v10 = vpop.f32.mrf.mxu1  ;;  %v6401_v52 = vpop.f32.mrf.mxu0  ;;  %v7602_v12 = vand.u32 4294901760, %v5613_v41 }
 0x3c2   :  { %7599 = vst [vmem:[#allocation61_spill] sm:$0xff] %v6401_v52  ;;  %3825 = vmatprep.mubr.msk.f32.mxu1 %vm4211_vm0, %v7397_v60 }
 0x3c3   :  { %v6405_v1 = vpop.f32.mrf.mxu1  ;;  %v3732_v46 = vpop.f32.mrf.mxu0 }
 0x3c5   :  { %3826 = vmatmul.mubr.f32.gmra.mxu1 %v7600_v45  ;;  %v3515_v0 = vpop.f32.mrf.mxu1  ;;  %v6409_v53 = vpop.f32.mrf.mxu0  ;;  %v7604_v45 = vand.u32 4294901760, %v5637_v44 }
 0x3c6   :  { %7601 = vst [vmem:[#allocation64_spill] sm:$0xff] %v6409_v53  ;;  %3828 = vmatprep.mubr.msk.f32.mxu1 %vm4211_vm0, %v7397_v60 }
 0x3c7   :  { %v6413_v62 = vpop.f32.mrf.mxu1  ;;  %v3735_v9 = vpop.f32.mrf.mxu0 }
 0x3c9   :  { %3829 = vmatmul.mubr.f32.gmra.mxu1 %v7602_v12  ;;  %v3518_v10 = vpop.f32.mrf.mxu1  ;;  %v6417_v52 = vpop.f32.mrf.mxu0  ;;  %v7607_v12 = vand.u32 4294901760, %v5659_v61 }
 0x3ca   :  { %7603 = vst [vmem:[#allocation67_spill] sm:$0xff] %v6417_v52  ;;  %3831 = vmatprep.mubr.msk.f32.mxu1 %vm4211_vm0, %v7397_v60 }
 0x3cb   :  { %v6421_v2 = vpop.f32.mrf.mxu1  ;;  %v3738_v46 = vpop.f32.mrf.mxu0 }
 0x3cd   :  { %3832 = vmatmul.mubr.f32.gmra.mxu1 %v7604_v45  ;;  %v3521_v0 = vpop.f32.mrf.mxu1  ;;  %v6425_v53 = vpop.f32.mrf.mxu0  ;;  %v7610_v45 = vand.u32 4294901760, %v5679_v50 }
 0x3ce   :  { %7605 = vst [vmem:[#allocation69_spill] sm:$0xff] %v6425_v53  ;;  %3834 = vmatprep.mubr.msk.f32.mxu1 %vm4211_vm0, %v7397_v60 }
 0x3cf   :  { %v6429_v41 = vpop.f32.mrf.mxu1  ;;  %v3741_v9 = vpop.f32.mrf.mxu0 }
 0x3d0   :  { %7606 = vst [vmem:[#allocation71_spill] sm:$0xff] %v6429_v41 }
 0x3d1   :  { %3835 = vmatmul.mubr.f32.gmra.mxu1 %v7607_v12  ;;  %v3524_v10 = vpop.f32.mrf.mxu1  ;;  %v6433_v52 = vpop.f32.mrf.mxu0  ;;  %v7613_v12 = vand.u32 4294901760, %v5699_v14 }
 0x3d2   :  { %7608 = vst [vmem:[#allocation74_spill] sm:$0xff] %v6433_v52  ;;  %3837 = vmatprep.mubr.msk.f32.mxu1 %vm4211_vm0, %v7397_v60 }
 0x3d3   :  { %v6437_v44 = vpop.f32.mrf.mxu1  ;;  %v3744_v46 = vpop.f32.mrf.mxu0 }
 0x3d4   :  { %7609 = vst [vmem:[#allocation50_spill] sm:$0xff] %v6437_v44 }
 0x3d5   :  { %3838 = vmatmul.mubr.f32.gmra.mxu1 %v7610_v45  ;;  %v3527_v0 = vpop.f32.mrf.mxu1  ;;  %v6441_v53 = vpop.f32.mrf.mxu0  ;;  %v7616_v45 = vand.u32 4294901760, %v5719_v28 }
 0x3d6   :  { %7611 = vst [vmem:[#allocation52_spill] sm:$0xff] %v6441_v53  ;;  %3840 = vmatprep.mubr.msk.f32.mxu1 %vm4211_vm0, %v7397_v60 }
 0x3d7   :  { %v6445_v61 = vpop.f32.mrf.mxu1  ;;  %v3747_v9 = vpop.f32.mrf.mxu0 }
 0x3d8   :  { %7612 = vst [vmem:[#allocation54_spill] sm:$0xff] %v6445_v61 }
 0x3d9   :  { %3841 = vmatmul.mubr.f32.gmra.mxu1 %v7613_v12  ;;  %v3530_v10 = vpop.f32.mrf.mxu1  ;;  %v6449_v52 = vpop.f32.mrf.mxu0  ;;  %v7619_v12 = vand.u32 4294901760, %v5739_v56 }
 0x3da   :  { %7614 = vst [vmem:[#allocation56_spill] sm:$0xff] %v6449_v52  ;;  %3843 = vmatprep.mubr.msk.f32.mxu1 %vm4211_vm0, %v7397_v60 }
 0x3db   :  { %v6453_v50 = vpop.f32.mrf.mxu1  ;;  %v3750_v46 = vpop.f32.mrf.mxu0 }
 0x3dc   :  { %7615 = vst [vmem:[#allocation58_spill] sm:$0xff] %v6453_v50 }
 0x3dd   :  { %3844 = vmatmul.mubr.f32.gmra.mxu1 %v7616_v45  ;;  %v3533_v0 = vpop.f32.mrf.mxu1  ;;  %v6457_v53 = vpop.f32.mrf.mxu0  ;;  %v7621_v45 = vand.u32 4294901760, %v5759_v3 }
 0x3de   :  { %7617 = vst [vmem:[#allocation48_spill] sm:$0xff] %v6457_v53  ;;  %3846 = vmatprep.mubr.msk.f32.mxu1 %vm4211_vm0, %v7397_v60 }
 0x3df   :  { %v6461_v14 = vpop.f32.mrf.mxu1  ;;  %v3892_v9 = vpop.f32.mrf.mxu0 }
 0x3e0   :  { %7618 = vst [vmem:[#allocation28_spill] sm:$0xff] %v6461_v14 }
 0x3e1   :  { %3847 = vmatmul.mubr.f32.gmra.mxu1 %v7619_v12  ;;  %v3536_v10 = vpop.f32.mrf.mxu1  ;;  %v6465_v52 = vpop.f32.mrf.mxu0  ;;  %v7623_v12 = vand.u32 4294901760, %v5778_v13 }
 0x3e2   :  { %7620 = vst [vmem:[#allocation60_spill] sm:$0xff] %v6465_v52  ;;  %3849 = vmatprep.mubr.msk.f32.mxu1 %vm4211_vm0, %v7397_v60 }
 0x3e3   :  { %v6469_v28 = vpop.f32.mrf.mxu1  ;;  %v3895_v46 = vpop.f32.mrf.mxu0 }
 0x3e5   :  { %3850 = vmatmul.mubr.f32.gmra.mxu1 %v7621_v45  ;;  %v3571_v0 = vpop.f32.mrf.mxu1  ;;  %v6473_v53 = vpop.f32.mrf.mxu0 }
 0x3e6   :  { %7622 = vst [vmem:[#allocation6_spill] sm:$0xff] %v6473_v53  ;;  %3852 = vmatprep.mubr.msk.f32.mxu1 %vm4211_vm0, %v7397_v60  ;;  %v7625_v0 = vand.u32 4294901760, %v5797_v16 }
 0x3e7   :  { %v6477_v56 = vpop.f32.mrf.mxu1  ;;  %v3898_v9 = vpop.f32.mrf.mxu0 }
 0x3e9   :  { %3853 = vmatmul.mubr.f32.gmra.mxu1 %v7623_v12  ;;  %v3574_v10 = vpop.f32.mrf.mxu1 }
 0x3ea   :  { %3855 = vmatprep.mubr.msk.f32.mxu1 %vm4211_vm0, %v7397_v60  ;;  %v6483_v46 = vpop.f32.mrf.mxu0  ;;  %v7627_v10 = vmov 1.0  }
 0x3eb   :  { %7624 = vst [vmem:[#allocation47_spill] sm:$0xff] %v6483_v46 }
 0x3ec   :  { %v6485_v3 = vpop.f32.mrf.mxu1  ;;  %v3901_v45 = vpop.f32.mrf.mxu0 }
 0x3ed   :  { %3856 = vmatmul.mubr.f32.gmra.mxu1 %v7625_v0 }
 0x3ee   :  { %3997 = vmatprep.mubr.msk.f32.mxu1 %vm4211_vm0, %v7397_v60  ;;  %v3577_v53 = vpop.f32.mrf.mxu1  ;;  %v6491_v9 = vpop.f32.mrf.mxu0 }
 0x3ef   :  { %7626 = vst [vmem:[#allocation62_spill] sm:$0xff] %v6491_v9 }
 0x3f0   :  { %v6493_v13 = vpop.f32.mrf.mxu1  ;;  %v3904_v12 = vpop.f32.mrf.mxu0 }
 0x3f1   :  { %3998 = vmatmul.mubr.msk.f32.vlgmr.msra.gmra.mxu1 %vm5201_vm7, %v7627_v10  ;;  %vm7631_vm7 = vnez %v7467_v18 }
 0x3f2   :  { %4000 = vmatprep.mubr.msk.f32.mxu1 %vm4211_vm0, %v7397_v60  ;;  %v3580_v45 = vpop.f32.mrf.mxu1 }
 0x3f3   :  { %v6500_v46 = vpop.f32.mrf.mxu0 }
 0x3f4   :  { %7628 = vst [vmem:[#allocation8_spill] sm:$0xff] %v6500_v46 }
 0x3f5   :  { %4001 = vmatmul.mubr.msk.f32.gmra.mxu1 %vm5218_vm8, %v7627_v10  ;;  %v6505_v16 = vpop.f32.mrf.mxu1  ;;  %v3907_v53 = vpop.f32.mrf.mxu0  ;;  %vm7632_vm8 = vnez %v7471_v11 }
 0x3f6   :  { %4003 = vmatprep.mubr.msk.f32.mxu1 %vm4211_vm0, %v7397_v60 }
 0x3f7   :  { %v3583_v0 = vpop.f32.mrf.mxu1 }
 0x3f8   :  { %v6509_v12 = vpop.f32.mrf.mxu0 }
 0x3f9   :  { %7629 = vst [vmem:[#allocation63_spill] sm:$0xff] %v6509_v12  ;;  %4004 = vmatmul.mubr.msk.f32.gmra.mxu1 %vm5244_vm9, %v7627_v10  ;;  %vm7634_vm9 = vnez %v7476_v20 }
 0x3fa   :  { %4006 = vmatprep.mubr.msk.f32.mxu1 %vm4211_vm0, %v7397_v60  ;;  %v6516_v29 = vpop.f32.mrf.mxu1  ;;  %v3910_v24 = vpop.f32.mrf.mxu0 }
 0x3fc   :  { %v3586_v45 = vpop.f32.mrf.mxu1  ;;  %v6518_v46 = vpop.f32.mrf.mxu0 }
 0x3fd   :  { %7630 = vst [vmem:[#allocation65_spill] sm:$0xff] %v6518_v46  ;;  %4007 = vmatmul.mubr.msk.f32.gmra.mxu1 %vm7631_vm7, %v7627_v10  ;;  %vm7636_vm7 = vnez %v7480_v8 }
 0x3fe   :  { %4009 = vmatprep.mubr.msk.f32.mxu1 %vm4211_vm0, %v7397_v60  ;;  %v6525_v53 = vpop.f32.mrf.mxu1  ;;  %v3913_v32 = vpop.f32.mrf.mxu0 }
 0x400   :  { %v3589_v0 = vpop.f32.mrf.mxu1 }
 0x401   :  { %4010 = vmatmul.mubr.msk.f32.gmra.mxu1 %vm7632_vm8, %v7627_v10  ;;  %v6530_v12 = vpop.f32.mrf.mxu0  ;;  %vm7638_vm8 = vnez %v7483_v55 }
 0x402   :  { %7633 = vst [vmem:[#allocation66_spill] sm:$0xff] %v6530_v12  ;;  %4012 = vmatprep.mubr.msk.f32.mxu1 %vm4211_vm0, %v7397_v60 }
 0x403   :  { %v6534_v24 = vpop.f32.mrf.mxu1  ;;  %v3916_v18 = vpop.f32.mrf.mxu0 }
 0x405   :  { %4013 = vmatmul.mubr.msk.f32.gmra.mxu1 %vm7634_vm9, %v7627_v10  ;;  %v3592_v45 = vpop.f32.mrf.mxu1  ;;  %v6539_v46 = vpop.f32.mrf.mxu0  ;;  %vm7640_vm9 = vnez %v7485_v25 }
 0x406   :  { %7635 = vst [vmem:[#allocation68_spill] sm:$0xff] %v6539_v46  ;;  %4015 = vmatprep.mubr.msk.f32.mxu1 %vm4211_vm0, %v7397_v60 }
 0x407   :  { %v3919_v11 = vpop.f32.mrf.mxu0 }
 0x408   :  { %v6543_v32 = vpop.f32.mrf.mxu1 }
 0x409   :  { %4016 = vmatmul.mubr.msk.f32.gmra.mxu1 %vm7636_vm7, %v7627_v10  ;;  %vm7642_vm7 = vnez %v7488_v5 }
 0x40a   :  { %v3595_v0 = vpop.f32.mrf.mxu1  ;;  %v6548_v12 = vpop.f32.mrf.mxu0  ;;  %4018 = vmatprep.mubr.msk.f32.mxu1 %vm4211_vm0, %v7397_v60 }
 0x40b   :  { %7637 = vst [vmem:[#allocation70_spill] sm:$0xff] %v6548_v12 }
 0x40c   :  { %v6552_v20 = vpop.f32.mrf.mxu1  ;;  %v3922_v18 = vpop.f32.mrf.mxu0 }
 0x40d   :  { %4019 = vmatmul.mubr.msk.f32.gmra.mxu1 %vm7638_vm8, %v7627_v10  ;;  %vm7644_vm8 = vnez %v7492_v57 }
 0x40e   :  { %v3598_v45 = vpop.f32.mrf.mxu1  ;;  %4021 = vmatprep.mubr.msk.f32.mxu1 %vm4211_vm0, %v7397_v60 }
 0x40f   :  { %v6559_v11 = vpop.f32.mrf.mxu0 }
 0x410   :  { %7639 = vst [vmem:[#allocation72_spill] sm:$0xff] %v6559_v11 }
 0x411   :  { %v6561_v8 = vpop.f32.mrf.mxu1  ;;  %v3925_v0 = vpop.f32.mrf.mxu0  ;;  %4022 = vmatmul.mubr.msk.f32.gmra.mxu1 %vm7640_vm9, %v7627_v10  ;;  %vm7646_vm9 = vnez %v7496_v31 }
 0x412   :  { %4024 = vmatprep.mubr.msk.f32.mxu1 %vm4211_vm0, %v7397_v60 }
 0x413   :  { %v3601_v18 = vpop.f32.mrf.mxu1  ;;  %v6568_v12 = vpop.f32.mrf.mxu0 }
 0x414   :  { %7641 = vst [vmem:[#allocation73_spill] sm:$0xff] %v6568_v12 }
 0x415   :  { %v6570_v55 = vpop.f32.mrf.mxu1  ;;  %v3928_v45 = vpop.f32.mrf.mxu0  ;;  %4025 = vmatmul.mubr.msk.f32.gmra.mxu1 %vm7642_vm7, %v7627_v10  ;;  %vm7648_vm7 = vnez %v7500_v59 }
 0x416   :  { %4027 = vmatprep.mubr.msk.f32.mxu1 %vm4211_vm0, %v7397_v60 }
 0x417   :  { %v3604_v0 = vpop.f32.mrf.mxu1  ;;  %v6577_v11 = vpop.f32.mrf.mxu0 }
 0x418   :  { %7643 = vst [vmem:[#allocation75_spill] sm:$0xff] %v6577_v11 }
 0x419   :  { %v6579_v25 = vpop.f32.mrf.mxu1  ;;  %v3931_v46 = vpop.f32.mrf.mxu0  ;;  %4028 = vmatmul.mubr.msk.f32.gmra.mxu1 %vm7644_vm8, %v7627_v10 }
 0x41a   :  { %4030 = vmatprep.mubr.msk.f32.mxu1 %vm4211_vm0, %v7397_v60 }
 0x41b   :  { %v3607_v18 = vpop.f32.mrf.mxu1  ;;  %v6586_v45 = vpop.f32.mrf.mxu0 }
 0x41c   :  { %7645 = vst [vmem:[#allocation76_spill] sm:$0xff] %v6586_v45 }
 0x41d   :  { %v6588_v5 = vpop.f32.mrf.mxu1  ;;  %v3934_v12 = vpop.f32.mrf.mxu0  ;;  %4031 = vmatmul.mubr.msk.f32.gmra.mxu1 %vm7646_vm9, %v7627_v10 }
 0x41e   :  { %4033 = vmatprep.mubr.msk.f32.mxu1 %vm4211_vm0, %v7397_v60 }
 0x41f   :  { %v3610_v46 = vpop.f32.mrf.mxu1  ;;  %v6595_v0 = vpop.f32.mrf.mxu0 }
 0x420   :  { %7647 = vst [vmem:[#allocation30_spill] sm:$0xff] %v6595_v0 }
 0x421   :  { %v6597_v57 = vpop.f32.mrf.mxu1  ;;  %v3937_v11 = vpop.f32.mrf.mxu0  ;;  %4034 = vmatmul.mubr.msk.f32.gmra.mxu1 %vm7648_vm7, %v7627_v10 }
 0x422   :  { %4036 = vmatprep.mubr.msk.f32.mxu1 %vm4211_vm0, %v7397_v60 }
 0x423   :  { %v3613_v12 = vpop.f32.mrf.mxu1  ;;  %v6604_v18 = vpop.f32.mrf.mxu0 }
 0x424   :  { %7649 = vst [vmem:[#allocation49_spill] sm:$0xff] %v6604_v18 }
 0x425   :  { %v6606_v31 = vpop.f32.mrf.mxu1  ;;  %v3940_v45 = vpop.f32.mrf.mxu0  ;;  %4037 = vmatmul.mubr.msk.f32.gmra.mxu1 %vm7560_vm2, %v7627_v10 }
 0x426   :  { %4039 = vmatprep.mubr.msk.f32.mxu1 %vm4211_vm0, %v7397_v60 }
 0x427   :  { %v3616_v11 = vpop.f32.mrf.mxu1  ;;  %v6613_v46 = vpop.f32.mrf.mxu0 }
 0x428   :  { %7650 = vst [vmem:[#allocation32_spill] sm:$0xff] %v6613_v46 }
 0x429   :  { %v6615_v59 = vpop.f32.mrf.mxu1  ;;  %v3943_v0 = vpop.f32.mrf.mxu0  ;;  %4040 = vmatmul.mubr.msk.f32.gmra.mxu1 %vm7562_vm3, %v7627_v10 }
 0x42a   :  { %4042 = vmatprep.mubr.msk.f32.mxu1 %vm4211_vm0, %v7397_v60 }
 0x42b   :  { %v3619_v45 = vpop.f32.mrf.mxu1  ;;  %v6622_v12 = vpop.f32.mrf.mxu0 }
 0x42c   :  { %7651 = vst [vmem:[#allocation10_spill] sm:$0xff] %v6622_v12 }
 0x42d   :  { %v6624_v26 = vpop.f32.mrf.mxu1  ;;  %v3946_v18 = vpop.f32.mrf.mxu0  ;;  %4043 = vmatmul.mubr.msk.f32.gmra.mxu1 %vm7565_vm4, %v7627_v10 }
 0x42e   :  { %4045 = vmatprep.mubr.msk.f32.mxu1 %vm4211_vm0, %v7397_v60 }
 0x42f   :  { %v3622_v0 = vpop.f32.mrf.mxu1  ;;  %v6631_v46 = vpop.f32.mrf.mxu0 }
 0x430   :  { %7653 = vst [vmem:[#allocation34_spill] sm:$0xff] %v6631_v46 }
 0x431   :  { %v6633_v47 = vpop.f32.mrf.mxu1  ;;  %v3949_v9 = vpop.f32.mrf.mxu0  ;;  %4046 = vmatmul.mubr.msk.f32.gmra.mxu1 %vm7558_vm10, %v7627_v10 }
 0x432   :  { %4048 = vmatprep.mubr.msk.f32.mxu1 %vm4211_vm0, %v7397_v60 }
 0x433   :  { %v3625_v18 = vpop.f32.mrf.mxu1  ;;  %v6640_v12 = vpop.f32.mrf.mxu0 }
 0x434   :  { %7655 = vst [vmem:[#allocation12_spill] sm:$0xff] %v6640_v12 }
 0x435   :  { %v6642_v11 = vpop.f32.mrf.mxu1  ;;  %v3952_v52 = vpop.f32.mrf.mxu0  ;;  %4049 = vmatmul.mubr.msk.f32.gmra.mxu1 %vm7556_vm11, %v7627_v10 }
 0x436   :  { %4051 = vmatprep.mubr.msk.f32.mxu1 %vm4211_vm0, %v7397_v60 }
 0x437   :  { %v3628_v9 = vpop.f32.mrf.mxu1  ;;  %v6649_v46 = vpop.f32.mrf.mxu0 }
 0x438   :  { %7657 = vst [vmem:[#allocation36_spill] sm:$0xff] %v6649_v46 }
 0x439   :  { %v6651_v45 = vpop.f32.mrf.mxu1  ;;  %v3955_v14 = vpop.f32.mrf.mxu0  ;;  %4052 = vmatmul.mubr.msk.f32.gmra.mxu1 %vm7555_vm1, %v7627_v10 }
 0x43a   :  { %7658 = vst [vmem:[#allocation14_spill] sm:$0xff] %v6651_v45  ;;  %4054 = vmatprep.mubr.msk.f32.mxu1 %vm4211_vm0, %v7397_v60 }
 0x43b   :  { %v3631_v52 = vpop.f32.mrf.mxu1  ;;  %v6658_v12 = vpop.f32.mrf.mxu0 }
 0x43c   :  { %7660 = vst [vmem:[#allocation38_spill] sm:$0xff] %v6658_v12 }
 0x43d   :  { %v6660_v0 = vpop.f32.mrf.mxu1  ;;  %v3958_v50 = vpop.f32.mrf.mxu0  ;;  %4055 = vmatmul.mubr.msk.f32.gmra.mxu1 %vm7552_vm5, %v7627_v10 }
 0x43e   :  { %7661 = vst [vmem:[#allocation77_spill] sm:$0xff] %v6660_v0  ;;  %4057 = vmatprep.mubr.msk.f32.mxu1 %vm4211_vm0, %v7397_v60 }
 0x43f   :  { %v3634_v14 = vpop.f32.mrf.mxu1  ;;  %v6667_v46 = vpop.f32.mrf.mxu0 }
 0x440   :  { %7663 = vst [vmem:[#allocation16_spill] sm:$0xff] %v6667_v46  ;;  %v7669_v46 = vld [vmem:[#allocation46_spill] sm:$0xff] }
 0x441   :  { %v6669_v18 = vpop.f32.mrf.mxu1  ;;  %v3961_v61 = vpop.f32.mrf.mxu0  ;;  %4058 = vmatmul.mubr.msk.f32.gmra.mxu1 %vm7551_vm15, %v7627_v10  ;;  %v1564_v52 = vadd.f32 %v6469_v28, %v7669_v46 }
 0x442   :  { %7664 = vst [vmem:[#allocation78_spill] sm:$0xff] %v6669_v18  ;;  %4060 = vmatprep.mubr.msk.f32.mxu1 %vm4211_vm0, %v7397_v60 }
 0x443   :  { %v3637_v50 = vpop.f32.mrf.mxu1  ;;  %v6676_v12 = vpop.f32.mrf.mxu0 }
 0x444   :  { %7666 = vst [vmem:[#allocation40_spill] sm:$0xff] %v6676_v12  ;;  %v7672_v12 = vld [vmem:[#allocation51_spill] sm:$0xff]  ;;  %v1576_v50 = vadd.f32 %v6485_v3, %v6253_v34  ;;  %v1588_v34 = vadd.f32 %v6505_v16, %v6272_v4  ;;  %v7677_v3 = vld [vmem:[#allocation53_spill] sm:$0xff] }
 0x445   :  { %v6678_v9 = vpop.f32.mrf.mxu1  ;;  %v3964_v0 = vpop.f32.mrf.mxu0  ;;  %4061 = vmatmul.mubr.msk.f32.gmra.mxu1 %vm7548_vm6, %v7627_v10  ;;  %v1570_v14 = vadd.f32 %v6477_v56, %v7672_v12 }
 0x446   :  { %7667 = vst [vmem:[#allocation79_spill] sm:$0xff] %v6678_v9  ;;  %4063 = vmatprep.mubr.msk.f32.mxu1 %vm4211_vm0, %v7397_v60  ;;  %v7673_v9 = vld [vmem:[#allocation44_spill] sm:$0xff] }
 0x447   :  { %v3640_v61 = vpop.f32.mrf.mxu1  ;;  %v1812_v44 = vadd.f32 %v7673_v9, %v1564_v52 }
 0x449   :  { %v6687_v18 = vpop.f32.mrf.mxu1  ;;  %4064 = vmatmul.mubr.msk.f32.gmra.mxu1 %vm7546_vm12, %v7627_v10 }
 0x44a   :  { %7670 = vst [vmem:[#allocation18_spill] sm:$0xff] %v6687_v18  ;;  %4066 = vmatprep.mubr.msk.f32.mxu1 %vm4211_vm0, %v7397_v60 }
 0x44b   :  { %v3643_v0 = vpop.f32.mrf.mxu1 }
 0x44c   :  { %v7675_v0 = vld [vmem:[#allocation22_spill] sm:$0xff] }
 0x44d   :  { %v2068_v45 = vpop.f32.mrf.mxu1  ;;  %4067 = vmatmul.mubr.msk.f32.gmra.mxu1 %vm5767_vm13, %v7627_v10  ;;  %v1819_v18 = vadd.f32 %v7675_v0, %v1570_v14 }
 0x44e   :  { %v6700_v28 = vadd.f32 %v2068_v45, %v1812_v44  ;;  %4069 = vmatprep.mubr.msk.f32.mxu1 %vm4211_vm0, %v7397_v60  ;;  %v1582_v44 = vadd.f32 %v6493_v13, %v6262_v39  ;;  %v7676_v45 = vld [vmem:[#allocation24_spill] sm:$0xff]  ;;  %v1840_v39 = vadd.f32 %v6258_v58, %v1588_v34  ;;  %vm2868_vm0 = vcmask 588800  }
 0x44f   :  { %v3785_v46 = vpop.f32.mrf.mxu1  ;;  %v1826_v9 = vadd.f32 %v7676_v45, %v1576_v50  ;;  %3094 = vmatprep.mubr.msk.f32.mxu0 %vm2868_vm0, %v7627_v10 }
 0x450   :  { %v1833_v14 = vadd.f32 %v7677_v3, %v1582_v44  ;;  %v1618_v3 = vadd.f32 %v6552_v20, %v6331_v30  ;;  %2937 = vmatmul.mubr.f32.vlgmr.msra.gmra.mxu0 %v7627_v10 }
 0x451   :  { %v2076_v41 = vpop.f32.mrf.mxu1  ;;  %4070 = vmatmul.mubr.msk.f32.gmra.mxu1 %vm5786_vm14, %v7627_v10 }
 0x452   :  { %v6710_v56 = vadd.f32 %v2076_v41, %v1819_v18  ;;  %v1594_v18 = vadd.f32 %v6516_v29, %v6283_v63 }
 0x453   :  { %v3788_v12 = vpop.f32.mrf.mxu1 }
 0x454   :  { %v1600_v12 = vadd.f32 %v6525_v53, %v6295_v43  ;;  %v1847_v4 = vadd.f32 %v6266_v33, %v1594_v18  ;;  %v1630_v18 = vadd.f32 %v6570_v55, %v6355_v42 }
 0x455   :  { %v2084_v60 = vpop.f32.mrf.mxu1 }
 0x456   :  { %v6715_v52 = vadd.f32 %v2084_v60, %v1826_v9  ;;  %v1606_v9 = vadd.f32 %v6534_v24, %v6307_v37  ;;  %v1854_v63 = vadd.f32 %v6277_v48, %v1600_v12  ;;  %v1642_v12 = vadd.f32 %v6588_v5, %v6373_v22 }
 0x457   :  { %v3791_v61 = vpop.f32.mrf.mxu1 }
 0x458   :  { %v1612_v61 = vadd.f32 %v6543_v32, %v6319_v7  ;;  %v1861_v43 = vadd.f32 %v6289_v6, %v1606_v9  ;;  %v1875_v7 = vadd.f32 %v6313_v49, %v1618_v3  ;;  %v1654_v9 = vadd.f32 %v6606_v31, %v6389_v54 }
 0x459   :  { %v2092_v46 = vpop.f32.mrf.mxu1  ;;  %v1672_v3 = vadd.f32 %v6633_v47, %v6413_v62 }
 0x45a   :  { %v6720_v27 = vadd.f32 %v2092_v46, %v1833_v14  ;;  %v1868_v37 = vadd.f32 %v6301_v17, %v1612_v61  ;;  %v1624_v46 = vadd.f32 %v6561_v8, %v6343_v15  ;;  %v1889_v15 = vadd.f32 %v6337_v40, %v1630_v18  ;;  %v7682_v18 = vld [vmem:[#allocation71_spill] sm:$0xff] }
 0x45b   :  { %v3794_v41 = vpop.f32.mrf.mxu1 }
 0x45c   :  { %v1882_v30 = vadd.f32 %v6325_v35, %v1624_v46  ;;  %v1678_v46 = vadd.f32 %v6642_v11, %v6421_v2 }
 0x45d   :  { %v2100_v13 = vpop.f32.mrf.mxu1 }
 0x45e   :  { %v6725_v50 = vadd.f32 %v2100_v13, %v1840_v39  ;;  %v1636_v13 = vadd.f32 %v6579_v25, %v6365_v38  ;;  %v1903_v38 = vadd.f32 %v6361_v23, %v1642_v12 }
 0x45f   :  { %v3797_v0 = vpop.f32.mrf.mxu1 }
 0x460   :  { %v1896_v42 = vadd.f32 %v6349_v51, %v1636_v13 }
 0x461   :  { %v2108_v16 = vpop.f32.mrf.mxu1 }
 0x462   :  { %v6730_v44 = vadd.f32 %v2108_v16, %v1847_v4  ;;  %v1648_v16 = vadd.f32 %v6597_v57, %v6381_v21 }
 0x463   :  { %v3800_v45 = vpop.f32.mrf.mxu1 }
 0x464   :  { %v1910_v22 = vadd.f32 %v6369_v36, %v1648_v16  ;;  %v7688_v16 = vld [vmem:[#allocation54_spill] sm:$0xff] }
 0x465   :  { %v2116_v29 = vpop.f32.mrf.mxu1 }
 0x466   :  { %v6735_v58 = vadd.f32 %v2116_v29, %v1854_v63  ;;  %v1660_v29 = vadd.f32 %v6615_v59, %v6397_v19 }
 0x467   :  { %v3803_v60 = vpop.f32.mrf.mxu1 }
 0x468   :  { %v7678_v60 = vld [vmem:[#allocation55_spill] sm:$0xff] }
 0x469   :  { %v2124_v53 = vpop.f32.mrf.mxu1  ;;  %v1917_v21 = vadd.f32 %v7678_v60, %v1654_v9  ;;  %v7692_v60 = vld [vmem:[#allocation79_spill] sm:$0xff] }
 0x46a   :  { %v6740_v33 = vadd.f32 %v2124_v53, %v1861_v43  ;;  %v1666_v43 = vadd.f32 %v6624_v26, %v6405_v1  ;;  %v7679_v53 = vld [vmem:[#allocation57_spill] sm:$0xff] }
 0x46b   :  { %v3806_v34 = vpop.f32.mrf.mxu1  ;;  %v1924_v54 = vadd.f32 %v7679_v53, %v1660_v29  ;;  %v7691_v29 = vld [vmem:[#allocation58_spill] sm:$0xff] }
 0x46d   :  { %v2132_v24 = vpop.f32.mrf.mxu1 }
 0x46e   :  { %v6745_v48 = vadd.f32 %v2132_v24, %v1868_v37  ;;  %v7680_v37 = vld [vmem:[#allocation59_spill] sm:$0xff] }
 0x46f   :  { %v3809_v14 = vpop.f32.mrf.mxu1  ;;  %v1931_v19 = vadd.f32 %v7680_v37, %v1666_v43  ;;  %v7696_v37 = vld [vmem:[#allocation52_spill] sm:$0xff] }
 0x471   :  { %v2140_v32 = vpop.f32.mrf.mxu1 }
 0x472   :  { %v6750_v6 = vadd.f32 %v2140_v32, %v1875_v7  ;;  %v7681_v7 = vld [vmem:[#allocation61_spill] sm:$0xff] }
 0x473   :  { %v3812_v41 = vpop.f32.mrf.mxu1  ;;  %v1938_v1 = vadd.f32 %v7681_v7, %v1672_v3 }
 0x475   :  { %v2148_v20 = vpop.f32.mrf.mxu1 }
 0x476   :  { %v6755_v17 = vadd.f32 %v2148_v20, %v1882_v30  ;;  %v7683_v30 = vld [vmem:[#allocation14_spill] sm:$0xff] }
 0x477   :  { %v3815_v39 = vpop.f32.mrf.mxu1  ;;  %v1684_v20 = vadd.f32 %v7683_v30, %v7682_v18  ;;  %v7698_v18 = vld [vmem:[#allocation48_spill] sm:$0xff] }
 0x478   :  { %v7684_v39 = vld [vmem:[#allocation64_spill] sm:$0xff]  ;;  %v2380_v30 = vadd.f32 %v7698_v18, %v6700_v28  ;;  %v4186_v28 = vld [vmem:[%s7144_s0 + $0x8] sm:$0xff] }
 0x479   :  { %v2156_v8 = vpop.f32.mrf.mxu1  ;;  %v1945_v62 = vadd.f32 %v7684_v39, %v1678_v46  ;;  %v7697_v46 = vld [vmem:[#allocation56_spill] sm:$0xff] }
 0x47a   :  { %v6760_v49 = vadd.f32 %v2156_v8, %v1889_v15  ;;  %v7685_v8 = vld [vmem:[#allocation50_spill] sm:$0xff] }
 0x47b   :  { %v3818_v0 = vpop.f32.mrf.mxu1 }
 0x47c   :  { %v7686_v0 = vld [vmem:[#allocation77_spill] sm:$0xff] }
 0x47d   :  { %v2164_v55 = vpop.f32.mrf.mxu1  ;;  %v1690_v12 = vadd.f32 %v7686_v0, %v7685_v8  ;;  %v4185_v0 = vld [vmem:[%s7144_s0] sm:$0xff] }
 0x47e   :  { %v6765_v35 = vadd.f32 %v2164_v55, %v1896_v42  ;;  %v7687_v42 = vld [vmem:[#allocation67_spill] sm:$0xff] }
 0x47f   :  { %v3821_v4 = vpop.f32.mrf.mxu1  ;;  %v1952_v2 = vadd.f32 %v7687_v42, %v1684_v20 }
 0x481   :  { %v2172_v25 = vpop.f32.mrf.mxu1 }
 0x482   :  { %v6770_v40 = vadd.f32 %v2172_v25, %v1903_v38  ;;  %v7689_v38 = vld [vmem:[#allocation78_spill] sm:$0xff] }
 0x483   :  { %v3824_v45 = vpop.f32.mrf.mxu1  ;;  %v1696_v25 = vadd.f32 %v7689_v38, %v7688_v16 }
 0x484   :  { %v7690_v45 = vld [vmem:[#allocation69_spill] sm:$0xff] }
 0x485   :  { %v2180_v5 = vpop.f32.mrf.mxu1  ;;  %v1959_v9 = vadd.f32 %v7690_v45, %v1690_v12 }
 0x486   :  { %v6775_v51 = vadd.f32 %v2180_v5, %v1910_v22 }
 0x487   :  { %v3827_v63 = vpop.f32.mrf.mxu1 }
 0x489   :  { %v2188_v57 = vpop.f32.mrf.mxu1 }
 0x48a   :  { %v6780_v23 = vadd.f32 %v2188_v57, %v1917_v21  ;;  %v1702_v21 = vadd.f32 %v7692_v60, %v7691_v29  ;;  %v7693_v57 = vld [vmem:[#allocation74_spill] sm:$0xff]  ;;  %v7701_v60 = vld [vmem:[#allocation47_spill] sm:$0xff] }
 0x48b   :  { %v3830_v61 = vpop.f32.mrf.mxu1 }
 0x48c   :  { %v1966_v61 = vadd.f32 %v7693_v57, %v1696_v25 }
 0x48d   :  { %v2196_v31 = vpop.f32.mrf.mxu1 }
 0x48e   :  { %v6785_v36 = vadd.f32 %v2196_v31, %v1924_v54  ;;  %v7694_v31 = vld [vmem:[#allocation28_spill] sm:$0xff] }
 0x48f   :  { %v3833_v34 = vpop.f32.mrf.mxu1 }
 0x490   :  { %v7695_v34 = vld [vmem:[#allocation18_spill] sm:$0xff] }
 0x491   :  { %v2204_v59 = vpop.f32.mrf.mxu1  ;;  %v1708_v3 = vadd.f32 %v7695_v34, %v7694_v31  ;;  %v4188_v31 = vld [vmem:[%s7144_s0 + $0x18] sm:$0xff] }
 0x492   :  { %v6790_v24 = vadd.f32 %v2204_v59, %v1931_v19  ;;  %v1973_v19 = vadd.f32 %v7696_v37, %v1702_v21  ;;  %v2398_v21 = vadd.f32 %v7701_v60, %v6720_v27 }
 0x493   :  { %v3836_v14 = vpop.f32.mrf.mxu1  ;;  %v1980_v7 = vadd.f32 %v7697_v46, %v1708_v3  ;;  %v7702_v3 = vld [vmem:[#allocation62_spill] sm:$0xff] }
 0x494   :  { %v2404_v37 = vadd.f32 %v7702_v3, %v6725_v50 }
 0x495   :  { %v2212_v26 = vpop.f32.mrf.mxu1 }
 0x496   :  { %v6795_v32 = vadd.f32 %v2212_v26, %v1938_v1 }
 0x497   :  { %v3839_v41 = vpop.f32.mrf.mxu1 }
 0x499   :  { %v2220_v47 = vpop.f32.mrf.mxu1 }
 0x49a   :  { %v6800_v13 = vadd.f32 %v2220_v47, %v1945_v62  ;;  %v7699_v47 = vld [vmem:[#allocation60_spill] sm:$0xff] }
 0x49b   :  { %v3842_v15 = vpop.f32.mrf.mxu1 }
 0x49c   :  { %v2386_v15 = vadd.f32 %v7699_v47, %v6710_v56  ;;  %v4190_v47 = vld [vmem:[%s7144_s0 + $0x28] sm:$0xff] }
 0x49d   :  { %v2228_v11 = vpop.f32.mrf.mxu1 }
 0x49e   :  { %v6805_v55 = vadd.f32 %v2228_v11, %v1952_v2 }
 0x49f   :  { %v3845_v4 = vpop.f32.mrf.mxu1 }
 0x4a0   :  { %v7700_v4 = vld [vmem:[#allocation6_spill] sm:$0xff] }
 0x4a1   :  { %v2236_v22 = vpop.f32.mrf.mxu1  ;;  %v2392_v56 = vadd.f32 %v7700_v4, %v6715_v52 }
 0x4a2   :  { %v6812_v5 = vadd.f32 %v2236_v22, %v1959_v9 }
 0x4a3   :  { %v3848_v63 = vpop.f32.mrf.mxu1 }
 0x4a4   :  { %v4187_v63 = vld [vmem:[%s7144_s0 + $0x10] sm:$0xff] }
 0x4a5   :  { %v2244_v43 = vpop.f32.mrf.mxu1 }
 0x4a6   :  { %v6817_v53 = vadd.f32 %v2244_v43, %v1966_v61 }
 0x4a7   :  { %v3851_v54 = vpop.f32.mrf.mxu1 }
 0x4a9   :  { %v2252_v59 = vpop.f32.mrf.mxu1 }
 0x4aa   :  { %v6822_v10 = vadd.f32 %v2252_v59, %v1973_v19 }
 0x4ab   :  { %v3854_v14 = vpop.f32.mrf.mxu1 }
 0x4ad   :  { %v2260_v1 = vpop.f32.mrf.mxu1 }
 0x4ae   :  { %v6825_v26 = vadd.f32 %v2260_v1, %v1980_v7  ;;  %v4189_v7 = vld [vmem:[%s7144_s0 + $0x20] sm:$0xff] }
 0x4af   :  { %v3857_v41 = vpop.f32.mrf.mxu1 }
 0x4b0   :  { %v7703_v41 = vld [vmem:[#allocation8_spill] sm:$0xff] }
 0x4b1   :  { %v2610_v20 = vpop.f32.mrf.mxu1  ;;  %v2410_v18 = vadd.f32 %v7703_v41, %v6730_v44 }
 0x4b2   :  { %v2611_v39 = vadd.f32 %v2610_v20, %v2380_v30 }
 0x4b3   :  { %v3999_v62 = vpop.f32.mrf.mxu1 }
 0x4b4   :  { %2758 = vst [vmem:[%s7148_s4] sm:$0xff] %v2611_v39  ;;  %v2783_v12 = vsub.f32 %v2611_v39, %v4185_v0 }
 0x4b5   :  { %v2616_v8 = vpop.f32.mrf.mxu1 }
 0x4b6   :  { %v2617_v42 = vadd.f32 %v2616_v8, %v2386_v15  ;;  %v2810_v38 = vmul.f32 %v2783_v12, %v2783_v12  ;;  %v7704_v8 = vld [vmem:[#allocation63_spill] sm:$0xff] }
 0x4b7   :  { %v4002_v2 = vpop.f32.mrf.mxu1  ;;  %v2416_v0 = vadd.f32 %v7704_v8, %v6735_v58 }
 0x4b8   :  { %2759 = vst [vmem:[%s7148_s4 + $0x8] sm:$0xff] %v2617_v42  ;;  %v2784_v11 = vsub.f32 %v2617_v42, %v4186_v28 }
 0x4b9   :  { %v2622_v16 = vpop.f32.mrf.mxu1 }
 0x4ba   :  { %v2811_v25 = vmul.f32 %v2784_v11, %v2784_v11  ;;  %v2623_v45 = vadd.f32 %v2622_v16, %v2392_v56  ;;  %v4191_v11 = vld [vmem:[%s7144_s0 + $0x30] sm:$0xff]  ;;  %v7705_v56 = vld [vmem:[#allocation65_spill] sm:$0xff] }
 0x4bb   :  { %v4005_v9 = vpop.f32.mrf.mxu1  ;;  %v2422_v16 = vadd.f32 %v7705_v56, %v6740_v33 }
 0x4bc   :  { %v2835_v22 = vadd.f32 %v2811_v25, %v2810_v38  ;;  %2760 = vst [vmem:[%s7148_s4 + $0x10] sm:$0xff] %v2623_v45  ;;  %v2785_v29 = vsub.f32 %v2623_v45, %v4187_v63 }
 0x4bd   :  { %v2628_v57 = vpop.f32.mrf.mxu1 }
 0x4be   :  { %v2812_v52 = vmul.f32 %v2785_v29, %v2785_v29  ;;  %v2629_v61 = vadd.f32 %v2628_v57, %v2398_v21  ;;  %v7706_v29 = vld [vmem:[#allocation66_spill] sm:$0xff] }
 0x4bf   :  { %v4008_v43 = vpop.f32.mrf.mxu1  ;;  %v2428_v60 = vadd.f32 %v7706_v29, %v6745_v48  ;;  %v4198_v29 = vld [vmem:[%s7144_s0 + $0x68] sm:$0xff] }
 0x4c0   :  { %v2836_v54 = vadd.f32 %v2835_v22, %v2812_v52  ;;  %2761 = vst [vmem:[%s7148_s4 + $0x18] sm:$0xff] %v2629_v61  ;;  %v2786_v34 = vsub.f32 %v2629_v61, %v4188_v31  ;;  %v4192_v22 = vld [vmem:[%s7144_s0 + $0x38] sm:$0xff]  ;;  %v4193_v43 = vld [vmem:[%s7144_s0 + $0x40] sm:$0xff]  ;;  %v7707_v31 = vld [vmem:[#allocation68_spill] sm:$0xff] }
 0x4c1   :  { %v2634_v19 = vpop.f32.mrf.mxu1 }
 0x4c2   :  { %v2813_v59 = vmul.f32 %v2786_v34, %v2786_v34  ;;  %v2635_v27 = vadd.f32 %v2634_v19, %v2404_v37  ;;  %v2434_v34 = vadd.f32 %v7707_v31, %v6750_v6 }
 0x4c3   :  { %v4011_v14 = vpop.f32.mrf.mxu1 }
 0x4c4   :  { %v2837_v46 = vadd.f32 %v2836_v54, %v2813_v59  ;;  %2762 = vst [vmem:[%s7148_s4 + $0x20] sm:$0xff] %v2635_v27  ;;  %v2787_v1 = vsub.f32 %v2635_v27, %v4189_v7  ;;  %v4194_v27 = vld [vmem:[%s7144_s0 + $0x48] sm:$0xff] }
 0x4c5   :  { %v2640_v30 = vpop.f32.mrf.mxu1 }
 0x4c6   :  { %v2814_v20 = vmul.f32 %v2787_v1, %v2787_v1  ;;  %v2641_v50 = vadd.f32 %v2640_v30, %v2410_v18 }
 0x4c7   :  { %v4014_v39 = vpop.f32.mrf.mxu1 }
 0x4c8   :  { %v2838_v62 = vadd.f32 %v2837_v46, %v2814_v20  ;;  %2763 = vst [vmem:[%s7148_s4 + $0x28] sm:$0xff] %v2641_v50  ;;  %v2788_v15 = vsub.f32 %v2641_v50, %v4190_v47  ;;  %v7708_v46 = vld [vmem:[#allocation70_spill] sm:$0xff]  ;;  %v4195_v20 = vld [vmem:[%s7144_s0 + $0x50] sm:$0xff] }
 0x4c9   :  { %v2646_v12 = vpop.f32.mrf.mxu1  ;;  %v2440_v7 = vadd.f32 %v7708_v46, %v6755_v17  ;;  %v7709_v39 = vld [vmem:[#allocation72_spill] sm:$0xff]  ;;  %v7714_v46 = vld [vmem:[#allocation49_spill] sm:$0xff] }
 0x4ca   :  { %v2815_v42 = vmul.f32 %v2788_v15, %v2788_v15  ;;  %v2647_v44 = vadd.f32 %v2646_v12, %v2416_v0  ;;  %v4196_v12 = vld [vmem:[%s7144_s0 + $0x58] sm:$0xff] }
 0x4cb   :  { %v4017_v2 = vpop.f32.mrf.mxu1 }
 0x4cc   :  { %v2839_v28 = vadd.f32 %v2838_v62, %v2815_v42  ;;  %2764 = vst [vmem:[%s7148_s4 + $0x30] sm:$0xff] %v2647_v44  ;;  %v2789_v4 = vsub.f32 %v2647_v44, %v4191_v11  ;;  %v2446_v62 = vadd.f32 %v7709_v39, %v6760_v49  ;;  %v7710_v44 = vld [vmem:[#allocation73_spill] sm:$0xff] }
 0x4cd   :  { %v2652_v38 = vpop.f32.mrf.mxu1  ;;  %v2452_v2 = vadd.f32 %v7710_v44, %v6765_v35 }
 0x4ce   :  { %v2816_v25 = vmul.f32 %v2789_v4, %v2789_v4  ;;  %v2653_v58 = vadd.f32 %v2652_v38, %v2422_v16  ;;  %v4197_v16 = vld [vmem:[%s7144_s0 + $0x60] sm:$0xff] }
 0x4cf   :  { %v4020_v45 = vpop.f32.mrf.mxu1 }
 0x4d0   :  { %v2840_v9 = vadd.f32 %v2839_v28, %v2816_v25  ;;  %2765 = vst [vmem:[%s7148_s4 + $0x38] sm:$0xff] %v2653_v58  ;;  %v2790_v63 = vsub.f32 %v2653_v58, %v4192_v22  ;;  %v7711_v25 = vld [vmem:[#allocation75_spill] sm:$0xff] }
 0x4d1   :  { %v2658_v21 = vpop.f32.mrf.mxu1  ;;  %v2458_v58 = vadd.f32 %v7711_v25, %v6770_v40 }
 0x4d2   :  { %v2817_v57 = vmul.f32 %v2790_v63, %v2790_v63  ;;  %v2659_v33 = vadd.f32 %v2658_v21, %v2428_v60  ;;  %v7712_v21 = vld [vmem:[#allocation76_spill] sm:$0xff] }
 0x4d3   :  { %v4023_v52 = vpop.f32.mrf.mxu1 }
 0x4d4   :  { %v2841_v61 = vadd.f32 %v2840_v9, %v2817_v57  ;;  %2766 = vst [vmem:[%s7148_s4 + $0x40] sm:$0xff] %v2659_v33  ;;  %v2791_v54 = vsub.f32 %v2659_v33, %v4193_v43  ;;  %v2464_v57 = vadd.f32 %v7712_v21, %v6775_v51 }
 0x4d5   :  { %v2664_v3 = vpop.f32.mrf.mxu1 }
 0x4d6   :  { %v2818_v37 = vmul.f32 %v2791_v54, %v2791_v54  ;;  %v2665_v48 = vadd.f32 %v2664_v3, %v2434_v34  ;;  %v4199_v54 = vld [vmem:[%s7144_s0 + $0x70] sm:$0xff]  ;;  %v7713_v34 = vld [vmem:[#allocation30_spill] sm:$0xff] }
 0x4d7   :  { %v4026_v19 = vpop.f32.mrf.mxu1  ;;  %v2470_v3 = vadd.f32 %v7713_v34, %v6780_v23  ;;  %v7721_v34 = vld [vmem:[#allocation3_spill] sm:$0xff] }
 0x4d8   :  { %v2842_v59 = vadd.f32 %v2841_v61, %v2818_v37  ;;  %2767 = vst [vmem:[%s7148_s4 + $0x48] sm:$0xff] %v2665_v48  ;;  %v2792_v14 = vsub.f32 %v2665_v48, %v4194_v27  ;;  %v4200_v27 = vld [vmem:[%s7144_s0 + $0x78] sm:$0xff] }
 0x4d9   :  { %v2670_v1 = vpop.f32.mrf.mxu1 }
 0x4da   :  { %v2819_v41 = vmul.f32 %v2792_v14, %v2792_v14  ;;  %v2671_v6 = vadd.f32 %v2670_v1, %v2440_v7  ;;  %v2476_v7 = vadd.f32 %v7714_v46, %v6785_v36 }
 0x4db   :  { %v4029_v18 = vpop.f32.mrf.mxu1 }
 0x4dc   :  { %v2843_v30 = vadd.f32 %v2842_v59, %v2819_v41  ;;  %2768 = vst [vmem:[%s7148_s4 + $0x50] sm:$0xff] %v2671_v6  ;;  %v2793_v50 = vsub.f32 %v2671_v6, %v4195_v20 }
 0x4dd   :  { %v2676_v47 = vpop.f32.mrf.mxu1 }
 0x4de   :  { %v2820_v15 = vmul.f32 %v2793_v50, %v2793_v50  ;;  %v2677_v17 = vadd.f32 %v2676_v47, %v2446_v62  ;;  %v7715_v50 = vld [vmem:[#allocation32_spill] sm:$0xff] }
 0x4df   :  { %v4032_v8 = vpop.f32.mrf.mxu1  ;;  %v2482_v39 = vadd.f32 %v7715_v50, %v6790_v24 }
 0x4e0   :  { %v2844_v0 = vadd.f32 %v2843_v30, %v2820_v15  ;;  %2769 = vst [vmem:[%s7148_s4 + $0x58] sm:$0xff] %v2677_v17  ;;  %v2794_v42 = vsub.f32 %v2677_v17, %v4196_v12  ;;  %v4201_v30 = vld [vmem:[%s7144_s0 + $0x80] sm:$0xff]  ;;  %v4202_v8 = vld [vmem:[%s7144_s0 + $0x88] sm:$0xff] }
 0x4e1   :  { %v2682_v28 = vpop.f32.mrf.mxu1  ;;  %v7716_v12 = vld [vmem:[#allocation10_spill] sm:$0xff] }
 0x4e2   :  { %v2821_v11 = vmul.f32 %v2794_v42, %v2794_v42  ;;  %v2683_v49 = vadd.f32 %v2682_v28, %v2452_v2  ;;  %v2488_v42 = vadd.f32 %v7716_v12, %v6795_v32 }
 0x4e3   :  { %v4035_v4 = vpop.f32.mrf.mxu1 }
 0x4e4   :  { %v2845_v56 = vadd.f32 %v2844_v0, %v2821_v11  ;;  %2770 = vst [vmem:[%s7148_s4 + $0x60] sm:$0xff] %v2683_v49  ;;  %v2795_v38 = vsub.f32 %v2683_v49, %v4197_v16  ;;  %v4203_v49 = vld [vmem:[%s7144_s0 + $0x90] sm:$0xff] }
 0x4e5   :  { %v2688_v45 = vpop.f32.mrf.mxu1 }
 0x4e6   :  { %v2822_v9 = vmul.f32 %v2795_v38, %v2795_v38  ;;  %v2689_v35 = vadd.f32 %v2688_v45, %v2458_v58 }
 0x4e7   :  { %v4038_v22 = vpop.f32.mrf.mxu1 }
 0x4e8   :  { %v2846_v63 = vadd.f32 %v2845_v56, %v2822_v9  ;;  %2771 = vst [vmem:[%s7148_s4 + $0x68] sm:$0xff] %v2689_v35  ;;  %v2796_v60 = vsub.f32 %v2689_v35, %v4198_v29  ;;  %v7717_v56 = vld [vmem:[#allocation34_spill] sm:$0xff]  ;;  %v4204_v9 = vld [vmem:[%s7144_s0 + $0x98] sm:$0xff]  ;;  %v7718_v22 = vld [vmem:[#allocation12_spill] sm:$0xff] }
 0x4e9   :  { %v2694_v33 = vpop.f32.mrf.mxu1  ;;  %v2494_v16 = vadd.f32 %v7717_v56, %v6800_v13  ;;  %v7729_v56 = vld [vmem:[#allocation29_spill] sm:$0xff] }
 0x4ea   :  { %v2823_v52 = vmul.f32 %v2796_v60, %v2796_v60  ;;  %v2695_v40 = vadd.f32 %v2694_v33, %v2464_v57  ;;  %v4205_v33 = vld [vmem:[%s7144_s0 + $0xa0] sm:$0xff] }
 0x4eb   :  { %v4041_v61 = vpop.f32.mrf.mxu1 }
 0x4ec   :  { %v2847_v43 = vadd.f32 %v2846_v63, %v2823_v52  ;;  %2772 = vst [vmem:[%s7148_s4 + $0x70] sm:$0xff] %v2695_v40  ;;  %v2797_v31 = vsub.f32 %v2695_v40, %v4199_v54  ;;  %v2500_v63 = vadd.f32 %v7718_v22, %v6805_v55  ;;  %v7719_v40 = vld [vmem:[#allocation36_spill] sm:$0xff] }
 0x4ed   :  { %v2700_v37 = vpop.f32.mrf.mxu1  ;;  %v2506_v61 = vadd.f32 %v7719_v40, %v6812_v5  ;;  %v7735_v40 = vld [vmem:[#allocation35_spill] sm:$0xff] }
 0x4ee   :  { %v2824_v48 = vmul.f32 %v2797_v31, %v2797_v31  ;;  %v2701_v51 = vadd.f32 %v2700_v37, %v2470_v3  ;;  %v7720_v31 = vld [vmem:[#allocation25_spill] sm:$0xff] }
 0x4ef   :  { %v4044_v19 = vpop.f32.mrf.mxu1  ;;  %v411_v3 = vsub.f32 %v7721_v34, %v7720_v31  ;;  %v7738_v31 = vld [vmem:[#allocation15_spill] sm:$0xff] }
 0x4f0   :  { %v2848_v59 = vadd.f32 %v2847_v43, %v2824_v48  ;;  %2773 = vst [vmem:[%s7148_s4 + $0x78] sm:$0xff] %v2701_v51  ;;  %v2798_v14 = vsub.f32 %v2701_v51, %v4200_v27  ;;  %v4206_v51 = vld [vmem:[%s7144_s0 + $0xa8] sm:$0xff] }
 0x4f1   :  { %v2706_v1 = vpop.f32.mrf.mxu1 }
 0x4f2   :  { %v2825_v41 = vmul.f32 %v2798_v14, %v2798_v14  ;;  %v2707_v23 = vadd.f32 %v2706_v1, %v2476_v7  ;;  %v437_v7 = vmul.f32 1.442695, %v411_v3  ;;  %v7723_v1 = vld [vmem:[#allocation26_spill] sm:$0xff] }
 0x4f3   :  { %v4047_v6 = vpop.f32.mrf.mxu1 }
 0x4f4   :  { %v2849_v18 = vadd.f32 %v2848_v59, %v2825_v41  ;;  %2774 = vst [vmem:[%s7148_s4 + $0x80] sm:$0xff] %v2707_v23  ;;  %v2799_v20 = vsub.f32 %v2707_v23, %v4201_v30  ;;  %v7722_v59 = vld [vmem:[#allocation38_spill] sm:$0xff]  ;;  %v7724_v41 = vld [vmem:[#allocation4_spill] sm:$0xff]  ;;  %4137 = vpow2.f32 %v437_v7 }
 0x4f5   :  { %v2712_v62 = vpop.f32.mrf.mxu1  ;;  %v2512_v5 = vadd.f32 %v7722_v59, %v6817_v53  ;;  %v413_v23 = vsub.f32 %v7724_v41, %v7723_v1  ;;  %v4207_v30 = vld [vmem:[%s7144_s0 + $0xb0] sm:$0xff]  ;;  %v7743_v41 = vld [vmem:[#allocation43_spill] sm:$0xff] }
 0x4f6   :  { %v2826_v47 = vmul.f32 %v2799_v20, %v2799_v20  ;;  %v2713_v36 = vadd.f32 %v2712_v62, %v2482_v39  ;;  %v7725_v53 = vld [vmem:[#allocation16_spill] sm:$0xff] }
 0x4f7   :  { %v4050_v15 = vpop.f32.mrf.mxu1  ;;  %v2518_v50 = vadd.f32 %v7725_v53, %v6822_v10  ;;  %v7728_v10 = vld [vmem:[#allocation40_spill] sm:$0xff]  ;;  %v7746_v53 = vld [vmem:[#allocation23_spill] sm:$0xff] }
 0x4f8   :  { %v2850_v17 = vadd.f32 %v2849_v18, %v2826_v47  ;;  %2775 = vst [vmem:[%s7148_s4 + $0x88] sm:$0xff] %v2713_v36  ;;  %v2800_v0 = vsub.f32 %v2713_v36, %v4202_v8  ;;  %v441_v36 = vmul.f32 1.442695, %v413_v23  ;;  %v7727_v8 = vld [vmem:[#allocation5_spill] sm:$0xff] }
 0x4f9   :  { %v2718_v44 = vpop.f32.mrf.mxu1  ;;  %v7744_v23 = vld [vmem:[#allocation21_spill] sm:$0xff] }
 0x4fa   :  { %v2827_v2 = vmul.f32 %v2800_v0, %v2800_v0  ;;  %v2719_v24 = vadd.f32 %v2718_v44, %v2488_v42  ;;  %v4208_v42 = vld [vmem:[%s7144_s0 + $0xb8] sm:$0xff]  ;;  %4139 = vpow2.f32 %v441_v36 }
 0x4fb   :  { %v4053_v28 = vpop.f32.mrf.mxu1 }
 0x4fc   :  { %v2851_v11 = vadd.f32 %v2850_v17, %v2827_v2  ;;  %2776 = vst [vmem:[%s7148_s4 + $0x90] sm:$0xff] %v2719_v24  ;;  %v2801_v4 = vsub.f32 %v2719_v24, %v4203_v49  ;;  %v7726_v17 = vld [vmem:[#allocation27_spill] sm:$0xff]  ;;  %v2524_v2 = vadd.f32 %v7728_v10, %v6825_v26 }
 0x4fd   :  { %v2724_v38 = vpop.f32.mrf.mxu1  ;;  %v415_v0 = vsub.f32 %v7727_v8, %v7726_v17 }
 0x4fe   :  { %v2828_v25 = vmul.f32 %v2801_v4, %v2801_v4  ;;  %v2725_v32 = vadd.f32 %v2724_v38, %v2494_v16  ;;  %v7730_v16 = vld [vmem:[#allocation7_spill] sm:$0xff] }
 0x4ff   :  { %v4056_v58 = vpop.f32.mrf.mxu1  ;;  %v445_v4 = vmul.f32 1.442695, %v415_v0  ;;  %v417_v38 = vsub.f32 %v7730_v16, %v7729_v56 }
 0x500   :  { %v2852_v45 = vadd.f32 %v2851_v11, %v2828_v25  ;;  %2777 = vst [vmem:[%s7148_s4 + $0x98] sm:$0xff] %v2725_v32  ;;  %v2802_v35 = vsub.f32 %v2725_v32, %v4204_v9  ;;  %v4209_v25 = vld [vmem:[%s7144_s0 + $0xc0] sm:$0xff]  ;;  %v7731_v9 = vld [vmem:[#allocation31_spill] sm:$0xff] }
 0x501   :  { %v2730_v29 = vpop.f32.mrf.mxu1  ;;  %4141 = vpow2.f32 %v445_v4 }
 0x502   :  { %v2829_v60 = vmul.f32 %v2802_v35, %v2802_v35  ;;  %v2731_v13 = vadd.f32 %v2730_v29, %v2500_v63  ;;  %v7732_v35 = vld [vmem:[#allocation9_spill] sm:$0xff]  ;;  %v7037_v29 = vpop.eup %4137 }
 0x503   :  { %v4059_v21 = vpop.f32.mrf.mxu1  ;;  %v419_v22 = vsub.f32 %v7732_v35, %v7731_v9 }
 0x504   :  { %v2853_v57 = vadd.f32 %v2852_v45, %v2829_v60  ;;  %2778 = vst [vmem:[%s7148_s4 + $0xa0] sm:$0xff] %v2731_v13  ;;  %v2803_v52 = vsub.f32 %v2731_v13, %v4205_v33  ;;  %v449_v45 = vmul.f32 1.442695, %v417_v38  ;;  %v7733_v13 = vld [vmem:[#allocation33_spill] sm:$0xff]  ;;  %v7734_v21 = vld [vmem:[#allocation11_spill] sm:$0xff] }
 0x505   :  { %v2736_v43 = vpop.f32.mrf.mxu1  ;;  %v453_v60 = vmul.f32 1.442695, %v419_v22 }
 0x506   :  { %v2830_v54 = vmul.f32 %v2803_v52, %v2803_v52  ;;  %v2737_v55 = vadd.f32 %v2736_v43, %v2506_v61  ;;  %4143 = vpow2.f32 %v449_v45  ;;  %v7736_v61 = vld [vmem:[#allocation13_spill] sm:$0xff] }
 0x507   :  { %v4062_v37 = vpop.f32.mrf.mxu1  ;;  %v7042_v33 = vpop.eup %4139  ;;  %4145 = vpow2.f32 %v453_v60  ;;  %v423_v43 = vsub.f32 %v7736_v61, %v7735_v40 }
 0x508   :  { %v2854_v48 = vadd.f32 %v2853_v57, %v2830_v54  ;;  %2779 = vst [vmem:[%s7148_s4 + $0xa8] sm:$0xff] %v2737_v55  ;;  %v2804_v19 = vsub.f32 %v2737_v55, %v4206_v51  ;;  %v421_v57 = vsub.f32 %v7734_v21, %v7733_v13  ;;  %v7737_v55 = vld [vmem:[#allocation37_spill] sm:$0xff] }
 0x509   :  { %v2742_v27 = vpop.f32.mrf.mxu1  ;;  %v461_v54 = vmul.f32 1.442695, %v423_v43  ;;  %v425_v34 = vsub.f32 %v7738_v31, %v7737_v55  ;;  %v7740_v51 = vld [vmem:[#allocation17_spill] sm:$0xff] }
 0x50a   :  { %v2831_v14 = vmul.f32 %v2804_v19, %v2804_v19  ;;  %v2743_v46 = vadd.f32 %v2742_v27, %v2512_v5  ;;  %v457_v52 = vmul.f32 1.442695, %v421_v57  ;;  %v7741_v27 = vld [vmem:[#allocation41_spill] sm:$0xff] }
 0x50b   :  { %v4065_v6 = vpop.f32.mrf.mxu1  ;;  %v465_v37 = vmul.f32 1.442695, %v425_v34 }
 0x50c   :  { %v2855_v18 = vadd.f32 %v2854_v48, %v2831_v14  ;;  %2780 = vst [vmem:[%s7148_s4 + $0xb0] sm:$0xff] %v2743_v46  ;;  %v2805_v20 = vsub.f32 %v2743_v46, %v4207_v30  ;;  %4147 = vpow2.f32 %v457_v52  ;;  %v7739_v48 = vld [vmem:[#allocation39_spill] sm:$0xff]  ;;  %v431_v6 = vsub.f32 %v7744_v23, %v7743_v41 }
 0x50d   :  { %v2748_v39 = vpop.f32.mrf.mxu1  ;;  %4149 = vpow2.f32 %v461_v54  ;;  %v427_v19 = vsub.f32 %v7740_v51, %v7739_v48  ;;  %v7742_v14 = vld [vmem:[#allocation19_spill] sm:$0xff]  ;;  %v7747_v51 = vlaneseq }
 0x50e   :  { %v2832_v62 = vmul.f32 %v2805_v20, %v2805_v20  ;;  %v2749_v47 = vadd.f32 %v2748_v39, %v2518_v50  ;;  %v7049_v3 = vpop.eup %4141  ;;  %4151 = vpow2.f32 %v465_v37  ;;  %v429_v46 = vsub.f32 %v7742_v14, %v7741_v27  ;;  %v7745_v20 = vld [vmem:[#allocation45_spill] sm:$0xff]  ;;  %v7748_v27 = vld [vmem:[#allocation2_spill] sm:$0xff] }
 0x50f   :  { %v4068_v15 = vpop.f32.mrf.mxu1  ;;  %v469_v5 = vmul.f32 1.442695, %v427_v19  ;;  %v477_v30 = vmul.f32 1.442695, %v431_v6  ;;  %v433_v50 = vsub.f32 %v7746_v53, %v7745_v20  ;;  %v2809_v19 = vshrl.u32 %v7747_v51, 7 }
 0x510   :  { %v2856_v12 = vadd.f32 %v2855_v18, %v2832_v62  ;;  %2781 = vst [vmem:[%s7148_s4 + $0xb8] sm:$0xff] %v2749_v47  ;;  %v2806_v44 = vsub.f32 %v2749_v47, %v4208_v42  ;;  %v473_v1 = vmul.f32 1.442695, %v429_v46  ;;  %v7087_v0 = vpop.f32.mrf.mxu0  ;;  %vm2943_vm11 = vcmp.eq.s32.totalorder %v7748_v27, 0 }
 0x511   :  { %v2754_v24 = vpop.f32.mrf.mxu1  ;;  %4153 = vpow2.f32 %v469_v5  ;;  %v481_v62 = vmul.f32 1.442695, %v433_v50  ;;  %vm2942_vm10 = vcmp.eq.s32.totalorder %v2809_v19, 1 }
 0x512   :  { %v2833_v28 = vmul.f32 %v2806_v44, %v2806_v44  ;;  %v2755_v11 = vadd.f32 %v2754_v24, %v2524_v2  ;;  %4155 = vpow2.f32 %v473_v1  ;;  %vm2944_vm12 = vmand %vm2942_vm10, %vm2943_vm11 }
 0x513   :  { %v4071_v49 = vpop.f32.mrf.mxu1  ;;  %v7054_v59 = vpop.eup %4143  ;;  %4157 = vpow2.f32 %v477_v30 }
 0x514   :  { %2782 = vst [vmem:[%s7148_s4 + $0xc0] sm:$0xff] %v2755_v11  ;;  %v2807_v32 = vsub.f32 %v2755_v11, %v4209_v25  ;;  %v2857_v58 = vadd.f32 %v2856_v12, %v2833_v28  ;;  %v7059_v7 = vpop.eup %4145  ;;  %4159 = vpow2.f32 %v481_v62  ;;  %v2940_v12 = vpop.f32.mrf.mxu0 }
 0x516   :  { %v2834_v26 = vmul.f32 %v2807_v32, %v2807_v32 }
 0x518   :  { %v2858_v63 = vadd.f32 %v2857_v58, %v2834_v26 }
 0x519   :  { %v7064_v18 = vpop.eup %4147 }
 0x51a   :  { %2859 = vadd.xlane.f32.xlu1 %v2858_v63  ;;  %v7069_v39 = vpop.eup %4149 }
 0x51b   :  { %v7072_v47 = vpop.eup %4151 }
 0x51e   :  { %487 = vadd.xlane.f32.xlu1 %v7037_v29  ;;  %v7075_v36 = vpop.eup %4153 }
 0x51f   :  { %v7078_v15 = vpop.eup %4155 }
 0x520   :  { %v7081_v17 = vpop.eup %4157 }
 0x521   :  { %v7084_v8 = vpop.eup %4159 }
 0x522   :  { %491 = vadd.xlane.f32.xlu1 %v7042_v33 }
 0x526   :  { %495 = vadd.xlane.f32.xlu1 %v7049_v3 }
 0x52a   :  { %499 = vadd.xlane.f32.xlu1 %v7054_v59 }
 0x52e   :  { %503 = vadd.xlane.f32.xlu1 %v7059_v7 }
 0x532   :  { %507 = vadd.xlane.f32.xlu1 %v7064_v18 }
 0x536   :  { %511 = vadd.xlane.f32.xlu1 %v7069_v39 }
 0x53a   :  { %515 = vadd.xlane.f32.xlu1 %v7072_v47 }
 0x53e   :  { %519 = vadd.xlane.f32.xlu1 %v7075_v36 }
 0x542   :  { %523 = vadd.xlane.f32.xlu1 %v7078_v15 }
 0x546   :  { %527 = vadd.xlane.f32.xlu1 %v7081_v17 }
 0x54a   :  { %531 = vadd.xlane.f32.xlu1 %v7084_v8 }
 0x5a3   :  { %v2860_v42 = vpop.xlane.xlu1 %2859 }
 0x5a4   :  { %v2861_v44 = vrot.slane %v2860_v42, 4 }
 0x5a6   :  { %v2862_v10 = vadd.f32 %v2861_v44, %v2860_v42 }
 0x5a7   :  { %v488_v2 = vpop.xlane.xlu1 %487 }
 0x5a8   :  { %v2863_v24 = vrot.slane %v2862_v10, 2  ;;  %4161 = vrcp.f32 %v488_v2 }
 0x5aa   :  { %v2864_v28 = vadd.f32 %v2863_v24, %v2862_v10 }
 0x5ab   :  { %v492_v11 = vpop.xlane.xlu1 %491 }
 0x5ac   :  { %4163 = vrcp.f32 %v492_v11  ;;  %v2865_v49 = vrot.slane %v2864_v28, 1 }
 0x5ae   :  { %v2866_v4 = vadd.f32 %v2865_v49, %v2864_v28 }
 0x5af   :  { %v496_v56 = vpop.xlane.xlu1 %495 }
 0x5b0   :  { %4165 = vrcp.f32 %v496_v56  ;;  %4072 = vpush %v2866_v4 }
 0x5b3   :  { %v500_v16 = vpop.xlane.xlu1 %499 }
 0x5b4   :  { %4167 = vrcp.f32 %v500_v16 }
 0x5b5   :  { %v4162_v38 = vpop.eup %4161 }
 0x5b6   :  { %v561_v25 = vmul.f32 %v4162_v38, %v7037_v29 }
 0x5b7   :  { %v504_v32 = vpop.xlane.xlu1 %503 }
 0x5b8   :  { %586 = vst [vmem:[%s7147_s5 + $0x8] sm:$0xff] %v561_v25  ;;  %4169 = vrcp.f32 %v504_v32 }
 0x5b9   :  { %v4164_v58 = vpop.eup %4163 }
 0x5ba   :  { %v563_v26 = vmul.f32 %v4164_v58, %v7042_v33 }
 0x5bb   :  { %v508_v45 = vpop.xlane.xlu1 %507 }
 0x5bc   :  { %588 = vst [vmem:[%s7147_s5 + $0x18] sm:$0xff] %v563_v26  ;;  %4171 = vrcp.f32 %v508_v45 }
 0x5bd   :  { %v4166_v9 = vpop.eup %4165 }
 0x5be   :  { %v565_v35 = vmul.f32 %v4166_v9, %v7049_v3 }
 0x5bf   :  { %v512_v22 = vpop.xlane.xlu1 %511 }
 0x5c0   :  { %590 = vst [vmem:[%s7147_s5 + $0x28] sm:$0xff] %v565_v35  ;;  %4173 = vrcp.f32 %v512_v22 }
 0x5c1   :  { %v4168_v63 = vpop.eup %4167 }
 0x5c2   :  { %v567_v29 = vmul.f32 %v4168_v63, %v7054_v59 }
 0x5c3   :  { %v516_v60 = vpop.xlane.xlu1 %515 }
 0x5c4   :  { %592 = vst [vmem:[%s7147_s5 + $0x38] sm:$0xff] %v567_v29  ;;  %4175 = vrcp.f32 %v516_v60 }
 0x5c5   :  { %v4170_v13 = vpop.eup %4169 }
 0x5c6   :  { %v569_v21 = vmul.f32 %v4170_v13, %v7059_v7 }
 0x5c7   :  { %v520_v57 = vpop.xlane.xlu1 %519 }
 0x5c8   :  { %594 = vst [vmem:[%s7147_s5 + $0x48] sm:$0xff] %v569_v21  ;;  %4177 = vrcp.f32 %v520_v57 }
 0x5c9   :  { %v4172_v33 = vpop.eup %4171 }
 0x5ca   :  { %v571_v52 = vmul.f32 %v4172_v33, %v7064_v18 }
 0x5cb   :  { %v524_v40 = vpop.xlane.xlu1 %523 }
 0x5cc   :  { %596 = vst [vmem:[%s7147_s5 + $0x58] sm:$0xff] %v571_v52  ;;  %4179 = vrcp.f32 %v524_v40 }
 0x5cd   :  { %v4174_v61 = vpop.eup %4173 }
 0x5ce   :  { %v573_v43 = vmul.f32 %v4174_v61, %v7069_v39 }
 0x5cf   :  { %v528_v54 = vpop.xlane.xlu1 %527 }
 0x5d0   :  { %598 = vst [vmem:[%s7147_s5 + $0x68] sm:$0xff] %v573_v43  ;;  %4181 = vrcp.f32 %v528_v54 }
 0x5d1   :  { %v4176_v55 = vpop.eup %4175 }
 0x5d2   :  { %v575_v31 = vmul.f32 %v4176_v55, %v7072_v47 }
 0x5d3   :  { %v532_v34 = vpop.xlane.xlu1 %531 }
 0x5d4   :  { %600 = vst [vmem:[%s7147_s5 + $0x78] sm:$0xff] %v575_v31  ;;  %4183 = vrcp.f32 %v532_v34 }
 0x5d5   :  { %v4178_v3 = vpop.eup %4177 }
 0x5d6   :  { %v577_v37 = vmul.f32 %v4178_v3, %v7075_v36 }
 0x5d8   :  { %602 = vst [vmem:[%s7147_s5 + $0x88] sm:$0xff] %v577_v37 }
 0x5d9   :  { %v4180_v48 = vpop.eup %4179 }
 0x5da   :  { %v579_v59 = vmul.f32 %v4180_v48, %v7078_v15 }
 0x5dc   :  { %604 = vst [vmem:[%s7147_s5 + $0x98] sm:$0xff] %v579_v59 }
 0x5dd   :  { %v4182_v5 = vpop.eup %4181 }
 0x5de   :  { %v581_v14 = vmul.f32 %v4182_v5, %v7081_v17 }
 0x5e0   :  { %606 = vst [vmem:[%s7147_s5 + $0xa8] sm:$0xff] %v581_v14 }
 0x5e1   :  { %v4184_v46 = vpop.eup %4183  ;;  %s4073_s29 = spop %4072 }
 0x5e2   :  { %v583_v7 = vmul.f32 %v4184_v46, %v7084_v8  ;;  %v2945_v1 = vstv %s4073_s29 }
 0x5e3   :  { %v2946_v41 = vsel %vm2944_vm12, %v2945_v1, %v7087_v0 }
 0x5e4   :  { %608 = vst [vmem:[%s7147_s5 + $0xb8] sm:$0xff] %v583_v7  ;;  %2947 = vst [vmem:[%s7149_s6] sm:$0xff] %v2946_v41 }

</bundles_post_ra>
